<compile_context>
chip_gen: v6e
topology: v6e:2x2x1
jax: 0.10.0
libtpu: 0.0.40
codegen_flags: <defaults>
</compile_context>

<pallas_src>
import functools

import jax
import jax.numpy as jnp
from jax.experimental import pallas as pl
from jax.experimental.pallas import tpu as pltpu


def _round_up(x, m):
    return (x + m - 1) // m * m


def _block_kernel(x_ref, w_ref, b_ref, g_ref, bt_ref, mem_ref, memt_ref,
                  o_ref, pad_ref, slab_ref, *, H, W, C, G, eps):
    HW = H * W
    Wp = pad_ref.shape[1]          # sublane-padded halo width (multiple of 8)
    j = pl.program_id(1)

    # ---------------- once per batch element: GN + Swish + halo + im2col slab ----------------
    @pl.when(j == 0)
    def _prep():
        xs = x_ref[0].astype(jnp.float32).reshape(HW, C)            # (HW, C) f32
        cnt = jnp.float32(HW * (C // G))

        # group mean (two-pass variance for accuracy; f32 throughout)
        ch_sum = jnp.sum(xs, axis=0, keepdims=True)                 # (1, C)
        mean_g = jnp.dot(ch_sum, mem_ref[...],
                         preferred_element_type=jnp.float32) / cnt  # (1, G)
        mean_c = jnp.dot(mean_g, memt_ref[...],
                         preferred_element_type=jnp.float32)        # (1, C)

        xc = xs - mean_c                                            # centered
        ch_sq = jnp.sum(xc * xc, axis=0, keepdims=True)             # (1, C)
        var_g = jnp.dot(ch_sq, mem_ref[...],
                        preferred_element_type=jnp.float32) / cnt   # (1, G)
        inv_g = jax.lax.rsqrt(var_g + eps)
        inv_c = jnp.dot(inv_g, memt_ref[...],
                        preferred_element_type=jnp.float32)         # (1, C)

        yn = xc * (g_ref[...] * inv_c) + bt_ref[...]                # GroupNorm affine
        yn = yn * jax.nn.sigmoid(yn)                                # Swish (EUP sigmoid)
        # Dropout(p=0) == identity.

        # zero only the halo border strips (interior is always overwritten below)
        zrow = jnp.zeros((1, Wp, C), pad_ref.dtype)
        pad_ref[0:1, :, :] = zrow
        pad_ref[H + 1:H + 2, :, :] = zrow
        pad_ref[:, 0:1, :] = jnp.zeros((H + 2, 1, C), pad_ref.dtype)
        pad_ref[:, W + 1:Wp, :] = jnp.zeros((H + 2, Wp - W - 1, C), pad_ref.dtype)
        pad_ref[1:H + 1, 1:W + 1, :] = yn.astype(pad_ref.dtype).reshape(H, W, C)

        # im2col slab (tap-major), built once per n and reused by every Cout tile
        for ky in range(3):
            for kx in range(3):
                slab_ref[ky * 3 + kx, :, :] = (
                    pad_ref[ky:ky + H, kx:kx + W, :].reshape(HW, C))

    # ---------------- per Cout tile: 3x3 conv = 9 accumulating K=C matmuls (bf16 MXU) -------
    co = b_ref.shape[-1]
    acc = jnp.zeros((HW, co), jnp.float32)
    for t in range(9):                                              # static unroll
        acc = acc + jnp.dot(slab_ref[t], w_ref[t],
                            preferred_element_type=jnp.float32)
    acc = acc + b_ref[...]                                          # bias broadcast
    o_ref[...] = acc.reshape(1, H, W, co).astype(o_ref.dtype)       # lane-dense store


def block_forward(x_nchw, gn_weight, gn_bias, conv_weight, conv_bias, *,
                  groups, eps=1e-5, conv_dtype=jnp.bfloat16):
    """Forward of `Block` (dropout = 0). Accepts / returns NCHW like PyTorch."""
    N, C, H, W = x_nchw.shape
    Cout = conv_weight.shape[0]
    assert conv_weight.shape == (Cout, C, 3, 3)
    assert C % groups == 0
    G = groups
    Cg = C // G

    # Single layout change: NCHW -> NHWC (channels on lanes) for the whole fused kernel.
    x_nhwc = jnp.transpose(x_nchw, (0, 2, 3, 1))

    # Pad Cout to a multiple of 128 -> unmasked lane-dense output stores.
    Cout_p = _round_up(max(Cout, 128), 128)

    # Conv weight (Cout, Cin, 3, 3) -> (tap = ky*3+kx, Cin, Cout_p), cast to bf16 for the MXU.
    w = jnp.transpose(conv_weight, (2, 3, 1, 0)).reshape(9, C, Cout)
    w = jnp.pad(w, ((0, 0), (0, 0), (0, Cout_p - Cout))).astype(conv_dtype)
    b = jnp.pad(conv_bias, (0, Cout_p - Cout)).astype(jnp.float32).reshape(1, Cout_p)
    gamma = gn_weight.astype(jnp.float32).reshape(1, C)
    beta = gn_bias.astype(jnp.float32).reshape(1, C)

    # Channel<->group membership matrices (host-built, tiny, constant across the grid).
    ch = jnp.arange(C, dtype=jnp.int32)
    grp = jnp.arange(G, dtype=jnp.int32)
    member = (ch[:, None] // Cg == grp[None, :]).astype(jnp.float32)   # (C, G)
    member_t = jnp.transpose(member)                                   # (G, C)

    # Cout tiling: whole Cout when it fits, else multiples of 256 (v6e/v7x MXU), min 128.
    if Cout_p <= 512:
        co_tile = Cout_p
    elif Cout_p % 512 == 0:
        co_tile = 512
    elif Cout_p % 256 == 0:
        co_tile = 256
    else:
        co_tile = 128
    n_co = Cout_p // co_tile

    Wp = _round_up(W + 2, 8)                 # sublane-aligned halo width
    HW = H * W
    c_sz = jnp.dtype(conv_dtype).itemsize
    in_sz = jnp.dtype(x_nhwc.dtype).itemsize
    out_sz = in_sz

    # VMEM budget: pipeline buffers + scratches + the large in-kernel temporaries.
    est = (2 * HW * C * in_sz                    # double-buffered input tile
           + 2 * 9 * C * co_tile * c_sz          # double-buffered weight tile
           + 2 * HW * co_tile * out_sz           # double-buffered output tile
           + (H + 2) * Wp * C * c_sz             # halo scratch
           + 9 * HW * C * c_sz                   # im2col slab scratch
           + 3 * HW * C * 4                      # f32 activation / centered / normalized temps
           + HW * co_tile * 4                    # f32 conv accumulator
           + HW * C * c_sz                       # slice/reshape temp
           + 8 * C * 4 + 2 * C * G * 4 + co_tile * 4)
    try:
        phys = int(pltpu.get_tpu_info().vmem_capacity_bytes)
    except Exception:
        phys = 64 * 2**20                        # conservative fallback
    vmem_limit = int(min(max(32 * 2**20, int(est * 1.6)), int(phys * 0.85)))

    kernel = functools.partial(_block_kernel, H=H, W=W, C=C, G=G, eps=float(eps))

    out = pl.pallas_call(
        kernel,
        out_shape=jax.ShapeDtypeStruct((N, H, W, Cout_p), x_nhwc.dtype),
        grid_spec=pltpu.PrefetchScalarGridSpec(
            num_scalar_prefetch=0,
            grid=(N, n_co),
            in_specs=[
                pl.BlockSpec((1, H, W, C), lambda n, j: (n, 0, 0, 0)),      # activation tile
                pl.BlockSpec((9, C, co_tile), lambda n, j: (0, 0, j)),      # conv weights (taps)
                pl.BlockSpec((1, co_tile), lambda n, j: (0, j)),            # conv bias
                pl.BlockSpec((1, C), lambda n, j: (0, 0)),                  # GN gamma
                pl.BlockSpec((1, C), lambda n, j: (0, 0)),                  # GN beta
                pl.BlockSpec((C, G), lambda n, j: (0, 0)),                  # channel->group member
                pl.BlockSpec((G, C), lambda n, j: (0, 0)),                  # group->channel member
            ],
            out_specs=pl.BlockSpec((1, H, W, co_tile), lambda n, j: (n, 0, 0, j)),
            scratch_shapes=[
                pltpu.VMEM((H + 2, Wp, C), conv_dtype),                     # halo'd activation
                pltpu.VMEM((9, HW, C), conv_dtype),                         # im2col slab
            ],
        ),
        compiler_params=pltpu.CompilerParams(
            # axis 0 (N) sharded across TensorCores on v7x; axis 1 carries scratch -> arbitrary
            dimension_semantics=("parallel", "arbitrary"),
            vmem_limit_bytes=vmem_limit,
        ),
    )(x_nhwc, w, b, gamma, beta, member, member_t)

    # Drop Cout padding, back to NCHW.
    return jnp.transpose(out[..., :Cout], (0, 3, 1, 2))


def _reference(x_nchw, gamma, beta, w, b, groups, eps=1e-5):
    """Pure-JAX reference: GroupNorm -> Swish -> Conv2d(3x3, pad=1)."""
    N, C, H, W = x_nchw.shape
    xg = x_nchw.astype(jnp.float32).reshape(N, groups, C // groups, H, W)
    mean = xg.mean(axis=(2, 3, 4), keepdims=True)
    var = xg.var(axis=(2, 3, 4), keepdims=True)
    xn = (xg - mean) * jax.lax.rsqrt(var + eps)
    xn = xn.reshape(N, C, H, W) * gamma[None, :, None, None] + beta[None, :, None, None]
    y = xn * jax.nn.sigmoid(xn)
    out = jax.lax.conv_general_dilated(
        y, w.astype(jnp.float32), window_strides=(1, 1),
        padding=((1, 1), (1, 1)),
        dimension_numbers=("NCHW", "OIHW", "NCHW"))
    return out + b[None, :, None, None]


if __name__ == "__main__":
    key = jax.random.PRNGKey(0)
    k1, k2, k3, k4, k5 = jax.random.split(key, 5)

    # Small shapes consistent with the module (groups must divide dim; default groups=32).
    N, C, H, W = 2, 32, 16, 16
    Cout, groups = 64, 32

    x = jax.random.normal(k1, (N, C, H, W), jnp.float32)
    gn_w = 1.0 + 0.1 * jax.random.normal(k2, (C,), jnp.float32)
    gn_b = 0.1 * jax.random.normal(k3, (C,), jnp.float32)
    conv_w = jax.random.normal(k4, (Cout, C, 3, 3), jnp.float32) / jnp.sqrt(9.0 * C)
    conv_b = 0.1 * jax.random.normal(k5, (Cout,), jnp.float32)

    out = block_forward(x, gn_w, gn_b, conv_w, conv_b, groups=groups)
    out = jax.block_until_ready(out)

    ref = _reference(x, gn_w, gn_b, conv_w, conv_b, groups)
    assert out.shape == (N, Cout, H, W)
    max_err = float(jnp.max(jnp.abs(out - ref)))
    # Conv path runs in bf16 (f32 accumulation); tolerance sized accordingly.
    if not (max_err < 2e-2):
        raise AssertionError(f"mismatch vs reference: max abs err = {max_err}")
    print("KERNEL_OK")
</pallas_src>

<mosaic_0001>
module attributes {stable_mosaic.version = 11 : i64} {
  func.func @_block_kernel(%arg0: i32, %arg1: i32, %arg2: memref<1x16x16x32xf32, #tpu.memory_space<vmem>>, %arg3: memref<9x32x128xbf16, #tpu.memory_space<vmem>>, %arg4: memref<1x128xf32, #tpu.memory_space<vmem>>, %arg5: memref<1x32xf32, #tpu.memory_space<vmem>>, %arg6: memref<1x32xf32, #tpu.memory_space<vmem>>, %arg7: memref<32x32xf32, #tpu.memory_space<vmem>>, %arg8: memref<32x32xf32, #tpu.memory_space<vmem>>, %arg9: memref<1x16x16x128xf32, #tpu.memory_space<vmem>>, %arg10: memref<18x24x32xbf16, #tpu.memory_space<vmem>>, %arg11: memref<9x256x32xbf16, #tpu.memory_space<vmem>>) attributes {dimension_semantics = [#tpu.dimension_semantics<parallel>, #tpu.dimension_semantics<arbitrary>], iteration_bounds = array<i64: 2, 1>, scalar_prefetch = 0 : i64, scratch_operands = 2 : i64, tpu.core_type = #tpu.core_type<tc>, window_params = [{transform_indices = @transform_0, window_bounds = array<i64: 1, 16, 16, 32>}, {transform_indices = @transform_1, window_bounds = array<i64: 9, 32, 128>}, {transform_indices = @transform_2, window_bounds = array<i64: 1, 128>}, {pipeline_mode = #tpu.pipeline_mode<synchronous>, transform_indices = @transform_3, window_bounds = array<i64: 1, 32>}, {pipeline_mode = #tpu.pipeline_mode<synchronous>, transform_indices = @transform_4, window_bounds = array<i64: 1, 32>}, {pipeline_mode = #tpu.pipeline_mode<synchronous>, transform_indices = @transform_5, window_bounds = array<i64: 32, 32>}, {pipeline_mode = #tpu.pipeline_mode<synchronous>, transform_indices = @transform_6, window_bounds = array<i64: 32, 32>}, {transform_indices = @transform_7, window_bounds = array<i64: 1, 16, 16, 128>}]} {
    %c0_i32 = arith.constant 0 : i32
    %0 = arith.cmpi eq, %arg1, %c0_i32 : i32
    %1 = arith.extui %0 : i1 to i32
    %c0_i32_0 = arith.constant 0 : i32
    %2 = arith.cmpi ne, %1, %c0_i32_0 : i32
    scf.if %2 {
      %c0_61 = arith.constant 0 : index
      %c0_62 = arith.constant 0 : index
      %c0_63 = arith.constant 0 : index
      %c0_64 = arith.constant 0 : index
      %63 = vector.load %arg2[%c0_61, %c0_62, %c0_63, %c0_64] : memref<1x16x16x32xf32, #tpu.memory_space<vmem>>, vector<1x16x16x32xf32>
      %64 = vector.shape_cast %63 : vector<1x16x16x32xf32> to vector<16x16x32xf32>
      %65 = vector.shape_cast %64 : vector<16x16x32xf32> to vector<256x32xf32>
      %cst_65 = arith.constant dense<0.000000e+00> : vector<32xf32>
      %66 = vector.multi_reduction <add>, %65, %cst_65 [0] : vector<256x32xf32> to vector<32xf32>
      %67 = vector.shape_cast %66 : vector<32xf32> to vector<1x32xf32>
      %c0_66 = arith.constant 0 : index
      %c0_67 = arith.constant 0 : index
      %68 = vector.load %arg7[%c0_66, %c0_67] : memref<32x32xf32, #tpu.memory_space<vmem>>, vector<32x32xf32>
      %cst_68 = arith.constant dense<0.000000e+00> : vector<1x32xf32>
      %69 = tpu.matmul %67, %68, %cst_68 {dimension_numbers = #tpu.dot_dimension_numbers<[1], [0], [0], [1], [0, 0, 1, 1], [], []>} : vector<1x32xf32>, vector<32x32xf32>, vector<1x32xf32> -> vector<1x32xf32>
      %cst_69 = arith.constant 2.560000e+02 : f32
      %70 = vector.broadcast %cst_69 : f32 to vector<1x32xf32>
      %71 = arith.divf %69, %70 : vector<1x32xf32>
      %c0_70 = arith.constant 0 : index
      %c0_71 = arith.constant 0 : index
      %72 = vector.load %arg8[%c0_70, %c0_71] : memref<32x32xf32, #tpu.memory_space<vmem>>, vector<32x32xf32>
      %cst_72 = arith.constant dense<0.000000e+00> : vector<1x32xf32>
      %73 = tpu.matmul %71, %72, %cst_72 {dimension_numbers = #tpu.dot_dimension_numbers<[1], [0], [0], [1], [0, 0, 1, 1], [], []>} : vector<1x32xf32>, vector<32x32xf32>, vector<1x32xf32> -> vector<1x32xf32>
      %74 = vector.broadcast %73 : vector<1x32xf32> to vector<256x32xf32>
      %75 = arith.subf %65, %74 : vector<256x32xf32>
      %76 = arith.mulf %75, %75 : vector<256x32xf32>
      %cst_73 = arith.constant dense<0.000000e+00> : vector<32xf32>
      %77 = vector.multi_reduction <add>, %76, %cst_73 [0] : vector<256x32xf32> to vector<32xf32>
      %78 = vector.shape_cast %77 : vector<32xf32> to vector<1x32xf32>
      %c0_74 = arith.constant 0 : index
      %c0_75 = arith.constant 0 : index
      %79 = vector.load %arg7[%c0_74, %c0_75] : memref<32x32xf32, #tpu.memory_space<vmem>>, vector<32x32xf32>
      %cst_76 = arith.constant dense<0.000000e+00> : vector<1x32xf32>
      %80 = tpu.matmul %78, %79, %cst_76 {dimension_numbers = #tpu.dot_dimension_numbers<[1], [0], [0], [1], [0, 0, 1, 1], [], []>} : vector<1x32xf32>, vector<32x32xf32>, vector<1x32xf32> -> vector<1x32xf32>
      %cst_77 = arith.constant 2.560000e+02 : f32
      %81 = vector.broadcast %cst_77 : f32 to vector<1x32xf32>
      %82 = arith.divf %80, %81 : vector<1x32xf32>
      %cst_78 = arith.constant 9.99999974E-6 : f32
      %83 = vector.broadcast %cst_78 : f32 to vector<1x32xf32>
      %84 = arith.addf %82, %83 : vector<1x32xf32>
      %85 = math.rsqrt %84 : vector<1x32xf32>
      %c0_79 = arith.constant 0 : index
      %c0_80 = arith.constant 0 : index
      %86 = vector.load %arg8[%c0_79, %c0_80] : memref<32x32xf32, #tpu.memory_space<vmem>>, vector<32x32xf32>
      %cst_81 = arith.constant dense<0.000000e+00> : vector<1x32xf32>
      %87 = tpu.matmul %85, %86, %cst_81 {dimension_numbers = #tpu.dot_dimension_numbers<[1], [0], [0], [1], [0, 0, 1, 1], [], []>} : vector<1x32xf32>, vector<32x32xf32>, vector<1x32xf32> -> vector<1x32xf32>
      %c0_82 = arith.constant 0 : index
      %c0_83 = arith.constant 0 : index
      %88 = vector.load %arg5[%c0_82, %c0_83] : memref<1x32xf32, #tpu.memory_space<vmem>>, vector<1x32xf32>
      %89 = arith.mulf %88, %87 : vector<1x32xf32>
      %90 = vector.broadcast %89 : vector<1x32xf32> to vector<256x32xf32>
      %91 = arith.mulf %75, %90 : vector<256x32xf32>
      %c0_84 = arith.constant 0 : index
      %c0_85 = arith.constant 0 : index
      %92 = vector.load %arg6[%c0_84, %c0_85] : memref<1x32xf32, #tpu.memory_space<vmem>>, vector<1x32xf32>
      %93 = vector.broadcast %92 : vector<1x32xf32> to vector<256x32xf32>
      %94 = arith.addf %91, %93 : vector<256x32xf32>
      %95 = arith.negf %94 : vector<256x32xf32>
      %96 = math.exp %95 : vector<256x32xf32>
      %cst_86 = arith.constant 1.000000e+00 : f32
      %97 = vector.broadcast %cst_86 : f32 to vector<256x32xf32>
      %98 = arith.addf %97, %96 : vector<256x32xf32>
      %99 = arith.divf %97, %98 : vector<256x32xf32>
      %100 = arith.mulf %94, %99 : vector<256x32xf32>
      %cst_87 = arith.constant 0.000000e+00 : bf16
      %101 = vector.broadcast %cst_87 : bf16 to vector<1x24x32xbf16>
      %c0_88 = arith.constant 0 : index
      %c0_89 = arith.constant 0 : index
      %c0_90 = arith.constant 0 : index
      %102 = vector.load %arg10[%c0_88, %c0_89, %c0_90] : memref<18x24x32xbf16, #tpu.memory_space<vmem>>, vector<1x24x32xbf16>
      tpu.vector_store %arg10[%c0_88, %c0_89, %c0_90], %101 {strides = array<i32>} : memref<18x24x32xbf16, #tpu.memory_space<vmem>>, vector<1x24x32xbf16>,
      %c17 = arith.constant 17 : index
      %c0_91 = arith.constant 0 : index
      %c0_92 = arith.constant 0 : index
      %103 = vector.load %arg10[%c17, %c0_91, %c0_92] : memref<18x24x32xbf16, #tpu.memory_space<vmem>>, vector<1x24x32xbf16>
      tpu.vector_store %arg10[%c17, %c0_91, %c0_92], %101 {strides = array<i32>} : memref<18x24x32xbf16, #tpu.memory_space<vmem>>, vector<1x24x32xbf16>,
      %cst_93 = arith.constant 0.000000e+00 : bf16
      %104 = vector.broadcast %cst_93 : bf16 to vector<18x1x32xbf16>
      %c0_94 = arith.constant 0 : index
      %c0_95 = arith.constant 0 : index
      %c0_96 = arith.constant 0 : index
      %105 = vector.load %arg10[%c0_94, %c0_95, %c0_96] : memref<18x24x32xbf16, #tpu.memory_space<vmem>>, vector<18x1x32xbf16>
      tpu.vector_store %arg10[%c0_94, %c0_95, %c0_96], %104 {strides = array<i32>} : memref<18x24x32xbf16, #tpu.memory_space<vmem>>, vector<18x1x32xbf16>,
      %cst_97 = arith.constant 0.000000e+00 : bf16
      %106 = vector.broadcast %cst_97 : bf16 to vector<18x7x32xbf16>
      %c0_98 = arith.constant 0 : index
      %c17_99 = arith.constant 17 : index
      %c0_100 = arith.constant 0 : index
      %107 = vector.load %arg10[%c0_98, %c17_99, %c0_100] : memref<18x24x32xbf16, #tpu.memory_space<vmem>>, vector<18x7x32xbf16>
      tpu.vector_store %arg10[%c0_98, %c17_99, %c0_100], %106 {strides = array<i32>} : memref<18x24x32xbf16, #tpu.memory_space<vmem>>, vector<18x7x32xbf16>,
      %108 = arith.truncf %100 : vector<256x32xf32> to vector<256x32xbf16>
      %109 = vector.shape_cast %108 : vector<256x32xbf16> to vector<16x16x32xbf16>
      %c1_101 = arith.constant 1 : index
      %c1_102 = arith.constant 1 : index
      %c0_103 = arith.constant 0 : index
      %110 = vector.load %arg10[%c1_101, %c1_102, %c0_103] : memref<18x24x32xbf16, #tpu.memory_space<vmem>>, vector<16x16x32xbf16>
      tpu.vector_store %arg10[%c1_101, %c1_102, %c0_103], %109 {strides = array<i32>} : memref<18x24x32xbf16, #tpu.memory_space<vmem>>, vector<16x16x32xbf16>,
      %c0_104 = arith.constant 0 : index
      %c0_105 = arith.constant 0 : index
      %c0_106 = arith.constant 0 : index
      %111 = vector.load %arg10[%c0_104, %c0_105, %c0_106] : memref<18x24x32xbf16, #tpu.memory_space<vmem>>, vector<16x16x32xbf16>
      %112 = vector.shape_cast %111 : vector<16x16x32xbf16> to vector<256x32xbf16>
      %c0_107 = arith.constant 0 : index
      %c0_108 = arith.constant 0 : index
      %c0_109 = arith.constant 0 : index
      %113 = vector.load %arg11[%c0_107, %c0_108, %c0_109] : memref<9x256x32xbf16, #tpu.memory_space<vmem>>, vector<1x256x32xbf16>
      %114 = vector.shape_cast %113 : vector<1x256x32xbf16> to vector<256x32xbf16>
      %115 = vector.shape_cast %112 : vector<256x32xbf16> to vector<1x256x32xbf16>
      tpu.vector_store %arg11[%c0_107, %c0_108, %c0_109], %115 {strides = array<i32>} : memref<9x256x32xbf16, #tpu.memory_space<vmem>>, vector<1x256x32xbf16>,
      %c0_110 = arith.constant 0 : index
      %c1_111 = arith.constant 1 : index
      %c0_112 = arith.constant 0 : index
      %116 = vector.load %arg10[%c0_110, %c1_111, %c0_112] : memref<18x24x32xbf16, #tpu.memory_space<vmem>>, vector<16x16x32xbf16>
      %117 = vector.shape_cast %116 : vector<16x16x32xbf16> to vector<256x32xbf16>
      %c1_113 = arith.constant 1 : index
      %c0_114 = arith.constant 0 : index
      %c0_115 = arith.constant 0 : index
      %118 = vector.load %arg11[%c1_113, %c0_114, %c0_115] : memref<9x256x32xbf16, #tpu.memory_space<vmem>>, vector<1x256x32xbf16>
      %119 = vector.shape_cast %118 : vector<1x256x32xbf16> to vector<256x32xbf16>
      %120 = vector.shape_cast %117 : vector<256x32xbf16> to vector<1x256x32xbf16>
      tpu.vector_store %arg11[%c1_113, %c0_114, %c0_115], %120 {strides = array<i32>} : memref<9x256x32xbf16, #tpu.memory_space<vmem>>, vector<1x256x32xbf16>,
      %c0_116 = arith.constant 0 : index
      %c2_117 = arith.constant 2 : index
      %c0_118 = arith.constant 0 : index
      %121 = vector.load %arg10[%c0_116, %c2_117, %c0_118] : memref<18x24x32xbf16, #tpu.memory_space<vmem>>, vector<16x16x32xbf16>
      %122 = vector.shape_cast %121 : vector<16x16x32xbf16> to vector<256x32xbf16>
      %c2_119 = arith.constant 2 : index
      %c0_120 = arith.constant 0 : index
      %c0_121 = arith.constant 0 : index
      %123 = vector.load %arg11[%c2_119, %c0_120, %c0_121] : memref<9x256x32xbf16, #tpu.memory_space<vmem>>, vector<1x256x32xbf16>
      %124 = vector.shape_cast %123 : vector<1x256x32xbf16> to vector<256x32xbf16>
      %125 = vector.shape_cast %122 : vector<256x32xbf16> to vector<1x256x32xbf16>
      tpu.vector_store %arg11[%c2_119, %c0_120, %c0_121], %125 {strides = array<i32>} : memref<9x256x32xbf16, #tpu.memory_space<vmem>>, vector<1x256x32xbf16>,
      %c1_122 = arith.constant 1 : index
      %c0_123 = arith.constant 0 : index
      %c0_124 = arith.constant 0 : index
      %126 = vector.load %arg10[%c1_122, %c0_123, %c0_124] : memref<18x24x32xbf16, #tpu.memory_space<vmem>>, vector<16x16x32xbf16>
      %127 = vector.shape_cast %126 : vector<16x16x32xbf16> to vector<256x32xbf16>
      %c3_125 = arith.constant 3 : index
      %c0_126 = arith.constant 0 : index
      %c0_127 = arith.constant 0 : index
      %128 = vector.load %arg11[%c3_125, %c0_126, %c0_127] : memref<9x256x32xbf16, #tpu.memory_space<vmem>>, vector<1x256x32xbf16>
      %129 = vector.shape_cast %128 : vector<1x256x32xbf16> to vector<256x32xbf16>
      %130 = vector.shape_cast %127 : vector<256x32xbf16> to vector<1x256x32xbf16>
      tpu.vector_store %arg11[%c3_125, %c0_126, %c0_127], %130 {strides = array<i32>} : memref<9x256x32xbf16, #tpu.memory_space<vmem>>, vector<1x256x32xbf16>,
      %c1_128 = arith.constant 1 : index
      %c1_129 = arith.constant 1 : index
      %c0_130 = arith.constant 0 : index
      %131 = vector.load %arg10[%c1_128, %c1_129, %c0_130] : memref<18x24x32xbf16, #tpu.memory_space<vmem>>, vector<16x16x32xbf16>
      %132 = vector.shape_cast %131 : vector<16x16x32xbf16> to vector<256x32xbf16>
      %c4_131 = arith.constant 4 : index
      %c0_132 = arith.constant 0 : index
      %c0_133 = arith.constant 0 : index
      %133 = vector.load %arg11[%c4_131, %c0_132, %c0_133] : memref<9x256x32xbf16, #tpu.memory_space<vmem>>, vector<1x256x32xbf16>
      %134 = vector.shape_cast %133 : vector<1x256x32xbf16> to vector<256x32xbf16>
      %135 = vector.shape_cast %132 : vector<256x32xbf16> to vector<1x256x32xbf16>
      tpu.vector_store %arg11[%c4_131, %c0_132, %c0_133], %135 {strides = array<i32>} : memref<9x256x32xbf16, #tpu.memory_space<vmem>>, vector<1x256x32xbf16>,
      %c1_134 = arith.constant 1 : index
      %c2_135 = arith.constant 2 : index
      %c0_136 = arith.constant 0 : index
      %136 = vector.load %arg10[%c1_134, %c2_135, %c0_136] : memref<18x24x32xbf16, #tpu.memory_space<vmem>>, vector<16x16x32xbf16>
      %137 = vector.shape_cast %136 : vector<16x16x32xbf16> to vector<256x32xbf16>
      %c5_137 = arith.constant 5 : index
      %c0_138 = arith.constant 0 : index
      %c0_139 = arith.constant 0 : index
      %138 = vector.load %arg11[%c5_137, %c0_138, %c0_139] : memref<9x256x32xbf16, #tpu.memory_space<vmem>>, vector<1x256x32xbf16>
      %139 = vector.shape_cast %138 : vector<1x256x32xbf16> to vector<256x32xbf16>
      %140 = vector.shape_cast %137 : vector<256x32xbf16> to vector<1x256x32xbf16>
      tpu.vector_store %arg11[%c5_137, %c0_138, %c0_139], %140 {strides = array<i32>} : memref<9x256x32xbf16, #tpu.memory_space<vmem>>, vector<1x256x32xbf16>,
      %c2_140 = arith.constant 2 : index
      %c0_141 = arith.constant 0 : index
      %c0_142 = arith.constant 0 : index
      %141 = vector.load %arg10[%c2_140, %c0_141, %c0_142] : memref<18x24x32xbf16, #tpu.memory_space<vmem>>, vector<16x16x32xbf16>
      %142 = vector.shape_cast %141 : vector<16x16x32xbf16> to vector<256x32xbf16>
      %c6_143 = arith.constant 6 : index
      %c0_144 = arith.constant 0 : index
      %c0_145 = arith.constant 0 : index
      %143 = vector.load %arg11[%c6_143, %c0_144, %c0_145] : memref<9x256x32xbf16, #tpu.memory_space<vmem>>, vector<1x256x32xbf16>
      %144 = vector.shape_cast %143 : vector<1x256x32xbf16> to vector<256x32xbf16>
      %145 = vector.shape_cast %142 : vector<256x32xbf16> to vector<1x256x32xbf16>
      tpu.vector_store %arg11[%c6_143, %c0_144, %c0_145], %145 {strides = array<i32>} : memref<9x256x32xbf16, #tpu.memory_space<vmem>>, vector<1x256x32xbf16>,
      %c2_146 = arith.constant 2 : index
      %c1_147 = arith.constant 1 : index
      %c0_148 = arith.constant 0 : index
      %146 = vector.load %arg10[%c2_146, %c1_147, %c0_148] : memref<18x24x32xbf16, #tpu.memory_space<vmem>>, vector<16x16x32xbf16>
      %147 = vector.shape_cast %146 : vector<16x16x32xbf16> to vector<256x32xbf16>
      %c7_149 = arith.constant 7 : index
      %c0_150 = arith.constant 0 : index
      %c0_151 = arith.constant 0 : index
      %148 = vector.load %arg11[%c7_149, %c0_150, %c0_151] : memref<9x256x32xbf16, #tpu.memory_space<vmem>>, vector<1x256x32xbf16>
      %149 = vector.shape_cast %148 : vector<1x256x32xbf16> to vector<256x32xbf16>
      %150 = vector.shape_cast %147 : vector<256x32xbf16> to vector<1x256x32xbf16>
      tpu.vector_store %arg11[%c7_149, %c0_150, %c0_151], %150 {strides = array<i32>} : memref<9x256x32xbf16, #tpu.memory_space<vmem>>, vector<1x256x32xbf16>,
      %c2_152 = arith.constant 2 : index
      %c2_153 = arith.constant 2 : index
      %c0_154 = arith.constant 0 : index
      %151 = vector.load %arg10[%c2_152, %c2_153, %c0_154] : memref<18x24x32xbf16, #tpu.memory_space<vmem>>, vector<16x16x32xbf16>
      %152 = vector.shape_cast %151 : vector<16x16x32xbf16> to vector<256x32xbf16>
      %c8_155 = arith.constant 8 : index
      %c0_156 = arith.constant 0 : index
      %c0_157 = arith.constant 0 : index
      %153 = vector.load %arg11[%c8_155, %c0_156, %c0_157] : memref<9x256x32xbf16, #tpu.memory_space<vmem>>, vector<1x256x32xbf16>
      %154 = vector.shape_cast %153 : vector<1x256x32xbf16> to vector<256x32xbf16>
      %155 = vector.shape_cast %152 : vector<256x32xbf16> to vector<1x256x32xbf16>
      tpu.vector_store %arg11[%c8_155, %c0_156, %c0_157], %155 {strides = array<i32>} : memref<9x256x32xbf16, #tpu.memory_space<vmem>>, vector<1x256x32xbf16>,
    } else {
    }
    %cst = arith.constant 0.000000e+00 : f32
    %3 = vector.broadcast %cst : f32 to vector<256x128xf32>
    %c0 = arith.constant 0 : index
    %c0_1 = arith.constant 0 : index
    %c0_2 = arith.constant 0 : index
    %4 = vector.load %arg11[%c0, %c0_1, %c0_2] : memref<9x256x32xbf16, #tpu.memory_space<vmem>>, vector<1x256x32xbf16>
    %5 = vector.shape_cast %4 : vector<1x256x32xbf16> to vector<256x32xbf16>
    %c0_3 = arith.constant 0 : index
    %c0_4 = arith.constant 0 : index
    %c0_5 = arith.constant 0 : index
    %6 = vector.load %arg3[%c0_3, %c0_4, %c0_5] : memref<9x32x128xbf16, #tpu.memory_space<vmem>>, vector<1x32x128xbf16>
    %7 = vector.shape_cast %6 : vector<1x32x128xbf16> to vector<32x128xbf16>
    %cst_6 = arith.constant dense<0.000000e+00> : vector<256x128xf32>
    %8 = tpu.matmul %5, %7, %cst_6 {dimension_numbers = #tpu.dot_dimension_numbers<[1], [0], [0], [1], [0, 0, 1, 1], [], []>} : vector<256x32xbf16>, vector<32x128xbf16>, vector<256x128xf32> -> vector<256x128xf32>
    %9 = arith.addf %3, %8 : vector<256x128xf32>
    %c1 = arith.constant 1 : index
    %c0_7 = arith.constant 0 : index
    %c0_8 = arith.constant 0 : index
    %10 = vector.load %arg11[%c1, %c0_7, %c0_8] : memref<9x256x32xbf16, #tpu.memory_space<vmem>>, vector<1x256x32xbf16>
    %11 = vector.shape_cast %10 : vector<1x256x32xbf16> to vector<256x32xbf16>
    %c1_9 = arith.constant 1 : index
    %c0_10 = arith.constant 0 : index
    %c0_11 = arith.constant 0 : index
    %12 = vector.load %arg3[%c1_9, %c0_10, %c0_11] : memref<9x32x128xbf16, #tpu.memory_space<vmem>>, vector<1x32x128xbf16>
    %13 = vector.shape_cast %12 : vector<1x32x128xbf16> to vector<32x128xbf16>
    %cst_12 = arith.constant dense<0.000000e+00> : vector<256x128xf32>
    %14 = tpu.matmul %11, %13, %cst_12 {dimension_numbers = #tpu.dot_dimension_numbers<[1], [0], [0], [1], [0, 0, 1, 1], [], []>} : vector<256x32xbf16>, vector<32x128xbf16>, vector<256x128xf32> -> vector<256x128xf32>
    %15 = arith.addf %9, %14 : vector<256x128xf32>
    %c2 = arith.constant 2 : index
    %c0_13 = arith.constant 0 : index
    %c0_14 = arith.constant 0 : index
    %16 = vector.load %arg11[%c2, %c0_13, %c0_14] : memref<9x256x32xbf16, #tpu.memory_space<vmem>>, vector<1x256x32xbf16>
    %17 = vector.shape_cast %16 : vector<1x256x32xbf16> to vector<256x32xbf16>
    %c2_15 = arith.constant 2 : index
    %c0_16 = arith.constant 0 : index
    %c0_17 = arith.constant 0 : index
    %18 = vector.load %arg3[%c2_15, %c0_16, %c0_17] : memref<9x32x128xbf16, #tpu.memory_space<vmem>>, vector<1x32x128xbf16>
    %19 = vector.shape_cast %18 : vector<1x32x128xbf16> to vector<32x128xbf16>
    %cst_18 = arith.constant dense<0.000000e+00> : vector<256x128xf32>
    %20 = tpu.matmul %17, %19, %cst_18 {dimension_numbers = #tpu.dot_dimension_numbers<[1], [0], [0], [1], [0, 0, 1, 1], [], []>} : vector<256x32xbf16>, vector<32x128xbf16>, vector<256x128xf32> -> vector<256x128xf32>
    %21 = arith.addf %15, %20 : vector<256x128xf32>
    %c3 = arith.constant 3 : index
    %c0_19 = arith.constant 0 : index
    %c0_20 = arith.constant 0 : index
    %22 = vector.load %arg11[%c3, %c0_19, %c0_20] : memref<9x256x32xbf16, #tpu.memory_space<vmem>>, vector<1x256x32xbf16>
    %23 = vector.shape_cast %22 : vector<1x256x32xbf16> to vector<256x32xbf16>
    %c3_21 = arith.constant 3 : index
    %c0_22 = arith.constant 0 : index
    %c0_23 = arith.constant 0 : index
    %24 = vector.load %arg3[%c3_21, %c0_22, %c0_23] : memref<9x32x128xbf16, #tpu.memory_space<vmem>>, vector<1x32x128xbf16>
    %25 = vector.shape_cast %24 : vector<1x32x128xbf16> to vector<32x128xbf16>
    %cst_24 = arith.constant dense<0.000000e+00> : vector<256x128xf32>
    %26 = tpu.matmul %23, %25, %cst_24 {dimension_numbers = #tpu.dot_dimension_numbers<[1], [0], [0], [1], [0, 0, 1, 1], [], []>} : vector<256x32xbf16>, vector<32x128xbf16>, vector<256x128xf32> -> vector<256x128xf32>
    %27 = arith.addf %21, %26 : vector<256x128xf32>
    %c4 = arith.constant 4 : index
    %c0_25 = arith.constant 0 : index
    %c0_26 = arith.constant 0 : index
    %28 = vector.load %arg11[%c4, %c0_25, %c0_26] : memref<9x256x32xbf16, #tpu.memory_space<vmem>>, vector<1x256x32xbf16>
    %29 = vector.shape_cast %28 : vector<1x256x32xbf16> to vector<256x32xbf16>
    %c4_27 = arith.constant 4 : index
    %c0_28 = arith.constant 0 : index
    %c0_29 = arith.constant 0 : index
    %30 = vector.load %arg3[%c4_27, %c0_28, %c0_29] : memref<9x32x128xbf16, #tpu.memory_space<vmem>>, vector<1x32x128xbf16>
    %31 = vector.shape_cast %30 : vector<1x32x128xbf16> to vector<32x128xbf16>
    %cst_30 = arith.constant dense<0.000000e+00> : vector<256x128xf32>
    %32 = tpu.matmul %29, %31, %cst_30 {dimension_numbers = #tpu.dot_dimension_numbers<[1], [0], [0], [1], [0, 0, 1, 1], [], []>} : vector<256x32xbf16>, vector<32x128xbf16>, vector<256x128xf32> -> vector<256x128xf32>
    %33 = arith.addf %27, %32 : vector<256x128xf32>
    %c5 = arith.constant 5 : index
    %c0_31 = arith.constant 0 : index
    %c0_32 = arith.constant 0 : index
    %34 = vector.load %arg11[%c5, %c0_31, %c0_32] : memref<9x256x32xbf16, #tpu.memory_space<vmem>>, vector<1x256x32xbf16>
    %35 = vector.shape_cast %34 : vector<1x256x32xbf16> to vector<256x32xbf16>
    %c5_33 = arith.constant 5 : index
    %c0_34 = arith.constant 0 : index
    %c0_35 = arith.constant 0 : index
    %36 = vector.load %arg3[%c5_33, %c0_34, %c0_35] : memref<9x32x128xbf16, #tpu.memory_space<vmem>>, vector<1x32x128xbf16>
    %37 = vector.shape_cast %36 : vector<1x32x128xbf16> to vector<32x128xbf16>
    %cst_36 = arith.constant dense<0.000000e+00> : vector<256x128xf32>
    %38 = tpu.matmul %35, %37, %cst_36 {dimension_numbers = #tpu.dot_dimension_numbers<[1], [0], [0], [1], [0, 0, 1, 1], [], []>} : vector<256x32xbf16>, vector<32x128xbf16>, vector<256x128xf32> -> vector<256x128xf32>
    %39 = arith.addf %33, %38 : vector<256x128xf32>
    %c6 = arith.constant 6 : index
    %c0_37 = arith.constant 0 : index
    %c0_38 = arith.constant 0 : index
    %40 = vector.load %arg11[%c6, %c0_37, %c0_38] : memref<9x256x32xbf16, #tpu.memory_space<vmem>>, vector<1x256x32xbf16>
    %41 = vector.shape_cast %40 : vector<1x256x32xbf16> to vector<256x32xbf16>
    %c6_39 = arith.constant 6 : index
    %c0_40 = arith.constant 0 : index
    %c0_41 = arith.constant 0 : index
    %42 = vector.load %arg3[%c6_39, %c0_40, %c0_41] : memref<9x32x128xbf16, #tpu.memory_space<vmem>>, vector<1x32x128xbf16>
    %43 = vector.shape_cast %42 : vector<1x32x128xbf16> to vector<32x128xbf16>
    %cst_42 = arith.constant dense<0.000000e+00> : vector<256x128xf32>
    %44 = tpu.matmul %41, %43, %cst_42 {dimension_numbers = #tpu.dot_dimension_numbers<[1], [0], [0], [1], [0, 0, 1, 1], [], []>} : vector<256x32xbf16>, vector<32x128xbf16>, vector<256x128xf32> -> vector<256x128xf32>
    %45 = arith.addf %39, %44 : vector<256x128xf32>
    %c7 = arith.constant 7 : index
    %c0_43 = arith.constant 0 : index
    %c0_44 = arith.constant 0 : index
    %46 = vector.load %arg11[%c7, %c0_43, %c0_44] : memref<9x256x32xbf16, #tpu.memory_space<vmem>>, vector<1x256x32xbf16>
    %47 = vector.shape_cast %46 : vector<1x256x32xbf16> to vector<256x32xbf16>
    %c7_45 = arith.constant 7 : index
    %c0_46 = arith.constant 0 : index
    %c0_47 = arith.constant 0 : index
    %48 = vector.load %arg3[%c7_45, %c0_46, %c0_47] : memref<9x32x128xbf16, #tpu.memory_space<vmem>>, vector<1x32x128xbf16>
    %49 = vector.shape_cast %48 : vector<1x32x128xbf16> to vector<32x128xbf16>
    %cst_48 = arith.constant dense<0.000000e+00> : vector<256x128xf32>
    %50 = tpu.matmul %47, %49, %cst_48 {dimension_numbers = #tpu.dot_dimension_numbers<[1], [0], [0], [1], [0, 0, 1, 1], [], []>} : vector<256x32xbf16>, vector<32x128xbf16>, vector<256x128xf32> -> vector<256x128xf32>
    %51 = arith.addf %45, %50 : vector<256x128xf32>
    %c8 = arith.constant 8 : index
    %c0_49 = arith.constant 0 : index
    %c0_50 = arith.constant 0 : index
    %52 = vector.load %arg11[%c8, %c0_49, %c0_50] : memref<9x256x32xbf16, #tpu.memory_space<vmem>>, vector<1x256x32xbf16>
    %53 = vector.shape_cast %52 : vector<1x256x32xbf16> to vector<256x32xbf16>
    %c8_51 = arith.constant 8 : index
    %c0_52 = arith.constant 0 : index
    %c0_53 = arith.constant 0 : index
    %54 = vector.load %arg3[%c8_51, %c0_52, %c0_53] : memref<9x32x128xbf16, #tpu.memory_space<vmem>>, vector<1x32x128xbf16>
    %55 = vector.shape_cast %54 : vector<1x32x128xbf16> to vector<32x128xbf16>
    %cst_54 = arith.constant dense<0.000000e+00> : vector<256x128xf32>
    %56 = tpu.matmul %53, %55, %cst_54 {dimension_numbers = #tpu.dot_dimension_numbers<[1], [0], [0], [1], [0, 0, 1, 1], [], []>} : vector<256x32xbf16>, vector<32x128xbf16>, vector<256x128xf32> -> vector<256x128xf32>
    %57 = arith.addf %51, %56 : vector<256x128xf32>
    %c0_55 = arith.constant 0 : index
    %c0_56 = arith.constant 0 : index
    %58 = vector.load %arg4[%c0_55, %c0_56] : memref<1x128xf32, #tpu.memory_space<vmem>>, vector<1x128xf32>
    %59 = vector.broadcast %58 : vector<1x128xf32> to vector<256x128xf32>
    %60 = arith.addf %57, %59 : vector<256x128xf32>
    %61 = vector.shape_cast %60 : vector<256x128xf32> to vector<1x16x16x128xf32>
    %c0_57 = arith.constant 0 : index
    %c0_58 = arith.constant 0 : index
    %c0_59 = arith.constant 0 : index
    %c0_60 = arith.constant 0 : index
    %62 = vector.load %arg9[%c0_57, %c0_58, %c0_59, %c0_60] : memref<1x16x16x128xf32, #tpu.memory_space<vmem>>, vector<1x16x16x128xf32>
    tpu.vector_store %arg9[%c0_57, %c0_58, %c0_59, %c0_60], %61 {strides = array<i32>} : memref<1x16x16x128xf32, #tpu.memory_space<vmem>>, vector<1x16x16x128xf32>,
    return
  }
  func.func @transform_0(%arg0: i32, %arg1: i32) -> (i32, i32, i32, i32) {
    %c0_i32 = arith.constant 0 : i32
    %c0_i32_0 = arith.constant 0 : i32
    %c0_i32_1 = arith.constant 0 : i32
    %c0_i32_2 = arith.constant 0 : i32
    return %arg0, %c0_i32, %c0_i32_0, %c0_i32_1 : i32, i32, i32, i32
  }
  func.func @transform_1(%arg0: i32, %arg1: i32) -> (i32, i32, i32) {
    %c0_i32 = arith.constant 0 : i32
    %c0_i32_0 = arith.constant 0 : i32
    %c0_i32_1 = arith.constant 0 : i32
    return %c0_i32, %c0_i32_0, %arg1 : i32, i32, i32
  }
  func.func @transform_2(%arg0: i32, %arg1: i32) -> (i32, i32) {
    %c0_i32 = arith.constant 0 : i32
    %c0_i32_0 = arith.constant 0 : i32
    return %c0_i32, %arg1 : i32, i32
  }
  func.func @transform_3(%arg0: i32, %arg1: i32) -> (i32, i32) {
    %c0_i32 = arith.constant 0 : i32
    %c0_i32_0 = arith.constant 0 : i32
    %c0_i32_1 = arith.constant 0 : i32
    return %c0_i32, %c0_i32_0 : i32, i32
  }
  func.func @transform_4(%arg0: i32, %arg1: i32) -> (i32, i32) {
    %c0_i32 = arith.constant 0 : i32
    %c0_i32_0 = arith.constant 0 : i32
    %c0_i32_1 = arith.constant 0 : i32
    return %c0_i32, %c0_i32_0 : i32, i32
  }
  func.func @transform_5(%arg0: i32, %arg1: i32) -> (i32, i32) {
    %c0_i32 = arith.constant 0 : i32
    %c0_i32_0 = arith.constant 0 : i32
    %c0_i32_1 = arith.constant 0 : i32
    return %c0_i32, %c0_i32_0 : i32, i32
  }
  func.func @transform_6(%arg0: i32, %arg1: i32) -> (i32, i32) {
    %c0_i32 = arith.constant 0 : i32
    %c0_i32_0 = arith.constant 0 : i32
    %c0_i32_1 = arith.constant 0 : i32
    return %c0_i32, %c0_i32_0 : i32, i32
  }
  func.func @transform_7(%arg0: i32, %arg1: i32) -> (i32, i32, i32, i32) {
    %c0_i32 = arith.constant 0 : i32
    %c0_i32_0 = arith.constant 0 : i32
    %c0_i32_1 = arith.constant 0 : i32
    return %arg0, %c0_i32, %c0_i32_0, %arg1 : i32, i32, i32, i32
  }
}

</mosaic_0001>

<bundles_post_ra>
// kernel: tpu_custom_call.1
= control target key start
LH: loop header
LB: loop body
LE: loop exit
PB: predicated region body
PF: predicated region fallthrough
CT: control target
= control target key end

     0   :  { %s12665_s0 = inlined_call_operand.hbm [shape: f32[2,16,16,32], index: 0, kind: input, shape index: {}]   ;;  %s12666_s1 = inlined_call_operand.hbm [shape: bf16[9,32,128], index: 1, kind: input, shape index: {}]   ;;  %s12667_s2 = inlined_call_operand.vmem [shape: f32[1,128], index: 2, kind: input, shape index: {}]   ;;  %s12668_s3 = inlined_call_operand.vmem [shape: f32[1,32], index: 3, kind: input, shape index: {}]   ;;  %s12669_s4 = inlined_call_operand.vmem [shape: f32[1,32], index: 4, kind: input, shape index: {}]   ;;  %s12670_s5 = inlined_call_operand.hbm [shape: f32[32,32], index: 5, kind: input, shape index: {}]   ;;  %s12671_s6 = inlined_call_operand.hbm [shape: f32[32,32], index: 6, kind: input, shape index: {}]   ;;  %s12672_s7 = inlined_call_operand.hbm [shape: f32[2,16,16,128], index: 7, kind: output, shape index: {}]  }
   0x1   :  { %12695 = sst [smem:[#allocation37_spill]] %s12666_s1 }
   0x2   :  { %12696 = sst [smem:[#allocation38_spill]] %s12670_s5 }
   0x3   :  { %12697 = sst [smem:[#allocation39_spill]] %s12671_s6 }
   0x4   :  { %12 = vsyncpa [#allocation5], 0 }
   0x5   :  { %14 = vsyncpa [#allocation5 + $0x1], 0 }
   0x6   :  { %15 = vsyncpa [#allocation8], 0 }
   0x7   :  { %16 = vsyncpa [#allocation11], 0 }
   0x8   :  { %17 = vsyncpa [#allocation6], 0 }
   0x9   :  { %19 = vsyncpa [#allocation6 + $0x1], 0  ;;  %s9558_s24 = smov 0   ;;  %s9560_s25 = smov 0  }
   0xa   :  { %s9562_s26 = smov 0   ;;  %s9564_s27 = smov 0  }
   0xb   :  { %s9566_s28 = smov 0   ;;  %s9568_s29 = smov 0  }
   0xc LB: > { %s7878_s30 = sadd.s32 4294967295, %s9502_s29   ;;  %s7879_s8 = sadd.s32 4294967294, %s9502_s29   ;;  %s9502_s29 = sphi %s9568_s29, %s25_s29   ;;  %s9498_s28 = sphi %s9566_s28, %s12827_s28   ;;  %s9494_s27 = sphi %s9564_s27, %s12826_s27   ;;  %s9490_s26 = sphi %s9562_s26, %s12825_s26   ;;  %s9486_s25 = sphi %s9560_s25, %s12824_s25   ;;  %s9482_s24 = sphi %s9558_s24, %s12823_s24  }
   0xd   : > { %p57_p0 = scmp.ne.s32.totalorder %s9486_s25, %s9482_s24  ;;  %p9592_p1 = scmp.eq.s32.totalorder %s7878_s30, 0 }
   0xe   : > { %p9596_p2 = scmp.eq.s32.totalorder %s7878_s30, 1  ;;  %p225_p3 = scmp.eq.s32.totalorder %s7879_s8, 1 }
   0xf   : > { %s12698_s9 = scalar_select %p9592_p1, 1, 0 }
  0x10   : > { %p9602_p4 = por %p9592_p1, %p57_p0  ;;  %p7880_p5 = scmp.ge.s32.totalorder %s9502_s29, 1 }
  0x11   : > { %p9607_p6 = por %p225_p3, %p57_p0  ;;  %p232_p7 = scmp.lt.s32.totalorder %s9502_s29, 3 }
  0x12   : > { %s12700_s11 = scalar_select %p9602_p4, 1, 0 }
  0x13   : > { %s12701_s12 = scalar_select %p9607_p6, 1, 0 }
  0x14   : > { %p9612_p8 = pnand %p7880_p5, %p232_p7  ;;  %s9504_s14 = smov [#allocation7]  }
  0x15   : > { %s246_s15 = sshll.u32 %s9504_s14, 4  ;;  %s9505_s17 = smov [#allocation9]   ;;  %s247_s15 = int_to_ptr.vmem [resolvable:$true] %s246_s15 }
  0x16   : > { %p8928_p9 = pneg %p9612_p8  ;;  %s271_s18 = sshll.u32 %s9505_s17, 4  ;;  %s272_s18 = int_to_ptr.vmem [resolvable:$true] %s271_s18 }
  0x17   : > { %s9319_s19 = scalar_lea.vmem %s247_s15, 2304  ;;  %p9327_p5 = scmp.lt.s32.totalorder %s247_s15, %s247_s15 }
  0x18   : > { %p9621_p11 = pnand %p8928_p9, %p9592_p1  ;;  %p9320_p13 = scmp.ne.s32.totalorder %s247_s15, %s9319_s19 }
  0x19   : > { %p9328_p7 = scmp.lt.s32.totalorder %s9319_s19, %s9319_s19 }
  0x1a   : > { %p9310_p12 = pneg %p9621_p11 }
  0x1b   : > { %p9329_p10 = por %p9328_p7, %p9327_p5 }
  0x1c   : > { %p9322_p0 = pnand %p9320_p13, %p9310_p12 }
  0x1e   : > { %p9323_p3 = pneg %p9322_p0 }
  0x20   : > { %p9330_p9 = pnand %p9329_p10, %p9323_p3 }
  0x22   : > { %9333 = shalt.err (!%p9330_p9)
}
  0x23   : > { %s9506_s20 = smov 64   ;;  %s9507_s21 = smov 4  }
  0x24   : > { %s12704_s1 = sld [smem:[#allocation37_spill]]  ;;  %s9345_s30 = scalar_lea.vmem %s272_s18, 512 }
  0x25   : > { %p9346_p6 = scmp.ne.s32.totalorder %s272_s18, %s9345_s30  ;;  %p9353_p1 = scmp.lt.s32.totalorder %s272_s18, %s272_s18 }
  0x26   : > { %p9354_p4 = scmp.lt.s32.totalorder %s9345_s30, %s9345_s30 }
  0x27   : > { %p9348_p13 = pnand %p9346_p6, %p9310_p12 }
  0x28   : > { %p9355_p5 = por %p9354_p4, %p9353_p1 }
  0x29   : > { %p9349_p0 = pneg %p9348_p13 }
  0x2a   : > { %8931 = dma.hbm_to_vmem [thread:$0]  (!%p9621_p11), %s12704_s1, 2304, %s247_s15, [#allocation8], %s9506_s20, %s9506_s20, %s9507_s21  }
  0x2b   : > { %p9356_p10 = pnand %p9355_p5, %p9349_p0 }
  0x2d   : > { %9359 = shalt.err (!%p9356_p10)
}
  0x2e   : > { %s12676_s8 = smov 128   ;;  %s12677_s14 = smov 8  }
  0x2f   : > { %s12705_s5 = sld [smem:[#allocation38_spill]]  ;;  %s9510_s19 = smov [#allocation10]  }
  0x30   : > { %s284_s20 = sshll.u32 %s9510_s19, 4  ;;  %s285_s20 = int_to_ptr.vmem [resolvable:$true] %s284_s20 }
  0x31   : > { %s9371_s21 = scalar_lea.vmem %s285_s20, 512  ;;  %p9379_p3 = scmp.lt.s32.totalorder %s285_s20, %s285_s20 }
  0x32   : > { %p9372_p6 = scmp.ne.s32.totalorder %s285_s20, %s9371_s21  ;;  %p9380_p7 = scmp.lt.s32.totalorder %s9371_s21, %s9371_s21 }
  0x34   : > { %p9374_p1 = pnand %p9372_p6, %p9310_p12  ;;  %p9381_p9 = por %p9380_p7, %p9379_p3 }
  0x35   : > { %8934 = dma.hbm_to_vmem [thread:$0]  (!%p9621_p11), %s12705_s5, 512, %s272_s18, [#allocation8], %s12676_s8, %s12676_s8, %s12677_s14  }
  0x36   : > { %p9375_p4 = pneg %p9374_p1 }
  0x38   : > { %p9382_p13 = pnand %p9381_p9, %p9375_p4 }
  0x3a   : > { %9385 = shalt.err (!%p9382_p13)
}
  0x3b   : > { %s12706_s6 = sld [smem:[#allocation39_spill]]  ;;  %s37_s23 = sadd.s32 1, %s9498_s28 }
  0x3c   : > { %p39_p12 = scmp.ge.s32.totalorder %s37_s23, 2  ;;  %s44_s16 = sadd.s32 1, %s9490_s26 }
  0x3d   : > { %p51_p0 = scmp.ne.s32.totalorder %s9490_s26, %s9486_s25  ;;  %p52_p5 = scmp.eq.s32.totalorder %s9502_s29, 0 }
  0x3e   : > { %s12829_s23 = smov (%p39_p12, %s37_s23), 0  ;;  %s298_s19 = sand.u32 1, %s9490_s26  }
  0x3f   : > { %12707 = sst [smem:[#allocation17_spill]] %s12829_s23  ;;  %p9664_p10 = por %p52_p5, %p51_p0 }
  0x40   : > { %p9670_p6 = por %p9596_p2, %p51_p0  ;;  %s41_s17 = ssub.s32 %s9498_s28, %s12829_s23 }
  0x41   : > { %8937 = dma.hbm_to_vmem [thread:$0]  (!%p9621_p11), %s12706_s6, 512, %s285_s20, [#allocation11], %s12676_s8, %s12676_s8, %s12677_s14  }
  0x42   : > { %p8949_p11 = scmp.lt.s32.totalorder %s9502_s29, 2  ;;  %p42_p1 = scmp.eq.s32.totalorder %s41_s17, 0 }
  0x43   : > { %s7886_s20 = sshll.u32 %s298_s19, 8  ;;  %s8324_s18 = sshll.u32 %s9498_s28, 12 }
  0x44   : > { %s9679_s21 = scalar_select %p42_p1, %s9490_s26, %s44_s16  }
  0x45   : > { %s308_s14 = scalar_lea.hbm %s12665_s0, %s8324_s18  ;;  %s302_s1 = scalar_lea.vmem [#allocation4], %s7886_s20 }
  0x46   : > { %s309_s5 = sshll.u32 %s302_s1, 4  ;;  %p9687_p2 = pnand %p8949_p11, %p9664_p10  ;;  %s310_s5 = int_to_ptr.vmem [resolvable:$true] %s309_s5 }
  0x47   : > { %s299_s6 = scalar_lea.sflag [#allocation5], %s298_s19  ;;  %s9399_s17 = scalar_lea.vmem %s310_s5, 4096 }
  0x48   : > { %p9388_p4 = pneg %p9687_p2  ;;  %p9400_p3 = scmp.ne.s32.totalorder %s310_s5, %s9399_s17 }
  0x49   : > { %s9511_s16 = smov [#allocation4]  }
  0x4a   : > { %p9402_p7 = pnand %p9400_p3, %p9388_p4  ;;  %s9404_s23 = sshll.u32 %s9511_s16, 4  ;;  %s9405_s23 = int_to_ptr.vmem [resolvable:$false] %s9404_s23 }
  0x4b   : > { %s9406_s8 = scalar_lea.vmem %s9405_s23, 8192  ;;  %p9407_p13 = scmp.lt.s32.totalorder %s310_s5, %s9405_s23 }
  0x4c   : > { %p9403_p9 = pneg %p9402_p7  ;;  %p9408_p12 = scmp.lt.s32.totalorder %s9406_s8, %s9399_s17 }
  0x4e   : > { %p9409_p0 = por %p9408_p12, %p9407_p13 }
  0x50   : > { %p9410_p5 = pnand %p9409_p0, %p9403_p9 }
  0x52   : > { %9413 = shalt.err (!%p9410_p5)
}
  0x53   : > { %s12711_s1 = smov 8   ;;  %s12712_s30 = smov 128  }
  0x54   : > { %8941 = dma.hbm_to_vmem [thread:$0]  (!%p9687_p2), %s308_s14, 4096, %s310_s5, %s299_s6, %s12712_s30, %s12712_s30, %s12711_s1  }
  0x55   : > { %321 = sbr.rel (%p9612_p8) target bundleno = 1816 (0x718), region = 48 }
  0x5a   : > { %s9701_s19 = sand.u32 1, %s9486_s25   ;;  %p12713_p10 = scmp.ne.s32.totalorder %s12700_s11, 0 }
  0x5b   : > { %s7890_s23 = sshll.u32 %s9701_s19, 8  ;;  %s324_s20 = scalar_lea.sflag [#allocation5], %s9701_s19 }
  0x5c   : > { %s9707_s18 = scalar_lea.vmem [#allocation4], %s7890_s23 }
  0x5d   : > { %9465 = dma.done.wait (%p12713_p10), %s324_s20, 4096  }
  0x5e   : > { %9467 = vsyncadd (%p12713_p10), %s324_s20, 4294963200  ;;  %p12714_p11 = scmp.ne.s32.totalorder %s12698_s9, 0 }
  0x60   : > { %9469 = dma.done.wait (%p12714_p11), [#allocation8], 2816  }
  0x61   : > { %9471 = vsyncadd (%p12714_p11), [#allocation8], 4294964480 }
  0x62   : > { %9473 = dma.done.wait (%p12714_p11), [#allocation11], 512  }
  0x63   : > { %9475 = vsyncadd (%p12714_p11), [#allocation11], 4294966784  ;;  %v9512_v0 = vmov 0.0   ;;  %vm9513_vm0 = vmmov 0   ;;  %vm413_vm1 = vcmask 261120   ;;  %v9727_v1 = vld [vmem:[#allocation9 + $0x18] sm:$0xff] }
  0x64   : > { %8540 = vmatprep.subr.mxu0 %v9512_v0  ;;  %8548 = vmatprep.mubr.msk.f32.mxu0 %vm9513_vm0, %v9512_v0  ;;  %v9729_v2 = vld [vmem:[#allocation9 + $0x10] sm:$0xff]  ;;  %v9736_v4 = vld [vmem:[%s9707_s18 + $0x8] sm:$0xff]  ;;  %v9739_v5 = vld [vmem:[#allocation9 + $0x8] sm:$0xff]  ;;  %vm1236_vm2 = vcmask 253952   ;;  %vm1237_vm3 = vsmask.f32 256 }
  0x65   : > { %8551 = vmatprep.subr.mxu1 %v9512_v0  ;;  %8559 = vmatprep.mubr.msk.f32.mxu1 %vm9513_vm0, %v9512_v0  ;;  %v9733_v3 = vld [vmem:[%s9707_s18] sm:$0xff]  ;;  %v9742_v6 = vld [vmem:[%s9707_s18 + $0x10] sm:$0xff]  ;;  %v9745_v7 = vld [vmem:[%s9707_s18 + $0x18] sm:$0xff]  ;;  %v415_v9 = vsel %vm413_vm1, %v9736_v4, 0.0  ;;  %vm1228_vm4 = vcmask 257024   ;;  %v12715_v34 = vmov 0 }
  0x66   : > { %8541 = vmatpush3.msra.mxu0 %v9727_v1  ;;  %v414_v8 = vsel %vm413_vm1, %v9733_v3, 0.0  ;;  %v9753_v10 = vld [vmem:[%s9707_s18 + $0x20] sm:$0xff]  ;;  %v417_v12 = vsel %vm413_vm1, %v9742_v6, 0.0  ;;  %v9758_v13 = vld [vmem:[#allocation9] sm:$0xff]  ;;  %v419_v14 = vsel %vm413_vm1, %v9745_v7, 0.0  ;;  %v9764_v15 = vld [vmem:[%s9707_s18 + $0x28] sm:$0xff] }
  0x67   : > { %8542 = vmatprep.subr.mxu0 %v9512_v0  ;;  %v416_v11 = vadd.f32 %v415_v9, %v414_v8  ;;  %v421_v17 = vsel %vm413_vm1, %v9753_v10, 0.0  ;;  %v9771_v18 = vld [vmem:[%s9707_s18 + $0x30] sm:$0xff]  ;;  %v9774_v19 = vld [vmem:[%s9707_s18 + $0x38] sm:$0xff]  ;;  %v9777_v21 = vld [vmem:[%s9707_s18 + $0x40] sm:$0xff]  ;;  %v423_v24 = vsel %vm413_vm1, %v9764_v15, 0.0  ;;  %vm2541_vm13 = vcmask 1042432  }
  0x68   : > { %8543 = vmatpush3.msra.mxu0 %v9729_v2  ;;  %v9780_v22 = vld [vmem:[%s9707_s18 + $0x48] sm:$0xff]  ;;  %v9783_v23 = vld [vmem:[%s9707_s18 + $0x50] sm:$0xff]  ;;  %v9789_v25 = vld [vmem:[%s9707_s18 + $0x58] sm:$0xff]  ;;  %v425_v29 = vsel %vm413_vm1, %v9771_v18, 0.0  ;;  %vm1294_vm5 = vsmask.f32 7938 }
  0x69   : > { %8544 = vmatprep.subr.mxu0 %v9512_v0  ;;  %v418_v16 = vadd.f32 %v417_v12, %v416_v11  ;;  %v9792_v26 = vld [vmem:[%s9707_s18 + $0x60] sm:$0xff]  ;;  %v9795_v27 = vld [vmem:[%s9707_s18 + $0x68] sm:$0xff]  ;;  %v427_v31 = vsel %vm413_vm1, %v9774_v19, 0.0  ;;  %v429_v32 = vsel %vm413_vm1, %v9777_v21, 0.0  ;;  %v431_v33 = vsel %vm413_vm1, %v9780_v22, 0.0  ;;  %vm9807_vm6 = vmand %vm1236_vm2, %vm1237_vm3  ;;  %s12517_s22 = scalar_lea.vmem [#allocation12], %s7890_s23 }
  0x6a   : > { %8545 = vmatpush3.msra.mxu0 %v9739_v5  ;;  %v12716_v34 = vsel %vm9807_vm6, 4294967295, %v12715_v34  ;;  %v9812_v35 = vld [vmem:[%s9707_s18 + $0x70] sm:$0xff]  ;;  %v433_v36 = vsel %vm413_vm1, %v9783_v23, 0.0  ;;  %v9818_v37 = vsel %vm413_vm1, %v9789_v25, 0.0  ;;  %v9822_v38 = vsel %vm413_vm1, %v9792_v26, 0.0  ;;  %v9828_v40 = vld [vmem:[#allocation10 + $0x18] sm:$0xff]  ;;  %vm9862_vm7 = vmand %vm1228_vm4, %vm1294_vm5 }
  0x6b   : > { %8546 = vmatprep.subr.mxu0 %v9512_v0  ;;  %v420_v20 = vadd.f32 %v419_v14, %v418_v16  ;;  %12717 = vst [vmem:[#allocation18_spill] sm:$0xff] %v12716_v34  ;;  %v9826_v39 = vsel %vm413_vm1, %v9795_v27, 0.0  ;;  %v1242_v42 = vld [vmem:[#allocation2 + $0xc] sm:$0x1]  ;;  %v1248_v43 = vld [vmem:[#allocation2 + $0x24] sm:$0x1]  ;;  %8552 = vmatpush3.msra.mxu1 %v9828_v40 }
  0x6c   : > { %8547 = vmatpush3.msra.mxu0 %v9758_v13  ;;  %v1251_v44 = vld [vmem:[#allocation2 + $0x30] sm:$0x1]  ;;  %v1243_v45 = vsel %vm9807_vm6, 0, %v1242_v42  ;;  %v1249_v46 = vsel %vm9807_vm6, 0, %v1248_v43  ;;  %v1254_v48 = vld [vmem:[#allocation2 + $0x3c] sm:$0x1]  ;;  %8553 = vmatprep.subr.mxu1 %v9512_v0 }
  0x6d   : > { %8562 = vmatprep.subr.mxu0 %v9512_v0  ;;  %v422_v28 = vadd.f32 %v421_v17, %v420_v20  ;;  %v1252_v47 = vsel %vm9807_vm6, 0, %v1251_v44  ;;  %v9838_v49 = vld [vmem:[#allocation10 + $0x10] sm:$0xff]  ;;  %v9842_v51 = vsel %vm413_vm1, %v9812_v35, 0.0  ;;  %1244 = vst [vmem:[#allocation2 + $0xc] sm:$0x1] %v1243_v45  ;;  %v1255_v52 = vsel %vm9807_vm6, 0, %v1254_v48 }
  0x6e   : > { %1250 = vst [vmem:[#allocation2 + $0x24] sm:$0x1] %v1249_v46  ;;  %1253 = vst [vmem:[#allocation2 + $0x30] sm:$0x1] %v1252_v47  ;;  %v1257_v53 = vld [vmem:[#allocation2 + $0x48] sm:$0x1]  ;;  %8554 = vmatpush3.msra.mxu1 %v9838_v49 }
  0x6f   : > { %v424_v30 = vadd.f32 %v423_v24, %v422_v28  ;;  %v1260_v54 = vld [vmem:[#allocation2 + $0x54] sm:$0x1]  ;;  %1256 = vst [vmem:[#allocation2 + $0x3c] sm:$0x1] %v1255_v52  ;;  %v1258_v55 = vsel %vm9807_vm6, 0, %v1257_v53  ;;  %8555 = vmatprep.subr.mxu1 %v9512_v0  ;;  %v12718_v14 = vmov 0 }
  0x70   : > { %v1261_v56 = vsel %vm9807_vm6, 0, %v1260_v54  ;;  %v1263_v57 = vld [vmem:[#allocation2 + $0x60] sm:$0x1]  ;;  %v1266_v58 = vld [vmem:[#allocation2 + $0x6c] sm:$0x1]  ;;  %v12719_v14 = vsel %vm9862_vm7, 4294967295, %v12718_v14 }
  0x71   : > { %v426_v41 = vadd.f32 %v425_v29, %v424_v30  ;;  %1259 = vst [vmem:[#allocation2 + $0x48] sm:$0x1] %v1258_v55  ;;  %1262 = vst [vmem:[#allocation2 + $0x54] sm:$0x1] %v1261_v56  ;;  %v1264_v60 = vsel %vm9807_vm6, 0, %v1263_v57  ;;  %v1267_v61 = vsel %vm9807_vm6, 0, %v1266_v58 }
  0x72   : > { %v1269_v62 = vld [vmem:[#allocation2 + $0x78] sm:$0x1]  ;;  %v1272_v63 = vld [vmem:[#allocation2 + $0x84] sm:$0x1]  ;;  %1265 = vst [vmem:[#allocation2 + $0x60] sm:$0x1] %v1264_v60 }
  0x73   : > { %v428_v50 = vadd.f32 %v427_v31, %v426_v41  ;;  %1268 = vst [vmem:[#allocation2 + $0x6c] sm:$0x1] %v1267_v61  ;;  %v1270_v8 = vsel %vm9807_vm6, 0, %v1269_v62  ;;  %v1273_v9 = vsel %vm9807_vm6, 0, %v1272_v63  ;;  %v1275_v11 = vld [vmem:[#allocation2 + $0x90] sm:$0x1] }
  0x74   : > { %v1278_v12 = vld [vmem:[#allocation2 + $0x9c] sm:$0x1]  ;;  %12720 = vst [vmem:[#allocation19_spill] sm:$0xff] %v12719_v14  ;;  %1271 = vst [vmem:[#allocation2 + $0x78] sm:$0x1] %v1270_v8  ;;  %v1276_v17 = vsel %vm9807_vm6, 0, %v1275_v11 }
  0x75   : > { %v430_v59 = vadd.f32 %v429_v32, %v428_v50  ;;  %1274 = vst [vmem:[#allocation2 + $0x84] sm:$0x1] %v1273_v9  ;;  %v1279_v20 = vsel %vm9807_vm6, 0, %v1278_v12  ;;  %v1281_v24 = vld [vmem:[#allocation2 + $0xa8] sm:$0x1]  ;;  %v9883_v48 = vld [vmem:[%s9707_s18 + $0x78] sm:$0xff] }
  0x76   : > { %v1284_v28 = vld [vmem:[#allocation2 + $0xb4] sm:$0x1]  ;;  %1277 = vst [vmem:[#allocation2 + $0x90] sm:$0x1] %v1276_v17  ;;  %1280 = vst [vmem:[#allocation2 + $0x9c] sm:$0x1] %v1279_v20 }
  0x77   : > { %v432_v16 = vadd.f32 %v431_v33, %v430_v59  ;;  %v1282_v29 = vsel %vm9807_vm6, 0, %v1281_v24  ;;  %v1285_v30 = vsel %vm9807_vm6, 0, %v1284_v28  ;;  %v1287_v31 = vld [vmem:[#allocation2 + $0xc0] sm:$0x1]  ;;  %v1305_v32 = vld [vmem:[#allocation2 + $0x2c] sm:$0xf] }
  0x78   : > { %1283 = vst [vmem:[#allocation2 + $0xa8] sm:$0x1] %v1282_v29  ;;  %1286 = vst [vmem:[#allocation2 + $0xb4] sm:$0x1] %v1285_v30  ;;  %v1288_v41 = vsel %vm9807_vm6, 0, %v1287_v31  ;;  %v1306_v42 = vsel %vm9862_vm7, 0, %v1305_v32 }
  0x79   : > { %v434_v33 = vadd.f32 %v433_v36, %v432_v16  ;;  %v1308_v43 = vld [vmem:[#allocation2 + $0x38] sm:$0xf]  ;;  %v1311_v44 = vld [vmem:[#allocation2 + $0x44] sm:$0xf]  ;;  %1289 = vst [vmem:[#allocation2 + $0xc0] sm:$0x1] %v1288_v41 }
  0x7a   : > { %1307 = vst [vmem:[#allocation2 + $0x2c] sm:$0xf] %v1306_v42  ;;  %v1309_v45 = vsel %vm9862_vm7, 0, %v1308_v43  ;;  %v1312_v46 = vsel %vm9862_vm7, 0, %v1311_v44  ;;  %v1314_v47 = vld [vmem:[#allocation2 + $0x50] sm:$0xf] }
  0x7b   : > { %v1317_v36 = vld [vmem:[#allocation2 + $0x5c] sm:$0xf]  ;;  %v436_v50 = vadd.f32 %v9818_v37, %v434_v33  ;;  %1310 = vst [vmem:[#allocation2 + $0x38] sm:$0xf] %v1309_v45  ;;  %1313 = vst [vmem:[#allocation2 + $0x44] sm:$0xf] %v1312_v46 }
  0x7c   : > { %v1315_v52 = vsel %vm9862_vm7, 0, %v1314_v47  ;;  %v1318_v53 = vsel %vm9862_vm7, 0, %v1317_v36  ;;  %v1320_v54 = vld [vmem:[#allocation2 + $0x68] sm:$0xf]  ;;  %v1323_v55 = vld [vmem:[#allocation2 + $0x74] sm:$0xf] }
  0x7d   : > { %1316 = vst [vmem:[#allocation2 + $0x50] sm:$0xf] %v1315_v52  ;;  %1319 = vst [vmem:[#allocation2 + $0x5c] sm:$0xf] %v1318_v53  ;;  %v1321_v56 = vsel %vm9862_vm7, 0, %v1320_v54  ;;  %v1324_v57 = vsel %vm9862_vm7, 0, %v1323_v55  ;;  %v438_v59 = vadd.f32 %v9822_v38, %v436_v50 }
  0x7e   : > { %v1326_v37 = vld [vmem:[#allocation2 + $0x80] sm:$0xf]  ;;  %v1329_v58 = vld [vmem:[#allocation2 + $0x8c] sm:$0xf]  ;;  %1322 = vst [vmem:[#allocation2 + $0x68] sm:$0xf] %v1321_v56 }
  0x7f   : > { %1325 = vst [vmem:[#allocation2 + $0x74] sm:$0xf] %v1324_v57  ;;  %v1327_v60 = vsel %vm9862_vm7, 0, %v1326_v37  ;;  %v1330_v61 = vsel %vm9862_vm7, 0, %v1329_v58  ;;  %v1332_v62 = vld [vmem:[#allocation2 + $0x98] sm:$0xf]  ;;  %v440_v16 = vadd.f32 %v9826_v39, %v438_v59 }
  0x80   : > { %v1335_v63 = vld [vmem:[#allocation2 + $0xa4] sm:$0xf]  ;;  %1328 = vst [vmem:[#allocation2 + $0x80] sm:$0xf] %v1327_v60  ;;  %1331 = vst [vmem:[#allocation2 + $0x8c] sm:$0xf] %v1330_v61 }
  0x81   : > { %v1333_v8 = vsel %vm9862_vm7, 0, %v1332_v62  ;;  %v1336_v9 = vsel %vm9862_vm7, 0, %v1335_v63  ;;  %v1338_v38 = vld [vmem:[#allocation2 + $0xb0] sm:$0xf]  ;;  %v1341_v11 = vld [vmem:[#allocation2 + $0xbc] sm:$0xf]  ;;  %v442_v30 = vadd.f32 %v9842_v51, %v440_v16 }
  0x82   : > { %v9904_v12 = vld [vmem:[%s9707_s18 + $0x80] sm:$0xff]  ;;  %1334 = vst [vmem:[#allocation2 + $0x98] sm:$0xf] %v1333_v8  ;;  %1337 = vst [vmem:[#allocation2 + $0xa4] sm:$0xf] %v1336_v9  ;;  %v1339_v17 = vsel %vm9862_vm7, 0, %v1338_v38 }
  0x83   : > { %v1342_v20 = vsel %vm9862_vm7, 0, %v1341_v11  ;;  %v1344_v24 = vld [vmem:[#allocation2 + $0xc8] sm:$0xf]  ;;  %v443_v28 = vsel %vm413_vm1, %v9883_v48, 0.0  ;;  %1340 = vst [vmem:[#allocation2 + $0xb0] sm:$0xf] %v1339_v17 }
  0x84   : > { %1343 = vst [vmem:[#allocation2 + $0xbc] sm:$0xf] %v1342_v20  ;;  %v1345_v39 = vsel %vm9862_vm7, 0, %v1344_v24  ;;  %v9916_v29 = vld [vmem:[%s9707_s18 + $0x88] sm:$0xff]  ;;  %v445_v31 = vsel %vm413_vm1, %v9904_v12, 0.0  ;;  %v9922_v32 = vld [vmem:[%s9707_s18 + $0x90] sm:$0xff]  ;;  %v444_v33 = vadd.f32 %v443_v28, %v442_v30 }
  0x85   : > { %1346 = vst [vmem:[#allocation2 + $0xc8] sm:$0xf] %v1345_v39  ;;  %v9925_v41 = vld [vmem:[%s9707_s18 + $0x98] sm:$0xff]  ;;  %v447_v42 = vsel %vm413_vm1, %v9916_v29, 0.0  ;;  %v9930_v43 = vld [vmem:[%s9707_s18 + $0xa0] sm:$0xff]  ;;  %v9933_v44 = vld [vmem:[%s9707_s18 + $0xa8] sm:$0xff] }
  0x86   : > { %v9936_v45 = vld [vmem:[%s9707_s18 + $0xb0] sm:$0xff]  ;;  %v446_v46 = vadd.f32 %v445_v31, %v444_v33  ;;  %v9939_v51 = vld [vmem:[%s9707_s18 + $0xb8] sm:$0xff]  ;;  %v9942_v47 = vld [vmem:[%s9707_s18 + $0xc0] sm:$0xff]  ;;  %v449_v50 = vsel %vm413_vm1, %v9922_v32, 0.0  ;;  %v451_v53 = vsel %vm413_vm1, %v9925_v41, 0.0  ;;  %v453_v54 = vsel %vm413_vm1, %v9930_v43, 0.0 }
  0x87   : > { %v9945_v36 = vld [vmem:[%s9707_s18 + $0xc8] sm:$0xff]  ;;  %v455_v55 = vsel %vm413_vm1, %v9933_v44, 0.0  ;;  %v457_v56 = vsel %vm413_vm1, %v9936_v45, 0.0  ;;  %v459_v37 = vsel %vm413_vm1, %v9939_v51, 0.0  ;;  %v461_v58 = vsel %vm413_vm1, %v9942_v47, 0.0  ;;  %v9964_v63 = vld [vmem:[%s9707_s18 + $0xd0] sm:$0xff] }
  0x88   : > { %v448_v52 = vadd.f32 %v447_v42, %v446_v46  ;;  %v463_v59 = vsel %vm413_vm1, %v9945_v36, 0.0  ;;  %v9967_v38 = vld [vmem:[%s9707_s18 + $0xd8] sm:$0xff]  ;;  %v465_v16 = vsel %vm413_vm1, %v9964_v63, 0.0  ;;  %v9972_v17 = vld [vmem:[%s9707_s18 + $0xe0] sm:$0xff]  ;;  %v9977_v28 = vld [vmem:[%s9707_s18 + $0xe8] sm:$0xff]  ;;  %vm2542_vm14 = vcmask 1046532  }
  0x89   : > { %v467_v24 = vsel %vm413_vm1, %v9967_v38, 0.0  ;;  %v469_v30 = vsel %vm413_vm1, %v9972_v17, 0.0  ;;  %v9982_v31 = vld [vmem:[%s9707_s18 + $0xf0] sm:$0xff]  ;;  %v471_v42 = vsel %vm413_vm1, %v9977_v28, 0.0  ;;  %v9987_v46 = vld [vmem:[%s9707_s18 + $0xf8] sm:$0xff]  ;;  %vm11151_vm15 = vmor %vm2541_vm13, %vm2542_vm14  ;;  %s8357_s10 = sshll.u32 %s9494_s27, 12 }
  0x8a   : > { %v450_v57 = vadd.f32 %v449_v50, %v448_v52  ;;  %v473_v52 = vsel %vm413_vm1, %v9982_v31, 0.0  ;;  %vm1993_vm8 = vsmask.f32 3328  ;;  %vm1994_vm9 = vsmask.f32 7440  ;;  %s7752_s17 = sshll.u32 %s12517_s22, 4  ;;  %s12612_s1 = scalar_lea.hbm %s12672_s7, %s8357_s10  ;;  %s12614_s17 = int_to_ptr.vmem [resolvable:$true] %s7752_s17 }
  0x8b   : > { %vm10494_vm10 = vmor %vm1993_vm8, %vm1994_vm9  ;;  %vm1446_vm11 = vsmask.f32 4368  ;;  %s7738_s27 = scalar_lea.sflag [#allocation6], %s9701_s19  ;;  %s9414_s30 = scalar_lea.vmem %s12614_s17, 4096 }
  0x8c   : > { %v452_v60 = vadd.f32 %v451_v53, %v450_v57  ;;  %vm10690_vm12 = vmor %vm1237_vm3, %vm1446_vm11  ;;  %p9415_p8 = scmp.ne.s32.totalorder %s12614_s17, %s9414_s30  ;;  %s9515_s23 = smov [#allocation12]  }
  0x8d   : > { %s9418_s20 = sshll.u32 %s9515_s23, 4  ;;  %s9419_s20 = int_to_ptr.vmem [resolvable:$false] %s9418_s20 }
  0x8e   : > { %v454_v61 = vadd.f32 %v453_v54, %v452_v60  ;;  %v475_v54 = vsel %vm413_vm1, %v9987_v46, 0.0  ;;  %p9416_p1 = pnand %p9415_p8, %p9670_p6  ;;  %s9420_s18 = scalar_lea.vmem %s9419_s20, 8192 }
  0x8f   : > { %p9421_p4 = scmp.lt.s32.totalorder %s12614_s17, %s9419_s20  ;;  %p9422_p3 = scmp.lt.s32.totalorder %s9420_s18, %s9414_s30 }
  0x90   : > { %v456_v62 = vadd.f32 %v455_v55, %v454_v61  ;;  %p9417_p2 = pneg %p9416_p1 }
  0x91   : > { %p9423_p7 = por %p9422_p3, %p9421_p4 }
  0x92   : > { %v458_v8 = vadd.f32 %v457_v56, %v456_v62  ;;  %v563_v62 = vld [vmem:[#allocation10 + $0x8] sm:$0xff] }
  0x93   : > { %8556 = vmatpush3.msra.mxu1 %v563_v62  ;;  %p9424_p9 = pnand %p9423_p7, %p9417_p2 }
  0x94   : > { %v460_v9 = vadd.f32 %v459_v37, %v458_v8  ;;  %8557 = vmatprep.subr.mxu1 %v9512_v0 }
  0x96   : > { %v462_v11 = vadd.f32 %v461_v58, %v460_v9 }
  0x98   : > { %v464_v20 = vadd.f32 %v463_v59, %v462_v11 }
  0x9a   : > { %v466_v39 = vadd.f32 %v465_v16, %v464_v20 }
  0x9c   : > { %v468_v33 = vadd.f32 %v467_v24, %v466_v39 }
  0x9e   : > { %v470_v50 = vadd.f32 %v469_v30, %v468_v33 }
  0xa0   : > { %v472_v53 = vadd.f32 %v471_v42, %v470_v50 }
  0xa2   : > { %v474_v55 = vadd.f32 %v473_v52, %v472_v53 }
  0xa4   : > { %v476_v56 = vadd.f32 %v475_v54, %v474_v55 }
  0xa6   : > { %v477_v57 = vrot.slane %v476_v56, 4 }
  0xa8   : > { %v478_v37 = vadd.f32 %v477_v57, %v476_v56 }
  0xaa   : > { %v479_v58 = vrot.slane %v478_v37, 2 }
  0xac   : > { %v480_v59 = vadd.f32 %v479_v58, %v478_v37 }
  0xae   : > { %v481_v60 = vrot.slane %v480_v59, 1 }
  0xb0   : > { %v482_v61 = vadd.f32 %v481_v60, %v480_v59 }
  0xb2   : > { %8549 = vmatmul.mubr.msk.f32.vlgmr.msra.gmra.mxu0 %vm413_vm1, %v482_v61 }
  0xb3   : > { %8563 = vmatpush3.msra.mxu0 %v9727_v1  ;;  %8570 = vmatprep.mubr.msk.f32.mxu0 %vm9513_vm0, %v9512_v0  ;;  %v562_v1 = vld [vmem:[#allocation10] sm:$0xff] }
  0xb4   : > { %8564 = vmatprep.subr.mxu0 %v9512_v0  ;;  %8558 = vmatpush3.msra.mxu1 %v562_v1 }
  0xb5   : > { %8565 = vmatpush3.msra.mxu0 %v9729_v2  ;;  %8573 = vmatprep.subr.mxu1 %v9512_v0  ;;  %v639_v2 = vlaneseq }
  0xb6   : > { %8566 = vmatprep.subr.mxu0 %v9512_v0 }
  0xb7   : > { %8567 = vmatpush3.msra.mxu0 %v9739_v5  ;;  %v10013_v5 = vshrl.u32 %v639_v2, 7 }
  0xb8   : > { %8568 = vmatprep.subr.mxu0 %v9512_v0 }
  0xb9   : > { %8569 = vmatpush3.msra.mxu0 %v9758_v13 }
 0x172   : > { %v556_v8 = vpop.f32.mrf.mxu0 }
 0x173   : > { %v561_v9 = vmul.f32 0.00390625, %v556_v8 }
 0x174   : > { %v8550_v11 = vpop.f32.mrf.mxu0 }
 0x175   : > { %8560 = vmatmul.mubr.msk.f32.vlgmr.msra.gmra.mxu1 %vm413_vm1, %v561_v9 }
 0x176   : > { %8574 = vmatpush3.msra.mxu1 %v9828_v40  ;;  %8581 = vmatprep.mubr.msk.f32.mxu1 %vm9513_vm0, %v9512_v0  ;;  %v641_v40 = vsub.s32 0, %v10013_v5 }
 0x177   : > { %8575 = vmatprep.subr.mxu1 %v9512_v0 }
 0x178   : > { %8576 = vmatpush3.msra.mxu1 %v9838_v49 }
 0x179   : > { %8577 = vmatprep.subr.mxu1 %v9512_v0 }
 0x17a   : > { %8578 = vmatpush3.msra.mxu1 %v563_v62 }
 0x17b   : > { %8579 = vmatprep.subr.mxu1 %v9512_v0 }
 0x17c   : > { %8580 = vmatpush3.msra.mxu1 %v562_v1 }
 0x235   : > { %v635_v13 = vpop.f32.mrf.mxu1 }
 0x236   : > { %v10018_v20 = vrot.slane %v635_v13, %v641_v40 }
 0x237   : > { %v8561_v16 = vpop.f32.mrf.mxu1 }
 0x238   : > { %v10022_v49 = vsub.f32 %v9733_v3, %v10018_v20  ;;  %v10026_v24 = vsub.f32 %v9736_v4, %v10018_v20  ;;  %v10030_v0 = vsub.f32 %v9742_v6, %v10018_v20  ;;  %v10034_v39 = vsub.f32 %v9745_v7, %v10018_v20 }
 0x239   : > { %v10042_v3 = vsub.f32 %v9753_v10, %v10018_v20  ;;  %v10048_v6 = vsub.f32 %v9764_v15, %v10018_v20  ;;  %v10056_v53 = vsub.f32 %v9771_v18, %v10018_v20  ;;  %v10063_v15 = vsub.f32 %v9774_v19, %v10018_v20 }
 0x23a   : > { %v675_v30 = vmul.f32 %v10022_v49, %v10022_v49  ;;  %v676_v33 = vmul.f32 %v10026_v24, %v10026_v24  ;;  %v677_v4 = vmul.f32 %v10030_v0, %v10030_v0  ;;  %v678_v7 = vmul.f32 %v10034_v39, %v10034_v39 }
 0x23b   : > { %v679_v10 = vmul.f32 %v10042_v3, %v10042_v3  ;;  %v680_v56 = vmul.f32 %v10048_v6, %v10048_v6  ;;  %v10070_v18 = vsub.f32 %v9777_v21, %v10018_v20  ;;  %v681_v58 = vmul.f32 %v10056_v53, %v10056_v53 }
 0x23c   : > { %v707_v42 = vsel %vm413_vm1, %v675_v30, 0.0  ;;  %v708_v50 = vsel %vm413_vm1, %v676_v33, 0.0  ;;  %v710_v54 = vsel %vm413_vm1, %v677_v4, 0.0  ;;  %v712_v57 = vsel %vm413_vm1, %v678_v7, 0.0 }
 0x23d   : > { %v709_v52 = vadd.f32 %v708_v50, %v707_v42  ;;  %v714_v59 = vsel %vm413_vm1, %v679_v10, 0.0  ;;  %v10077_v19 = vsub.f32 %v9780_v22, %v10018_v20  ;;  %v682_v61 = vmul.f32 %v10063_v15, %v10063_v15 }
 0x23e   : > { %v716_v62 = vsel %vm413_vm1, %v680_v56, 0.0  ;;  %v10084_v21 = vsub.f32 %v9783_v23, %v10018_v20  ;;  %v683_v8 = vmul.f32 %v10070_v18, %v10070_v18  ;;  %v718_v9 = vsel %vm413_vm1, %v681_v58, 0.0 }
 0x23f   : > { %v711_v55 = vadd.f32 %v710_v54, %v709_v52  ;;  %v10091_v22 = vsub.f32 %v9789_v25, %v10018_v20  ;;  %v684_v2 = vmul.f32 %v10077_v19, %v10077_v19  ;;  %v720_v13 = vsel %vm413_vm1, %v682_v61, 0.0 }
 0x240   : > { %v10098_v23 = vsub.f32 %v9792_v26, %v10018_v20  ;;  %v685_v30 = vmul.f32 %v10084_v21, %v10084_v21  ;;  %v722_v33 = vsel %vm413_vm1, %v683_v8, 0.0  ;;  %v10105_v25 = vsub.f32 %v9795_v27, %v10018_v20 }
 0x241   : > { %v713_v37 = vadd.f32 %v712_v57, %v711_v55  ;;  %v686_v7 = vmul.f32 %v10091_v22, %v10091_v22  ;;  %v724_v42 = vsel %vm413_vm1, %v684_v2, 0.0  ;;  %v10112_v26 = vsub.f32 %v9812_v35, %v10018_v20 }
 0x242   : > { %v687_v52 = vmul.f32 %v10098_v23, %v10098_v23  ;;  %v726_v10 = vsel %vm413_vm1, %v685_v30, 0.0  ;;  %v10119_v27 = vsub.f32 %v9883_v48, %v10018_v20  ;;  %v688_v55 = vmul.f32 %v10105_v25, %v10105_v25 }
 0x243   : > { %v715_v60 = vadd.f32 %v714_v59, %v713_v37  ;;  %v728_v56 = vsel %vm413_vm1, %v686_v7, 0.0  ;;  %v10126_v35 = vsub.f32 %v9904_v12, %v10018_v20  ;;  %v689_v37 = vmul.f32 %v10112_v26, %v10112_v26 }
 0x244   : > { %v730_v58 = vsel %vm413_vm1, %v687_v52, 0.0  ;;  %v10133_v48 = vsub.f32 %v9916_v29, %v10018_v20  ;;  %v732_v61 = vsel %vm413_vm1, %v688_v55, 0.0  ;;  %v10140_v12 = vsub.f32 %v9922_v32, %v10018_v20 }
 0x245   : > { %v717_v1 = vadd.f32 %v716_v62, %v715_v60  ;;  %v690_v60 = vmul.f32 %v10119_v27, %v10119_v27  ;;  %v734_v8 = vsel %vm413_vm1, %v689_v37, 0.0  ;;  %v10147_v29 = vsub.f32 %v9925_v41, %v10018_v20 }
 0x246   : > { %v10154_v32 = vsub.f32 %v9930_v43, %v10018_v20  ;;  %v10161_v41 = vsub.f32 %v9933_v44, %v10018_v20  ;;  %v10168_v43 = vsub.f32 %v9936_v45, %v10018_v20  ;;  %v10175_v44 = vsub.f32 %v9939_v51, %v10018_v20 }
 0x247   : > { %v719_v11 = vadd.f32 %v718_v9, %v717_v1  ;;  %v691_v1 = vmul.f32 %v10126_v35, %v10126_v35  ;;  %v736_v2 = vsel %vm413_vm1, %v690_v60, 0.0  ;;  %v10182_v45 = vsub.f32 %v9942_v47, %v10018_v20 }
 0x248   : > { %v10189_v51 = vsub.f32 %v9945_v36, %v10018_v20  ;;  %v10196_v47 = vsub.f32 %v9964_v63, %v10018_v20  ;;  %v10203_v36 = vsub.f32 %v9967_v38, %v10018_v20  ;;  %v10210_v63 = vsub.f32 %v9972_v17, %v10018_v20 }
 0x249   : > { %v721_v16 = vadd.f32 %v720_v13, %v719_v11  ;;  %v692_v11 = vmul.f32 %v10133_v48, %v10133_v48  ;;  %v738_v30 = vsel %vm413_vm1, %v691_v1, 0.0  ;;  %v10217_v38 = vsub.f32 %v9977_v28, %v10018_v20 }
 0x24a   : > { %v10224_v17 = vsub.f32 %v9982_v31, %v10018_v20  ;;  %v10231_v28 = vsub.f32 %v9987_v46, %v10018_v20 }
 0x24b   : > { %v723_v4 = vadd.f32 %v722_v33, %v721_v16  ;;  %v693_v16 = vmul.f32 %v10140_v12, %v10140_v12  ;;  %v740_v7 = vsel %vm413_vm1, %v692_v11, 0.0 }
 0x24c   : > { %v705_v31 = vmul.f32 %v10224_v17, %v10224_v17 }
 0x24d   : > { %v725_v50 = vadd.f32 %v724_v42, %v723_v4  ;;  %v694_v4 = vmul.f32 %v10147_v29, %v10147_v29  ;;  %v742_v52 = vsel %vm413_vm1, %v693_v16, 0.0 }
 0x24e   : > { %v766_v46 = vsel %vm413_vm1, %v705_v31, 0.0 }
 0x24f   : > { %v727_v54 = vadd.f32 %v726_v10, %v725_v50  ;;  %v695_v50 = vmul.f32 %v10154_v32, %v10154_v32  ;;  %v744_v55 = vsel %vm413_vm1, %v694_v4, 0.0 }
 0x251   : > { %v729_v57 = vadd.f32 %v728_v56, %v727_v54  ;;  %v696_v54 = vmul.f32 %v10161_v41, %v10161_v41  ;;  %v746_v37 = vsel %vm413_vm1, %v695_v50, 0.0 }
 0x253   : > { %v731_v59 = vadd.f32 %v730_v58, %v729_v57  ;;  %v697_v57 = vmul.f32 %v10168_v43, %v10168_v43  ;;  %v748_v60 = vsel %vm413_vm1, %v696_v54, 0.0 }
 0x255   : > { %v733_v62 = vadd.f32 %v732_v61, %v731_v59  ;;  %v698_v59 = vmul.f32 %v10175_v44, %v10175_v44  ;;  %v750_v1 = vsel %vm413_vm1, %v697_v57, 0.0 }
 0x257   : > { %v735_v9 = vadd.f32 %v734_v8, %v733_v62  ;;  %v699_v62 = vmul.f32 %v10182_v45, %v10182_v45  ;;  %v752_v11 = vsel %vm413_vm1, %v698_v59, 0.0 }
 0x259   : > { %v737_v13 = vadd.f32 %v736_v2, %v735_v9  ;;  %v700_v9 = vmul.f32 %v10189_v51, %v10189_v51  ;;  %v754_v16 = vsel %vm413_vm1, %v699_v62, 0.0 }
 0x25b   : > { %v739_v33 = vadd.f32 %v738_v30, %v737_v13  ;;  %v701_v13 = vmul.f32 %v10196_v47, %v10196_v47  ;;  %v756_v4 = vsel %vm413_vm1, %v700_v9, 0.0 }
 0x25d   : > { %v741_v42 = vadd.f32 %v740_v7, %v739_v33  ;;  %v702_v33 = vmul.f32 %v10203_v36, %v10203_v36  ;;  %v758_v50 = vsel %vm413_vm1, %v701_v13, 0.0 }
 0x25f   : > { %v743_v10 = vadd.f32 %v742_v52, %v741_v42  ;;  %v703_v42 = vmul.f32 %v10210_v63, %v10210_v63  ;;  %v760_v54 = vsel %vm413_vm1, %v702_v33, 0.0 }
 0x261   : > { %v745_v56 = vadd.f32 %v744_v55, %v743_v10  ;;  %v704_v10 = vmul.f32 %v10217_v38, %v10217_v38 }
 0x263   : > { %v747_v58 = vadd.f32 %v746_v37, %v745_v56  ;;  %v762_v56 = vsel %vm413_vm1, %v703_v42, 0.0  ;;  %v706_v37 = vmul.f32 %v10231_v28, %v10231_v28  ;;  %v925_v42 = vld [vmem:[%s12668_s3] sm:$0x1] }
 0x265   : > { %v749_v61 = vadd.f32 %v748_v60, %v747_v58  ;;  %v764_v58 = vsel %vm413_vm1, %v704_v10, 0.0  ;;  %v768_v60 = vsel %vm413_vm1, %v706_v37, 0.0  ;;  %v1245_v10 = vld [vmem:[#allocation2 + $0x18] sm:$0x1] }
 0x266   : > { %v1246_v31 = vsel %vm9807_vm6, 0, %v1245_v10 }
 0x267   : > { %v751_v8 = vadd.f32 %v750_v1, %v749_v61  ;;  %1247 = vst [vmem:[#allocation2 + $0x18] sm:$0x1] %v1246_v31 }
 0x269   : > { %v753_v2 = vadd.f32 %v752_v11, %v751_v8 }
 0x26b   : > { %v755_v30 = vadd.f32 %v754_v16, %v753_v2 }
 0x26d   : > { %v757_v7 = vadd.f32 %v756_v4, %v755_v30 }
 0x26f   : > { %v759_v52 = vadd.f32 %v758_v50, %v757_v7 }
 0x271   : > { %v761_v55 = vadd.f32 %v760_v54, %v759_v52  ;;  %v1299_v52 = vld [vmem:[#allocation2 + $0x14] sm:$0xf]  ;;  %v9514_v54 = vmov 0  }
 0x272   : > { %1229 = vst.msk [vmem:[#allocation2] sm:$0xf] %vm1228_vm4, %v9514_v54  ;;  %1230 = vst.msk [vmem:[#allocation2 + $0x4] sm:$0xf] %vm1228_vm4, %v9514_v54 }
 0x273   : > { %v763_v57 = vadd.f32 %v762_v56, %v761_v55  ;;  %1231 = vst.msk [vmem:[#allocation2 + $0x8] sm:$0xf] %vm1228_vm4, %v9514_v54  ;;  %1233 = vst.msk [vmem:[#allocation2 + $0xcc] sm:$0xf] %vm1228_vm4, %v9514_v54  ;;  %v1300_v55 = vsel %vm9862_vm7, 0, %v1299_v52 }
 0x274   : > { %1234 = vst.msk [vmem:[#allocation2 + $0xd0] sm:$0xf] %vm1228_vm4, %v9514_v54  ;;  %1235 = vst.msk [vmem:[#allocation2 + $0xd4] sm:$0xf] %vm1228_vm4, %v9514_v54 }
 0x275   : > { %v765_v59 = vadd.f32 %v764_v58, %v763_v57  ;;  %1301 = vst [vmem:[#allocation2 + $0x14] sm:$0xf] %v1300_v55 }
 0x277   : > { %v767_v20 = vadd.f32 %v766_v46, %v765_v59 }
 0x279   : > { %v769_v61 = vadd.f32 %v768_v60, %v767_v20  ;;  %v10274_v20 = vld [vmem:[%s12669_s4] ss:$0 sm:$0xff] }
 0x27b   : > { %v770_v62 = vrot.slane %v769_v61, 4 }
 0x27d   : > { %v771_v1 = vadd.f32 %v770_v62, %v769_v61 }
 0x27f   : > { %v772_v8 = vrot.slane %v771_v1, 2 }
 0x281   : > { %v773_v9 = vadd.f32 %v772_v8, %v771_v1 }
 0x283   : > { %v774_v11 = vrot.slane %v773_v9, 1 }
 0x285   : > { %v775_v2 = vadd.f32 %v774_v11, %v773_v9 }
 0x287   : > { %8571 = vmatmul.mubr.msk.f32.vlgmr.msra.gmra.mxu0 %vm413_vm1, %v775_v2 }
 0x347   : > { %v845_v13 = vpop.f32.mrf.mxu0 }
 0x348   : > { %v849_v16 = vmul.f32 0.00390625, %v845_v13 }
 0x349   : > { %v8572_v30 = vpop.f32.mrf.mxu0 }
 0x34a   : > { %v850_v33 = vadd.f32 1e-05, %v849_v16 }
 0x34c   : > { %9176 = vrsqrt.f32 %v850_v33 }
 0x359   : > { %v9177_v4 = vpop.eup %9176 }
 0x35a   : > { %8582 = vmatmul.mubr.msk.f32.vlgmr.msra.gmra.mxu1 %vm413_vm1, %v9177_v4 }
 0x41a   : > { %v921_v7 = vpop.f32.mrf.mxu1 }
 0x41b   : > { %v926_v56 = vmul.f32 %v925_v42, %v921_v7 }
 0x41c   : > { %v8583_v50 = vpop.f32.mrf.mxu1 }
 0x41d   : > { %v10261_v57 = vrot.slane %v926_v56, %v641_v40 }
 0x41f   : > { %v933_v37 = vmul.f32 %v10261_v57, %v10022_v49  ;;  %v934_v58 = vmul.f32 %v10261_v57, %v10026_v24  ;;  %v935_v59 = vmul.f32 %v10261_v57, %v10030_v0  ;;  %v936_v46 = vmul.f32 %v10261_v57, %v10034_v39  ;;  %v9014_v0 = vld [vmem:[#allocation7 + $0x18] sm:$0xff]  }
 0x420   : > { %v937_v5 = vmul.f32 %v10261_v57, %v10042_v3  ;;  %v938_v40 = vmul.f32 %v10261_v57, %v10048_v6  ;;  %v939_v49 = vmul.f32 %v10261_v57, %v10056_v53  ;;  %v940_v24 = vmul.f32 %v10261_v57, %v10063_v15  ;;  %8584 = vmatprep.subr.bf16.mxu0 %v9014_v0 }
 0x421   : > { %v941_v39 = vmul.f32 %v10261_v57, %v10070_v18  ;;  %v942_v60 = vmul.f32 %v10261_v57, %v10077_v19  ;;  %v943_v61 = vmul.f32 %v10261_v57, %v10084_v21  ;;  %v944_v3 = vmul.f32 %v10261_v57, %v10091_v22  ;;  %v9015_v19 = vld [vmem:[#allocation7 + $0x10] sm:$0xff]   ;;  %8908 = vmatprep.subr.bf16.mxu1 %v9014_v0 }
 0x422   : > { %v945_v6 = vmul.f32 %v10261_v57, %v10098_v23  ;;  %v946_v53 = vmul.f32 %v10261_v57, %v10105_v25  ;;  %v947_v15 = vmul.f32 %v10261_v57, %v10112_v26  ;;  %v948_v18 = vmul.f32 %v10261_v57, %v10119_v27  ;;  %8585 = vmatpush3.bf16.msra.mxu0 %v9014_v0 }
 0x423   : > { %v949_v21 = vmul.f32 %v10261_v57, %v10126_v35  ;;  %v10303_v62 = vadd.f32 %v10274_v20, %v933_v37  ;;  %v10306_v22 = vadd.f32 %v10274_v20, %v934_v58  ;;  %v10309_v23 = vadd.f32 %v10274_v20, %v935_v59  ;;  %8910 = vmatpush3.bf16.msra.mxu1 %v9014_v0  ;;  %v1302_v0 = vld [vmem:[#allocation2 + $0x20] sm:$0xf] }
 0x424   : > { %v950_v25 = vmul.f32 %v10261_v57, %v10133_v48  ;;  %v951_v26 = vmul.f32 %v10261_v57, %v10140_v12  ;;  %v952_v27 = vmul.f32 %v10261_v57, %v10147_v29  ;;  %v10318_v35 = vadd.f32 %v10274_v20, %v936_v46  ;;  %8586 = vmatprep.subr.bf16.mxu0 %v9015_v19  ;;  %v1296_v46 = vld [vmem:[#allocation2 + $0x8] sm:$0xf] }
 0x425   : > { %v953_v1 = vmul.f32 %v10261_v57, %v10154_v32  ;;  %v10324_v8 = vmul.f32 %v10261_v57, %v10161_v41  ;;  %v10328_v48 = vmul.f32 %v10261_v57, %v10168_v43  ;;  %v10331_v12 = vadd.f32 %v10274_v20, %v937_v5  ;;  %8909 = vmatprep.subr.bf16.mxu1 %v9015_v19 }
 0x426   : > { %v10335_v29 = vmul.f32 %v10261_v57, %v10175_v44  ;;  %v10339_v9 = vmul.f32 %v10261_v57, %v10182_v45  ;;  %v10343_v32 = vmul.f32 %v10261_v57, %v10189_v51  ;;  %v10346_v41 = vadd.f32 %v10274_v20, %v938_v40  ;;  %8587 = vmatpush3.bf16.msra.mxu0 %v9015_v19 }
 0x427   : > { %v10349_v43 = vadd.f32 %v10274_v20, %v939_v49  ;;  %v7900_v11 = vmul.f32 -1.442695, %v10303_v62  ;;  %v7901_v44 = vmul.f32 -1.442695, %v10306_v22  ;;  %v7902_v2 = vmul.f32 -1.442695, %v10309_v23  ;;  %8911 = vmatpush3.bf16.msra.mxu1 %v9015_v19 }
 0x428   : > { %v10356_v45 = vmul.f32 %v10261_v57, %v10196_v47  ;;  %v10360_v51 = vmul.f32 %v10261_v57, %v10203_v36  ;;  %v10363_v13 = vadd.f32 %v10274_v20, %v940_v24  ;;  %v7903_v16 = vmul.f32 -1.442695, %v10318_v35  ;;  %v1946_v24 = vld [vmem:[#allocation2 + $0x4] sm:$0xf] }
 0x429   : > { %v10368_v30 = vmul.f32 %v10261_v57, %v10210_v63  ;;  %v10371_v33 = vadd.f32 %v10274_v20, %v941_v39  ;;  %9178 = vpow2.f32 %v7900_v11  ;;  %v7904_v47 = vmul.f32 -1.442695, %v10331_v12 }
 0x42a   : > { %v10376_v36 = vmul.f32 %v10261_v57, %v10217_v38  ;;  %v10379_v4 = vadd.f32 %v10274_v20, %v942_v60  ;;  %9180 = vpow2.f32 %v7901_v44  ;;  %v7905_v7 = vmul.f32 -1.442695, %v10346_v41 }
 0x42b   : > { %v10384_v63 = vmul.f32 %v10261_v57, %v10224_v17  ;;  %v10387_v42 = vadd.f32 %v10274_v20, %v943_v61  ;;  %9182 = vpow2.f32 %v7902_v2  ;;  %v7906_v50 = vmul.f32 -1.442695, %v10349_v43 }
 0x42c   : > { %v10392_v38 = vmul.f32 %v10261_v57, %v10231_v28  ;;  %v10395_v52 = vadd.f32 %v10274_v20, %v944_v3  ;;  %9184 = vpow2.f32 %v7903_v16  ;;  %v7907_v10 = vmul.f32 -1.442695, %v10363_v13  ;;  %v1239_v57 = vld [vmem:[#allocation2] sm:$0x1] }
 0x42d   : > { %v10399_v54 = vadd.f32 %v10274_v20, %v945_v6  ;;  %v10402_v17 = vadd.f32 %v10274_v20, %v946_v53  ;;  %9186 = vpow2.f32 %v7904_v47  ;;  %v7908_v55 = vmul.f32 -1.442695, %v10371_v33 }
 0x42e   : > { %v10406_v31 = vadd.f32 %v10274_v20, %v947_v15  ;;  %v10409_v28 = vadd.f32 %v10274_v20, %v948_v18  ;;  %9188 = vpow2.f32 %v7905_v7  ;;  %v7909_v56 = vmul.f32 -1.442695, %v10379_v4 }
 0x42f   : > { %v10413_v37 = vadd.f32 %v10274_v20, %v949_v21  ;;  %v10416_v58 = vadd.f32 %v10274_v20, %v950_v25  ;;  %9190 = vpow2.f32 %v7906_v50  ;;  %v7910_v59 = vmul.f32 -1.442695, %v10387_v42 }
 0x430   : > { %v10420_v5 = vadd.f32 %v10274_v20, %v951_v26  ;;  %v10423_v40 = vadd.f32 %v10274_v20, %v952_v27  ;;  %9192 = vpow2.f32 %v7907_v10  ;;  %v7911_v49 = vmul.f32 -1.442695, %v10395_v52 }
 0x431   : > { %v10427_v39 = vadd.f32 %v10274_v20, %v953_v1  ;;  %9194 = vpow2.f32 %v7908_v55  ;;  %v7912_v60 = vmul.f32 -1.442695, %v10399_v54  ;;  %v1240_v61 = vsel %vm9807_vm6, 0, %v1239_v57 }
 0x432   : > { %9196 = vpow2.f32 %v7909_v56  ;;  %v7913_v3 = vmul.f32 -1.442695, %v10402_v17  ;;  %v7914_v6 = vmul.f32 -1.442695, %v10406_v31  ;;  %1241 = vst [vmem:[#allocation2] sm:$0x1] %v1240_v61  ;;  %v10440_v21 = vadd.f32 %v10274_v20, %v10324_v8 }
 0x433   : > { %v1297_v53 = vsel %vm9862_vm7, 0, %v1296_v46  ;;  %9198 = vpow2.f32 %v7910_v59  ;;  %v2006_v15 = vshll.u32 %v1946_v24, 16  ;;  %v2010_v18 = vshrl.u32 %v1946_v24, 16 }
 0x434   : > { %1298 = vst [vmem:[#allocation2 + $0x8] sm:$0xf] %v1297_v53  ;;  %v1303_v19 = vsel %vm9862_vm7, 0, %v1302_v0  ;;  %v10444_v25 = vadd.f32 %v10274_v20, %v10328_v48  ;;  %9200 = vpow2.f32 %v7911_v49  ;;  %v7915_v26 = vmul.f32 -1.442695, %v10409_v28 }
 0x435   : > { %1304 = vst [vmem:[#allocation2 + $0x20] sm:$0xf] %v1303_v19  ;;  %9202 = vpow2.f32 %v7912_v60  ;;  %v7916_v27 = vmul.f32 -1.442695, %v10413_v37  ;;  %v10448_v1 = vrot.slane %v2006_v15, 5  ;;  %v2012_v11 = vrot.slane %v2010_v18, 4 }
 0x436   : > { %v10450_v44 = vpop.eup %9178  ;;  %v10454_v8 = vadd.f32 %v10274_v20, %v10335_v29  ;;  %v10458_v48 = vadd.f32 %v10274_v20, %v10339_v9  ;;  %9204 = vpow2.f32 %v7913_v3  ;;  %v7917_v2 = vmul.f32 -1.442695, %v10416_v58  ;;  %v9019_v60 = vld [vmem:[#allocation7 + $0x8] sm:$0xff]  }
 0x437   : > { %v10461_v16 = vpop.eup %9180  ;;  %v10465_v47 = vadd.f32 %v10274_v20, %v10343_v32  ;;  %9206 = vpow2.f32 %v7914_v6  ;;  %v7918_v7 = vmul.f32 -1.442695, %v10420_v5  ;;  %v2013_v50 = vor.u32 %v2012_v11, %v10448_v1  ;;  %8620 = vmatprep.subr.bf16.mxu1 %v9019_v60 }
 0x438   : > { %v10469_v29 = vpop.eup %9182  ;;  %9208 = vpow2.f32 %v7915_v26  ;;  %v7919_v9 = vmul.f32 -1.442695, %v10423_v40  ;;  %v7920_v10 = vmul.f32 -1.442695, %v10427_v39  ;;  %v7921_v55 = vmul.f32 -1.442695, %v10440_v21 }
 0x439   : > { %v10474_v56 = vpop.eup %9184  ;;  %v10478_v32 = vadd.f32 %v10274_v20, %v10356_v45  ;;  %9210 = vpow2.f32 %v7916_v27  ;;  %v1945_v57 = vld [vmem:[#allocation2] sm:$0xf]  ;;  %v10484_v46 = vadd.f32 %v10274_v20, %v10360_v51  ;;  %v7922_v45 = vmul.f32 -1.442695, %v10444_v25 }
 0x43a   : > { %v10480_v59 = vpop.eup %9186  ;;  %9212 = vpow2.f32 %v7917_v2  ;;  %v1997_v24 = vshrl.u32 %v1945_v57, 16  ;;  %v2000_v0 = vshll.u32 %v1945_v57, 16  ;;  %v2014_v3 = vrot.slane %v2013_v50, 4 }
 0x43b   : > { %v1947_v49 = vld [vmem:[#allocation2 + $0x8] sm:$0x1]  ;;  %v10486_v61 = vpop.eup %9188  ;;  %9214 = vpow2.f32 %v7918_v7  ;;  %v7923_v15 = vmul.f32 -1.442695, %v10454_v8  ;;  %v12721_v51 = vmov 0  ;;  %v10500_v27 = vadd.f32 %v10274_v20, %v10368_v30 }
 0x43c   : > { %v2016_v6 = vshll.u32 %v1947_v49, 16  ;;  %v10489_v53 = vpop.eup %9190  ;;  %9216 = vpow2.f32 %v7919_v9  ;;  %v12722_v51 = vsel %vm10494_vm10, 4294967295, %v12721_v51  ;;  %v1999_v18 = vrot.slane %v1997_v24, 4 }
 0x43d   : > { %12723 = vst [vmem:[#allocation20_spill] sm:$0xff] %v12722_v51  ;;  %v2002_v19 = vrot.slane %v2000_v0, 5  ;;  %v9193_v26 = vpop.eup %9192  ;;  %12724 = vst [vmem:[#allocation21_spill] sm:$0xff] %v10500_v27  ;;  %9218 = vpow2.f32 %v7920_v10  ;;  %v7924_v11 = vmul.f32 -1.442695, %v10458_v48  ;;  %v10505_v50 = vadd.f32 %v10274_v20, %v10376_v36 }
 0x43e   : > { %v2018_v2 = vrot.slane %v2016_v6, 5  ;;  %v9195_v7 = vpop.eup %9194  ;;  %9220 = vpow2.f32 %v7921_v55  ;;  %v7925_v9 = vmul.f32 -1.442695, %v10465_v47  ;;  %v10510_v24 = vadd.f32 %v10274_v20, %v10384_v63 }
 0x43f   : > { %12725 = vst [vmem:[#allocation22_spill] sm:$0xff] %v10505_v50  ;;  %v2003_v57 = vor.u32 %v2002_v19, %v1999_v18  ;;  %v9197_v49 = vpop.eup %9196  ;;  %9222 = vpow2.f32 %v7922_v45  ;;  %v7926_v30 = vmul.f32 -1.442695, %v10478_v32  ;;  %v10517_v36 = vadd.f32 %v10274_v20, %v10392_v38 }
 0x440   : > { %12726 = vst [vmem:[#allocation23_spill] sm:$0xff] %v10510_v24  ;;  %v2019_v10 = vsel %vm10494_vm10, %v2014_v3, %v2018_v2  ;;  %v9199_v0 = vpop.eup %9198  ;;  %9224 = vpow2.f32 %v7923_v15  ;;  %v7927_v55 = vmul.f32 -1.442695, %v10484_v46  ;;  %v7928_v63 = vmul.f32 -1.442695, %v10500_v27 }
 0x441   : > { %12727 = vst [vmem:[#allocation24_spill] sm:$0xff] %v10517_v36  ;;  %v2004_v60 = vrot.slane %v2003_v57, 4  ;;  %2414 = vst.msk [vmem:[#allocation3 + $0x84] sm:$0xf] %vm1228_vm4, %v2019_v10  ;;  %v9201_v6 = vpop.eup %9200  ;;  %9226 = vpow2.f32 %v7924_v11  ;;  %v7929_v18 = vmul.f32 -1.442695, %v10505_v50 }
 0x442   : > { %v9203_v45 = vpop.eup %9202  ;;  %9228 = vpow2.f32 %v7925_v9  ;;  %v7930_v38 = vmul.f32 -1.442695, %v10510_v24  ;;  %v7931_v19 = vmul.f32 -1.442695, %v10517_v36  ;;  %v1100_v2 = vadd.f32 1.0, %v10450_v44  ;;  %v9023_v9 = vld [vmem:[#allocation7 + $0x28] sm:$0xff]  }
 0x443   : > { %v2009_v3 = vsel %vm10494_vm10, %v2004_v60, %v10448_v1  ;;  %v9205_v20 = vpop.eup %9204  ;;  %9230 = vpow2.f32 %v7926_v30  ;;  %v1101_v10 = vadd.f32 1.0, %v10461_v16  ;;  %v1102_v30 = vadd.f32 1.0, %v10469_v29  ;;  %8656 = vmatprep.subr.bf16.mxu0 %v9023_v9 }
 0x444   : > { %2413 = vst.msk [vmem:[#allocation3 + $0x80] sm:$0xf] %vm1228_vm4, %v2009_v3  ;;  %v9207_v15 = vpop.eup %9206  ;;  %9232 = vpow2.f32 %v7927_v55  ;;  %v1103_v55 = vadd.f32 1.0, %v10474_v56  ;;  %v1104_v51 = vadd.f32 1.0, %v10480_v59  ;;  %v1105_v44 = vadd.f32 1.0, %v10486_v61 }
 0x445   : > { %v9209_v11 = vpop.eup %9208  ;;  %9234 = vpow2.f32 %v7928_v63  ;;  %v1106_v16 = vadd.f32 1.0, %v10489_v53  ;;  %v1107_v29 = vadd.f32 1.0, %v9193_v26  ;;  %v1108_v56 = vadd.f32 1.0, %v9195_v7 }
 0x446   : > { %v9211_v57 = vpop.eup %9210  ;;  %9236 = vpow2.f32 %v7929_v18  ;;  %v1109_v59 = vadd.f32 1.0, %v9197_v49  ;;  %v1110_v14 = vadd.f32 1.0, %v9199_v0  ;;  %v1112_v53 = vadd.f32 1.0, %v9203_v45 }
 0x447   : > { %v9213_v1 = vpop.eup %9212  ;;  %9238 = vpow2.f32 %v7930_v38  ;;  %v1113_v26 = vadd.f32 1.0, %v9205_v20  ;;  %v1115_v24 = vadd.f32 1.0, %v9209_v11  ;;  %v1116_v7 = vadd.f32 1.0, %v9211_v57 }
 0x448   : > { %v9215_v60 = vpop.eup %9214  ;;  %9240 = vpow2.f32 %v7931_v19  ;;  %v1117_v49 = vadd.f32 1.0, %v9213_v1 }
 0x449   : > { %v9217_v3 = vpop.eup %9216  ;;  %9242 = vrcp.f32 %v1100_v2 }
 0x44a   : > { %v9219_v63 = vpop.eup %9218  ;;  %9244 = vrcp.f32 %v1101_v10  ;;  %v1111_v10 = vadd.f32 1.0, %v9201_v6  ;;  %v1119_v50 = vadd.f32 1.0, %v9217_v3 }
 0x44b   : > { %v9016_v18 = vld [vmem:[#allocation3 + $0x80] sm:$0xff]   ;;  %v9221_v34 = vpop.eup %9220  ;;  %9246 = vrcp.f32 %v1102_v30 }
 0x44c   : > { %v9223_v38 = vpop.eup %9222  ;;  %9248 = vrcp.f32 %v1103_v55  ;;  %8588 = vmatprep.mubr.msk.bf16.mxu0 %vm413_vm1, %v9016_v18  ;;  %v1114_v18 = vadd.f32 1.0, %v9207_v15  ;;  %v1121_v6 = vadd.f32 1.0, %v9221_v34 }
 0x44d   : > { %v9225_v19 = vpop.eup %9224  ;;  %9250 = vrcp.f32 %v1104_v51 }
 0x44e   : > { %v9227_v9 = vpop.eup %9226  ;;  %9252 = vrcp.f32 %v1105_v44  ;;  %v1118_v44 = vadd.f32 1.0, %v9215_v60 }
 0x44f   : > { %v9229_v2 = vpop.eup %9228  ;;  %9254 = vrcp.f32 %v1106_v16  ;;  %v1120_v16 = vadd.f32 1.0, %v9219_v63  ;;  %v1124_v27 = vadd.f32 1.0, %v9227_v9 }
 0x450   : > { %v9231_v61 = vpop.eup %9230  ;;  %9256 = vrcp.f32 %v1107_v29  ;;  %v1122_v29 = vadd.f32 1.0, %v9223_v38  ;;  %v1125_v20 = vadd.f32 1.0, %v9229_v2 }
 0x451   : > { %v9233_v36 = vpop.eup %9232  ;;  %9258 = vrcp.f32 %v1108_v56  ;;  %v1123_v56 = vadd.f32 1.0, %v9225_v19  ;;  %v1126_v15 = vadd.f32 1.0, %v9231_v61 }
 0x452   : > { %v9235_v30 = vpop.eup %9234  ;;  %9260 = vrcp.f32 %v1109_v59  ;;  %v10537_v11 = vadd.f32 1.0, %v9233_v36 }
 0x453   : > { %v9237_v55 = vpop.eup %9236  ;;  %9262 = vrcp.f32 %v1110_v14  ;;  %v10540_v1 = vadd.f32 1.0, %v9235_v30 }
 0x454   : > { %v9239_v51 = vpop.eup %9238  ;;  %9264 = vrcp.f32 %v1111_v10  ;;  %v10542_v60 = vadd.f32 1.0, %v9237_v55 }
 0x455   : > { %v9241_v0 = vpop.eup %9240  ;;  %9266 = vrcp.f32 %v1112_v53  ;;  %v10545_v63 = vadd.f32 1.0, %v9239_v51 }
 0x456   : > { %v9243_v45 = vpop.eup %9242  ;;  %9268 = vrcp.f32 %v1113_v26  ;;  %v10548_v9 = vadd.f32 1.0, %v9241_v0 }
 0x457   : > { %v9245_v59 = vpop.eup %9244  ;;  %9270 = vrcp.f32 %v1114_v18  ;;  %v1196_v14 = vmul.f32 %v9243_v45, %v10303_v62 }
 0x458   : > { %v9247_v57 = vpop.eup %9246  ;;  %9272 = vrcp.f32 %v1115_v24  ;;  %v1197_v34 = vmul.f32 %v9245_v59, %v10306_v22 }
 0x459   : > { %v9249_v3 = vpop.eup %9248  ;;  %9274 = vrcp.f32 %v1116_v7  ;;  %v1198_v38 = vmul.f32 %v9247_v57, %v10309_v23  ;;  %v8325_v19 = vpack.c.bf16 %v1196_v14, %v1196_v14 }
 0x45a   : > { %v9251_v36 = vpop.eup %9250  ;;  %9276 = vrcp.f32 %v1117_v49  ;;  %v1199_v62 = vmul.f32 %v9249_v3, %v10318_v35  ;;  %v8326_v2 = vpack.c.bf16 %v1197_v34, %v1197_v34 }
 0x45b   : > { %v9253_v61 = vpop.eup %9252  ;;  %9278 = vrcp.f32 %v1118_v44  ;;  %v1200_v24 = vmul.f32 %v9251_v36, %v10331_v12  ;;  %v10552_v10 = vpack.c.bf16 %v1198_v38, %v1198_v38  ;;  %v1449_v22 = vshrl.u32 %v8325_v19, 16 }
 0x45c   : > { %v9255_v53 = vpop.eup %9254  ;;  %9280 = vrcp.f32 %v1119_v50  ;;  %v1201_v30 = vmul.f32 %v9253_v61, %v10346_v41  ;;  %v10555_v23 = vpack.c.bf16 %v1199_v62, %v1199_v62  ;;  %v1452_v26 = vshll.u32 %v8325_v19, 16 }
 0x45d   : > { %v9257_v55 = vpop.eup %9256  ;;  %9282 = vrcp.f32 %v1120_v16  ;;  %v1202_v18 = vmul.f32 %v9255_v53, %v10349_v43  ;;  %v10558_v35 = vpack.c.bf16 %v1200_v24, %v1200_v24  ;;  %v10560_v7 = vrot.slane %v1449_v22, 7 }
 0x45e   : > { %v9259_v51 = vpop.eup %9258  ;;  %9284 = vrcp.f32 %v1121_v6  ;;  %v1203_v12 = vmul.f32 %v9257_v55, %v10363_v13  ;;  %v10563_v49 = vpack.c.bf16 %v1201_v30, %v1201_v30  ;;  %v1457_v50 = vshrl.u32 %v8326_v2, 16 }
 0x45f   : > { %12728 = vst [vmem:[#allocation25_spill] sm:$0xff] %v10560_v7  ;;  %v9261_v44 = vpop.eup %9260  ;;  %9286 = vrcp.f32 %v1122_v29  ;;  %v1204_v41 = vmul.f32 %v9259_v51, %v10371_v33  ;;  %v10566_v0 = vpack.c.bf16 %v1202_v18, %v1202_v18  ;;  %v10569_v16 = vor.u32 %v1452_v26, %v10560_v7 }
 0x460   : > { %v9263_v43 = vpop.eup %9262  ;;  %9288 = vrcp.f32 %v1123_v56  ;;  %v1205_v45 = vmul.f32 %v9261_v44, %v10379_v4  ;;  %v10572_v59 = vpack.c.bf16 %v1203_v12, %v1203_v12  ;;  %v10578_v33 = vrot.slane %v1457_v50, 7 }
 0x461   : > { %v9265_v6 = vpop.eup %9264  ;;  %9290 = vrcp.f32 %v1124_v27  ;;  %v1206_v14 = vmul.f32 %v9263_v43, %v10387_v42  ;;  %v10576_v29 = vpack.c.bf16 %v1204_v41, %v1204_v41  ;;  %v1460_v56 = vshll.u32 %v8326_v2, 16 }
 0x462   : > { %12729 = vst [vmem:[#allocation26_spill] sm:$0xff] %v10578_v33  ;;  %v9267_v57 = vpop.eup %9266  ;;  %9292 = vrcp.f32 %v1125_v20  ;;  %v1207_v34 = vmul.f32 %v9265_v6, %v10395_v52  ;;  %v10581_v3 = vpack.c.bf16 %v1205_v45, %v1205_v45  ;;  %v1466_v2 = vshrl.u32 %v10552_v10, 16 }
 0x463   : > { %v9269_v4 = vpop.eup %9268  ;;  %9294 = vrcp.f32 %v1126_v15  ;;  %v1208_v38 = vmul.f32 %v9267_v57, %v10399_v54  ;;  %v10584_v19 = vpack.c.bf16 %v1206_v14, %v1206_v14  ;;  %v10592_v52 = vor.u32 %v1460_v56, %v10578_v33  ;;  %v10887_v33 = vld [vmem:[#allocation2 + $0x9c] sm:$0xf] }
 0x464   : > { %v9271_v42 = vpop.eup %9270  ;;  %9296 = vrcp.f32 %v10537_v11  ;;  %v1209_v36 = vmul.f32 %v9269_v4, %v10402_v17  ;;  %v10589_v62 = vpack.c.bf16 %v1207_v34, %v1207_v34  ;;  %v1469_v24 = vshll.u32 %v10552_v10, 16 }
 0x465   : > { %v9273_v20 = vpop.eup %9272  ;;  %9298 = vrcp.f32 %v10540_v1  ;;  %v1210_v15 = vmul.f32 %v9271_v42, %v10406_v31  ;;  %v10596_v54 = vpack.c.bf16 %v1208_v38, %v1208_v38  ;;  %v10608_v31 = vrot.slane %v1466_v2, 7 }
 0x466   : > { %v9275_v61 = vpop.eup %9274  ;;  %9300 = vrcp.f32 %v10542_v60  ;;  %v1211_v11 = vmul.f32 %v9273_v20, %v10409_v28  ;;  %v10601_v17 = vpack.c.bf16 %v1209_v36, %v1209_v36  ;;  %v1474_v28 = vshrl.u32 %v10555_v23, 16 }
 0x467   : > { %v9277_v22 = vpop.eup %9276  ;;  %9302 = vrcp.f32 %v10545_v63  ;;  %v1212_v1 = vmul.f32 %v9275_v61, %v10413_v37  ;;  %v10606_v53 = vpack.c.bf16 %v1210_v15, %v1210_v15  ;;  %12730 = vst [vmem:[#allocation27_spill] sm:$0xff] %v10608_v31  ;;  %v10619_v37 = vor.u32 %v1469_v24, %v10608_v31  ;;  %v1881_v24 = vld [vmem:[#allocation2] sm:$0xf] }
 0x468   : > { %v9279_v30 = vpop.eup %9278  ;;  %9304 = vrcp.f32 %v10548_v9  ;;  %v1213_v60 = vmul.f32 %v9277_v22, %v10416_v58  ;;  %v10612_v26 = vpack.c.bf16 %v1211_v11, %v1211_v11  ;;  %v10625_v58 = vrot.slane %v1474_v28, 7  ;;  %1913 = vst.msk [vmem:[#allocation3] sm:$0xf] %vm1228_vm4, %v1881_v24  ;;  %v1794_v11 = vld [vmem:[#allocation2 + $0x38] sm:$0x1] }
 0x469   : > { %v9281_v55 = vpop.eup %9280  ;;  %v1214_v10 = vmul.f32 %v9279_v30, %v10420_v5  ;;  %v10616_v18 = vpack.c.bf16 %v1212_v1, %v1212_v1  ;;  %12731 = vst [vmem:[#allocation28_spill] sm:$0xff] %v10619_v37  ;;  %v1477_v50 = vshll.u32 %v10555_v23, 16  ;;  %v1483_v43 = vshrl.u32 %v10558_v35, 16 }
 0x46a   : > { %v9283_v51 = vpop.eup %9282  ;;  %v1215_v9 = vmul.f32 %v9281_v55, %v10423_v40  ;;  %v10623_v12 = vpack.c.bf16 %v1213_v60, %v1213_v60  ;;  %12732 = vst [vmem:[#allocation29_spill] sm:$0xff] %v10625_v58  ;;  %v1486_v45 = vshll.u32 %v10558_v35, 16  ;;  %v1491_v38 = vshrl.u32 %v10563_v49, 16  ;;  %v1882_v60 = vld [vmem:[#allocation2 + $0x4] sm:$0xf] }
 0x46b   : > { %v9285_v44 = vpop.eup %9284  ;;  %v1216_v5 = vmul.f32 %v9283_v51, %v10427_v39  ;;  %v10629_v41 = vpack.c.bf16 %v1214_v10, %v1214_v10  ;;  %v10637_v40 = vor.u32 %v1477_v50, %v10625_v58  ;;  %v10643_v4 = vrot.slane %v1483_v43, 7  ;;  %1914 = vst.msk [vmem:[#allocation3 + $0x4] sm:$0xf] %vm1228_vm4, %v1882_v60 }
 0x46c   : > { %v9287_v6 = vpop.eup %9286  ;;  %v1217_v14 = vmul.f32 %v9285_v44, %v10440_v21  ;;  %v10634_v57 = vpack.c.bf16 %v1215_v9, %v1215_v9  ;;  %v1494_v36 = vshll.u32 %v10563_v49, 16  ;;  %v1500_v20 = vshrl.u32 %v10566_v0, 16 }
 0x46d   : > { %12733 = vst [vmem:[#allocation30_spill] sm:$0xff] %v10637_v40  ;;  %v9289_v23 = vpop.eup %9288  ;;  %v1218_v56 = vmul.f32 %v9287_v6, %v10444_v25  ;;  %v10641_v39 = vpack.c.bf16 %v1216_v5, %v1216_v5  ;;  %12734 = vst [vmem:[#allocation31_spill] sm:$0xff] %v10643_v4  ;;  %v10655_v25 = vor.u32 %v1486_v45, %v10643_v4  ;;  %v10661_v30 = vrot.slane %v1491_v38, 7  ;;  %v10857_v5 = vld [vmem:[#allocation2 + $0x60] sm:$0xf] }
 0x46e   : > { %v9291_v35 = vpop.eup %9290  ;;  %v1219_v42 = vmul.f32 %v9289_v23, %v10454_v8  ;;  %v10647_v21 = vpack.c.bf16 %v1217_v14, %v1217_v14  ;;  %v1502_v49 = vrot.slane %v1500_v20, 7  ;;  %v1503_v10 = vshll.u32 %v10566_v0, 16  ;;  %v1822_v4 = vld [vmem:[#allocation2 + $0x68] sm:$0x1]  ;;  %v1850_v40 = vld [vmem:[#allocation2 + $0x98] sm:$0x1] }
 0x46f   : > { %v9293_v15 = vpop.eup %9292  ;;  %v1220_v2 = vmul.f32 %v9291_v35, %v10458_v48  ;;  %v10652_v61 = vpack.c.bf16 %v1218_v56, %v1218_v56  ;;  %v1508_v51 = vshrl.u32 %v10572_v59, 16  ;;  %v10674_v44 = vor.u32 %v1494_v36, %v10661_v30  ;;  %v12737_v56 = vld [vmem:[#allocation22_spill] sm:$0xff] }
 0x470   : > { %v9295_v22 = vpop.eup %9294  ;;  %v1221_v8 = vmul.f32 %v9293_v15, %v10465_v47  ;;  %v10659_v1 = vpack.c.bf16 %v1219_v42, %v1219_v42  ;;  %v10680_v0 = vor.u32 %v1503_v10, %v1502_v49  ;;  %v1506_v14 = vrot.slane %v1502_v49, 4  ;;  %v12740_v15 = vld [vmem:[#allocation23_spill] sm:$0xff]  ;;  %v12741_v49 = vld [vmem:[#allocation24_spill] sm:$0xff] }
 0x471   : > { %v9297_v48 = vpop.eup %9296  ;;  %v1222_v28 = vmul.f32 %v9295_v22, %v10478_v32  ;;  %v10665_v55 = vpack.c.bf16 %v1220_v2, %v1220_v2  ;;  %12735 = vst [vmem:[#allocation32_spill] sm:$0xff] %v10674_v44  ;;  %v12736_v32 = vld [vmem:[#allocation21_spill] sm:$0xff]  ;;  %v1511_v42 = vshll.u32 %v10572_v59, 16  ;;  %v1517_v22 = vshrl.u32 %v10576_v29, 16  ;;  %v1829_v44 = vld [vmem:[#allocation2 + $0x74] sm:$0x1] }
 0x472   : > { %v9299_v47 = vpop.eup %9298  ;;  %v1223_v9 = vmul.f32 %v9297_v48, %v10484_v46  ;;  %v10671_v50 = vpack.c.bf16 %v1221_v8, %v1221_v8  ;;  %v10685_v46 = vrot.slane %v1508_v51, 7  ;;  %v1520_v8 = vshll.u32 %v10576_v29, 16 }
 0x473   : > { %v9301_v43 = vpop.eup %9300  ;;  %v1224_v45 = vmul.f32 %v9299_v47, %v12736_v32  ;;  %v10678_v6 = vpack.c.bf16 %v1222_v28, %v1222_v28  ;;  %v1519_v51 = vrot.slane %v1517_v22, 7  ;;  %v1525_v47 = vshrl.u32 %v10581_v3, 16 }
 0x474   : > { %v9303_v23 = vpop.eup %9302  ;;  %v1225_v38 = vmul.f32 %v9301_v43, %v12737_v56  ;;  %v10683_v35 = vpack.c.bf16 %v1223_v9, %v1223_v9  ;;  %v1513_v59 = vor.u32 %v1511_v42, %v10685_v46  ;;  %v1528_v9 = vshll.u32 %v10581_v3, 16 }
 0x475   : > { %v9305_v36 = vpop.eup %9304  ;;  %v1226_v2 = vmul.f32 %v9303_v23, %v12740_v15  ;;  %v10695_v24 = vpack.c.bf16 %v1224_v45, %v1224_v45  ;;  %v1534_v32 = vshrl.u32 %v10584_v19, 16  ;;  %v1537_v45 = vshll.u32 %v10584_v19, 16 }
 0x476   : > { %v1227_v60 = vmul.f32 %v9305_v36, %v12741_v49  ;;  %v10700_v48 = vpack.c.bf16 %v1225_v38, %v1225_v38  ;;  %v1514_v29 = vsel %vm10690_vm12, %v1506_v14, %v1513_v59  ;;  %v10714_v23 = vor.u32 %v1520_v8, %v1519_v51 }
 0x477   : > { %v10704_v10 = vpack.c.bf16 %v1226_v2, %v1226_v2  ;;  %v1523_v56 = vrot.slane %v1519_v51, 4  ;;  %v10716_v38 = vrot.slane %v1525_v47, 7  ;;  %v1542_v42 = vshrl.u32 %v10589_v62, 16  ;;  %1793 = vst.msk [vmem:[#allocation2 + $0x34] sm:$0xf] %vm1228_vm4, %v1514_v29 }
 0x478   : > { %v10708_v43 = vpack.c.bf16 %v1227_v60, %v1227_v60  ;;  %v1536_v36 = vrot.slane %v1534_v32, 7  ;;  %v1545_v3 = vshll.u32 %v10589_v62, 16  ;;  %v1551_v15 = vshrl.u32 %v10596_v54, 16 }
 0x479   : > { %v1554_v14 = vshll.u32 %v10596_v54, 16  ;;  %v1530_v2 = vor.u32 %v1528_v9, %v10716_v38  ;;  %v10725_v22 = vrot.slane %v1542_v42, 7  ;;  %v1559_v8 = vshrl.u32 %v10601_v17, 16  ;;  %v1811_v54 = vld [vmem:[#allocation2 + $0x54] sm:$0xf] }
 0x47a   : > { %v10728_v49 = vor.u32 %v1537_v45, %v1536_v36  ;;  %v1540_v60 = vrot.slane %v1536_v36, 4  ;;  %v1553_v59 = vrot.slane %v1551_v15, 7  ;;  %v1562_v51 = vshll.u32 %v10601_v17, 16  ;;  %v1797_v36 = vld [vmem:[#allocation2 + $0x3c] sm:$0xf] }
 0x47b   : > { %v1531_v62 = vsel %vm10690_vm12, %v1523_v56, %v1530_v2  ;;  %v1547_v47 = vor.u32 %v1545_v3, %v10725_v22  ;;  %v10735_v9 = vrot.slane %v1559_v8, 7  ;;  %v1568_v42 = vshrl.u32 %v10606_v53, 16 }
 0x47c   : > { %v10737_v29 = vor.u32 %v1554_v14, %v1553_v59  ;;  %v1557_v32 = vrot.slane %v1553_v59, 4  ;;  %v1571_v45 = vshll.u32 %v10606_v53, 16  ;;  %1800 = vst.msk [vmem:[#allocation2 + $0x40] sm:$0xf] %vm1228_vm4, %v1531_v62  ;;  %v1576_v3 = vshrl.u32 %v10612_v26, 16 }
 0x47d   : > { %v1548_v17 = vsel %vm10690_vm12, %v1540_v60, %v1547_v47  ;;  %v1564_v56 = vor.u32 %v1562_v51, %v10735_v9  ;;  %v1570_v15 = vrot.slane %v1568_v42, 7  ;;  %v1579_v14 = vshll.u32 %v10612_v26, 16 }
 0x47e   : > { %v1585_v2 = vshrl.u32 %v10616_v18, 16  ;;  %v1588_v8 = vshll.u32 %v10616_v18, 16  ;;  %1807 = vst.msk [vmem:[#allocation2 + $0x4c] sm:$0xf] %vm1228_vm4, %v1548_v17  ;;  %v10753_v59 = vrot.slane %v1576_v3, 7  ;;  %v1593_v60 = vshrl.u32 %v10623_v12, 16 }
 0x47f   : > { %v1565_v53 = vsel %vm10690_vm12, %v1557_v32, %v1564_v56  ;;  %v1596_v51 = vshll.u32 %v10623_v12, 16  ;;  %v10757_v62 = vor.u32 %v1571_v45, %v1570_v15  ;;  %v1574_v47 = vrot.slane %v1570_v15, 4  ;;  %v1890_v18 = vld [vmem:[#allocation2 + $0x34] sm:$0xf] }
 0x480   : > { %v1587_v42 = vrot.slane %v1585_v2, 7  ;;  %v1602_v26 = vshrl.u32 %v10629_v41, 16  ;;  %1814 = vst.msk [vmem:[#allocation2 + $0x58] sm:$0xf] %vm1228_vm4, %v1565_v53  ;;  %v1581_v17 = vor.u32 %v1579_v14, %v10753_v59  ;;  %v10763_v32 = vrot.slane %v1593_v60, 7 }
 0x481   : > { %v1605_v56 = vshll.u32 %v10629_v41, 16  ;;  %1922 = vst.msk [vmem:[#allocation3 + $0x24] sm:$0xf] %vm1228_vm4, %v1890_v18  ;;  %v1610_v15 = vshrl.u32 %v10634_v57, 16  ;;  %v1613_v60 = vshll.u32 %v10634_v57, 16  ;;  %v1630_v18 = vshll.u32 %v10647_v21, 16 }
 0x482   : > { %v10767_v12 = vor.u32 %v1588_v8, %v1587_v42  ;;  %v1591_v45 = vrot.slane %v1587_v42, 4  ;;  %v1604_v3 = vrot.slane %v1602_v26, 7  ;;  %v1582_v2 = vsel %vm10690_vm12, %v1574_v47, %v1581_v17 }
 0x483   : > { %v1598_v53 = vor.u32 %v1596_v51, %v10763_v32  ;;  %v10777_v63 = vrot.slane %v1610_v15, 7  ;;  %v1619_v8 = vshrl.u32 %v10641_v39, 16  ;;  %1821 = vst.msk [vmem:[#allocation2 + $0x64] sm:$0xf] %vm1228_vm4, %v1582_v2  ;;  %v1892_v42 = vld [vmem:[#allocation2 + $0x40] sm:$0xf] }
 0x484   : > { %v10775_v34 = vor.u32 %v1605_v56, %v1604_v3  ;;  %v1608_v41 = vrot.slane %v1604_v3, 4  ;;  %v1622_v47 = vshll.u32 %v10641_v39, 16  ;;  %v1627_v51 = vshrl.u32 %v10647_v21, 16  ;;  %1924 = vst.msk [vmem:[#allocation3 + $0x2c] sm:$0xf] %vm1228_vm4, %v1892_v42 }
 0x485   : > { %v1599_v26 = vsel %vm10690_vm12, %v1591_v45, %v1598_v53  ;;  %v1615_v57 = vor.u32 %v1613_v60, %v10777_v63  ;;  %v1621_v56 = vrot.slane %v1619_v8, 7  ;;  %v1636_v3 = vshrl.u32 %v10652_v61, 16  ;;  %v1894_v8 = vld [vmem:[#allocation2 + $0x4c] sm:$0xf] }
 0x486   : > { %1828 = vst.msk [vmem:[#allocation2 + $0x70] sm:$0xf] %vm1228_vm4, %v1599_v26  ;;  %v10791_v15 = vrot.slane %v1627_v51, 7  ;;  %v1639_v45 = vshll.u32 %v10652_v61, 16  ;;  %v1644_v39 = vshrl.u32 %v10659_v1, 16  ;;  %v1647_v2 = vshll.u32 %v10659_v1, 16 }
 0x487   : > { %v1616_v21 = vsel %vm10690_vm12, %v1608_v41, %v1615_v57  ;;  %v10798_v53 = vor.u32 %v1622_v47, %v1621_v56  ;;  %v1625_v60 = vrot.slane %v1621_v56, 4  ;;  %v1638_v42 = vrot.slane %v1636_v3, 7  ;;  %1926 = vst.msk [vmem:[#allocation3 + $0x34] sm:$0xf] %vm1228_vm4, %v1894_v8  ;;  %v1896_v56 = vld [vmem:[#allocation2 + $0x58] sm:$0xf] }
 0x488   : > { %v1632_v27 = vor.u32 %v1630_v18, %v10791_v15  ;;  %v10802_v51 = vrot.slane %v1644_v39, 7  ;;  %v1653_v61 = vshrl.u32 %v10665_v55, 16  ;;  %1835 = vst.msk [vmem:[#allocation2 + $0x7c] sm:$0xf] %vm1228_vm4, %v1616_v21  ;;  %v1656_v47 = vshll.u32 %v10665_v55, 16 }
 0x489   : > { %v10807_v1 = vor.u32 %v1639_v45, %v1638_v42  ;;  %v1642_v41 = vrot.slane %v1638_v42, 4  ;;  %v1661_v57 = vshrl.u32 %v10671_v50, 16  ;;  %1928 = vst.msk [vmem:[#allocation3 + $0x3c] sm:$0xf] %vm1228_vm4, %v1896_v56  ;;  %v1664_v45 = vshll.u32 %v10671_v50, 16 }
 0x48a   : > { %v1633_v18 = vsel %vm10690_vm12, %v1625_v60, %v1632_v27  ;;  %v1649_v3 = vor.u32 %v1647_v2, %v10802_v51  ;;  %v1655_v13 = vrot.slane %v1653_v61, 7  ;;  %v1670_v42 = vshrl.u32 %v10678_v6, 16  ;;  %v1898_v61 = vld [vmem:[#allocation2 + $0x64] sm:$0xf]  ;;  %v1790_v26 = vld [vmem:[#allocation2 + $0x30] sm:$0xf] }
 0x48b   : > { %v10816_v21 = vrot.slane %v1661_v57, 7  ;;  %v1673_v55 = vshll.u32 %v10678_v6, 16  ;;  %1842 = vst.msk [vmem:[#allocation2 + $0x88] sm:$0xf] %vm1228_vm4, %v1633_v18  ;;  %v1678_v8 = vshrl.u32 %v10683_v35, 16  ;;  %v1681_v39 = vshll.u32 %v10683_v35, 16 }
 0x48c   : > { %v1650_v27 = vsel %vm10690_vm12, %v1642_v41, %v1649_v3  ;;  %v10824_v60 = vor.u32 %v1656_v47, %v1655_v13  ;;  %v1659_v2 = vrot.slane %v1655_v13, 4  ;;  %v1672_v50 = vrot.slane %v1670_v42, 7  ;;  %1930 = vst.msk [vmem:[#allocation3 + $0x44] sm:$0xf] %vm1228_vm4, %v1898_v61  ;;  %v1769_v6 = vld [vmem:[#allocation2 + $0xc] sm:$0xf] }
 0x48d   : > { %v1666_v57 = vor.u32 %v1664_v45, %v10816_v21  ;;  %1849 = vst.msk [vmem:[#allocation2 + $0x94] sm:$0xf] %vm1228_vm4, %v1650_v27  ;;  %v10832_v18 = vrot.slane %v1678_v8, 7  ;;  %v1687_v41 = vshrl.u32 %v10695_v24, 16  ;;  %v1690_v13 = vshll.u32 %v10695_v24, 16 }
 0x48e   : > { %v1695_v47 = vshrl.u32 %v10700_v48, 16  ;;  %v1900_v3 = vld [vmem:[#allocation2 + $0x70] sm:$0xf]  ;;  %v1783_v45 = vld [vmem:[#allocation2 + $0x24] sm:$0xf]  ;;  %v10839_v35 = vor.u32 %v1673_v55, %v1672_v50  ;;  %v1676_v27 = vrot.slane %v1672_v50, 4 }
 0x48f   : > { %v1667_v42 = vsel %vm10690_vm12, %v1659_v2, %v1666_v57  ;;  %v1698_v61 = vshll.u32 %v10700_v48, 16  ;;  %1932 = vst.msk [vmem:[#allocation3 + $0x4c] sm:$0xf] %vm1228_vm4, %v1900_v3  ;;  %v1787_v8 = vld [vmem:[#allocation2 + $0x2c] sm:$0x1]  ;;  %v1683_v56 = vor.u32 %v1681_v39, %v10832_v18  ;;  %v1689_v17 = vrot.slane %v1687_v41, 7 }
 0x490   : > { %v10845_v14 = vrot.slane %v1695_v47, 7  ;;  %1856 = vst.msk [vmem:[#allocation2 + $0xa0] sm:$0xf] %vm1228_vm4, %v1667_v42  ;;  %v1801_v2 = vld [vmem:[#allocation2 + $0x44] sm:$0x1]  ;;  %v1704_v57 = vshrl.u32 %v10704_v10, 16 }
 0x491   : > { %v1804_v55 = vld [vmem:[#allocation2 + $0x48] sm:$0xf]  ;;  %v1707_v48 = vshll.u32 %v10704_v10, 16  ;;  %v1712_v50 = vshrl.u32 %v10708_v43, 16  ;;  %v1715_v3 = vshll.u32 %v10708_v43, 16  ;;  %v1684_v41 = vsel %vm10690_vm12, %v1676_v27, %v1683_v56 }
 0x492   : > { %v1808_v39 = vld [vmem:[#allocation2 + $0x50] sm:$0x1]  ;;  %v1815_v24 = vld [vmem:[#allocation2 + $0x5c] sm:$0x1]  ;;  %v10854_v47 = vor.u32 %v1690_v13, %v1689_v17  ;;  %v1693_v42 = vrot.slane %v1689_v17, 4  ;;  %v1700_v19 = vor.u32 %v1698_v61, %v10845_v14  ;;  %v1706_v58 = vrot.slane %v1704_v57, 7 }
 0x493   : > { %v1902_v28 = vld [vmem:[#allocation2 + $0x7c] sm:$0xf]  ;;  %v10859_v10 = vld [vmem:[#allocation2 + $0x6c] sm:$0xf]  ;;  %v10862_v37 = vrot.slane %v1712_v50, 7  ;;  %v1770_v56 = vsel %vm9862_vm7, %v10569_v16, %v1769_v6  ;;  %v1784_v57 = vsel %vm9862_vm7, %v10655_v25, %v1783_v45  ;;  %v12743_v50 = vrot.slane %v10661_v30, 4 }
 0x494   : > { %1863 = vst.msk [vmem:[#allocation2 + $0xac] sm:$0xf] %vm1228_vm4, %v1684_v41  ;;  %1934 = vst.msk [vmem:[#allocation3 + $0x54] sm:$0xf] %vm1228_vm4, %v1902_v28  ;;  %v10869_v17 = vld [vmem:[#allocation2 + $0x78] sm:$0xf]  ;;  %v1701_v43 = vsel %vm10690_vm12, %v1693_v42, %v1700_v19  ;;  %v1791_v28 = vsel %vm9862_vm7, %v10680_v0, %v1790_v26  ;;  %v10889_v42 = vor.u32 %v1707_v48, %v1706_v58 }
 0x495   : > { %v1836_v13 = vld [vmem:[#allocation2 + $0x80] sm:$0x1]  ;;  %v10871_v27 = vld [vmem:[#allocation2 + $0x84] sm:$0xf]  ;;  %v1843_v61 = vld [vmem:[#allocation2 + $0x8c] sm:$0x1]  ;;  %v1788_v6 = vsel %vm9807_vm6, %v12743_v50, %v1787_v8  ;;  %v1717_v25 = vor.u32 %v1715_v3, %v10862_v37 }
 0x496   : > { %1771 = vst [vmem:[#allocation2 + $0xc] sm:$0xf] %v1770_v56  ;;  %v10885_v41 = vld [vmem:[#allocation2 + $0x90] sm:$0xf]  ;;  %v1857_v19 = vld [vmem:[#allocation2 + $0xa4] sm:$0x1] }
 0x497   : > { %v1710_v7 = vrot.slane %v1706_v58, 4  ;;  %v1719_v30 = vrot.slane %v10862_v37, 4  ;;  %1870 = vst.msk [vmem:[#allocation2 + $0xb8] sm:$0xf] %vm1228_vm4, %v1701_v43  ;;  %1785 = vst [vmem:[#allocation2 + $0x24] sm:$0xf] %v1784_v57  ;;  %v1798_v58 = vsel %vm9862_vm7, %v10714_v23, %v1797_v36  ;;  %v1805_v43 = vsel %vm9862_vm7, %v10728_v49, %v1804_v55 }
 0x498   : > { %1789 = vst [vmem:[#allocation2 + $0x2c] sm:$0x1] %v1788_v6  ;;  %1792 = vst [vmem:[#allocation2 + $0x30] sm:$0xf] %v1791_v28  ;;  %v1904_v0 = vld [vmem:[#allocation2 + $0x88] sm:$0xf]  ;;  %v1812_v36 = vsel %vm9862_vm7, %v10737_v29, %v1811_v54  ;;  %v1819_v54 = vsel %vm9862_vm7, %v10757_v62, %v10857_v5 }
 0x499   : > { %v10894_v26 = vld [vmem:[#allocation2 + $0xa8] sm:$0xf]  ;;  %v12745_v45 = vrot.slane %v10685_v46, 4  ;;  %v12746_v48 = vrot.slane %v10716_v38, 4  ;;  %1936 = vst.msk [vmem:[#allocation3 + $0x5c] sm:$0xf] %vm1228_vm4, %v1904_v0 }
 0x49a   : > { %v1906_v56 = vld [vmem:[#allocation2 + $0x94] sm:$0xf]  ;;  %v1864_v46 = vld [vmem:[#allocation2 + $0xb0] sm:$0x1]  ;;  %1806 = vst [vmem:[#allocation2 + $0x48] sm:$0xf] %v1805_v43 }
 0x49b   : > { %v1795_v8 = vsel %vm9807_vm6, %v12745_v45, %v1794_v11  ;;  %v1802_v3 = vsel %vm9807_vm6, %v12746_v48, %v1801_v2  ;;  %v1867_v57 = vld [vmem:[#allocation2 + $0xb4] sm:$0xf]  ;;  %v1718_v11 = vsel %vm10690_vm12, %v1710_v7, %v1717_v25  ;;  %v12747_v23 = vrot.slane %v10725_v22, 4  ;;  %1799 = vst [vmem:[#allocation2 + $0x3c] sm:$0xf] %v1798_v58  ;;  %v12761_v48 = vld [vmem:[#allocation30_spill] sm:$0xff] }
 0x49c   : > { %v12748_v49 = vrot.slane %v10735_v9, 4  ;;  %1796 = vst [vmem:[#allocation2 + $0x38] sm:$0x1] %v1795_v8  ;;  %1803 = vst [vmem:[#allocation2 + $0x44] sm:$0x1] %v1802_v3  ;;  %v12749_v9 = vrot.slane %v10753_v59, 4 }
 0x49d   : > { %v1809_v38 = vsel %vm9807_vm6, %v12747_v23, %v1808_v39  ;;  %1938 = vst.msk [vmem:[#allocation3 + $0x64] sm:$0xf] %vm1228_vm4, %v1906_v56  ;;  %v1908_v7 = vld [vmem:[#allocation2 + $0xa0] sm:$0xf]  ;;  %v1871_v55 = vld [vmem:[#allocation2 + $0xbc] sm:$0x1] }
 0x49e   : > { %v1816_v2 = vsel %vm9807_vm6, %v12748_v49, %v1815_v24  ;;  %v1874_v22 = vld [vmem:[#allocation2 + $0xc0] sm:$0xf]  ;;  %1810 = vst [vmem:[#allocation2 + $0x50] sm:$0x1] %v1809_v38  ;;  %1813 = vst [vmem:[#allocation2 + $0x54] sm:$0xf] %v1812_v36  ;;  %v1823_v29 = vsel %vm9807_vm6, %v12749_v9, %v1822_v4  ;;  %v1826_v24 = vsel %vm9862_vm7, %v10767_v12, %v10859_v10 }
 0x49f   : > { %1817 = vst [vmem:[#allocation2 + $0x5c] sm:$0x1] %v1816_v2  ;;  %v12750_v39 = vrot.slane %v10763_v32, 4  ;;  %1877 = vst.msk [vmem:[#allocation2 + $0xc4] sm:$0xf] %vm1228_vm4, %v1718_v11  ;;  %v1833_v4 = vsel %vm9862_vm7, %v10775_v34, %v10869_v17  ;;  %v12751_v59 = vrot.slane %v10777_v63, 4  ;;  %v1840_v32 = vsel %vm9862_vm7, %v10798_v53, %v10871_v27 }
 0x4a0   : > { %1940 = vst.msk [vmem:[#allocation3 + $0x6c] sm:$0xf] %vm1228_vm4, %v1908_v7  ;;  %v2728_v5 = vld [vmem:[#allocation2 + $0x34] sm:$0xf]  ;;  %v1878_v62 = vld [vmem:[#allocation2 + $0xc8] sm:$0x1]  ;;  %v1847_v63 = vsel %vm9862_vm7, %v10807_v1, %v10885_v41  ;;  %v1854_v53 = vsel %vm9862_vm7, %v10824_v60, %v10887_v33  ;;  %v1868_v1 = vsel %vm9862_vm7, %v10854_v47, %v1867_v57 }
 0x4a1   : > { %v1830_v50 = vsel %vm9807_vm6, %v12750_v39, %v1829_v44  ;;  %1820 = vst [vmem:[#allocation2 + $0x60] sm:$0xf] %v1819_v54  ;;  %1824 = vst [vmem:[#allocation2 + $0x68] sm:$0x1] %v1823_v29  ;;  %v1837_v44 = vsel %vm9807_vm6, %v12751_v59, %v1836_v13  ;;  %v12752_v12 = vrot.slane %v10791_v15, 4  ;;  %v12753_v34 = vrot.slane %v10802_v51, 4 }
 0x4a2   : > { %1827 = vst [vmem:[#allocation2 + $0x6c] sm:$0xf] %v1826_v24  ;;  %1831 = vst [vmem:[#allocation2 + $0x74] sm:$0x1] %v1830_v50  ;;  %v1773_v6 = vld [vmem:[#allocation2 + $0x14] sm:$0x1] }
 0x4a3   : > { %v1844_v10 = vsel %vm9807_vm6, %v12752_v12, %v1843_v61  ;;  %v1776_v28 = vld [vmem:[#allocation2 + $0x18] sm:$0xf]  ;;  %2761 = vst.msk [vmem:[#allocation3 + $0x19c] sm:$0xf] %vm1228_vm4, %v2728_v5  ;;  %1834 = vst [vmem:[#allocation2 + $0x78] sm:$0xf] %v1833_v4  ;;  %v1851_v15 = vsel %vm9807_vm6, %v12753_v34, %v1850_v40  ;;  %v1861_v40 = vsel %vm9862_vm7, %v10839_v35, %v10894_v26 }
 0x4a4   : > { %1838 = vst [vmem:[#allocation2 + $0x80] sm:$0x1] %v1837_v44  ;;  %1841 = vst [vmem:[#allocation2 + $0x84] sm:$0xf] %v1840_v32  ;;  %v12754_v17 = vrot.slane %v10816_v21, 4  ;;  %v12755_v51 = vrot.slane %v10832_v18, 4  ;;  %v1875_v18 = vsel %vm9862_vm7, %v10889_v42, %v1874_v22 }
 0x4a5   : > { %1845 = vst [vmem:[#allocation2 + $0x8c] sm:$0x1] %v1844_v10  ;;  %v1970_v27 = vld [vmem:[#allocation2 + $0x64] sm:$0xf]  ;;  %v1780_v61 = vld [vmem:[#allocation2 + $0x20] sm:$0x1] }
 0x4a6   : > { %v1858_v13 = vsel %vm9807_vm6, %v12754_v17, %v1857_v19  ;;  %1848 = vst [vmem:[#allocation2 + $0x90] sm:$0xf] %v1847_v63  ;;  %1852 = vst [vmem:[#allocation2 + $0x98] sm:$0x1] %v1851_v15  ;;  %v1865_v33 = vsel %vm9807_vm6, %v12755_v51, %v1864_v46  ;;  %v12756_v21 = vrot.slane %v10845_v14, 4  ;;  %v1879_v14 = vsel %vm9807_vm6, %v1719_v30, %v1878_v62  ;;  %v12757_v35 = vld [vmem:[#allocation25_spill] sm:$0xff] }
 0x4a7   : > { %1855 = vst [vmem:[#allocation2 + $0x9c] sm:$0xf] %v1854_v53  ;;  %1859 = vst [vmem:[#allocation2 + $0xa4] sm:$0x1] %v1858_v13  ;;  %v1948_v41 = vld [vmem:[#allocation2 + $0xc] sm:$0xf] }
 0x4a8   : > { %v1872_v60 = vsel %vm9807_vm6, %v12756_v21, %v1871_v55  ;;  %v10991_v19 = vld [vmem:[#allocation2 + $0x70] sm:$0xf]  ;;  %v1883_v25 = vld [vmem:[#allocation2 + $0xc] sm:$0xf]  ;;  %1862 = vst [vmem:[#allocation2 + $0xa8] sm:$0xf] %v1861_v40 }
 0x4a9   : > { %1866 = vst [vmem:[#allocation2 + $0xb0] sm:$0x1] %v1865_v33  ;;  %1869 = vst [vmem:[#allocation2 + $0xb4] sm:$0xf] %v1868_v1  ;;  %v12758_v47 = vrot.slane %v12757_v35, 4  ;;  %v12759_v26 = vld [vmem:[#allocation26_spill] sm:$0xff] }
 0x4aa   : > { %1873 = vst [vmem:[#allocation2 + $0xbc] sm:$0x1] %v1872_v60  ;;  %v12760_v45 = vrot.slane %v12759_v26, 4  ;;  %1915 = vst.msk [vmem:[#allocation3 + $0x8] sm:$0xf] %vm1228_vm4, %v1883_v25  ;;  %v2021_v37 = vshrl.u32 %v1948_v41, 16 }
 0x4ab   : > { %v1463_v0 = vsel %vm10690_vm12, %v12758_v47, %v10592_v52  ;;  %1876 = vst [vmem:[#allocation2 + $0xc0] sm:$0xf] %v1875_v18  ;;  %1880 = vst [vmem:[#allocation2 + $0xc8] sm:$0x1] %v1879_v14  ;;  %v2024_v42 = vshll.u32 %v1948_v41, 16  ;;  %v2198_v30 = vshll.u32 %v1970_v27, 16 }
 0x4ac   : > { %v1774_v8 = vsel %vm9807_vm6, %v12760_v45, %v1773_v6  ;;  %1772 = vst.msk [vmem:[#allocation2 + $0x10] sm:$0xf] %vm1228_vm4, %v1463_v0  ;;  %v2202_v58 = vshrl.u32 %v1970_v27, 16  ;;  %v12762_v3 = vld [vmem:[#allocation27_spill] sm:$0xff]  ;;  %v12764_v56 = vld [vmem:[#allocation28_spill] sm:$0xff]  ;;  %v12765_v57 = vld [vmem:[#allocation29_spill] sm:$0xff] }
 0x4ad   : > { %1775 = vst [vmem:[#allocation2 + $0x14] sm:$0x1] %v1774_v8  ;;  %v12763_v43 = vrot.slane %v12762_v3, 4  ;;  %v1777_v46 = vsel %vm9862_vm7, %v12764_v56, %v1776_v28  ;;  %v12766_v11 = vrot.slane %v12765_v57, 4  ;;  %v2222_v38 = vshll.u32 %v10991_v19, 16  ;;  %v12767_v9 = vld [vmem:[#allocation32_spill] sm:$0xff] }
 0x4ae   : > { %v2023_v36 = vrot.slane %v2021_v37, 4  ;;  %v2026_v49 = vrot.slane %v2024_v42, 5  ;;  %v2200_v2 = vrot.slane %v2198_v30, 5  ;;  %v2204_v7 = vrot.slane %v2202_v58, 4  ;;  %1778 = vst [vmem:[#allocation2 + $0x18] sm:$0xf] %v1777_v46 }
 0x4af   : > { %v1480_v52 = vsel %vm10690_vm12, %v12763_v43, %v12761_v48  ;;  %v1781_v23 = vsel %vm9807_vm6, %v12766_v11, %v1780_v61  ;;  %v1969_v55 = vld [vmem:[#allocation2 + $0x60] sm:$0xf]  ;;  %v1971_v22 = vld [vmem:[#allocation2 + $0x68] sm:$0x1]  ;;  %v1972_v54 = vld [vmem:[#allocation2 + $0x6c] sm:$0xf] }
 0x4b0   : > { %1779 = vst.msk [vmem:[#allocation2 + $0x1c] sm:$0xf] %vm1228_vm4, %v1480_v52  ;;  %1782 = vst [vmem:[#allocation2 + $0x20] sm:$0x1] %v1781_v23  ;;  %v12768_v29 = vld [vmem:[#allocation31_spill] sm:$0xff]  ;;  %v2027_v50 = vor.u32 %v2026_v49, %v2023_v36  ;;  %v2189_v5 = vshrl.u32 %v1969_v55, 16  ;;  %v2205_v4 = vor.u32 %v2204_v7, %v2200_v2 }
 0x4b1   : > { %v12769_v24 = vrot.slane %v12768_v29, 4  ;;  %v2192_v62 = vshll.u32 %v1969_v55, 16  ;;  %v2208_v59 = vshll.u32 %v1971_v22, 16  ;;  %v2213_v44 = vshrl.u32 %v1972_v54, 16  ;;  %v1974_v42 = vld [vmem:[#allocation2 + $0x74] sm:$0x1] }
 0x4b2   : > { %v2216_v32 = vshll.u32 %v1972_v54, 16  ;;  %v11031_v12 = vrot.slane %v2222_v38, 5  ;;  %v2028_v10 = vrot.slane %v2027_v50, 4  ;;  %v2191_v6 = vrot.slane %v2189_v5, 4  ;;  %v1975_v30 = vld [vmem:[#allocation2 + $0x78] sm:$0xf] }
 0x4b3   : > { %v1497_v39 = vsel %vm10690_vm12, %v12769_v24, %v12767_v9  ;;  %v2194_v28 = vrot.slane %v2192_v62, 5  ;;  %v2206_v63 = vrot.slane %v2205_v4, 4  ;;  %v1949_v34 = vld [vmem:[#allocation2 + $0x10] sm:$0xf]  ;;  %v2210_v53 = vrot.slane %v2208_v59, 5 }
 0x4b4   : > { %1786 = vst.msk [vmem:[#allocation2 + $0x28] sm:$0xf] %vm1228_vm4, %v1497_v39  ;;  %v1950_v15 = vld [vmem:[#allocation2 + $0x14] sm:$0x1]  ;;  %v2215_v20 = vrot.slane %v2213_v44, 4  ;;  %v2030_v17 = vshll.u32 %v1949_v34, 16 }
 0x4b5   : > { %v2034_v13 = vshrl.u32 %v1949_v34, 16  ;;  %v2040_v27 = vshll.u32 %v1950_v15, 16  ;;  %v2195_v61 = vor.u32 %v2194_v28, %v2191_v6  ;;  %v2211_v51 = vsel %vm10494_vm10, %v2206_v63, %v2210_v53  ;;  %v1951_v33 = vld [vmem:[#allocation2 + $0x18] sm:$0xf]  ;;  %v1976_v36 = vld [vmem:[#allocation2 + $0x7c] sm:$0xf] }
 0x4b6   : > { %v2032_v60 = vrot.slane %v2030_v17, 5  ;;  %2430 = vst.msk [vmem:[#allocation3 + $0xc4] sm:$0xf] %vm1228_vm4, %v2211_v51  ;;  %v2045_v14 = vshrl.u32 %v1951_v33, 16  ;;  %v2048_v35 = vshll.u32 %v1951_v33, 16  ;;  %v2218_v46 = vrot.slane %v2216_v32, 5 }
 0x4b7   : > { %v1952_v1 = vld [vmem:[#allocation2 + $0x1c] sm:$0xf]  ;;  %v1953_v21 = vld [vmem:[#allocation2 + $0x20] sm:$0x1]  ;;  %v2036_v41 = vrot.slane %v2034_v13, 4  ;;  %v2042_v25 = vrot.slane %v2040_v27, 5 }
 0x4b8   : > { %v2196_v18 = vrot.slane %v2195_v61, 4  ;;  %v2054_v47 = vshll.u32 %v1952_v1, 16  ;;  %v2058_v0 = vshrl.u32 %v1952_v1, 16  ;;  %v2033_v26 = vsel %vm10494_vm10, %v2028_v10, %v2032_v60  ;;  %v1977_v22 = vld [vmem:[#allocation2 + $0x80] sm:$0x1] }
 0x4b9   : > { %v2037_v45 = vor.u32 %v2036_v41, %v2032_v60  ;;  %v2064_v37 = vshll.u32 %v1953_v21, 16  ;;  %2415 = vst.msk [vmem:[#allocation3 + $0x88] sm:$0xf] %vm1228_vm4, %v2033_v26  ;;  %v2047_v58 = vrot.slane %v2045_v14, 4  ;;  %v2050_v48 = vrot.slane %v2048_v35, 5  ;;  %v9033_v35 = vld [vmem:[#allocation7 + $0x20] sm:$0xff]  }
 0x4ba   : > { %v2201_v8 = vsel %vm10494_vm10, %v2196_v18, %v2200_v2  ;;  %v2056_v3 = vrot.slane %v2054_v47, 5  ;;  %v2060_v43 = vrot.slane %v2058_v0, 4  ;;  %v2226_v57 = vshrl.u32 %v10991_v19, 16  ;;  %v1954_v4 = vld [vmem:[#allocation2 + $0x24] sm:$0xf] }
 0x4bb   : > { %2429 = vst.msk [vmem:[#allocation3 + $0xc0] sm:$0xf] %vm1228_vm4, %v2201_v8  ;;  %v2038_v52 = vrot.slane %v2037_v45, 4  ;;  %v2066_v56 = vrot.slane %v2064_v37, 5  ;;  %v2051_v11 = vor.u32 %v2050_v48, %v2047_v58  ;;  %v2232_v38 = vshll.u32 %v1974_v42, 16 }
 0x4bc   : > { %v2061_v23 = vor.u32 %v2060_v43, %v2056_v3  ;;  %v2237_v49 = vshrl.u32 %v1975_v30, 16  ;;  %v2219_v7 = vor.u32 %v2218_v46, %v2215_v20  ;;  %v2228_v55 = vrot.slane %v2226_v57, 4  ;;  %v1955_v6 = vld [vmem:[#allocation2 + $0x28] sm:$0xf]  ;;  %v1956_v28 = vld [vmem:[#allocation2 + $0x2c] sm:$0x1] }
 0x4bd   : > { %v2043_v2 = vsel %vm10494_vm10, %v2038_v52, %v2042_v25  ;;  %v2240_v54 = vshll.u32 %v1975_v30, 16  ;;  %v2052_v9 = vrot.slane %v2051_v11, 4  ;;  %v2234_v24 = vrot.slane %v2232_v38, 5  ;;  %v1957_v61 = vld [vmem:[#allocation2 + $0x30] sm:$0xf]  ;;  %v11066_v11 = vld [vmem:[#allocation7 + $0x48] sm:$0xff]  }
 0x4be   : > { %2416 = vst.msk [vmem:[#allocation3 + $0x8c] sm:$0xf] %vm1228_vm4, %v2043_v2  ;;  %v2062_v29 = vrot.slane %v2061_v23, 4  ;;  %v2239_v39 = vrot.slane %v2237_v49, 4  ;;  %v2220_v50 = vrot.slane %v2219_v7, 4  ;;  %v2229_v19 = vor.u32 %v2228_v55, %v11031_v12 }
 0x4bf   : > { %v2242_v5 = vrot.slane %v2240_v54, 5  ;;  %v2246_v62 = vshll.u32 %v1976_v36, 16  ;;  %v2057_v59 = vsel %vm10494_vm10, %v2052_v9, %v2056_v3  ;;  %v2250_v32 = vshrl.u32 %v1976_v36, 16  ;;  %v1958_v60 = vld [vmem:[#allocation2 + $0x34] sm:$0xf]  ;;  %v9306_v36 = vld [vmem:[#allocation7 + $0x28] sm:$0xff]  }
 0x4c0   : > { %v2067_v44 = vsel %vm10494_vm10, %v2062_v29, %v2066_v56  ;;  %v2256_v10 = vshll.u32 %v1977_v22, 16  ;;  %2417 = vst.msk [vmem:[#allocation3 + $0x90] sm:$0xf] %vm1228_vm4, %v2057_v59  ;;  %v2225_v34 = vsel %vm10494_vm10, %v2220_v50, %v11031_v12  ;;  %v2230_v15 = vrot.slane %v2229_v19, 4  ;;  %v1959_v14 = vld [vmem:[#allocation2 + $0x38] sm:$0x1] }
 0x4c1   : > { %2418 = vst.msk [vmem:[#allocation3 + $0x94] sm:$0xf] %vm1228_vm4, %v2067_v44  ;;  %v2243_v53 = vor.u32 %v2242_v5, %v2239_v39  ;;  %2431 = vst.msk [vmem:[#allocation3 + $0xc8] sm:$0xf] %vm1228_vm4, %v2225_v34  ;;  %v2248_v20 = vrot.slane %v2246_v62, 5  ;;  %v2252_v17 = vrot.slane %v2250_v32, 4 }
 0x4c2   : > { %v9018_v63 = vld [vmem:[#allocation3 + $0xc0] sm:$0xff]   ;;  %v2258_v13 = vrot.slane %v2256_v10, 5  ;;  %v2069_v27 = vshrl.u32 %v1954_v4, 16  ;;  %v2235_v51 = vsel %vm10494_vm10, %v2230_v15, %v2234_v24  ;;  %v2072_v1 = vshll.u32 %v1954_v4, 16  ;;  %v1884_v47 = vld [vmem:[#allocation2 + $0x10] sm:$0xf] }
 0x4c3   : > { %8604 = vmatprep.mubr.msk.bf16.mxu1 %vm413_vm1, %v9018_v63  ;;  %v2244_v33 = vrot.slane %v2243_v53, 4  ;;  %v2078_v21 = vshll.u32 %v1955_v6, 16  ;;  %2432 = vst.msk [vmem:[#allocation3 + $0xcc] sm:$0xf] %vm1228_vm4, %v2235_v51  ;;  %v2253_v12 = vor.u32 %v2252_v17, %v2248_v20  ;;  %v2082_v25 = vshrl.u32 %v1955_v6, 16  ;;  %v9029_v10 = vld [vmem:[#allocation7] sm:$0xff]  }
 0x4c4   : > { %v2071_v41 = vrot.slane %v2069_v27, 4  ;;  %v2088_v18 = vshll.u32 %v1956_v28, 16  ;;  %v2074_v45 = vrot.slane %v2072_v1, 5  ;;  %v2093_v37 = vshrl.u32 %v1957_v61, 16  ;;  %1916 = vst.msk [vmem:[#allocation3 + $0xc] sm:$0xf] %vm1228_vm4, %v1884_v47 }
 0x4c5   : > { %v9017_v0 = vld [vmem:[#allocation3 + $0x88] sm:$0xff]   ;;  %v2249_v26 = vsel %vm10494_vm10, %v2244_v33, %v2248_v20  ;;  %v2080_v8 = vrot.slane %v2078_v21, 5  ;;  %v2254_v42 = vrot.slane %v2253_v12, 4  ;;  %v2084_v30 = vrot.slane %v2082_v25, 4  ;;  %v1979_v3 = vld [vmem:[#allocation2 + $0x88] sm:$0xf] }
 0x4c6   : > { %2433 = vst.msk [vmem:[#allocation3 + $0xd0] sm:$0xf] %vm1228_vm4, %v2249_v26  ;;  %v2090_v58 = vrot.slane %v2088_v18, 5  ;;  %v2096_v48 = vshll.u32 %v1957_v61, 16  ;;  %8589 = vmatmul.mubr.msk.bf16.vlgmr.msra.gmra.mxu0 %vm413_vm1, %v9017_v0  ;;  %v2075_v43 = vor.u32 %v2074_v45, %v2071_v41  ;;  %v2095_v52 = vrot.slane %v2093_v37, 4  ;;  %v9307_v27 = vld [vmem:[#allocation7 + $0x8] sm:$0xff]  }
 0x4c7   : > { %v2102_v56 = vshll.u32 %v1958_v60, 16  ;;  %v2106_v46 = vshrl.u32 %v1958_v60, 16  ;;  %v1978_v57 = vld [vmem:[#allocation2 + $0x84] sm:$0xf]  ;;  %v2259_v38 = vsel %vm10494_vm10, %v2254_v42, %v2258_v13  ;;  %8657 = vmatpush3.bf16.msra.mxu0 %v9306_v36  ;;  %v2085_v49 = vor.u32 %v2084_v30, %v2080_v8  ;;  %v1980_v7 = vld [vmem:[#allocation2 + $0x8c] sm:$0x1] }
 0x4c8   : > { %v9020_v23 = vld [vmem:[#allocation3 + $0x90] sm:$0xff]   ;;  %v2098_v2 = vrot.slane %v2096_v48, 5  ;;  %2434 = vst.msk [vmem:[#allocation3 + $0xd4] sm:$0xf] %vm1228_vm4, %v2259_v38  ;;  %v2076_v55 = vrot.slane %v2075_v43, 4  ;;  %v2112_v9 = vshll.u32 %v1959_v14, 16  ;;  %8658 = vmatprep.subr.bf16.mxu0 %v9033_v35 }
 0x4c9   : > { %v2104_v22 = vrot.slane %v2102_v56, 5  ;;  %v2108_v54 = vrot.slane %v2106_v46, 4  ;;  %8592 = vmatprep.mubr.msk.bf16.mxu0 %vm413_vm1, %v9020_v23  ;;  %v2086_v29 = vrot.slane %v2085_v49, 4  ;;  %v2261_v39 = vshrl.u32 %v1978_v57, 16  ;;  %v1981_v19 = vld [vmem:[#allocation2 + $0x90] sm:$0xf] }
 0x4ca   : > { %v2099_v24 = vor.u32 %v2098_v2, %v2095_v52  ;;  %v2264_v50 = vshll.u32 %v1978_v57, 16  ;;  %v1982_v5 = vld [vmem:[#allocation2 + $0x94] sm:$0xf]  ;;  %v9021_v62 = vld [vmem:[#allocation3 + $0xc8] sm:$0xff]   ;;  %v2081_v4 = vsel %vm10494_vm10, %v2076_v55, %v2080_v8  ;;  %v2114_v44 = vrot.slane %v2112_v9, 5 }
 0x4cb   : > { %v2109_v59 = vor.u32 %v2108_v54, %v2104_v22  ;;  %v2270_v32 = vshll.u32 %v1979_v3, 16  ;;  %v2091_v6 = vsel %vm10494_vm10, %v2086_v29, %v2090_v58  ;;  %2419 = vst.msk [vmem:[#allocation3 + $0x98] sm:$0xf] %vm1228_vm4, %v2081_v4  ;;  %v2263_v63 = vrot.slane %v2261_v39, 4  ;;  %8659 = vmatpush3.bf16.msra.mxu0 %v9033_v35  ;;  %8605 = vmatmul.mubr.msk.bf16.vlgmr.msra.gmra.mxu1 %vm413_vm1, %v9021_v62  ;;  %v1960_v13 = vld [vmem:[#allocation2 + $0x3c] sm:$0xf] }
 0x4cc   : > { %v2100_v28 = vrot.slane %v2099_v24, 4  ;;  %v2266_v34 = vrot.slane %v2264_v50, 5  ;;  %2420 = vst.msk [vmem:[#allocation3 + $0x9c] sm:$0xf] %vm1228_vm4, %v2091_v6  ;;  %v2274_v20 = vshrl.u32 %v1979_v3, 16  ;;  %v2280_v17 = vshll.u32 %v1980_v7, 16  ;;  %8728 = vmatprep.subr.bf16.mxu0 %v11066_v11  ;;  %8621 = vmatpush3.bf16.msra.mxu1 %v9307_v27 }
 0x4cd   : > { %v2110_v15 = vrot.slane %v2109_v59, 4  ;;  %v2272_v53 = vrot.slane %v2270_v32, 5  ;;  %v1983_v33 = vld [vmem:[#allocation2 + $0x98] sm:$0x1]  ;;  %v2285_v1 = vshrl.u32 %v1981_v19, 16  ;;  %v2288_v21 = vshll.u32 %v1981_v19, 16  ;;  %8622 = vmatprep.subr.bf16.mxu1 %v9029_v10 }
 0x4ce   : > { %v2105_v61 = vsel %vm10494_vm10, %v2100_v28, %v2104_v22  ;;  %v2267_v51 = vor.u32 %v2266_v34, %v2263_v63  ;;  %v1961_v60 = vld [vmem:[#allocation2 + $0x40] sm:$0xf]  ;;  %v1885_v12 = vld [vmem:[#allocation2 + $0x18] sm:$0xf]  ;;  %v2276_v25 = vrot.slane %v2274_v20, 4  ;;  %v2282_v18 = vrot.slane %v2280_v17, 5 }
 0x4cf   : > { %v2115_v41 = vsel %vm10494_vm10, %v2110_v15, %v2114_v44  ;;  %2421 = vst.msk [vmem:[#allocation3 + $0xa0] sm:$0xf] %vm1228_vm4, %v2105_v61  ;;  %v2294_v14 = vshll.u32 %v1982_v5, 16  ;;  %v11085_v35 = vld [vmem:[#allocation7 + $0x38] sm:$0xff]   ;;  %v1886_v47 = vld [vmem:[#allocation2 + $0x1c] sm:$0xf] }
 0x4d0   : > { %1917 = vst.msk [vmem:[#allocation3 + $0x10] sm:$0xf] %vm1228_vm4, %v1885_v12  ;;  %v9022_v0 = vld [vmem:[#allocation3 + $0xd0] sm:$0xff]   ;;  %2422 = vst.msk [vmem:[#allocation3 + $0xa4] sm:$0xf] %vm1228_vm4, %v2115_v41  ;;  %v2268_v26 = vrot.slane %v2267_v51, 4  ;;  %v2277_v37 = vor.u32 %v2276_v25, %v2272_v53  ;;  %8623 = vmatpush3.bf16.msra.mxu1 %v9029_v10 }
 0x4d1   : > { %v2287_v45 = vrot.slane %v2285_v1, 4  ;;  %v2290_v8 = vrot.slane %v2288_v21, 5  ;;  %1918 = vst.msk [vmem:[#allocation3 + $0x14] sm:$0xf] %vm1228_vm4, %v1886_v47  ;;  %v2296_v42 = vrot.slane %v2294_v14, 5  ;;  %v2298_v30 = vshrl.u32 %v1982_v5, 16  ;;  %8608 = vmatprep.mubr.msk.bf16.mxu1 %vm413_vm1, %v9022_v0  ;;  %8692 = vmatprep.subr.bf16.mxu1 %v11085_v35 }
 0x4d2   : > { %v2304_v58 = vshll.u32 %v1983_v33, 16  ;;  %v2273_v48 = vsel %vm10494_vm10, %v2268_v26, %v2272_v53  ;;  %v1962_v43 = vld [vmem:[#allocation2 + $0x44] sm:$0x1]  ;;  %v2117_v52 = vshrl.u32 %v1960_v13, 16  ;;  %v2120_v56 = vshll.u32 %v1960_v13, 16 }
 0x4d3   : > { %v2291_v3 = vor.u32 %v2290_v8, %v2287_v45  ;;  %v1963_v46 = vld [vmem:[#allocation2 + $0x48] sm:$0xf]  ;;  %v2278_v57 = vrot.slane %v2277_v37, 4  ;;  %2435 = vst.msk [vmem:[#allocation3 + $0xd8] sm:$0xf] %vm1228_vm4, %v2273_v48  ;;  %v2300_v23 = vrot.slane %v2298_v30, 4 }
 0x4d4   : > { %v2306_v38 = vrot.slane %v2304_v58, 5  ;;  %v2126_v36 = vshll.u32 %v1961_v60, 16  ;;  %v1964_v49 = vld [vmem:[#allocation2 + $0x4c] sm:$0xf]  ;;  %v9024_v2 = vld [vmem:[#allocation3 + $0x98] sm:$0xff]   ;;  %v2119_v55 = vrot.slane %v2117_v52, 4 }
 0x4d5   : > { %v2292_v7 = vrot.slane %v2291_v3, 4  ;;  %v2122_v22 = vrot.slane %v2120_v56, 5  ;;  %v2283_v54 = vsel %vm10494_vm10, %v2278_v57, %v2282_v18  ;;  %v2301_v9 = vor.u32 %v2300_v23, %v2296_v42  ;;  %v1965_v39 = vld [vmem:[#allocation2 + $0x50] sm:$0x1]  ;;  %v1984_v50 = vld [vmem:[#allocation2 + $0x9c] sm:$0xf]  ;;  %8593 = vmatmul.mubr.msk.bf16.gmra.mxu0 %vm413_vm1, %v9024_v2 }
 0x4d6   : > { %v2128_v29 = vrot.slane %v2126_v36, 5  ;;  %v2130_v24 = vshrl.u32 %v1961_v60, 16  ;;  %v1887_v19 = vld [vmem:[#allocation2 + $0x24] sm:$0xf]  ;;  %v1888_v5 = vld [vmem:[#allocation2 + $0x28] sm:$0xf] }
 0x4d7   : > { %2436 = vst.msk [vmem:[#allocation3 + $0xdc] sm:$0xf] %vm1228_vm4, %v2283_v54  ;;  %v2297_v62 = vsel %vm10494_vm10, %v2292_v7, %v2296_v42  ;;  %v2123_v4 = vor.u32 %v2122_v22, %v2119_v55  ;;  %v2136_v59 = vshll.u32 %v1962_v43, 16  ;;  %v2141_v44 = vshrl.u32 %v1963_v46, 16  ;;  %1919 = vst.msk [vmem:[#allocation3 + $0x18] sm:$0xf] %vm1228_vm4, %v1887_v19 }
 0x4d8   : > { %1920 = vst.msk [vmem:[#allocation3 + $0x1c] sm:$0xf] %vm1228_vm4, %v1888_v5  ;;  %v9025_v32 = vld [vmem:[#allocation3 + $0xa0] sm:$0xff]   ;;  %v2302_v10 = vrot.slane %v2301_v9, 4  ;;  %2437 = vst.msk [vmem:[#allocation3 + $0xe0] sm:$0xf] %vm1228_vm4, %v2297_v62 }
 0x4d9   : > { %v2132_v6 = vrot.slane %v2130_v24, 4  ;;  %v2144_v28 = vshll.u32 %v1963_v46, 16  ;;  %v2124_v63 = vrot.slane %v2123_v4, 4  ;;  %v2138_v34 = vrot.slane %v2136_v59, 5  ;;  %8596 = vmatprep.mubr.msk.bf16.mxu0 %vm413_vm1, %v9025_v32  ;;  %v1985_v61 = vld [vmem:[#allocation2 + $0xa0] sm:$0xf] }
 0x4da   : > { %v2143_v15 = vrot.slane %v2141_v44, 4  ;;  %v2150_v53 = vshll.u32 %v1964_v49, 16  ;;  %v2307_v20 = vsel %vm10494_vm10, %v2302_v10, %v2306_v38  ;;  %v2154_v27 = vshrl.u32 %v1964_v49, 16  ;;  %v1986_v51 = vld [vmem:[#allocation2 + $0xa4] sm:$0x1] }
 0x4db   : > { %v2133_v17 = vor.u32 %v2132_v6, %v2128_v29  ;;  %v2146_v13 = vrot.slane %v2144_v28, 5  ;;  %2438 = vst.msk [vmem:[#allocation3 + $0xe4] sm:$0xf] %vm1228_vm4, %v2307_v20  ;;  %v2129_v33 = vsel %vm10494_vm10, %v2124_v63, %v2128_v29  ;;  %v2160_v21 = vshll.u32 %v1965_v39, 16  ;;  %v1987_v14 = vld [vmem:[#allocation2 + $0xa8] sm:$0xf] }
 0x4dc   : > { %v2152_v1 = vrot.slane %v2150_v53, 5  ;;  %v2309_v60 = vshrl.u32 %v1984_v50, 16  ;;  %2423 = vst.msk [vmem:[#allocation3 + $0xa8] sm:$0xf] %vm1228_vm4, %v2129_v33  ;;  %v2156_v25 = vrot.slane %v2154_v27, 4  ;;  %v2312_v18 = vshll.u32 %v1984_v50, 16 }
 0x4dd   : > { %v2134_v12 = vrot.slane %v2133_v17, 4  ;;  %v2147_v41 = vor.u32 %v2146_v13, %v2143_v15  ;;  %v1988_v47 = vld [vmem:[#allocation2 + $0xac] sm:$0xf]  ;;  %v2162_v0 = vrot.slane %v2160_v21, 5  ;;  %v2318_v45 = vshll.u32 %v1985_v61, 16 }
 0x4de   : > { %v2311_v26 = vrot.slane %v2309_v60, 4  ;;  %v2322_v8 = vshrl.u32 %v1985_v61, 16  ;;  %v1889_v37 = vld [vmem:[#allocation2 + $0x30] sm:$0xf]  ;;  %v2157_v48 = vor.u32 %v2156_v25, %v2152_v1  ;;  %v2314_v3 = vrot.slane %v2312_v18, 5 }
 0x4df   : > { %v9026_v42 = vld [vmem:[#allocation3 + $0xd8] sm:$0xff]   ;;  %v2139_v30 = vsel %vm10494_vm10, %v2134_v12, %v2138_v34  ;;  %v2148_v58 = vrot.slane %v2147_v41, 4  ;;  %1921 = vst.msk [vmem:[#allocation3 + $0x20] sm:$0xf] %vm1228_vm4, %v1889_v37  ;;  %v2320_v56 = vrot.slane %v2318_v45, 5  ;;  %v2328_v57 = vshll.u32 %v1986_v51, 16 }
 0x4e0   : > { %v1989_v43 = vld [vmem:[#allocation2 + $0xb0] sm:$0x1]  ;;  %v1966_v52 = vld [vmem:[#allocation2 + $0x54] sm:$0xf]  ;;  %2424 = vst.msk [vmem:[#allocation3 + $0xac] sm:$0xf] %vm1228_vm4, %v2139_v30  ;;  %8609 = vmatmul.mubr.msk.bf16.gmra.mxu1 %vm413_vm1, %v9026_v42  ;;  %v2315_v49 = vor.u32 %v2314_v3, %v2311_v26 }
 0x4e1   : > { %v2324_v46 = vrot.slane %v2322_v8, 4  ;;  %v2333_v23 = vshrl.u32 %v1987_v14, 16  ;;  %v2153_v38 = vsel %vm10494_vm10, %v2148_v58, %v2152_v1  ;;  %v2158_v36 = vrot.slane %v2157_v48, 4  ;;  %v1967_v9 = vld [vmem:[#allocation2 + $0x58] sm:$0xf] }
 0x4e2   : > { %v2336_v2 = vshll.u32 %v1987_v14, 16  ;;  %2425 = vst.msk [vmem:[#allocation3 + $0xb0] sm:$0xf] %vm1228_vm4, %v2153_v38  ;;  %v2330_v55 = vrot.slane %v2328_v57, 5  ;;  %v2342_v54 = vshll.u32 %v1988_v47, 16  ;;  %v9027_v29 = vld [vmem:[#allocation3 + $0xe0] sm:$0xff]  }
 0x4e3   : > { %v2325_v7 = vor.u32 %v2324_v46, %v2320_v56  ;;  %v2335_v22 = vrot.slane %v2333_v23, 4  ;;  %v2163_v24 = vsel %vm10494_vm10, %v2158_v36, %v2162_v0  ;;  %v2316_v39 = vrot.slane %v2315_v49, 4  ;;  %v1968_v5 = vld [vmem:[#allocation2 + $0x5c] sm:$0x1]  ;;  %8612 = vmatprep.mubr.msk.bf16.mxu1 %vm413_vm1, %v9027_v29  ;;  %v1990_v63 = vld [vmem:[#allocation2 + $0xb4] sm:$0xf] }
 0x4e4   : > { %v2338_v50 = vrot.slane %v2336_v2, 5  ;;  %v2346_v19 = vshrl.u32 %v1988_v47, 16  ;;  %2426 = vst.msk [vmem:[#allocation3 + $0xb4] sm:$0xf] %vm1228_vm4, %v2163_v24  ;;  %v2344_v4 = vrot.slane %v2342_v54, 5  ;;  %v2352_v59 = vshll.u32 %v1989_v43, 16 }
 0x4e5   : > { %v2326_v62 = vrot.slane %v2325_v7, 4  ;;  %v2165_v44 = vshrl.u32 %v1966_v52, 16  ;;  %v2321_v32 = vsel %vm10494_vm10, %v2316_v39, %v2320_v56  ;;  %v2168_v28 = vshll.u32 %v1966_v52, 16  ;;  %v1991_v34 = vld [vmem:[#allocation2 + $0xb8] sm:$0xf] }
 0x4e6   : > { %v2339_v10 = vor.u32 %v2338_v50, %v2335_v22  ;;  %v2348_v6 = vrot.slane %v2346_v19, 4  ;;  %v1891_v15 = vld [vmem:[#allocation2 + $0x3c] sm:$0xf]  ;;  %2439 = vst.msk [vmem:[#allocation3 + $0xe8] sm:$0xf] %vm1228_vm4, %v2321_v32  ;;  %v2354_v20 = vrot.slane %v2352_v59, 5 }
 0x4e7   : > { %v2331_v53 = vsel %vm10494_vm10, %v2326_v62, %v2330_v55  ;;  %v2167_v17 = vrot.slane %v2165_v44, 4  ;;  %v2174_v13 = vshll.u32 %v1967_v9, 16  ;;  %1923 = vst.msk [vmem:[#allocation3 + $0x28] sm:$0xf] %vm1228_vm4, %v1891_v15  ;;  %v9028_v27 = vld [vmem:[#allocation3 + $0xa8] sm:$0xff]   ;;  %v2170_v33 = vrot.slane %v2168_v28, 5 }
 0x4e8   : > { %2440 = vst.msk [vmem:[#allocation3 + $0xec] sm:$0xf] %vm1228_vm4, %v2331_v53  ;;  %v2340_v61 = vrot.slane %v2339_v10, 4  ;;  %v2349_v51 = vor.u32 %v2348_v6, %v2344_v4  ;;  %v2178_v1 = vshrl.u32 %v1967_v9, 16  ;;  %v2184_v60 = vshll.u32 %v1968_v5, 16  ;;  %8597 = vmatmul.mubr.msk.bf16.gmra.mxu0 %vm413_vm1, %v9028_v27 }
 0x4e9   : > { %v2176_v21 = vrot.slane %v2174_v13, 5  ;;  %v2357_v12 = vshrl.u32 %v1990_v63, 16  ;;  %v2360_v41 = vshll.u32 %v1990_v63, 16  ;;  %v2171_v14 = vor.u32 %v2170_v33, %v2167_v17  ;;  %v1992_v0 = vld [vmem:[#allocation2 + $0xbc] sm:$0x1] }
 0x4ea   : > { %v2345_v25 = vsel %vm10494_vm10, %v2340_v61, %v2344_v4  ;;  %v2350_v18 = vrot.slane %v2349_v51, 4  ;;  %v2180_v47 = vrot.slane %v2178_v1, 4  ;;  %v2445_v26 = vld [vmem:[#allocation2] sm:$0xe]  ;;  %v2186_v45 = vrot.slane %v2184_v60, 5 }
 0x4eb   : > { %2441 = vst.msk [vmem:[#allocation3 + $0xf0] sm:$0xf] %vm1228_vm4, %v2345_v25  ;;  %v2359_v8 = vrot.slane %v2357_v12, 4  ;;  %v2362_v37 = vrot.slane %v2360_v41, 5  ;;  %v2366_v42 = vshll.u32 %v1991_v34, 16  ;;  %v9030_v3 = vld [vmem:[#allocation3 + $0xb0] sm:$0xff]  }
 0x4ec   : > { %v2446_v30 = vld [vmem:[#allocation2 + $0x4] sm:$0xf]  ;;  %v11134_v58 = vld [vmem:[#allocation2 + $0x8] sm:$0x1]  ;;  %v2355_v43 = vsel %vm10494_vm10, %v2350_v18, %v2354_v20  ;;  %v2172_v52 = vrot.slane %v2171_v14, 4  ;;  %v2181_v56 = vor.u32 %v2180_v47, %v2176_v21  ;;  %v2370_v46 = vshrl.u32 %v1991_v34, 16  ;;  %8600 = vmatprep.mubr.msk.bf16.mxu0 %vm413_vm1, %v9030_v3 }
 0x4ed   : > { %v1893_v48 = vld [vmem:[#allocation2 + $0x48] sm:$0xf]  ;;  %v2448_v57 = vld [vmem:[#allocation2 + $0xc] sm:$0xe]  ;;  %v2449_v23 = vld [vmem:[#allocation2 + $0x10] sm:$0xf]  ;;  %v2363_v36 = vor.u32 %v2362_v37, %v2359_v8 }
 0x4ee   : > { %v11138_v38 = vld [vmem:[#allocation2 + $0x14] sm:$0x1]  ;;  %1925 = vst.msk [vmem:[#allocation3 + $0x30] sm:$0xf] %vm1228_vm4, %v1893_v48  ;;  %2442 = vst.msk [vmem:[#allocation3 + $0xf4] sm:$0xf] %vm1228_vm4, %v2355_v43  ;;  %v2177_v55 = vsel %vm10494_vm10, %v2172_v52, %v2176_v21 }
 0x4ef   : > { %v2368_v49 = vrot.slane %v2366_v42, 5  ;;  %v2376_v2 = vshll.u32 %v1992_v0, 16  ;;  %v2451_v7 = vld [vmem:[#allocation2 + $0x18] sm:$0xe]  ;;  %v2182_v22 = vrot.slane %v2181_v56, 4  ;;  %v2372_v54 = vrot.slane %v2370_v46, 4 }
 0x4f0   : > { %v2452_v9 = vld [vmem:[#allocation2 + $0x1c] sm:$0xf]  ;;  %v11145_v29 = vld [vmem:[#allocation2 + $0x20] sm:$0x1]  ;;  %2427 = vst.msk [vmem:[#allocation3 + $0xb8] sm:$0xf] %vm1228_vm4, %v2177_v55 }
 0x4f1   : > { %v9031_v24 = vld [vmem:[#allocation3 + $0xe8] sm:$0xff]   ;;  %v2364_v39 = vrot.slane %v2363_v36, 4  ;;  %v2378_v50 = vrot.slane %v2376_v2, 5  ;;  %v7964_v19 = vrot.slane %v2445_v26, 9  ;;  %v2455_v62 = vld [vmem:[#allocation2 + $0x28] sm:$0xf]  ;;  %v2187_v4 = vsel %vm10494_vm10, %v2182_v22, %v2186_v45 }
 0x4f2   : > { %v2454_v5 = vld [vmem:[#allocation2 + $0x24] sm:$0xe]  ;;  %v2373_v59 = vor.u32 %v2372_v54, %v2368_v49  ;;  %v2546_v32 = vrot.slane %v2446_v30, 5  ;;  %v2549_v10 = vrot.slane %v11134_v58, 5  ;;  %v2456_v6 = vld [vmem:[#allocation2 + $0x2c] sm:$0x1]  ;;  %8613 = vmatmul.mubr.msk.bf16.gmra.mxu1 %vm413_vm1, %v9031_v24 }
 0x4f3   : > { %2428 = vst.msk [vmem:[#allocation3 + $0xbc] sm:$0xf] %vm1228_vm4, %v2187_v4  ;;  %v2369_v28 = vsel %vm10494_vm10, %v2364_v39, %v2368_v49  ;;  %v7965_v63 = vrot.slane %v2448_v57, 9  ;;  %v2553_v34 = vrot.slane %v2449_v23, 5  ;;  %v2556_v15 = vrot.slane %v11138_v38, 5 }
 0x4f4   : > { %v2457_v53 = vld [vmem:[#allocation2 + $0x30] sm:$0xe]  ;;  %v2458_v20 = vld [vmem:[#allocation2 + $0x34] sm:$0xf]  ;;  %v2374_v13 = vrot.slane %v2373_v59, 4  ;;  %v2547_v27 = vsel %vm11151_vm15, %v7964_v19, %v2546_v32  ;;  %v2548_v61 = vrot.slane %v2546_v32, 4 }
 0x4f5   : > { %v1895_v17 = vld [vmem:[#allocation2 + $0x54] sm:$0xf]  ;;  %2443 = vst.msk [vmem:[#allocation3 + $0xf8] sm:$0xf] %vm1228_vm4, %v2369_v28  ;;  %v7966_v51 = vrot.slane %v2451_v7, 9  ;;  %v2554_v60 = vsel %vm11151_vm15, %v7965_v63, %v2553_v34  ;;  %v2555_v12 = vrot.slane %v2553_v34, 4 }
 0x4f6   : > { %v2459_v33 = vld [vmem:[#allocation2 + $0x38] sm:$0x1]  ;;  %v2460_v1 = vld [vmem:[#allocation2 + $0x3c] sm:$0xe]  ;;  %v2461_v21 = vld [vmem:[#allocation2 + $0x40] sm:$0xf]  ;;  %v2379_v47 = vsel %vm10494_vm10, %v2374_v13, %v2378_v50  ;;  %v2550_v0 = vsel %vm11151_vm15, %v2548_v61, %v2549_v10 }
 0x4f7   : > { %1927 = vst.msk [vmem:[#allocation3 + $0x38] sm:$0xf] %vm1228_vm4, %v1895_v17  ;;  %2689 = vst.msk [vmem:[#allocation3 + $0x100] sm:$0xf] %vm1228_vm4, %v2547_v27  ;;  %v2560_v41 = vrot.slane %v2452_v9, 5  ;;  %v2563_v25 = vrot.slane %v11145_v29, 5  ;;  %v2557_v42 = vsel %vm11151_vm15, %v2555_v12, %v2556_v15 }
 0x4f8   : > { %v2462_v18 = vld [vmem:[#allocation2 + $0x44] sm:$0x1]  ;;  %v9032_v14 = vld [vmem:[#allocation3 + $0xf0] sm:$0xff]   ;;  %2691 = vst.msk [vmem:[#allocation3 + $0x108] sm:$0xf] %vm1228_vm4, %v2554_v60  ;;  %v7967_v26 = vrot.slane %v2454_v5, 9 }
 0x4f9   : > { %v2567_v45 = vrot.slane %v2455_v62, 5  ;;  %v2463_v8 = vld [vmem:[#allocation2 + $0x48] sm:$0xe]  ;;  %v2464_v37 = vld [vmem:[#allocation2 + $0x4c] sm:$0xf]  ;;  %v2561_v30 = vsel %vm11151_vm15, %v7966_v51, %v2560_v41  ;;  %v2562_v58 = vrot.slane %v2560_v41, 4  ;;  %8616 = vmatprep.mubr.msk.bf16.mxu1 %vm413_vm1, %v9032_v14 }
 0x4fa   : > { %2444 = vst.msk [vmem:[#allocation3 + $0xfc] sm:$0xf] %vm1228_vm4, %v2379_v47  ;;  %2690 = vst.msk [vmem:[#allocation3 + $0x104] sm:$0xf] %vm1228_vm4, %v2550_v0  ;;  %v2570_v48 = vrot.slane %v2456_v6, 5  ;;  %v7968_v57 = vrot.slane %v2457_v53, 9 }
 0x4fb   : > { %v2465_v3 = vld [vmem:[#allocation2 + $0x50] sm:$0x1]  ;;  %v2466_v43 = vld [vmem:[#allocation2 + $0x54] sm:$0xe]  ;;  %v2467_v52 = vld [vmem:[#allocation2 + $0x58] sm:$0xf]  ;;  %v2568_v56 = vsel %vm11151_vm15, %v7967_v26, %v2567_v45  ;;  %v2564_v36 = vsel %vm11151_vm15, %v2562_v58, %v2563_v25 }
 0x4fc   : > { %2692 = vst.msk [vmem:[#allocation3 + $0x10c] sm:$0xf] %vm1228_vm4, %v2557_v42  ;;  %2693 = vst.msk [vmem:[#allocation3 + $0x110] sm:$0xf] %vm1228_vm4, %v2561_v30  ;;  %v2569_v46 = vrot.slane %v2567_v45, 4  ;;  %v2574_v23 = vrot.slane %v2458_v20, 5 }
 0x4fd   : > { %v2468_v38 = vld [vmem:[#allocation2 + $0x5c] sm:$0x1]  ;;  %2695 = vst.msk [vmem:[#allocation3 + $0x118] sm:$0xf] %vm1228_vm4, %v2568_v56  ;;  %v2577_v49 = vrot.slane %v2459_v33, 5  ;;  %v7969_v2 = vrot.slane %v2460_v1, 9 }
 0x4fe   : > { %v2581_v7 = vrot.slane %v2461_v21, 5  ;;  %v1897_v55 = vld [vmem:[#allocation2 + $0x60] sm:$0xf]  ;;  %v9034_v22 = vld [vmem:[#allocation3 + $0xb8] sm:$0xff]   ;;  %2694 = vst.msk [vmem:[#allocation3 + $0x114] sm:$0xf] %vm1228_vm4, %v2564_v36  ;;  %v2571_v54 = vsel %vm11151_vm15, %v2569_v46, %v2570_v48  ;;  %v2575_v9 = vsel %vm11151_vm15, %v7968_v57, %v2574_v23 }
 0x4ff   : > { %v2576_v29 = vrot.slane %v2574_v23, 4  ;;  %v2584_v24 = vrot.slane %v2462_v18, 5  ;;  %v2469_v39 = vld [vmem:[#allocation2 + $0x60] sm:$0xe]  ;;  %v2470_v50 = vld [vmem:[#allocation2 + $0x64] sm:$0xf]  ;;  %8601 = vmatmul.mubr.msk.bf16.gmra.mxu0 %vm413_vm1, %v9034_v22 }
 0x500   : > { %1929 = vst.msk [vmem:[#allocation3 + $0x40] sm:$0xf] %vm1228_vm4, %v1897_v55  ;;  %2696 = vst.msk [vmem:[#allocation3 + $0x11c] sm:$0xf] %vm1228_vm4, %v2571_v54  ;;  %v2582_v19 = vsel %vm11151_vm15, %v7969_v2, %v2581_v7  ;;  %v2583_v5 = vrot.slane %v2581_v7, 4  ;;  %v7970_v62 = vrot.slane %v2463_v8, 9 }
 0x501   : > { %2697 = vst.msk [vmem:[#allocation3 + $0x120] sm:$0xf] %vm1228_vm4, %v2575_v9  ;;  %v2588_v4 = vrot.slane %v2464_v37, 5  ;;  %v2473_v59 = vld [vmem:[#allocation2 + $0x70] sm:$0xf]  ;;  %v9037_v32 = vld [vmem:[#allocation3] sm:$0xff]   ;;  %v2578_v10 = vsel %vm11151_vm15, %v2576_v29, %v2577_v49 }
 0x502   : > { %2699 = vst.msk [vmem:[#allocation3 + $0x128] sm:$0xf] %vm1228_vm4, %v2582_v19  ;;  %v2591_v6 = vrot.slane %v2465_v3, 5  ;;  %v7971_v28 = vrot.slane %v2466_v43, 9  ;;  %v2595_v63 = vrot.slane %v2467_v52, 5  ;;  %v2585_v15 = vsel %vm11151_vm15, %v2583_v5, %v2584_v24  ;;  %v9035_v13 = vld [vmem:[#allocation3 + $0xf8] sm:$0xff]  }
 0x503   : > { %v2471_v34 = vld [vmem:[#allocation2 + $0x68] sm:$0x1]  ;;  %2698 = vst.msk [vmem:[#allocation3 + $0x124] sm:$0xf] %vm1228_vm4, %v2578_v10  ;;  %v2589_v53 = vsel %vm11151_vm15, %v7970_v62, %v2588_v4  ;;  %v2590_v20 = vrot.slane %v2588_v4, 4  ;;  %v2598_v17 = vrot.slane %v2468_v38, 5  ;;  %8617 = vmatmul.mubr.msk.bf16.gmra.mxu1 %vm413_vm1, %v9035_v13 }
 0x504   : > { %2700 = vst.msk [vmem:[#allocation3 + $0x12c] sm:$0xf] %vm1228_vm4, %v2585_v15  ;;  %2701 = vst.msk [vmem:[#allocation3 + $0x130] sm:$0xf] %vm1228_vm4, %v2589_v53  ;;  %v2596_v27 = vsel %vm11151_vm15, %v7971_v28, %v2595_v63  ;;  %v2597_v61 = vrot.slane %v2595_v63, 4  ;;  %v9036_v51 = vld [vmem:[#allocation3 + $0x100] sm:$0xff]   ;;  %8624 = vmatprep.mubr.msk.bf16.mxu1 %vm413_vm1, %v9037_v32 }
 0x505   : > { %v2592_v33 = vsel %vm11151_vm15, %v2590_v20, %v2591_v6  ;;  %2703 = vst.msk [vmem:[#allocation3 + $0x138] sm:$0xf] %vm1228_vm4, %v2596_v27  ;;  %v7972_v1 = vrot.slane %v2469_v39, 9  ;;  %v2602_v21 = vrot.slane %v2470_v50, 5  ;;  %v2476_v60 = vld [vmem:[#allocation2 + $0x7c] sm:$0xf]  ;;  %8660 = vmatprep.mubr.msk.bf16.mxu0 %vm413_vm1, %v9036_v51 }
 0x506   : > { %2702 = vst.msk [vmem:[#allocation3 + $0x134] sm:$0xf] %vm1228_vm4, %v2592_v33  ;;  %v2599_v12 = vsel %vm11151_vm15, %v2597_v61, %v2598_v17  ;;  %v2609_v41 = vrot.slane %v2473_v59, 5  ;;  %v9061_v25 = vld [vmem:[#allocation7 + $0x40] sm:$0xff]   ;;  %v2605_v47 = vrot.slane %v2471_v34, 5  ;;  %v9038_v0 = vld [vmem:[#allocation3 + $0x108] sm:$0xff]  }
 0x507   : > { %2704 = vst.msk [vmem:[#allocation3 + $0x13c] sm:$0xf] %vm1228_vm4, %v2599_v12  ;;  %v2603_v18 = vsel %vm11151_vm15, %v7972_v1, %v2602_v21  ;;  %v2604_v14 = vrot.slane %v2602_v21, 4  ;;  %v9041_v26 = vld [vmem:[#allocation3 + $0x110] sm:$0xff]   ;;  %8661 = vmatmul.mubr.msk.bf16.vlgmr.msra.gmra.mxu0 %vm413_vm1, %v9038_v0  ;;  %v2474_v30 = vld [vmem:[#allocation2 + $0x74] sm:$0x1] }
 0x508   : > { %2705 = vst.msk [vmem:[#allocation3 + $0x140] sm:$0xf] %vm1228_vm4, %v2603_v18  ;;  %v2472_v8 = vld [vmem:[#allocation2 + $0x6c] sm:$0xe]  ;;  %v2611_v37 = vrot.slane %v2609_v41, 4  ;;  %v2616_v3 = vrot.slane %v2476_v60, 5  ;;  %8664 = vmatprep.mubr.msk.bf16.mxu0 %vm413_vm1, %v9041_v26  ;;  %8729 = vmatpush3.bf16.msra.mxu0 %v11066_v11 }
 0x509   : > { %v2606_v45 = vsel %vm11151_vm15, %v2604_v14, %v2605_v47  ;;  %v2479_v42 = vld [vmem:[#allocation2 + $0x88] sm:$0xf]  ;;  %v7973_v58 = vrot.slane %v2472_v8, 9  ;;  %v9040_v43 = vld [vmem:[#allocation3 + $0x8] sm:$0xff]   ;;  %v2612_v52 = vrot.slane %v2474_v30, 5  ;;  %8730 = vmatprep.subr.bf16.mxu0 %v9061_v25  ;;  %v9044_v55 = vld [vmem:[#allocation3 + $0x118] sm:$0xff]  }
 0x50a   : > { %2706 = vst.msk [vmem:[#allocation3 + $0x144] sm:$0xf] %vm1228_vm4, %v2606_v45  ;;  %v9057_v48 = vld [vmem:[#allocation7 + $0x30] sm:$0xff]   ;;  %v11230_v56 = vld [vmem:[#allocation7 + $0x68] sm:$0xff]   ;;  %v2475_v23 = vld [vmem:[#allocation2 + $0x78] sm:$0xe] }
 0x50b   : > { %v2610_v46 = vsel %vm11151_vm15, %v7973_v58, %v2609_v41  ;;  %v1899_v57 = vld [vmem:[#allocation2 + $0x6c] sm:$0xf]  ;;  %v2613_v36 = vsel %vm11151_vm15, %v2611_v37, %v2612_v52  ;;  %v2477_v49 = vld [vmem:[#allocation2 + $0x80] sm:$0x1]  ;;  %v7974_v2 = vrot.slane %v2475_v23, 9  ;;  %8625 = vmatmul.mubr.msk.bf16.vlgmr.msra.gmra.mxu1 %vm413_vm1, %v9040_v43  ;;  %v2618_v22 = vrot.slane %v2616_v3, 4 }
 0x50c   : > { %v9042_v38 = vld [vmem:[#allocation3 + $0x10] sm:$0xff]   ;;  %2707 = vst.msk [vmem:[#allocation3 + $0x148] sm:$0xf] %vm1228_vm4, %v2610_v46  ;;  %1931 = vst.msk [vmem:[#allocation3 + $0x48] sm:$0xf] %vm1228_vm4, %v1899_v57  ;;  %v2619_v54 = vrot.slane %v2477_v49, 5  ;;  %8693 = vmatpush3.bf16.msra.mxu1 %v11085_v35  ;;  %8731 = vmatpush3.bf16.msra.mxu0 %v9061_v25 }
 0x50d   : > { %v2482_v11 = vld [vmem:[#allocation2 + $0x94] sm:$0xf]  ;;  %v11238_v7 = vld [vmem:[#allocation2 + $0xa0] sm:$0xf]  ;;  %2708 = vst.msk [vmem:[#allocation3 + $0x14c] sm:$0xf] %vm1228_vm4, %v2613_v36  ;;  %8628 = vmatprep.mubr.msk.bf16.mxu1 %vm413_vm1, %v9042_v38  ;;  %v2617_v24 = vsel %vm11151_vm15, %v7974_v2, %v2616_v3  ;;  %8694 = vmatprep.subr.bf16.mxu1 %v9057_v48 }
 0x50e   : > { %v2623_v9 = vrot.slane %v2479_v42, 5  ;;  %v11242_v29 = vld [vmem:[#allocation7 + $0x58] sm:$0xff]   ;;  %v1901_v39 = vld [vmem:[#allocation2 + $0x78] sm:$0xf]  ;;  %v2478_v50 = vld [vmem:[#allocation2 + $0x84] sm:$0xe]  ;;  %v2620_v19 = vsel %vm11151_vm15, %v2618_v22, %v2619_v54  ;;  %8800 = vmatprep.subr.bf16.mxu0 %v11230_v56 }
 0x50f   : > { %2709 = vst.msk [vmem:[#allocation3 + $0x150] sm:$0xf] %vm1228_vm4, %v2617_v24  ;;  %1933 = vst.msk [vmem:[#allocation3 + $0x50] sm:$0xf] %vm1228_vm4, %v1901_v39  ;;  %v2480_v5 = vld [vmem:[#allocation2 + $0x8c] sm:$0x1]  ;;  %8665 = vmatmul.mubr.msk.bf16.gmra.mxu0 %vm413_vm1, %v9044_v55 }
 0x510   : > { %v7975_v62 = vrot.slane %v2478_v50, 9  ;;  %v2625_v4 = vrot.slane %v2623_v9, 4  ;;  %v1903_v35 = vld [vmem:[#allocation2 + $0x84] sm:$0xf]  ;;  %v9046_v59 = vld [vmem:[#allocation3 + $0x120] sm:$0xff]   ;;  %v2626_v32 = vrot.slane %v2480_v5, 5  ;;  %8695 = vmatpush3.bf16.msra.mxu1 %v9057_v48 }
 0x511   : > { %2710 = vst.msk [vmem:[#allocation3 + $0x154] sm:$0xf] %vm1228_vm4, %v2620_v19  ;;  %1935 = vst.msk [vmem:[#allocation3 + $0x58] sm:$0xf] %vm1228_vm4, %v1903_v35  ;;  %v2488_v10 = vld [vmem:[#allocation2 + $0xac] sm:$0xf]  ;;  %8668 = vmatprep.mubr.msk.bf16.mxu0 %vm413_vm1, %v9046_v59  ;;  %8764 = vmatprep.subr.bf16.mxu1 %v11242_v29 }
 0x512   : > { %v2624_v6 = vsel %vm11151_vm15, %v7975_v62, %v2623_v9  ;;  %v2481_v28 = vld [vmem:[#allocation2 + $0x90] sm:$0xe]  ;;  %v2483_v63 = vld [vmem:[#allocation2 + $0x98] sm:$0x1]  ;;  %v2630_v34 = vrot.slane %v2482_v11, 5  ;;  %v2637_v15 = vrot.slane %v11238_v7, 5  ;;  %v2627_v20 = vsel %vm11151_vm15, %v2625_v4, %v2626_v32 }
 0x513   : > { %v9045_v53 = vld [vmem:[#allocation3 + $0x18] sm:$0xff]   ;;  %2711 = vst.msk [vmem:[#allocation3 + $0x158] sm:$0xf] %vm1228_vm4, %v2624_v6  ;;  %v7976_v17 = vrot.slane %v2481_v28, 9  ;;  %2712 = vst.msk [vmem:[#allocation3 + $0x15c] sm:$0xf] %vm1228_vm4, %v2627_v20 }
 0x514   : > { %v1905_v13 = vld [vmem:[#allocation2 + $0x90] sm:$0xf]  ;;  %v2632_v27 = vrot.slane %v2630_v34, 4  ;;  %v2633_v61 = vrot.slane %v2483_v63, 5  ;;  %v9047_v51 = vld [vmem:[#allocation3 + $0x20] sm:$0xff]   ;;  %v2639_v21 = vrot.slane %v2637_v15, 4  ;;  %8629 = vmatmul.mubr.msk.bf16.gmra.mxu1 %vm413_vm1, %v9045_v53 }
 0x515   : > { %1937 = vst.msk [vmem:[#allocation3 + $0x60] sm:$0xf] %vm1228_vm4, %v1905_v13  ;;  %v2631_v33 = vsel %vm11151_vm15, %v7976_v17, %v2630_v34  ;;  %v2484_v1 = vld [vmem:[#allocation2 + $0x9c] sm:$0xe]  ;;  %v2486_v12 = vld [vmem:[#allocation2 + $0xa4] sm:$0x1]  ;;  %8632 = vmatprep.mubr.msk.bf16.mxu1 %vm413_vm1, %v9047_v51 }
 0x516   : > { %v2634_v60 = vsel %vm11151_vm15, %v2632_v27, %v2633_v61  ;;  %2713 = vst.msk [vmem:[#allocation3 + $0x160] sm:$0xf] %vm1228_vm4, %v2631_v33  ;;  %v7977_v41 = vrot.slane %v2484_v1, 9  ;;  %v1907_v25 = vld [vmem:[#allocation2 + $0x9c] sm:$0xf]  ;;  %v2644_v18 = vrot.slane %v2488_v10, 5 }
 0x517   : > { %2714 = vst.msk [vmem:[#allocation3 + $0x164] sm:$0xf] %vm1228_vm4, %v2634_v60  ;;  %v2640_v14 = vrot.slane %v2486_v12, 5  ;;  %1939 = vst.msk [vmem:[#allocation3 + $0x68] sm:$0xf] %vm1228_vm4, %v1907_v25  ;;  %v9048_v47 = vld [vmem:[#allocation3 + $0x128] sm:$0xff]  }
 0x518   : > { %v2638_v0 = vsel %vm11151_vm15, %v7977_v41, %v2637_v15  ;;  %v9050_v26 = vld [vmem:[#allocation3 + $0x130] sm:$0xff]   ;;  %v2646_v37 = vrot.slane %v2644_v18, 4  ;;  %8669 = vmatmul.mubr.msk.bf16.gmra.mxu0 %vm413_vm1, %v9048_v47  ;;  %v2489_v42 = vld [vmem:[#allocation2 + $0xb0] sm:$0x1]  ;;  %v9049_v58 = vld [vmem:[#allocation3 + $0x28] sm:$0xff]  }
 0x519   : > { %v2641_v45 = vsel %vm11151_vm15, %v2639_v21, %v2640_v14  ;;  %2715 = vst.msk [vmem:[#allocation3 + $0x168] sm:$0xf] %vm1228_vm4, %v2638_v0  ;;  %v2487_v8 = vld [vmem:[#allocation2 + $0xa8] sm:$0xe]  ;;  %8672 = vmatprep.mubr.msk.bf16.mxu0 %vm413_vm1, %v9050_v26  ;;  %v2647_v48 = vrot.slane %v2489_v42, 5  ;;  %v9052_v2 = vld [vmem:[#allocation3 + $0x138] sm:$0xff]  }
 0x51a   : > { %2716 = vst.msk [vmem:[#allocation3 + $0x16c] sm:$0xf] %vm1228_vm4, %v2641_v45  ;;  %v7978_v30 = vrot.slane %v2487_v8, 9  ;;  %v9051_v3 = vld [vmem:[#allocation3 + $0x30] sm:$0xff]   ;;  %v2490_v23 = vld [vmem:[#allocation2 + $0xb4] sm:$0xe] }
 0x51b   : > { %v1909_v52 = vld [vmem:[#allocation2 + $0xa8] sm:$0xf]  ;;  %v1910_v46 = vld [vmem:[#allocation2 + $0xac] sm:$0xf]  ;;  %v2648_v57 = vsel %vm11151_vm15, %v2646_v37, %v2647_v48  ;;  %v2491_v38 = vld [vmem:[#allocation2 + $0xb8] sm:$0xf] }
 0x51c   : > { %v2645_v43 = vsel %vm11151_vm15, %v7978_v30, %v2644_v18  ;;  %1941 = vst.msk [vmem:[#allocation3 + $0x70] sm:$0xf] %vm1228_vm4, %v1909_v52  ;;  %1942 = vst.msk [vmem:[#allocation3 + $0x74] sm:$0xf] %vm1228_vm4, %v1910_v46  ;;  %v2796_v36 = vld [vmem:[#allocation2 + $0x34] sm:$0xf]  ;;  %8633 = vmatmul.mubr.msk.bf16.gmra.mxu1 %vm413_vm1, %v9049_v58 }
 0x51d   : > { %2717 = vst.msk [vmem:[#allocation3 + $0x170] sm:$0xf] %vm1228_vm4, %v2645_v43  ;;  %2718 = vst.msk [vmem:[#allocation3 + $0x174] sm:$0xf] %vm1228_vm4, %v2648_v57  ;;  %v7979_v49 = vrot.slane %v2490_v23, 9  ;;  %8636 = vmatprep.mubr.msk.bf16.mxu1 %vm413_vm1, %v9051_v3  ;;  %v2651_v7 = vrot.slane %v2491_v38, 5 }
 0x51e   : > { %v2492_v11 = vld [vmem:[#allocation2 + $0xbc] sm:$0x1]  ;;  %v1911_v55 = vld [vmem:[#allocation2 + $0xb4] sm:$0xf]  ;;  %v1912_v54 = vld [vmem:[#allocation2 + $0xb8] sm:$0xf] }
 0x51f   : > { %v9054_v22 = vld [vmem:[#allocation3 + $0x140] sm:$0xff]   ;;  %1943 = vst.msk [vmem:[#allocation3 + $0x78] sm:$0xf] %vm1228_vm4, %v1911_v55  ;;  %v2652_v9 = vsel %vm11151_vm15, %v7979_v49, %v2651_v7  ;;  %v2653_v24 = vrot.slane %v2651_v7, 4  ;;  %v2654_v39 = vrot.slane %v2492_v11, 5  ;;  %v9053_v19 = vld [vmem:[#allocation3 + $0x38] sm:$0xff]  }
 0x520   : > { %1944 = vst.msk [vmem:[#allocation3 + $0x7c] sm:$0xf] %vm1228_vm4, %v1912_v54  ;;  %v2786_v50 = vld [vmem:[#allocation2 + $0xc] sm:$0xf]  ;;  %8673 = vmatmul.mubr.msk.bf16.gmra.mxu0 %vm413_vm1, %v9052_v2  ;;  %2719 = vst.msk [vmem:[#allocation3 + $0x178] sm:$0xf] %vm1228_vm4, %v2652_v9 }
 0x521   : > { %v2787_v5 = vld [vmem:[#allocation2 + $0x10] sm:$0xf]  ;;  %v2835_v62 = vshrl.u32 %v2786_v50, 16  ;;  %v2838_v4 = vshll.u32 %v2786_v50, 16  ;;  %v2916_v35 = vshll.u32 %v2796_v36, 16  ;;  %v2920_v59 = vshrl.u32 %v2796_v36, 16  ;;  %8676 = vmatprep.mubr.msk.bf16.mxu0 %vm413_vm1, %v9054_v22 }
 0x522   : > { %v2655_v32 = vsel %vm11151_vm15, %v2653_v24, %v2654_v39  ;;  %v2788_v10 = vld [vmem:[#allocation2 + $0x14] sm:$0x1]  ;;  %v2844_v6 = vshll.u32 %v2787_v5, 16  ;;  %v2848_v28 = vshrl.u32 %v2787_v5, 16  ;;  %v2721_v63 = vld [vmem:[#allocation2 + $0xc] sm:$0xf] }
 0x523   : > { %2720 = vst.msk [vmem:[#allocation3 + $0x17c] sm:$0xf] %vm1228_vm4, %v2655_v32  ;;  %2754 = vst.msk [vmem:[#allocation3 + $0x180] sm:$0xf] %vm1228_vm4, %v2721_v63  ;;  %v9055_v34 = vld [vmem:[#allocation3 + $0x40] sm:$0xff]   ;;  %v2837_v15 = vrot.slane %v2835_v62, 4 }
 0x524   : > { %v2840_v53 = vrot.slane %v2838_v4, 5  ;;  %8637 = vmatmul.mubr.msk.bf16.gmra.mxu1 %vm413_vm1, %v9053_v19  ;;  %v9056_v20 = vld [vmem:[#allocation3 + $0x148] sm:$0xff]   ;;  %v2846_v17 = vrot.slane %v2844_v6, 5  ;;  %v2850_v13 = vrot.slane %v2848_v28, 4  ;;  %v2854_v27 = vshll.u32 %v2788_v10, 16  ;;  %v9059_v33 = vld [vmem:[#allocation3 + $0x150] sm:$0xff]  }
 0x525   : > { %v2722_v61 = vld [vmem:[#allocation2 + $0x10] sm:$0xf]  ;;  %v11305_v51 = vrot.slane %v2916_v35, 5  ;;  %8640 = vmatprep.mubr.msk.bf16.mxu1 %vm413_vm1, %v9055_v34  ;;  %v2789_v21 = vld [vmem:[#allocation2 + $0x18] sm:$0xf]  ;;  %v11309_v18 = vrot.slane %v2920_v59, 4 }
 0x526   : > { %v2841_v1 = vor.u32 %v2840_v53, %v2837_v15  ;;  %2755 = vst.msk [vmem:[#allocation3 + $0x184] sm:$0xf] %vm1228_vm4, %v2722_v61  ;;  %v2790_v60 = vld [vmem:[#allocation2 + $0x1c] sm:$0xf]  ;;  %v2851_v12 = vor.u32 %v2850_v13, %v2846_v17  ;;  %v2791_v41 = vld [vmem:[#allocation2 + $0x20] sm:$0x1] }
 0x527   : > { %v2859_v25 = vshrl.u32 %v2789_v21, 16  ;;  %v2862_v47 = vshll.u32 %v2789_v21, 16  ;;  %v2868_v0 = vshll.u32 %v2790_v60, 16  ;;  %v2872_v26 = vshrl.u32 %v2790_v60, 16  ;;  %v2723_v42 = vld [vmem:[#allocation2 + $0x18] sm:$0xf] }
 0x528   : > { %v2842_v14 = vrot.slane %v2841_v1, 4  ;;  %8677 = vmatmul.mubr.msk.bf16.gmra.mxu0 %vm413_vm1, %v9056_v20  ;;  %v2852_v45 = vrot.slane %v2851_v12, 4  ;;  %v2856_v8 = vrot.slane %v2854_v27, 5  ;;  %v2878_v48 = vshll.u32 %v2791_v41, 16  ;;  %2756 = vst.msk [vmem:[#allocation3 + $0x188] sm:$0xf] %vm1228_vm4, %v2723_v42 }
 0x529   : > { %v2861_v37 = vrot.slane %v2859_v25, 4  ;;  %8680 = vmatprep.mubr.msk.bf16.mxu0 %vm413_vm1, %v9059_v33  ;;  %v2864_v58 = vrot.slane %v2862_v47, 5  ;;  %v9058_v3 = vld [vmem:[#allocation3 + $0x48] sm:$0xff]   ;;  %v9060_v43 = vld [vmem:[#allocation3 + $0x50] sm:$0xff]   ;;  %v2870_v46 = vrot.slane %v2868_v0, 5  ;;  %v2874_v57 = vrot.slane %v2872_v26, 4 }
 0x52a   : > { %v2847_v30 = vsel %vm10494_vm10, %v2842_v14, %v2846_v17  ;;  %v2857_v52 = vsel %vm10494_vm10, %v2852_v45, %v2856_v8  ;;  %v2724_v23 = vld [vmem:[#allocation2 + $0x1c] sm:$0xf]  ;;  %v2792_v36 = vld [vmem:[#allocation2 + $0x24] sm:$0xf]  ;;  %v2793_v49 = vld [vmem:[#allocation2 + $0x28] sm:$0xf]  ;;  %v2923_v11 = vor.u32 %v11309_v18, %v11305_v51 }
 0x52b   : > { %3251 = vst.msk [vmem:[#allocation3 + $0x200] sm:$0xf] %vm1228_vm4, %v2847_v30  ;;  %3252 = vst.msk [vmem:[#allocation3 + $0x204] sm:$0xf] %vm1228_vm4, %v2857_v52  ;;  %v2865_v38 = vor.u32 %v2864_v58, %v2861_v37  ;;  %v2794_v2 = vld [vmem:[#allocation2 + $0x2c] sm:$0x1]  ;;  %v2875_v55 = vor.u32 %v2874_v57, %v2870_v46 }
 0x52c   : > { %2757 = vst.msk [vmem:[#allocation3 + $0x18c] sm:$0xf] %vm1228_vm4, %v2724_v23  ;;  %8641 = vmatmul.mubr.msk.bf16.gmra.mxu1 %vm413_vm1, %v9058_v3  ;;  %v9062_v7 = vld [vmem:[#allocation3 + $0x158] sm:$0xff]   ;;  %v2883_v22 = vshrl.u32 %v2792_v36, 16  ;;  %v2886_v54 = vshll.u32 %v2792_v36, 16  ;;  %v2892_v9 = vshll.u32 %v2793_v49, 16 }
 0x52d   : > { %8644 = vmatprep.mubr.msk.bf16.mxu1 %vm413_vm1, %v9060_v43  ;;  %v2866_v24 = vrot.slane %v2865_v38, 4  ;;  %v2880_v39 = vrot.slane %v2878_v48, 5  ;;  %v2896_v50 = vshrl.u32 %v2793_v49, 16  ;;  %v2902_v19 = vshll.u32 %v2794_v2, 16  ;;  %v2725_v5 = vld [vmem:[#allocation2 + $0x24] sm:$0xf] }
 0x52e   : > { %v2876_v62 = vrot.slane %v2875_v55, 4  ;;  %v2885_v4 = vrot.slane %v2883_v22, 4  ;;  %v2888_v35 = vrot.slane %v2886_v54, 5  ;;  %v2894_v59 = vrot.slane %v2892_v9, 5  ;;  %v2726_v32 = vld [vmem:[#allocation2 + $0x28] sm:$0xf] }
 0x52f   : > { %2758 = vst.msk [vmem:[#allocation3 + $0x190] sm:$0xf] %vm1228_vm4, %v2725_v5  ;;  %v9064_v10 = vld [vmem:[#allocation3 + $0x160] sm:$0xff]   ;;  %v2871_v6 = vsel %vm10494_vm10, %v2866_v24, %v2870_v46  ;;  %v2898_v28 = vrot.slane %v2896_v50, 4  ;;  %2759 = vst.msk [vmem:[#allocation3 + $0x194] sm:$0xf] %vm1228_vm4, %v2726_v32 }
 0x530   : > { %v2795_v63 = vld [vmem:[#allocation2 + $0x30] sm:$0xf]  ;;  %v2797_v34 = vld [vmem:[#allocation2 + $0x38] sm:$0x1]  ;;  %8681 = vmatmul.mubr.msk.bf16.gmra.mxu0 %vm413_vm1, %v9062_v7  ;;  %v2881_v53 = vsel %vm10494_vm10, %v2876_v62, %v2880_v39  ;;  %3253 = vst.msk [vmem:[#allocation3 + $0x208] sm:$0xf] %vm1228_vm4, %v2871_v6  ;;  %v2889_v20 = vor.u32 %v2888_v35, %v2885_v4 }
 0x531   : > { %v9063_v15 = vld [vmem:[#allocation3 + $0x58] sm:$0xff]   ;;  %v2907_v17 = vshrl.u32 %v2795_v63, 16  ;;  %v2910_v13 = vshll.u32 %v2795_v63, 16  ;;  %8684 = vmatprep.mubr.msk.bf16.mxu0 %vm413_vm1, %v9064_v10  ;;  %3254 = vst.msk [vmem:[#allocation3 + $0x20c] sm:$0xf] %vm1228_vm4, %v2881_v53  ;;  %v2899_v61 = vor.u32 %v2898_v28, %v2894_v59  ;;  %v2924_v33 = vrot.slane %v2923_v11, 4 }
 0x532   : > { %v2727_v27 = vld [vmem:[#allocation2 + $0x30] sm:$0xf]  ;;  %v2926_v1 = vshll.u32 %v2797_v34, 16  ;;  %v2890_v21 = vrot.slane %v2889_v20, 4  ;;  %v2904_v60 = vrot.slane %v2902_v19, 5  ;;  %v9065_v12 = vld [vmem:[#allocation3 + $0x60] sm:$0xff]  }
 0x533   : > { %2760 = vst.msk [vmem:[#allocation3 + $0x198] sm:$0xf] %vm1228_vm4, %v2727_v27  ;;  %v2900_v41 = vrot.slane %v2899_v61, 4  ;;  %v2909_v25 = vrot.slane %v2907_v17, 4  ;;  %v2912_v18 = vrot.slane %v2910_v13, 5  ;;  %v9066_v48 = vld [vmem:[#allocation3 + $0x168] sm:$0xff]  }
 0x534   : > { %v2928_v14 = vrot.slane %v2926_v1, 5  ;;  %8645 = vmatmul.mubr.msk.bf16.gmra.mxu1 %vm413_vm1, %v9063_v15  ;;  %v2895_v47 = vsel %vm10494_vm10, %v2890_v21, %v2894_v59  ;;  %v2798_v0 = vld [vmem:[#allocation2 + $0x3c] sm:$0xf]  ;;  %v2799_v26 = vld [vmem:[#allocation2 + $0x40] sm:$0xf]  ;;  %v9068_v46 = vld [vmem:[#allocation3 + $0x170] sm:$0xff]  }
 0x535   : > { %v2800_v45 = vld [vmem:[#allocation2 + $0x44] sm:$0x1]  ;;  %8648 = vmatprep.mubr.msk.bf16.mxu1 %vm413_vm1, %v9065_v12  ;;  %v2905_v8 = vsel %vm10494_vm10, %v2900_v41, %v2904_v60  ;;  %3255 = vst.msk [vmem:[#allocation3 + $0x210] sm:$0xf] %vm1228_vm4, %v2895_v47  ;;  %v2913_v37 = vor.u32 %v2912_v18, %v2909_v25  ;;  %v2931_v30 = vshrl.u32 %v2798_v0, 16  ;;  %v2934_v3 = vshll.u32 %v2798_v0, 16 }
 0x536   : > { %v2929_v42 = vsel %vm10494_vm10, %v2924_v33, %v2928_v14  ;;  %v2729_v58 = vld [vmem:[#allocation2 + $0x3c] sm:$0xf]  ;;  %3256 = vst.msk [vmem:[#allocation3 + $0x214] sm:$0xf] %vm1228_vm4, %v2905_v8  ;;  %v2940_v43 = vshll.u32 %v2799_v26, 16  ;;  %v2944_v52 = vshrl.u32 %v2799_v26, 16 }
 0x537   : > { %3258 = vst.msk [vmem:[#allocation3 + $0x21c] sm:$0xf] %vm1228_vm4, %v2929_v42  ;;  %2762 = vst.msk [vmem:[#allocation3 + $0x1a0] sm:$0xf] %vm1228_vm4, %v2729_v58  ;;  %v2914_v57 = vrot.slane %v2913_v37, 4  ;;  %v2933_v23 = vrot.slane %v2931_v30, 4 }
 0x538   : > { %8685 = vmatmul.mubr.msk.bf16.gmra.mxu0 %vm413_vm1, %v9066_v48  ;;  %v2936_v38 = vrot.slane %v2934_v3, 5  ;;  %v2942_v49 = vrot.slane %v2940_v43, 5  ;;  %v2946_v2 = vrot.slane %v2944_v52, 4  ;;  %v2950_v11 = vshll.u32 %v2800_v45, 16  ;;  %v2730_v7 = vld [vmem:[#allocation2 + $0x40] sm:$0xf] }
 0x539   : > { %8688 = vmatprep.mubr.msk.bf16.mxu0 %vm413_vm1, %v9068_v46  ;;  %v2919_v36 = vsel %vm10494_vm10, %v2914_v57, %v11305_v51  ;;  %v9067_v55 = vld [vmem:[#allocation3 + $0x68] sm:$0xff]   ;;  %2763 = vst.msk [vmem:[#allocation3 + $0x1a4] sm:$0xf] %vm1228_vm4, %v2730_v7  ;;  %v2801_v54 = vld [vmem:[#allocation2 + $0x48] sm:$0xf]  ;;  %v9070_v51 = vld [vmem:[#allocation3 + $0x178] sm:$0xff]  }
 0x53a   : > { %3257 = vst.msk [vmem:[#allocation3 + $0x218] sm:$0xf] %vm1228_vm4, %v2919_v36  ;;  %v2937_v22 = vor.u32 %v2936_v38, %v2933_v23  ;;  %v2802_v9 = vld [vmem:[#allocation2 + $0x4c] sm:$0xf]  ;;  %v2947_v39 = vor.u32 %v2946_v2, %v2942_v49  ;;  %v2955_v50 = vshrl.u32 %v2801_v54, 16  ;;  %v2958_v19 = vshll.u32 %v2801_v54, 16 }
 0x53b   : > { %v9069_v24 = vld [vmem:[#allocation3 + $0x70] sm:$0xff]   ;;  %v2964_v5 = vshll.u32 %v2802_v9, 16  ;;  %v2803_v35 = vld [vmem:[#allocation2 + $0x50] sm:$0x1]  ;;  %v2968_v59 = vshrl.u32 %v2802_v9, 16  ;;  %v2952_v10 = vrot.slane %v2950_v11, 5 }
 0x53c   : > { %v2731_v62 = vld [vmem:[#allocation2 + $0x48] sm:$0xf]  ;;  %8649 = vmatmul.mubr.msk.bf16.gmra.mxu1 %vm413_vm1, %v9067_v55  ;;  %v2938_v4 = vrot.slane %v2937_v22, 4  ;;  %v2948_v32 = vrot.slane %v2947_v39, 4  ;;  %v9072_v6 = vld [vmem:[#allocation3 + $0x200] sm:$0xff]   ;;  %v2957_v63 = vrot.slane %v2955_v50, 4 }
 0x53d   : > { %2764 = vst.msk [vmem:[#allocation3 + $0x1a8] sm:$0xf] %vm1228_vm4, %v2731_v62  ;;  %8652 = vmatprep.mubr.msk.bf16.mxu1 %vm413_vm1, %v9069_v24  ;;  %v2960_v34 = vrot.slane %v2958_v19, 5  ;;  %v2966_v15 = vrot.slane %v2964_v5, 5  ;;  %v2970_v20 = vrot.slane %v2968_v59, 4  ;;  %v2974_v17 = vshll.u32 %v2803_v35, 16 }
 0x53e   : > { %v2943_v28 = vsel %vm10494_vm10, %v2938_v4, %v2942_v49  ;;  %v2953_v53 = vsel %vm10494_vm10, %v2948_v32, %v2952_v10  ;;  %v2732_v13 = vld [vmem:[#allocation2 + $0x4c] sm:$0xf]  ;;  %v2804_v27 = vld [vmem:[#allocation2 + $0x54] sm:$0xf]  ;;  %v2805_v33 = vld [vmem:[#allocation2 + $0x58] sm:$0xf] }
 0x53f   : > { %3259 = vst.msk [vmem:[#allocation3 + $0x220] sm:$0xf] %vm1228_vm4, %v2943_v28  ;;  %3260 = vst.msk [vmem:[#allocation3 + $0x224] sm:$0xf] %vm1228_vm4, %v2953_v53  ;;  %v2961_v61 = vor.u32 %v2960_v34, %v2957_v63  ;;  %v2806_v1 = vld [vmem:[#allocation2 + $0x5c] sm:$0x1]  ;;  %v2971_v12 = vor.u32 %v2970_v20, %v2966_v15 }
 0x540   : > { %8689 = vmatmul.mubr.msk.bf16.gmra.mxu0 %vm413_vm1, %v9070_v51  ;;  %2765 = vst.msk [vmem:[#allocation3 + $0x1ac] sm:$0xf] %vm1228_vm4, %v2732_v13  ;;  %v2979_v21 = vshrl.u32 %v2804_v27, 16  ;;  %v2982_v60 = vshll.u32 %v2804_v27, 16  ;;  %v2988_v41 = vshll.u32 %v2805_v33, 16  ;;  %v9071_v25 = vld [vmem:[#allocation3 + $0x78] sm:$0xff]  }
 0x541   : > { %8732 = vmatprep.mubr.msk.bf16.mxu0 %vm413_vm1, %v9072_v6  ;;  %v9073_v18 = vld [vmem:[#allocation3 + $0x180] sm:$0xff]   ;;  %v2962_v14 = vrot.slane %v2961_v61, 4  ;;  %v2992_v26 = vshrl.u32 %v2805_v33, 16  ;;  %v2972_v45 = vrot.slane %v2971_v12, 4  ;;  %v2976_v8 = vrot.slane %v2974_v17, 5  ;;  %v9074_v30 = vld [vmem:[#allocation3 + $0x208] sm:$0xff]  }
 0x542   : > { %v2981_v47 = vrot.slane %v2979_v21, 4  ;;  %v2984_v0 = vrot.slane %v2982_v60, 5  ;;  %v2990_v37 = vrot.slane %v2988_v41, 5  ;;  %v2998_v42 = vshll.u32 %v2806_v1, 16  ;;  %v2733_v43 = vld [vmem:[#allocation2 + $0x54] sm:$0xf] }
 0x543   : > { %v2967_v58 = vsel %vm10494_vm10, %v2962_v14, %v2966_v15  ;;  %v2994_v3 = vrot.slane %v2992_v26, 4  ;;  %v2734_v52 = vld [vmem:[#allocation2 + $0x58] sm:$0xf]  ;;  %v9077_v57 = vld [vmem:[#allocation3 + $0x210] sm:$0xff]   ;;  %v2977_v23 = vsel %vm10494_vm10, %v2972_v45, %v2976_v8  ;;  %2766 = vst.msk [vmem:[#allocation3 + $0x1b0] sm:$0xf] %vm1228_vm4, %v2733_v43 }
 0x544   : > { %8653 = vmatmul.mubr.msk.bf16.gmra.mxu1 %vm413_vm1, %v9071_v25  ;;  %v2985_v48 = vor.u32 %v2984_v0, %v2981_v47  ;;  %v9097_v46 = vld [vmem:[#allocation7 + $0x60] sm:$0xff]   ;;  %3261 = vst.msk [vmem:[#allocation3 + $0x228] sm:$0xf] %vm1228_vm4, %v2967_v58  ;;  %2767 = vst.msk [vmem:[#allocation3 + $0x1b4] sm:$0xf] %vm1228_vm4, %v2734_v52  ;;  %v3000_v55 = vrot.slane %v2998_v42, 5 }
 0x545   : > { %8696 = vmatprep.mubr.msk.bf16.mxu1 %vm413_vm1, %v9073_v18  ;;  %v2807_v38 = vld [vmem:[#allocation2 + $0x60] sm:$0xf]  ;;  %v2808_v36 = vld [vmem:[#allocation2 + $0x64] sm:$0xf]  ;;  %3262 = vst.msk [vmem:[#allocation3 + $0x22c] sm:$0xf] %vm1228_vm4, %v2977_v23  ;;  %v2995_v2 = vor.u32 %v2994_v3, %v2990_v37 }
 0x546   : > { %v2986_v49 = vrot.slane %v2985_v48, 4  ;;  %v2809_v11 = vld [vmem:[#allocation2 + $0x68] sm:$0x1]  ;;  %v3003_v7 = vshrl.u32 %v2807_v38, 16  ;;  %v3006_v22 = vshll.u32 %v2807_v38, 16  ;;  %v3012_v39 = vshll.u32 %v2808_v36, 16 }
 0x547   : > { %v2996_v9 = vrot.slane %v2995_v2, 4  ;;  %v2735_v50 = vld [vmem:[#allocation2 + $0x60] sm:$0xf]  ;;  %v9093_v19 = vld [vmem:[#allocation7 + $0x50] sm:$0xff]   ;;  %v3016_v62 = vshrl.u32 %v2808_v36, 16  ;;  %v3022_v51 = vshll.u32 %v2809_v11, 16 }
 0x548   : > { %8733 = vmatmul.mubr.msk.bf16.vlgmr.msra.gmra.mxu0 %vm413_vm1, %v9074_v30  ;;  %v2991_v54 = vsel %vm10494_vm10, %v2986_v49, %v2990_v37  ;;  %v3005_v24 = vrot.slane %v3003_v7, 4  ;;  %v3008_v5 = vrot.slane %v3006_v22, 5  ;;  %v2736_v4 = vld [vmem:[#allocation2 + $0x64] sm:$0xf]  ;;  %2768 = vst.msk [vmem:[#allocation3 + $0x1b8] sm:$0xf] %vm1228_vm4, %v2735_v50 }
 0x549   : > { %8736 = vmatprep.mubr.msk.bf16.mxu0 %vm413_vm1, %v9077_v57  ;;  %8801 = vmatpush3.bf16.msra.mxu0 %v11230_v56  ;;  %3263 = vst.msk [vmem:[#allocation3 + $0x230] sm:$0xf] %vm1228_vm4, %v2991_v54  ;;  %v11384_v35 = vld [vmem:[#allocation7 + $0x88] sm:$0xff]   ;;  %v9078_v32 = vld [vmem:[#allocation3 + $0x190] sm:$0xff]   ;;  %v3001_v10 = vsel %vm10494_vm10, %v2996_v9, %v3000_v55  ;;  %v3014_v6 = vrot.slane %v3012_v39, 5  ;;  %v3018_v63 = vrot.slane %v3016_v62, 4 }
 0x54a   : > { %v9076_v59 = vld [vmem:[#allocation3 + $0x188] sm:$0xff]   ;;  %2769 = vst.msk [vmem:[#allocation3 + $0x1bc] sm:$0xf] %vm1228_vm4, %v2736_v4  ;;  %v2810_v28 = vld [vmem:[#allocation2 + $0x6c] sm:$0xf]  ;;  %8802 = vmatprep.subr.bf16.mxu0 %v9097_v46  ;;  %v3009_v56 = vor.u32 %v3008_v5, %v3005_v24  ;;  %v11391_v20 = vld [vmem:[#allocation7 + $0x78] sm:$0xff]  }
 0x54b   : > { %3264 = vst.msk [vmem:[#allocation3 + $0x234] sm:$0xf] %vm1228_vm4, %v3001_v10  ;;  %v2811_v34 = vld [vmem:[#allocation2 + $0x70] sm:$0xf]  ;;  %v2812_v15 = vld [vmem:[#allocation2 + $0x74] sm:$0x1]  ;;  %v3019_v61 = vor.u32 %v3018_v63, %v3014_v6 }
 0x54c   : > { %v3027_v53 = vshrl.u32 %v2810_v28, 16  ;;  %8697 = vmatmul.mubr.msk.bf16.vlgmr.msra.gmra.mxu1 %vm413_vm1, %v9076_v59  ;;  %v9080_v17 = vld [vmem:[#allocation3 + $0x218] sm:$0xff]   ;;  %v9082_v13 = vld [vmem:[#allocation3 + $0x220] sm:$0xff]   ;;  %v3010_v27 = vrot.slane %v3009_v56, 4  ;;  %v3024_v33 = vrot.slane %v3022_v51, 5  ;;  %v3030_v21 = vshll.u32 %v2810_v28, 16 }
 0x54d   : > { %8765 = vmatpush3.bf16.msra.mxu1 %v11242_v29  ;;  %8700 = vmatprep.mubr.msk.bf16.mxu1 %vm413_vm1, %v9078_v32  ;;  %v3036_v60 = vshll.u32 %v2811_v34, 16  ;;  %v3040_v12 = vshrl.u32 %v2811_v34, 16  ;;  %v2737_v41 = vld [vmem:[#allocation2 + $0x6c] sm:$0xf]  ;;  %v3020_v18 = vrot.slane %v3019_v61, 4  ;;  %v3046_v14 = vshll.u32 %v2812_v15, 16 }
 0x54e   : > { %v3029_v1 = vrot.slane %v3027_v53, 4  ;;  %8766 = vmatprep.subr.bf16.mxu1 %v9093_v19  ;;  %8803 = vmatpush3.bf16.msra.mxu0 %v9097_v46  ;;  %v3015_v25 = vsel %vm10494_vm10, %v3010_v27, %v3014_v6  ;;  %v2738_v29 = vld [vmem:[#allocation2 + $0x70] sm:$0xf]  ;;  %2770 = vst.msk [vmem:[#allocation3 + $0x1c0] sm:$0xf] %vm1228_vm4, %v2737_v41  ;;  %v3032_v0 = vrot.slane %v3030_v21, 5 }
 0x54f   : > { %v2813_v47 = vld [vmem:[#allocation2 + $0x78] sm:$0xf]  ;;  %8872 = vmatprep.subr.bf16.mxu0 %v11384_v35  ;;  %3265 = vst.msk [vmem:[#allocation3 + $0x238] sm:$0xf] %vm1228_vm4, %v3015_v25  ;;  %v3038_v26 = vrot.slane %v3036_v60, 5  ;;  %v3025_v45 = vsel %vm10494_vm10, %v3020_v18, %v3024_v33  ;;  %v3042_v8 = vrot.slane %v3040_v12, 4 }
 0x550   : > { %8737 = vmatmul.mubr.msk.bf16.gmra.mxu0 %vm413_vm1, %v9080_v17  ;;  %2771 = vst.msk [vmem:[#allocation3 + $0x1c4] sm:$0xf] %vm1228_vm4, %v2738_v29  ;;  %v3051_v37 = vshrl.u32 %v2813_v47, 16  ;;  %v9081_v42 = vld [vmem:[#allocation3 + $0x198] sm:$0xff]   ;;  %3266 = vst.msk [vmem:[#allocation3 + $0x23c] sm:$0xf] %vm1228_vm4, %v3025_v45  ;;  %v3033_v30 = vor.u32 %v3032_v0, %v3029_v1 }
 0x551   : > { %8740 = vmatprep.mubr.msk.bf16.mxu0 %vm413_vm1, %v9082_v13  ;;  %8767 = vmatpush3.bf16.msra.mxu1 %v9093_v19  ;;  %v2814_v58 = vld [vmem:[#allocation2 + $0x7c] sm:$0xf]  ;;  %v3054_v48 = vshll.u32 %v2813_v47, 16  ;;  %v3043_v43 = vor.u32 %v3042_v8, %v3038_v26  ;;  %v2815_v52 = vld [vmem:[#allocation2 + $0x80] sm:$0x1]  ;;  %v3048_v36 = vrot.slane %v3046_v14, 5 }
 0x552   : > { %8836 = vmatprep.subr.bf16.mxu1 %v11391_v20  ;;  %v9083_v3 = vld [vmem:[#allocation3 + $0x1a0] sm:$0xff]   ;;  %v3053_v46 = vrot.slane %v3051_v37, 4  ;;  %v3060_v57 = vshll.u32 %v2814_v58, 16  ;;  %v3064_v23 = vshrl.u32 %v2814_v58, 16  ;;  %v3034_v38 = vrot.slane %v3033_v30, 4  ;;  %v9084_v9 = vld [vmem:[#allocation3 + $0x228] sm:$0xff]  }
 0x553   : > { %v3056_v49 = vrot.slane %v3054_v48, 5  ;;  %v2739_v2 = vld [vmem:[#allocation2 + $0x78] sm:$0xf]  ;;  %v3044_v11 = vrot.slane %v3043_v43, 4  ;;  %v3070_v22 = vshll.u32 %v2815_v52, 16  ;;  %v9086_v19 = vld [vmem:[#allocation3 + $0x230] sm:$0xff]  }
 0x554   : > { %8701 = vmatmul.mubr.msk.bf16.gmra.mxu1 %vm413_vm1, %v9081_v42  ;;  %v3062_v7 = vrot.slane %v3060_v57, 5  ;;  %v3066_v55 = vrot.slane %v3064_v23, 4  ;;  %v2740_v54 = vld [vmem:[#allocation2 + $0x7c] sm:$0xf]  ;;  %2772 = vst.msk [vmem:[#allocation3 + $0x1c8] sm:$0xf] %vm1228_vm4, %v2739_v2  ;;  %v3039_v24 = vsel %vm10494_vm10, %v3034_v38, %v3038_v26 }
 0x555   : > { %8704 = vmatprep.mubr.msk.bf16.mxu1 %vm413_vm1, %v9083_v3  ;;  %v3057_v39 = vor.u32 %v3056_v49, %v3053_v46  ;;  %2773 = vst.msk [vmem:[#allocation3 + $0x1cc] sm:$0xf] %vm1228_vm4, %v2740_v54  ;;  %v2816_v50 = vld [vmem:[#allocation2 + $0x84] sm:$0xf]  ;;  %v3049_v5 = vsel %vm10494_vm10, %v3044_v11, %v3048_v36  ;;  %3267 = vst.msk [vmem:[#allocation3 + $0x240] sm:$0xf] %vm1228_vm4, %v3039_v24 }
 0x556   : > { %v3067_v62 = vor.u32 %v3066_v55, %v3062_v7  ;;  %v3075_v51 = vshrl.u32 %v2816_v50, 16  ;;  %3268 = vst.msk [vmem:[#allocation3 + $0x244] sm:$0xf] %vm1228_vm4, %v3049_v5  ;;  %v2817_v59 = vld [vmem:[#allocation2 + $0x88] sm:$0xf]  ;;  %v3078_v10 = vshll.u32 %v2816_v50, 16 }
 0x557   : > { %v3058_v4 = vrot.slane %v3057_v39, 4  ;;  %v2818_v32 = vld [vmem:[#allocation2 + $0x8c] sm:$0x1]  ;;  %v3072_v28 = vrot.slane %v3070_v22, 5  ;;  %v3084_v63 = vshll.u32 %v2817_v59, 16  ;;  %v9085_v34 = vld [vmem:[#allocation3 + $0x1a8] sm:$0xff]  }
 0x558   : > { %8741 = vmatmul.mubr.msk.bf16.gmra.mxu0 %vm413_vm1, %v9084_v9  ;;  %v3068_v6 = vrot.slane %v3067_v62, 4  ;;  %v3077_v56 = vrot.slane %v3075_v51, 4  ;;  %v3080_v53 = vrot.slane %v3078_v10, 5  ;;  %v3088_v17 = vshrl.u32 %v2817_v59, 16  ;;  %v2741_v27 = vld [vmem:[#allocation2 + $0x84] sm:$0xf] }
 0x559   : > { %8744 = vmatprep.mubr.msk.bf16.mxu0 %vm413_vm1, %v9086_v19  ;;  %v3063_v15 = vsel %vm10494_vm10, %v3058_v4, %v3062_v7  ;;  %v3094_v13 = vshll.u32 %v2818_v32, 16  ;;  %v9087_v61 = vld [vmem:[#allocation3 + $0x1b0] sm:$0xff]   ;;  %v3086_v1 = vrot.slane %v3084_v63, 5  ;;  %2774 = vst.msk [vmem:[#allocation3 + $0x1d0] sm:$0xf] %vm1228_vm4, %v2741_v27  ;;  %v9088_v47 = vld [vmem:[#allocation3 + $0x238] sm:$0xff]  }
 0x55a   : > { %v3073_v33 = vsel %vm10494_vm10, %v3068_v6, %v3072_v28  ;;  %3269 = vst.msk [vmem:[#allocation3 + $0x248] sm:$0xf] %vm1228_vm4, %v3063_v15  ;;  %v2742_v21 = vld [vmem:[#allocation2 + $0x88] sm:$0xf]  ;;  %v2819_v60 = vld [vmem:[#allocation2 + $0x90] sm:$0xf]  ;;  %v3081_v12 = vor.u32 %v3080_v53, %v3077_v56 }
 0x55b   : > { %3270 = vst.msk [vmem:[#allocation3 + $0x24c] sm:$0xf] %vm1228_vm4, %v3073_v33  ;;  %v3090_v41 = vrot.slane %v3088_v17, 4  ;;  %2775 = vst.msk [vmem:[#allocation3 + $0x1d4] sm:$0xf] %vm1228_vm4, %v2742_v21  ;;  %v3096_v18 = vrot.slane %v3094_v13, 5 }
 0x55c   : > { %8705 = vmatmul.mubr.msk.bf16.gmra.mxu1 %vm413_vm1, %v9085_v34  ;;  %v2820_v25 = vld [vmem:[#allocation2 + $0x94] sm:$0xf]  ;;  %v2821_v14 = vld [vmem:[#allocation2 + $0x98] sm:$0x1]  ;;  %v3099_v29 = vshrl.u32 %v2819_v60, 16  ;;  %v3082_v0 = vrot.slane %v3081_v12, 4 }
 0x55d   : > { %8708 = vmatprep.mubr.msk.bf16.mxu1 %vm413_vm1, %v9087_v61  ;;  %v3091_v26 = vor.u32 %v3090_v41, %v3086_v1  ;;  %v3102_v45 = vshll.u32 %v2819_v60, 16  ;;  %v3108_v8 = vshll.u32 %v2820_v25, 16  ;;  %v9090_v37 = vld [vmem:[#allocation3 + $0x240] sm:$0xff]   ;;  %v3112_v30 = vshrl.u32 %v2820_v25, 16  ;;  %v2743_v46 = vld [vmem:[#allocation2 + $0x90] sm:$0xf] }
 0x55e   : > { %v3101_v42 = vrot.slane %v3099_v29, 4  ;;  %v3118_v58 = vshll.u32 %v2821_v14, 16  ;;  %v3087_v48 = vsel %vm10494_vm10, %v3082_v0, %v3086_v1  ;;  %v9089_v57 = vld [vmem:[#allocation3 + $0x1b8] sm:$0xff]   ;;  %2776 = vst.msk [vmem:[#allocation3 + $0x1d8] sm:$0xf] %vm1228_vm4, %v2743_v46  ;;  %v9091_v7 = vld [vmem:[#allocation3 + $0x1c0] sm:$0xff]  }
 0x55f   : > { %v3092_v3 = vrot.slane %v3091_v26, 4  ;;  %v3104_v43 = vrot.slane %v3102_v45, 5  ;;  %v3110_v52 = vrot.slane %v3108_v8, 5  ;;  %3271 = vst.msk [vmem:[#allocation3 + $0x250] sm:$0xf] %vm1228_vm4, %v3087_v48  ;;  %v3114_v23 = vrot.slane %v3112_v30, 4 }
 0x560   : > { %8745 = vmatmul.mubr.msk.bf16.gmra.mxu0 %vm413_vm1, %v9088_v47  ;;  %v2744_v38 = vld [vmem:[#allocation2 + $0x94] sm:$0xf]  ;;  %v2822_v36 = vld [vmem:[#allocation2 + $0x9c] sm:$0xf]  ;;  %v2823_v11 = vld [vmem:[#allocation2 + $0xa0] sm:$0xf] }
 0x561   : > { %8748 = vmatprep.mubr.msk.bf16.mxu0 %vm413_vm1, %v9090_v37  ;;  %v3097_v49 = vsel %vm10494_vm10, %v3092_v3, %v3096_v18  ;;  %v3105_v2 = vor.u32 %v3104_v43, %v3101_v42  ;;  %2777 = vst.msk [vmem:[#allocation3 + $0x1dc] sm:$0xf] %vm1228_vm4, %v2744_v38  ;;  %v3115_v55 = vor.u32 %v3114_v23, %v3110_v52  ;;  %v3123_v22 = vshrl.u32 %v2822_v36, 16  ;;  %v2824_v24 = vld [vmem:[#allocation2 + $0xa4] sm:$0x1] }
 0x562   : > { %3272 = vst.msk [vmem:[#allocation3 + $0x254] sm:$0xf] %vm1228_vm4, %v3097_v49  ;;  %v3120_v9 = vrot.slane %v3118_v58, 5  ;;  %v3126_v39 = vshll.u32 %v2822_v36, 16  ;;  %v3132_v50 = vshll.u32 %v2823_v11, 16  ;;  %v9092_v19 = vld [vmem:[#allocation3 + $0x248] sm:$0xff]  }
 0x563   : > { %v3106_v54 = vrot.slane %v3105_v2, 4  ;;  %v3116_v5 = vrot.slane %v3115_v55, 4  ;;  %v3125_v62 = vrot.slane %v3123_v22, 4  ;;  %v3136_v51 = vshrl.u32 %v2823_v11, 16  ;;  %v2745_v4 = vld [vmem:[#allocation2 + $0x9c] sm:$0xf] }
 0x564   : > { %8709 = vmatmul.mubr.msk.bf16.gmra.mxu1 %vm413_vm1, %v9089_v57  ;;  %v3128_v32 = vrot.slane %v3126_v39, 5  ;;  %v3134_v10 = vrot.slane %v3132_v50, 5  ;;  %v2746_v6 = vld [vmem:[#allocation2 + $0xa0] sm:$0xf]  ;;  %2778 = vst.msk [vmem:[#allocation3 + $0x1e0] sm:$0xf] %vm1228_vm4, %v2745_v4 }
 0x565   : > { %8712 = vmatprep.mubr.msk.bf16.mxu1 %vm413_vm1, %v9091_v7  ;;  %v3111_v59 = vsel %vm10494_vm10, %v3106_v54, %v3110_v52  ;;  %v2825_v28 = vld [vmem:[#allocation2 + $0xa8] sm:$0xf]  ;;  %v3121_v56 = vsel %vm10494_vm10, %v3116_v5, %v3120_v9  ;;  %v3138_v63 = vrot.slane %v3136_v51, 4  ;;  %v3142_v34 = vshll.u32 %v2824_v24, 16  ;;  %2779 = vst.msk [vmem:[#allocation3 + $0x1e4] sm:$0xf] %vm1228_vm4, %v2746_v6 }
 0x566   : > { %3273 = vst.msk [vmem:[#allocation3 + $0x258] sm:$0xf] %vm1228_vm4, %v3111_v59  ;;  %v2826_v15 = vld [vmem:[#allocation2 + $0xac] sm:$0xf]  ;;  %v2827_v53 = vld [vmem:[#allocation2 + $0xb0] sm:$0x1]  ;;  %v3129_v13 = vor.u32 %v3128_v32, %v3125_v62 }
 0x567   : > { %v9094_v17 = vld [vmem:[#allocation3 + $0x1c8] sm:$0xff]   ;;  %3274 = vst.msk [vmem:[#allocation3 + $0x25c] sm:$0xf] %vm1228_vm4, %v3121_v56  ;;  %v3147_v27 = vshrl.u32 %v2825_v28, 16  ;;  %v3150_v61 = vshll.u32 %v2825_v28, 16  ;;  %v9096_v33 = vld [vmem:[#allocation3 + $0x1d0] sm:$0xff]   ;;  %v3139_v1 = vor.u32 %v3138_v63, %v3134_v10 }
 0x568   : > { %8749 = vmatmul.mubr.msk.bf16.gmra.mxu0 %vm413_vm1, %v9092_v19  ;;  %v3156_v21 = vshll.u32 %v2826_v15, 16  ;;  %v3160_v60 = vshrl.u32 %v2826_v15, 16  ;;  %v3166_v12 = vshll.u32 %v2827_v53, 16  ;;  %v3130_v25 = vrot.slane %v3129_v13, 4  ;;  %v2747_v45 = vld [vmem:[#allocation2 + $0xa8] sm:$0xf] }
 0x569   : > { %v9095_v41 = vld [vmem:[#allocation3 + $0x250] sm:$0xff]   ;;  %v3149_v18 = vrot.slane %v3147_v27, 4  ;;  %v3152_v14 = vrot.slane %v3150_v61, 5  ;;  %v3140_v29 = vrot.slane %v3139_v1, 4  ;;  %v3144_v47 = vrot.slane %v3142_v34, 5  ;;  %v9099_v11 = vld [vmem:[#allocation3 + $0x1d8] sm:$0xff]  }
 0x56a   : > { %v3158_v0 = vrot.slane %v3156_v21, 5  ;;  %v3162_v26 = vrot.slane %v3160_v60, 4  ;;  %8752 = vmatprep.mubr.msk.bf16.mxu0 %vm413_vm1, %v9095_v41  ;;  %v3135_v8 = vsel %vm10494_vm10, %v3130_v25, %v3134_v10  ;;  %v2748_v42 = vld [vmem:[#allocation2 + $0xac] sm:$0xf]  ;;  %2780 = vst.msk [vmem:[#allocation3 + $0x1e8] sm:$0xf] %vm1228_vm4, %v2747_v45 }
 0x56b   : > { %v3153_v37 = vor.u32 %v3152_v14, %v3149_v18  ;;  %v2828_v30 = vld [vmem:[#allocation2 + $0xb4] sm:$0xf]  ;;  %v2829_v58 = vld [vmem:[#allocation2 + $0xb8] sm:$0xf]  ;;  %v3145_v48 = vsel %vm10494_vm10, %v3140_v29, %v3144_v47  ;;  %3275 = vst.msk [vmem:[#allocation3 + $0x260] sm:$0xf] %vm1228_vm4, %v3135_v8 }
 0x56c   : > { %8713 = vmatmul.mubr.msk.bf16.gmra.mxu1 %vm413_vm1, %v9094_v17  ;;  %v3163_v3 = vor.u32 %v3162_v26, %v3158_v0  ;;  %2781 = vst.msk [vmem:[#allocation3 + $0x1ec] sm:$0xf] %vm1228_vm4, %v2748_v42  ;;  %v2830_v43 = vld [vmem:[#allocation2 + $0xbc] sm:$0x1]  ;;  %v3171_v52 = vshrl.u32 %v2828_v30, 16  ;;  %v3174_v46 = vshll.u32 %v2828_v30, 16 }
 0x56d   : > { %8716 = vmatprep.mubr.msk.bf16.mxu1 %vm413_vm1, %v9096_v33  ;;  %3276 = vst.msk [vmem:[#allocation3 + $0x264] sm:$0xf] %vm1228_vm4, %v3145_v48  ;;  %v3154_v57 = vrot.slane %v3153_v37, 4  ;;  %v3168_v23 = vrot.slane %v3166_v12, 5  ;;  %v3180_v55 = vshll.u32 %v2829_v58, 16  ;;  %v3184_v22 = vshrl.u32 %v2829_v58, 16 }
 0x56e   : > { %v9098_v38 = vld [vmem:[#allocation3 + $0x258] sm:$0xff]   ;;  %v3164_v36 = vrot.slane %v3163_v3, 4  ;;  %v3173_v49 = vrot.slane %v3171_v52, 4  ;;  %v3176_v2 = vrot.slane %v3174_v46, 5  ;;  %v3190_v54 = vshll.u32 %v2830_v43, 16  ;;  %v9101_v62 = vld [vmem:[#allocation3 + $0x1e0] sm:$0xff]  }
 0x56f   : > { %v3159_v7 = vsel %vm10494_vm10, %v3154_v57, %v3158_v0  ;;  %v2749_v9 = vld [vmem:[#allocation2 + $0xb4] sm:$0xf]  ;;  %v2750_v50 = vld [vmem:[#allocation2 + $0xb8] sm:$0xf]  ;;  %v2831_v19 = vld [vmem:[#allocation2 + $0xc0] sm:$0xf] }
 0x570   : > { %8753 = vmatmul.mubr.msk.bf16.gmra.mxu0 %vm413_vm1, %v9098_v38  ;;  %v3169_v24 = vsel %vm10494_vm10, %v3164_v36, %v3168_v23  ;;  %3277 = vst.msk [vmem:[#allocation3 + $0x268] sm:$0xf] %vm1228_vm4, %v3159_v7  ;;  %v3177_v39 = vor.u32 %v3176_v2, %v3173_v49  ;;  %2782 = vst.msk [vmem:[#allocation3 + $0x1f0] sm:$0xf] %vm1228_vm4, %v2749_v9  ;;  %v2832_v5 = vld [vmem:[#allocation2 + $0xc4] sm:$0xf] }
 0x571   : > { %3278 = vst.msk [vmem:[#allocation3 + $0x26c] sm:$0xf] %vm1228_vm4, %v3169_v24  ;;  %v3182_v51 = vrot.slane %v3180_v55, 5  ;;  %v3186_v4 = vrot.slane %v3184_v22, 4  ;;  %2783 = vst.msk [vmem:[#allocation3 + $0x1f4] sm:$0xf] %vm1228_vm4, %v2750_v50 }
 0x572   : > { %v2833_v59 = vld [vmem:[#allocation2 + $0xc8] sm:$0x1]  ;;  %v3195_v32 = vshrl.u32 %v2831_v19, 16  ;;  %v3178_v10 = vrot.slane %v3177_v39, 4  ;;  %v3198_v6 = vshll.u32 %v2831_v19, 16  ;;  %v3204_v28 = vshll.u32 %v2832_v5, 16 }
 0x573   : > { %v3208_v56 = vshrl.u32 %v2832_v5, 16  ;;  %v3187_v63 = vor.u32 %v3186_v4, %v3182_v51  ;;  %v3192_v34 = vrot.slane %v3190_v54, 5  ;;  %v3214_v1 = vshll.u32 %v2833_v59, 16  ;;  %v2751_v21 = vld [vmem:[#allocation2 + $0xc0] sm:$0xf] }
 0x574   : > { %8717 = vmatmul.mubr.msk.bf16.gmra.mxu1 %vm413_vm1, %v9099_v11  ;;  %v3197_v15 = vrot.slane %v3195_v32, 4  ;;  %v9100_v53 = vld [vmem:[#allocation3 + $0x260] sm:$0xff]   ;;  %v3183_v17 = vsel %vm10494_vm10, %v3178_v10, %v3182_v51  ;;  %v3200_v13 = vrot.slane %v3198_v6, 5  ;;  %v3206_v27 = vrot.slane %v3204_v28, 5  ;;  %v2752_v60 = vld [vmem:[#allocation2 + $0xc4] sm:$0xf] }
 0x575   : > { %8720 = vmatprep.mubr.msk.bf16.mxu1 %vm413_vm1, %v9101_v62  ;;  %v3210_v61 = vrot.slane %v3208_v56, 4  ;;  %v3188_v33 = vrot.slane %v3187_v63, 4  ;;  %3279 = vst.msk [vmem:[#allocation3 + $0x270] sm:$0xf] %vm1228_vm4, %v3183_v17  ;;  %8756 = vmatprep.mubr.msk.bf16.mxu0 %vm413_vm1, %v9100_v53  ;;  %2784 = vst.msk [vmem:[#allocation3 + $0x1f8] sm:$0xf] %vm1228_vm4, %v2751_v21 }
 0x576   : > { %v3201_v12 = vor.u32 %v3200_v13, %v3197_v15  ;;  %2785 = vst.msk [vmem:[#allocation3 + $0x1fc] sm:$0xf] %vm1228_vm4, %v2752_v60  ;;  %v3557_v25 = vld [vmem:[#allocation2 + $0x18] sm:$0xf]  ;;  %v3558_v18 = vld [vmem:[#allocation2 + $0x1c] sm:$0xf] }
 0x577   : > { %v3211_v41 = vor.u32 %v3210_v61, %v3206_v27  ;;  %v3283_v14 = vld [vmem:[#allocation2 + $0xc] sm:$0xe]  ;;  %v9103_v29 = vld [vmem:[#allocation3 + $0x1e8] sm:$0xff]   ;;  %v3193_v47 = vsel %vm10494_vm10, %v3188_v33, %v3192_v34  ;;  %v3216_v0 = vrot.slane %v3214_v1, 5  ;;  %3590 = vst.msk [vmem:[#allocation3 + $0x300] sm:$0xf] %vm1228_vm4, %v3557_v25 }
 0x578   : > { %3591 = vst.msk [vmem:[#allocation3 + $0x304] sm:$0xf] %vm1228_vm4, %v3558_v18  ;;  %v7980_v26 = vrot.slane %v3283_v14, 9  ;;  %v9102_v45 = vld [vmem:[#allocation3 + $0x268] sm:$0xff]   ;;  %3280 = vst.msk [vmem:[#allocation3 + $0x274] sm:$0xf] %vm1228_vm4, %v3193_v47 }
 0x579   : > { %v3202_v8 = vrot.slane %v3201_v12, 4  ;;  %v9105_v37 = vld [vmem:[#allocation3 + $0x1f0] sm:$0xff]   ;;  %v3212_v42 = vrot.slane %v3211_v41, 4  ;;  %v3284_v30 = vld [vmem:[#allocation2 + $0x10] sm:$0xf]  ;;  %8757 = vmatmul.mubr.msk.bf16.gmra.mxu0 %vm413_vm1, %v9102_v45 }
 0x57a   : > { %v3285_v58 = vld [vmem:[#allocation2 + $0x14] sm:$0x1]  ;;  %v3381_v3 = vrot.slane %v3284_v30, 5  ;;  %v3559_v52 = vld [vmem:[#allocation2 + $0x24] sm:$0xf]  ;;  %v9129_v60 = vld [vmem:[#allocation7 + $0x70] sm:$0xff]  }
 0x57b   : > { %v3207_v48 = vsel %vm10494_vm10, %v3202_v8, %v3206_v27  ;;  %v3384_v43 = vrot.slane %v3285_v58, 5  ;;  %v3560_v46 = vld [vmem:[#allocation2 + $0x28] sm:$0xf]  ;;  %v3217_v57 = vsel %vm10494_vm10, %v3212_v42, %v3216_v0  ;;  %3592 = vst.msk [vmem:[#allocation3 + $0x308] sm:$0xf] %vm1228_vm4, %v3559_v52  ;;  %v9133_v42 = vld [vmem:[#allocation7 + $0x80] sm:$0xff]  }
 0x57c   : > { %8721 = vmatmul.mubr.msk.bf16.gmra.mxu1 %vm413_vm1, %v9103_v29  ;;  %3281 = vst.msk [vmem:[#allocation3 + $0x278] sm:$0xf] %vm1228_vm4, %v3207_v48  ;;  %3593 = vst.msk [vmem:[#allocation3 + $0x30c] sm:$0xf] %vm1228_vm4, %v3560_v46  ;;  %v3286_v23 = vld [vmem:[#allocation2 + $0x18] sm:$0xe]  ;;  %v3382_v49 = vsel %vm11151_vm15, %v7980_v26, %v3381_v3 }
 0x57d   : > { %v3287_v38 = vld [vmem:[#allocation2 + $0x1c] sm:$0xf]  ;;  %v3288_v36 = vld [vmem:[#allocation2 + $0x20] sm:$0x1]  ;;  %8724 = vmatprep.mubr.msk.bf16.mxu1 %vm413_vm1, %v9105_v37  ;;  %3282 = vst.msk [vmem:[#allocation3 + $0x27c] sm:$0xf] %vm1228_vm4, %v3217_v57 }
 0x57e   : > { %v3383_v2 = vrot.slane %v3381_v3, 4  ;;  %v7981_v11 = vrot.slane %v3286_v23, 9  ;;  %v3388_v7 = vrot.slane %v3287_v38, 5  ;;  %3524 = vst.msk [vmem:[#allocation3 + $0x280] sm:$0xf] %vm1228_vm4, %v3382_v49  ;;  %v3391_v9 = vrot.slane %v3288_v36, 5 }
 0x57f   : > { %v9104_v24 = vld [vmem:[#allocation3 + $0x270] sm:$0xff]   ;;  %v9107_v39 = vld [vmem:[#allocation3 + $0x1f8] sm:$0xff]   ;;  %v3289_v62 = vld [vmem:[#allocation2 + $0x24] sm:$0xe] }
 0x580   : > { %v3385_v55 = vsel %vm11151_vm15, %v3383_v2, %v3384_v43  ;;  %v3389_v22 = vsel %vm11151_vm15, %v7981_v11, %v3388_v7  ;;  %v3390_v54 = vrot.slane %v3388_v7, 4  ;;  %v3561_v50 = vld [vmem:[#allocation2 + $0x30] sm:$0xf]  ;;  %v3562_v5 = vld [vmem:[#allocation2 + $0x34] sm:$0xf]  ;;  %8760 = vmatprep.mubr.msk.bf16.mxu0 %vm413_vm1, %v9104_v24  ;;  %v7982_v59 = vrot.slane %v3289_v62, 9 }
 0x581   : > { %3525 = vst.msk [vmem:[#allocation3 + $0x284] sm:$0xf] %vm1228_vm4, %v3385_v55  ;;  %3526 = vst.msk [vmem:[#allocation3 + $0x288] sm:$0xf] %vm1228_vm4, %v3389_v22  ;;  %v3290_v51 = vld [vmem:[#allocation2 + $0x28] sm:$0xf] }
 0x582   : > { %v3392_v19 = vsel %vm11151_vm15, %v3390_v54, %v3391_v9  ;;  %3594 = vst.msk [vmem:[#allocation3 + $0x310] sm:$0xf] %vm1228_vm4, %v3561_v50  ;;  %3595 = vst.msk [vmem:[#allocation3 + $0x314] sm:$0xf] %vm1228_vm4, %v3562_v5  ;;  %v3291_v4 = vld [vmem:[#allocation2 + $0x2c] sm:$0x1] }
 0x583   : > { %3527 = vst.msk [vmem:[#allocation3 + $0x28c] sm:$0xf] %vm1228_vm4, %v3392_v19  ;;  %v3395_v32 = vrot.slane %v3290_v51, 5  ;;  %v3563_v10 = vld [vmem:[#allocation2 + $0x3c] sm:$0xf]  ;;  %v3398_v34 = vrot.slane %v3291_v4, 5 }
 0x584   : > { %3596 = vst.msk [vmem:[#allocation3 + $0x318] sm:$0xf] %vm1228_vm4, %v3563_v10  ;;  %v9106_v6 = vld [vmem:[#allocation3 + $0x278] sm:$0xff]   ;;  %8725 = vmatmul.mubr.msk.bf16.gmra.mxu1 %vm413_vm1, %v9107_v39  ;;  %v9108_v28 = vld [vmem:[#allocation3 + $0x300] sm:$0xff]   ;;  %v3564_v15 = vld [vmem:[#allocation2 + $0x40] sm:$0xf] }
 0x585   : > { %v3396_v56 = vsel %vm11151_vm15, %v7982_v59, %v3395_v32  ;;  %v3397_v63 = vrot.slane %v3395_v32, 4  ;;  %v3292_v53 = vld [vmem:[#allocation2 + $0x30] sm:$0xe]  ;;  %8761 = vmatmul.mubr.msk.bf16.gmra.mxu0 %vm413_vm1, %v9106_v6  ;;  %3597 = vst.msk [vmem:[#allocation3 + $0x31c] sm:$0xf] %vm1228_vm4, %v3564_v15  ;;  %v9110_v45 = vld [vmem:[#allocation3 + $0x308] sm:$0xff]  }
 0x586   : > { %3528 = vst.msk [vmem:[#allocation3 + $0x290] sm:$0xf] %vm1228_vm4, %v3396_v56  ;;  %v3293_v13 = vld [vmem:[#allocation2 + $0x34] sm:$0xf]  ;;  %v3294_v27 = vld [vmem:[#allocation2 + $0x38] sm:$0x1]  ;;  %8804 = vmatprep.mubr.msk.bf16.mxu0 %vm413_vm1, %v9108_v28  ;;  %v11542_v2 = vpop.f32.mrf.mxu0 }
 0x587   : > { %v3399_v17 = vsel %vm11151_vm15, %v3397_v63, %v3398_v34  ;;  %v7983_v61 = vrot.slane %v3292_v53, 9  ;;  %v3402_v1 = vrot.slane %v3293_v13, 5  ;;  %v3565_v21 = vld [vmem:[#allocation2 + $0x48] sm:$0xf]  ;;  %v3405_v25 = vrot.slane %v3294_v27, 5 }
 0x588   : > { %v9109_v33 = vld [vmem:[#allocation3 + $0x280] sm:$0xff]   ;;  %3529 = vst.msk [vmem:[#allocation3 + $0x294] sm:$0xf] %vm1228_vm4, %v3399_v17  ;;  %3598 = vst.msk [vmem:[#allocation3 + $0x320] sm:$0xf] %vm1228_vm4, %v3565_v21  ;;  %v11552_v4 = vpop.f32.mrf.mxu0 }
 0x589   : > { %8768 = vmatprep.mubr.msk.bf16.mxu1 %vm413_vm1, %v9109_v33  ;;  %v3403_v12 = vsel %vm11151_vm15, %v7983_v61, %v3402_v1  ;;  %v3404_v41 = vrot.slane %v3402_v1, 4  ;;  %v3566_v14 = vld [vmem:[#allocation2 + $0x4c] sm:$0xf]  ;;  %v3295_v47 = vld [vmem:[#allocation2 + $0x3c] sm:$0xe] }
 0x58a   : > { %v9112_v18 = vld [vmem:[#allocation3 + $0x288] sm:$0xff]   ;;  %3530 = vst.msk [vmem:[#allocation3 + $0x298] sm:$0xf] %vm1228_vm4, %v3403_v12  ;;  %3599 = vst.msk [vmem:[#allocation3 + $0x324] sm:$0xf] %vm1228_vm4, %v3566_v14  ;;  %v7984_v8 = vrot.slane %v3295_v47, 9  ;;  %v11567_v61 = vpop.f32.mrf.mxu0 }
 0x58b   : > { %v3406_v29 = vsel %vm11151_vm15, %v3404_v41, %v3405_v25  ;;  %v3296_v0 = vld [vmem:[#allocation2 + $0x40] sm:$0xf]  ;;  %v3297_v26 = vld [vmem:[#allocation2 + $0x44] sm:$0x1]  ;;  %v9113_v30 = vld [vmem:[#allocation3 + $0x310] sm:$0xff]   ;;  %v11565_v27 = vpop.f32.mrf.mxu1 }
 0x58c   : > { %8769 = vmatmul.mubr.msk.bf16.vlgmr.msra.gmra.mxu1 %vm413_vm1, %v9112_v18  ;;  %3531 = vst.msk [vmem:[#allocation3 + $0x29c] sm:$0xf] %vm1228_vm4, %v3406_v29  ;;  %v3409_v37 = vrot.slane %v3296_v0, 5  ;;  %v3412_v58 = vrot.slane %v3297_v26, 5  ;;  %v3567_v48 = vld [vmem:[#allocation2 + $0x54] sm:$0xf]  ;;  %v11580_v26 = vpop.f32.mrf.mxu0 }
 0x58d   : > { %8837 = vmatpush3.bf16.msra.mxu1 %v11391_v20  ;;  %8805 = vmatmul.mubr.msk.bf16.vlgmr.msra.gmra.mxu0 %vm413_vm1, %v9110_v45  ;;  %v3568_v46 = vld [vmem:[#allocation2 + $0x58] sm:$0xf]  ;;  %3600 = vst.msk [vmem:[#allocation3 + $0x328] sm:$0xf] %vm1228_vm4, %v3567_v48  ;;  %v3298_v20 = vld [vmem:[#allocation2 + $0x48] sm:$0xe]  ;;  %v11578_v0 = vpop.f32.mrf.mxu1 }
 0x58e   : > { %v3410_v43 = vsel %vm11151_vm15, %v7984_v8, %v3409_v37  ;;  %v3411_v52 = vrot.slane %v3409_v37, 4  ;;  %8838 = vmatprep.subr.bf16.mxu1 %v9129_v60  ;;  %8808 = vmatprep.mubr.msk.bf16.mxu0 %vm413_vm1, %v9113_v30  ;;  %3601 = vst.msk [vmem:[#allocation3 + $0x32c] sm:$0xf] %vm1228_vm4, %v3568_v46  ;;  %v3299_v57 = vld [vmem:[#allocation2 + $0x4c] sm:$0xf]  ;;  %v7985_v36 = vrot.slane %v3298_v20, 9 }
 0x58f   : > { %v9114_v3 = vld [vmem:[#allocation3 + $0x290] sm:$0xff]   ;;  %8873 = vmatpush3.bf16.msra.mxu0 %v11384_v35  ;;  %3532 = vst.msk [vmem:[#allocation3 + $0x2a0] sm:$0xf] %vm1228_vm4, %v3410_v43  ;;  %v3300_v23 = vld [vmem:[#allocation2 + $0x50] sm:$0x1]  ;;  %v3416_v49 = vrot.slane %v3299_v57, 5  ;;  %v11591_v57 = vpop.f32.mrf.mxu1 }
 0x590   : > { %8772 = vmatprep.mubr.msk.bf16.mxu1 %vm413_vm1, %v9114_v3  ;;  %v3413_v38 = vsel %vm11151_vm15, %v3411_v52, %v3412_v58  ;;  %8874 = vmatprep.subr.bf16.mxu0 %v9133_v42  ;;  %v3569_v35 = vld [vmem:[#allocation2 + $0x60] sm:$0xf]  ;;  %v3570_v11 = vld [vmem:[#allocation2 + $0x64] sm:$0xf]  ;;  %v3419_v22 = vrot.slane %v3300_v23, 5  ;;  %v9116_v50 = vld [vmem:[#allocation3 + $0x318] sm:$0xff]  }
 0x591   : > { %3533 = vst.msk [vmem:[#allocation3 + $0x2a4] sm:$0xf] %vm1228_vm4, %v3413_v38  ;;  %8839 = vmatpush3.bf16.msra.mxu1 %v9129_v60  ;;  %v3417_v7 = vsel %vm11151_vm15, %v7985_v36, %v3416_v49  ;;  %v3418_v55 = vrot.slane %v3416_v49, 4  ;;  %3602 = vst.msk [vmem:[#allocation3 + $0x330] sm:$0xf] %vm1228_vm4, %v3569_v35  ;;  %v9118_v59 = vld [vmem:[#allocation3 + $0x320] sm:$0xff]  }
 0x592   : > { %3603 = vst.msk [vmem:[#allocation3 + $0x334] sm:$0xf] %vm1228_vm4, %v3570_v11  ;;  %v3301_v54 = vld [vmem:[#allocation2 + $0x54] sm:$0xe]  ;;  %3534 = vst.msk [vmem:[#allocation3 + $0x2a8] sm:$0xf] %vm1228_vm4, %v3417_v7 }
 0x593   : > { %v9117_v9 = vld [vmem:[#allocation3 + $0x298] sm:$0xff]   ;;  %v3302_v24 = vld [vmem:[#allocation2 + $0x58] sm:$0xf]  ;;  %v7986_v39 = vrot.slane %v3301_v54, 9  ;;  %8875 = vmatpush3.bf16.msra.mxu0 %v9133_v42  ;;  %v3420_v19 = vsel %vm11151_vm15, %v3418_v55, %v3419_v22  ;;  %v3303_v5 = vld [vmem:[#allocation2 + $0x5c] sm:$0x1] }
 0x594   : > { %v3423_v62 = vrot.slane %v3302_v24, 5  ;;  %v3571_v51 = vld [vmem:[#allocation2 + $0x6c] sm:$0xf]  ;;  %8773 = vmatmul.mubr.msk.bf16.gmra.mxu1 %vm413_vm1, %v9117_v9  ;;  %3535 = vst.msk [vmem:[#allocation3 + $0x2ac] sm:$0xf] %vm1228_vm4, %v3420_v19  ;;  %v3426_v28 = vrot.slane %v3303_v5, 5 }
 0x595   : > { %v3572_v32 = vld [vmem:[#allocation2 + $0x70] sm:$0xf]  ;;  %3604 = vst.msk [vmem:[#allocation3 + $0x338] sm:$0xf] %vm1228_vm4, %v3571_v51  ;;  %8809 = vmatmul.mubr.msk.bf16.gmra.mxu0 %vm413_vm1, %v9116_v50  ;;  %v3304_v56 = vld [vmem:[#allocation2 + $0x60] sm:$0xe]  ;;  %v11593_v23 = vpop.f32.mrf.mxu0 }
 0x596   : > { %v3424_v10 = vsel %vm11151_vm15, %v7986_v39, %v3423_v62  ;;  %v3425_v6 = vrot.slane %v3423_v62, 4  ;;  %3605 = vst.msk [vmem:[#allocation3 + $0x33c] sm:$0xf] %vm1228_vm4, %v3572_v32  ;;  %8812 = vmatprep.mubr.msk.bf16.mxu0 %vm413_vm1, %v9118_v59  ;;  %v3305_v63 = vld [vmem:[#allocation2 + $0x64] sm:$0xf]  ;;  %v7987_v17 = vrot.slane %v3304_v56, 9  ;;  %v11604_v39 = vpop.f32.mrf.mxu1 }
 0x597   : > { %3536 = vst.msk [vmem:[#allocation3 + $0x2b0] sm:$0xf] %vm1228_vm4, %v3424_v10  ;;  %v3306_v34 = vld [vmem:[#allocation2 + $0x68] sm:$0x1]  ;;  %v3430_v13 = vrot.slane %v3305_v63, 5  ;;  %v9120_v33 = vld [vmem:[#allocation3 + $0x328] sm:$0xff]   ;;  %v11606_v50 = vpop.f32.mrf.mxu0 }
 0x598   : > { %v9119_v15 = vld [vmem:[#allocation3 + $0x2a0] sm:$0xff]   ;;  %v3427_v53 = vsel %vm11151_vm15, %v3425_v6, %v3426_v28  ;;  %v3433_v60 = vrot.slane %v3306_v34, 5  ;;  %v3307_v25 = vld [vmem:[#allocation2 + $0x6c] sm:$0xe]  ;;  %v3308_v18 = vld [vmem:[#allocation2 + $0x70] sm:$0xf] }
 0x599   : > { %3537 = vst.msk [vmem:[#allocation3 + $0x2b4] sm:$0xf] %vm1228_vm4, %v3427_v53  ;;  %8776 = vmatprep.mubr.msk.bf16.mxu1 %vm413_vm1, %v9119_v15  ;;  %v3431_v1 = vsel %vm11151_vm15, %v7987_v17, %v3430_v13  ;;  %v3432_v21 = vrot.slane %v3430_v13, 4  ;;  %v3573_v12 = vld [vmem:[#allocation2 + $0x78] sm:$0xf]  ;;  %v7988_v47 = vrot.slane %v3307_v25, 9  ;;  %v11619_v53 = vpop.f32.mrf.mxu0 }
 0x59a   : > { %3538 = vst.msk [vmem:[#allocation3 + $0x2b8] sm:$0xf] %vm1228_vm4, %v3431_v1  ;;  %v3574_v41 = vld [vmem:[#allocation2 + $0x7c] sm:$0xf]  ;;  %3606 = vst.msk [vmem:[#allocation3 + $0x340] sm:$0xf] %vm1228_vm4, %v3573_v12 }
 0x59b   : > { %v9121_v14 = vld [vmem:[#allocation3 + $0x2a8] sm:$0xff]   ;;  %v3434_v29 = vsel %vm11151_vm15, %v3432_v21, %v3433_v60  ;;  %3607 = vst.msk [vmem:[#allocation3 + $0x344] sm:$0xf] %vm1228_vm4, %v3574_v41  ;;  %v9122_v45 = vld [vmem:[#allocation3 + $0x330] sm:$0xff]   ;;  %v3309_v8 = vld [vmem:[#allocation2 + $0x74] sm:$0x1] }
 0x59c   : > { %3539 = vst.msk [vmem:[#allocation3 + $0x2bc] sm:$0xf] %vm1228_vm4, %v3434_v29  ;;  %v3437_v37 = vrot.slane %v3308_v18, 5  ;;  %8777 = vmatmul.mubr.msk.bf16.gmra.mxu1 %vm413_vm1, %v9121_v14  ;;  %v3575_v42 = vld [vmem:[#allocation2 + $0x84] sm:$0xf]  ;;  %v3440_v48 = vrot.slane %v3309_v8, 5 }
 0x59d   : > { %8813 = vmatmul.mubr.msk.bf16.gmra.mxu0 %vm413_vm1, %v9120_v33  ;;  %v3576_v3 = vld [vmem:[#allocation2 + $0x88] sm:$0xf]  ;;  %3608 = vst.msk [vmem:[#allocation3 + $0x348] sm:$0xf] %vm1228_vm4, %v3575_v42  ;;  %v3310_v43 = vld [vmem:[#allocation2 + $0x78] sm:$0xe] }
 0x59e   : > { %8816 = vmatprep.mubr.msk.bf16.mxu0 %vm413_vm1, %v9122_v45  ;;  %v3438_v30 = vsel %vm11151_vm15, %v7988_v47, %v3437_v37  ;;  %v3439_v58 = vrot.slane %v3437_v37, 4  ;;  %3609 = vst.msk [vmem:[#allocation3 + $0x34c] sm:$0xf] %vm1228_vm4, %v3576_v3  ;;  %v3311_v46 = vld [vmem:[#allocation2 + $0x7c] sm:$0xf]  ;;  %v7989_v20 = vrot.slane %v3310_v43, 9  ;;  %v11630_v45 = vpop.f32.mrf.mxu0 }
 0x59f   : > { %3540 = vst.msk [vmem:[#allocation3 + $0x2c0] sm:$0xf] %vm1228_vm4, %v3438_v30  ;;  %v3312_v36 = vld [vmem:[#allocation2 + $0x80] sm:$0x1]  ;;  %v3444_v49 = vrot.slane %v3311_v46, 5  ;;  %v9124_v11 = vld [vmem:[#allocation3 + $0x338] sm:$0xff]  }
 0x5a0   : > { %v9123_v52 = vld [vmem:[#allocation3 + $0x2b0] sm:$0xff]   ;;  %v3441_v38 = vsel %vm11151_vm15, %v3439_v58, %v3440_v48  ;;  %v3577_v35 = vld [vmem:[#allocation2 + $0x90] sm:$0xf]  ;;  %v3447_v22 = vrot.slane %v3312_v36, 5  ;;  %v3578_v54 = vld [vmem:[#allocation2 + $0x94] sm:$0xf]  ;;  %v11617_v34 = vpop.f32.mrf.mxu1 }
 0x5a1   : > { %8780 = vmatprep.mubr.msk.bf16.mxu1 %vm413_vm1, %v9123_v52  ;;  %3541 = vst.msk [vmem:[#allocation3 + $0x2c4] sm:$0xf] %vm1228_vm4, %v3441_v38  ;;  %3610 = vst.msk [vmem:[#allocation3 + $0x350] sm:$0xf] %vm1228_vm4, %v3577_v35  ;;  %v3445_v7 = vsel %vm11151_vm15, %v7989_v20, %v3444_v49  ;;  %v3446_v55 = vrot.slane %v3444_v49, 4 }
 0x5a2   : > { %3542 = vst.msk [vmem:[#allocation3 + $0x2c8] sm:$0xf] %vm1228_vm4, %v3445_v7  ;;  %3611 = vst.msk [vmem:[#allocation3 + $0x354] sm:$0xf] %vm1228_vm4, %v3578_v54  ;;  %v3313_v24 = vld [vmem:[#allocation2 + $0x84] sm:$0xe]  ;;  %v11628_v25 = vpop.f32.mrf.mxu1 }
 0x5a3   : > { %v9125_v9 = vld [vmem:[#allocation3 + $0x2b8] sm:$0xff]   ;;  %v9126_v19 = vld [vmem:[#allocation3 + $0x340] sm:$0xff]   ;;  %v3448_v5 = vsel %vm11151_vm15, %v3446_v55, %v3447_v22  ;;  %v3314_v62 = vld [vmem:[#allocation2 + $0x88] sm:$0xf]  ;;  %v7990_v59 = vrot.slane %v3313_v24, 9 }
 0x5a4   : > { %v3315_v51 = vld [vmem:[#allocation2 + $0x8c] sm:$0x1]  ;;  %8781 = vmatmul.mubr.msk.bf16.gmra.mxu1 %vm413_vm1, %v9125_v9  ;;  %3543 = vst.msk [vmem:[#allocation3 + $0x2cc] sm:$0xf] %vm1228_vm4, %v3448_v5  ;;  %v3451_v32 = vrot.slane %v3314_v62, 5  ;;  %v11641_v52 = vpop.f32.mrf.mxu1 }
 0x5a5   : > { %8817 = vmatmul.mubr.msk.bf16.gmra.mxu0 %vm413_vm1, %v9124_v11  ;;  %v3579_v10 = vld [vmem:[#allocation2 + $0x9c] sm:$0xf]  ;;  %v3454_v56 = vrot.slane %v3315_v51, 5  ;;  %v3580_v63 = vld [vmem:[#allocation2 + $0xa0] sm:$0xf] }
 0x5a6   : > { %8820 = vmatprep.mubr.msk.bf16.mxu0 %vm413_vm1, %v9126_v19  ;;  %3612 = vst.msk [vmem:[#allocation3 + $0x358] sm:$0xf] %vm1228_vm4, %v3579_v10  ;;  %v3452_v6 = vsel %vm11151_vm15, %v7990_v59, %v3451_v32  ;;  %v3453_v28 = vrot.slane %v3451_v32, 4  ;;  %v3316_v15 = vld [vmem:[#allocation2 + $0x90] sm:$0xe]  ;;  %v9128_v12 = vld [vmem:[#allocation3 + $0x348] sm:$0xff]   ;;  %v11654_v19 = vpop.f32.mrf.mxu1 }
 0x5a7   : > { %3544 = vst.msk [vmem:[#allocation3 + $0x2d0] sm:$0xf] %vm1228_vm4, %v3452_v6  ;;  %3613 = vst.msk [vmem:[#allocation3 + $0x35c] sm:$0xf] %vm1228_vm4, %v3580_v63  ;;  %v7991_v13 = vrot.slane %v3316_v15, 9 }
 0x5a8   : > { %v9127_v17 = vld [vmem:[#allocation3 + $0x2c0] sm:$0xff]   ;;  %v3455_v33 = vsel %vm11151_vm15, %v3453_v28, %v3454_v56  ;;  %v3317_v1 = vld [vmem:[#allocation2 + $0x94] sm:$0xf]  ;;  %v3581_v60 = vld [vmem:[#allocation2 + $0xa8] sm:$0xf]  ;;  %v11646_v35 = vpop.f32.mrf.mxu0 }
 0x5a9   : > { %v3318_v21 = vld [vmem:[#allocation2 + $0x98] sm:$0x1]  ;;  %8784 = vmatprep.mubr.msk.bf16.mxu1 %vm413_vm1, %v9127_v17  ;;  %3545 = vst.msk [vmem:[#allocation3 + $0x2d4] sm:$0xf] %vm1228_vm4, %v3455_v33  ;;  %v3458_v41 = vrot.slane %v3317_v1, 5  ;;  %v9131_v18 = vld [vmem:[#allocation3 + $0x350] sm:$0xff]  }
 0x5aa   : > { %3614 = vst.msk [vmem:[#allocation3 + $0x360] sm:$0xf] %vm1228_vm4, %v3581_v60  ;;  %v3461_v14 = vrot.slane %v3318_v21, 5  ;;  %v3582_v29 = vld [vmem:[#allocation2 + $0xac] sm:$0xf]  ;;  %v11659_v10 = vpop.f32.mrf.mxu0 }
 0x5ab   : > { %v3319_v47 = vld [vmem:[#allocation2 + $0x9c] sm:$0xe]  ;;  %v9130_v8 = vld [vmem:[#allocation3 + $0x2c8] sm:$0xff]   ;;  %v3459_v37 = vsel %vm11151_vm15, %v7991_v13, %v3458_v41  ;;  %v3460_v42 = vrot.slane %v3458_v41, 4  ;;  %3615 = vst.msk [vmem:[#allocation3 + $0x364] sm:$0xf] %vm1228_vm4, %v3582_v29 }
 0x5ac   : > { %v3320_v30 = vld [vmem:[#allocation2 + $0xa0] sm:$0xf]  ;;  %3546 = vst.msk [vmem:[#allocation3 + $0x2d8] sm:$0xf] %vm1228_vm4, %v3459_v37  ;;  %v3321_v58 = vld [vmem:[#allocation2 + $0xa4] sm:$0x1]  ;;  %8785 = vmatmul.mubr.msk.bf16.gmra.mxu1 %vm413_vm1, %v9130_v8 }
 0x5ad   : > { %8821 = vmatmul.mubr.msk.bf16.gmra.mxu0 %vm413_vm1, %v9128_v12  ;;  %v7992_v48 = vrot.slane %v3319_v47, 9  ;;  %v3465_v3 = vrot.slane %v3320_v30, 5  ;;  %v3462_v43 = vsel %vm11151_vm15, %v3460_v42, %v3461_v14  ;;  %v3583_v46 = vld [vmem:[#allocation2 + $0xb4] sm:$0xf]  ;;  %v3584_v20 = vld [vmem:[#allocation2 + $0xb8] sm:$0xf]  ;;  %v11673_v14 = vpop.f32.mrf.mxu0 }
 0x5ae   : > { %8824 = vmatprep.mubr.msk.bf16.mxu0 %vm413_vm1, %v9131_v18  ;;  %3547 = vst.msk [vmem:[#allocation3 + $0x2dc] sm:$0xf] %vm1228_vm4, %v3462_v43  ;;  %v3468_v49 = vrot.slane %v3321_v58, 5  ;;  %3616 = vst.msk [vmem:[#allocation3 + $0x368] sm:$0xf] %vm1228_vm4, %v3583_v46  ;;  %v9134_v24 = vld [vmem:[#allocation3 + $0x358] sm:$0xff]  }
 0x5af   : > { %v3466_v38 = vsel %vm11151_vm15, %v7992_v48, %v3465_v3  ;;  %v3467_v36 = vrot.slane %v3465_v3, 4  ;;  %3617 = vst.msk [vmem:[#allocation3 + $0x36c] sm:$0xf] %vm1228_vm4, %v3584_v20  ;;  %v3322_v11 = vld [vmem:[#allocation2 + $0xa8] sm:$0xe]  ;;  %v11688_v20 = vpop.f32.mrf.mxu0 }
 0x5b0   : > { %3548 = vst.msk [vmem:[#allocation3 + $0x2e0] sm:$0xf] %vm1228_vm4, %v3466_v38  ;;  %v3323_v7 = vld [vmem:[#allocation2 + $0xac] sm:$0xf]  ;;  %v3324_v55 = vld [vmem:[#allocation2 + $0xb0] sm:$0x1] }
 0x5b1   : > { %v9132_v22 = vld [vmem:[#allocation3 + $0x2d0] sm:$0xff]   ;;  %v3469_v54 = vsel %vm11151_vm15, %v3467_v36, %v3468_v49  ;;  %v7993_v9 = vrot.slane %v3322_v11, 9  ;;  %v3472_v5 = vrot.slane %v3323_v7, 5  ;;  %v3585_v62 = vld [vmem:[#allocation2 + $0xc0] sm:$0xf]  ;;  %v3475_v32 = vrot.slane %v3324_v55, 5 }
 0x5b2   : > { %3549 = vst.msk [vmem:[#allocation3 + $0x2e4] sm:$0xf] %vm1228_vm4, %v3469_v54  ;;  %v3586_v51 = vld [vmem:[#allocation2 + $0xc4] sm:$0xf]  ;;  %8788 = vmatprep.mubr.msk.bf16.mxu1 %vm413_vm1, %v9132_v22  ;;  %v9136_v59 = vld [vmem:[#allocation3 + $0x360] sm:$0xff]   ;;  %v11666_v21 = vpop.f32.mrf.mxu1 }
 0x5b3   : > { %3618 = vst.msk [vmem:[#allocation3 + $0x370] sm:$0xf] %vm1228_vm4, %v3585_v62  ;;  %3619 = vst.msk [vmem:[#allocation3 + $0x374] sm:$0xf] %vm1228_vm4, %v3586_v51  ;;  %v3325_v6 = vld [vmem:[#allocation2 + $0xb4] sm:$0xe]  ;;  %v3473_v28 = vsel %vm11151_vm15, %v7993_v9, %v3472_v5 }
 0x5b4   : > { %v3474_v56 = vrot.slane %v3472_v5, 4  ;;  %v3326_v63 = vld [vmem:[#allocation2 + $0xb8] sm:$0xf]  ;;  %v7994_v15 = vrot.slane %v3325_v6, 9  ;;  %3550 = vst.msk [vmem:[#allocation3 + $0x2e8] sm:$0xf] %vm1228_vm4, %v3473_v28  ;;  %v11677_v29 = vpop.f32.mrf.mxu1 }
 0x5b5   : > { %8825 = vmatmul.mubr.msk.bf16.gmra.mxu0 %vm413_vm1, %v9134_v24  ;;  %v3327_v17 = vld [vmem:[#allocation2 + $0xbc] sm:$0x1]  ;;  %v3479_v13 = vrot.slane %v3326_v63, 5  ;;  %v1290_v33 = vld [vmem:[#allocation2 + $0xcc] sm:$0x1]  ;;  %v9135_v1 = vld [vmem:[#allocation3 + $0x2d8] sm:$0xff]  }
 0x5b6   : > { %8828 = vmatprep.mubr.msk.bf16.mxu0 %vm413_vm1, %v9136_v59  ;;  %v3476_v60 = vsel %vm11151_vm15, %v3474_v56, %v3475_v32  ;;  %v3482_v18 = vrot.slane %v3327_v17, 5  ;;  %8789 = vmatmul.mubr.msk.bf16.gmra.mxu1 %vm413_vm1, %v9135_v1  ;;  %v1291_v47 = vsel %vm9807_vm6, 0, %v1290_v33  ;;  %v3588_v8 = vld [vmem:[#allocation2 + $0xd0] sm:$0xf]  ;;  %v3328_v37 = vld [vmem:[#allocation2 + $0xc0] sm:$0xe]  ;;  %v11686_v16 = vpop.f32.mrf.mxu1 }
 0x5b7   : > { %3551 = vst.msk [vmem:[#allocation3 + $0x2ec] sm:$0xf] %vm1228_vm4, %v3476_v60  ;;  %v3480_v12 = vsel %vm11151_vm15, %v7994_v15, %v3479_v13  ;;  %v3481_v41 = vrot.slane %v3479_v13, 4  ;;  %v9138_v30 = vld [vmem:[#allocation3 + $0x368] sm:$0xff]   ;;  %1292 = vst [vmem:[#allocation2 + $0xcc] sm:$0x1] %v1291_v47 }
 0x5b8   : > { %3552 = vst.msk [vmem:[#allocation3 + $0x2f0] sm:$0xf] %vm1228_vm4, %v3480_v12  ;;  %3621 = vst.msk [vmem:[#allocation3 + $0x37c] sm:$0xf] %vm1228_vm4, %v3588_v8  ;;  %v3329_v48 = vld [vmem:[#allocation2 + $0xc4] sm:$0xf]  ;;  %v11697_v6 = vpop.f32.mrf.mxu1 }
 0x5b9   : > { %v9137_v42 = vld [vmem:[#allocation3 + $0x2e0] sm:$0xff]   ;;  %v3483_v58 = vsel %vm11151_vm15, %v3481_v41, %v3482_v18  ;;  %v7995_v3 = vrot.slane %v3328_v37, 9  ;;  %v3486_v46 = vrot.slane %v3329_v48, 5  ;;  %v3330_v38 = vld [vmem:[#allocation2 + $0xc8] sm:$0x1] }
 0x5ba   : > { %v9140_v43 = vld [vmem:[#allocation3 + $0x370] sm:$0xff]   ;;  %3553 = vst.msk [vmem:[#allocation3 + $0x2f4] sm:$0xf] %vm1228_vm4, %v3483_v58  ;;  %8792 = vmatprep.mubr.msk.bf16.mxu1 %vm413_vm1, %v9137_v42  ;;  %v4119_v36 = vld [vmem:[#allocation2 + $0x18] sm:$0xe]  ;;  %v3489_v55 = vrot.slane %v3330_v38, 5 }
 0x5bb   : > { %v4120_v49 = vld [vmem:[#allocation2 + $0x1c] sm:$0xf]  ;;  %v3487_v11 = vsel %vm11151_vm15, %v7995_v3, %v3486_v46  ;;  %v3488_v7 = vrot.slane %v3486_v46, 4  ;;  %v4121_v22 = vld [vmem:[#allocation2 + $0x20] sm:$0x1]  ;;  %v7996_v54 = vrot.slane %v4119_v36, 9 }
 0x5bc   : > { %3554 = vst.msk [vmem:[#allocation3 + $0x2f8] sm:$0xf] %vm1228_vm4, %v3487_v11  ;;  %v4217_v9 = vrot.slane %v4120_v49, 5  ;;  %v4220_v24 = vrot.slane %v4121_v22, 5  ;;  %v3622_v5 = vld [vmem:[#allocation2 + $0x18] sm:$0xf] }
 0x5bd   : > { %8829 = vmatmul.mubr.msk.bf16.gmra.mxu0 %vm413_vm1, %v9138_v30  ;;  %v3490_v51 = vsel %vm11151_vm15, %v3488_v7, %v3489_v55  ;;  %v3623_v59 = vld [vmem:[#allocation2 + $0x1c] sm:$0xf]  ;;  %v3671_v32 = vshrl.u32 %v3622_v5, 16  ;;  %v3624_v15 = vld [vmem:[#allocation2 + $0x20] sm:$0x1]  ;;  %v3674_v17 = vshll.u32 %v3622_v5, 16 }
 0x5be   : > { %v9139_v62 = vld [vmem:[#allocation3 + $0x2e8] sm:$0xff]   ;;  %8832 = vmatprep.mubr.msk.bf16.mxu0 %vm413_vm1, %v9140_v43  ;;  %3555 = vst.msk [vmem:[#allocation3 + $0x2fc] sm:$0xf] %vm1228_vm4, %v3490_v51  ;;  %v4218_v56 = vsel %vm11151_vm15, %v7996_v54, %v4217_v9  ;;  %v4219_v63 = vrot.slane %v4217_v9, 4  ;;  %v3587_v13 = vld [vmem:[#allocation2 + $0xcc] sm:$0xf] }
 0x5bf   : > { %v11699_v28 = vpop.f32.mrf.mxu0  ;;  %8793 = vmatmul.mubr.msk.bf16.gmra.mxu1 %vm413_vm1, %v9139_v62  ;;  %4360 = vst.msk [vmem:[#allocation3 + $0x400] sm:$0xf] %vm1228_vm4, %v4218_v56  ;;  %v3673_v33 = vrot.slane %v3671_v32, 4  ;;  %v3680_v1 = vshll.u32 %v3623_v59, 16  ;;  %3620 = vst.msk [vmem:[#allocation3 + $0x378] sm:$0xf] %vm1228_vm4, %v3587_v13 }
 0x5c0   : > { %v4221_v12 = vsel %vm11151_vm15, %v4219_v63, %v4220_v24  ;;  %v3676_v18 = vrot.slane %v3674_v17, 5  ;;  %v3684_v47 = vshrl.u32 %v3623_v59, 16  ;;  %v3690_v8 = vshll.u32 %v3624_v15, 16  ;;  %v4122_v42 = vld [vmem:[#allocation2 + $0x24] sm:$0xe] }
 0x5c1   : > { %v9141_v60 = vld [vmem:[#allocation3 + $0x2f0] sm:$0xff]   ;;  %v11709_v41 = vpop.f32.mrf.mxu0  ;;  %4361 = vst.msk [vmem:[#allocation3 + $0x404] sm:$0xf] %vm1228_vm4, %v4221_v12  ;;  %v3682_v37 = vrot.slane %v3680_v1, 5  ;;  %v7997_v36 = vrot.slane %v4122_v42, 9 }
 0x5c2   : > { %v4123_v30 = vld [vmem:[#allocation2 + $0x28] sm:$0xf]  ;;  %8796 = vmatprep.mubr.msk.bf16.mxu1 %vm413_vm1, %v9141_v60  ;;  %v3677_v48 = vor.u32 %v3676_v18, %v3673_v33  ;;  %v3686_v3 = vrot.slane %v3684_v47, 4  ;;  %v3692_v43 = vrot.slane %v3690_v8, 5  ;;  %v4124_v38 = vld [vmem:[#allocation2 + $0x2c] sm:$0x1] }
 0x5c3   : > { %v11713_v58 = vpop.f32.mrf.mxu1  ;;  %v11715_v46 = vpop.f32.mrf.mxu0  ;;  %v4224_v49 = vrot.slane %v4123_v30, 5  ;;  %v4227_v11 = vrot.slane %v4124_v38, 5  ;;  %v3625_v7 = vld [vmem:[#allocation2 + $0x24] sm:$0xf]  ;;  %v3626_v24 = vld [vmem:[#allocation2 + $0x28] sm:$0xf] }
 0x5c4   : > { %v3678_v55 = vrot.slane %v3677_v48, 4  ;;  %v3687_v22 = vor.u32 %v3686_v3, %v3682_v37  ;;  %v3627_v5 = vld [vmem:[#allocation2 + $0x2c] sm:$0x1]  ;;  %v3695_v62 = vshrl.u32 %v3625_v7, 16  ;;  %v3698_v56 = vshll.u32 %v3625_v7, 16 }
 0x5c5   : > { %v11717_v54 = vpop.f32.mrf.mxu1  ;;  %v11719_v9 = vpop.f32.mrf.mxu0  ;;  %v9143_v51 = vld [vmem:[#allocation3 + $0x2f8] sm:$0xff]   ;;  %v4225_v59 = vsel %vm11151_vm15, %v7997_v36, %v4224_v49  ;;  %v4226_v32 = vrot.slane %v4224_v49, 4  ;;  %v3704_v63 = vshll.u32 %v3626_v24, 16  ;;  %v3708_v60 = vshrl.u32 %v3626_v24, 16 }
 0x5c6   : > { %v3683_v15 = vsel %vm10494_vm10, %v3678_v55, %v3682_v37  ;;  %v3688_v17 = vrot.slane %v3687_v22, 4  ;;  %4362 = vst.msk [vmem:[#allocation3 + $0x408] sm:$0xf] %vm1228_vm4, %v4225_v59  ;;  %v3697_v1 = vrot.slane %v3695_v62, 4  ;;  %v9142_v12 = vld [vmem:[#allocation3 + $0x378] sm:$0xff]   ;;  %v3700_v47 = vrot.slane %v3698_v56, 5 }
 0x5c7   : > { %v11725_v13 = vpop.f32.mrf.mxu1  ;;  %v11727_v33 = vpop.f32.mrf.mxu0  ;;  %8797 = vmatmul.mubr.msk.bf16.gmra.mxu1 %vm413_vm1, %v9143_v51  ;;  %4087 = vst.msk [vmem:[#allocation3 + $0x380] sm:$0xf] %vm1228_vm4, %v3683_v15  ;;  %v4228_v18 = vsel %vm11151_vm15, %v4226_v32, %v4227_v11  ;;  %v3706_v8 = vrot.slane %v3704_v63, 5  ;;  %v3714_v37 = vshll.u32 %v3627_v5, 16  ;;  %v3710_v3 = vrot.slane %v3708_v60, 4  ;;  %8833 = vmatmul.mubr.msk.bf16.gmra.mxu0 %vm413_vm1, %v9142_v12 }
 0x5c8   : > { %v9144_v42 = vld [vmem:[#allocation3 + $0x400] sm:$0xff]   ;;  %v3693_v30 = vsel %vm10494_vm10, %v3688_v17, %v3692_v43  ;;  %4363 = vst.msk [vmem:[#allocation3 + $0x40c] sm:$0xf] %vm1228_vm4, %v4228_v18  ;;  %v4125_v38 = vld [vmem:[#allocation2 + $0x30] sm:$0xe]  ;;  %v3701_v49 = vor.u32 %v3700_v47, %v3697_v1 }
 0x5c9   : > { %v11736_v48 = vpop.f32.mrf.mxu1  ;;  %v11739_v36 = vpop.f32.mrf.mxu0  ;;  %4088 = vst.msk [vmem:[#allocation3 + $0x384] sm:$0xf] %vm1228_vm4, %v3693_v30  ;;  %v3716_v11 = vrot.slane %v3714_v37, 5  ;;  %v4126_v7 = vld [vmem:[#allocation2 + $0x34] sm:$0xf]  ;;  %v7998_v22 = vrot.slane %v4125_v38, 9  ;;  %8876 = vmatprep.mubr.msk.bf16.mxu0 %vm413_vm1, %v9144_v42  ;;  %v3711_v24 = vor.u32 %v3710_v3, %v3706_v8 }
 0x5ca   : > { %v4127_v55 = vld [vmem:[#allocation2 + $0x38] sm:$0x1]  ;;  %v4231_v5 = vrot.slane %v4126_v7, 5  ;;  %v3628_v51 = vld [vmem:[#allocation2 + $0x30] sm:$0xf]  ;;  %v3702_v63 = vrot.slane %v3701_v49, 4 }
 0x5cb   : > { %v8626_v43 = vpop.f32.mrf.mxu1  ;;  %v4234_v62 = vrot.slane %v4127_v55, 5  ;;  %v3629_v59 = vld [vmem:[#allocation2 + $0x34] sm:$0xf]  ;;  %v11744_v32 = vpop.f32.mrf.mxu0  ;;  %v3630_v15 = vld [vmem:[#allocation2 + $0x38] sm:$0x1]  ;;  %v3719_v17 = vshrl.u32 %v3628_v51, 16 }
 0x5cc   : > { %v4951_v56 = vadd.f32 %v8626_v43, %v11542_v2  ;;  %v3722_v1 = vshll.u32 %v3628_v51, 16  ;;  %v3712_v60 = vrot.slane %v3711_v24, 4  ;;  %v4232_v12 = vsel %vm11151_vm15, %v7998_v22, %v4231_v5  ;;  %v4128_v30 = vld [vmem:[#allocation2 + $0x3c] sm:$0xe]  ;;  %v4129_v51 = vld [vmem:[#allocation2 + $0x40] sm:$0xf] }
 0x5cd   : > { %v4233_v18 = vrot.slane %v4231_v5, 4  ;;  %v3728_v47 = vshll.u32 %v3629_v59, 16  ;;  %v4942_v37 = vpop.f32.mrf.mxu1  ;;  %v11749_v42 = vpop.f32.mrf.mxu0  ;;  %v3707_v3 = vsel %vm10494_vm10, %v3702_v63, %v3706_v8  ;;  %4364 = vst.msk [vmem:[#allocation3 + $0x410] sm:$0xf] %vm1228_vm4, %v4232_v12  ;;  %v3721_v2 = vrot.slane %v3719_v17, 4 }
 0x5ce   : > { %v3724_v38 = vrot.slane %v3722_v1, 5  ;;  %v3732_v49 = vshrl.u32 %v3629_v59, 16  ;;  %v3717_v7 = vsel %vm10494_vm10, %v3712_v60, %v3716_v11  ;;  %4089 = vst.msk [vmem:[#allocation3 + $0x388] sm:$0xf] %vm1228_vm4, %v3707_v3  ;;  %v3738_v43 = vshll.u32 %v3630_v15, 16 }
 0x5cf   : > { %v4235_v55 = vsel %vm11151_vm15, %v4233_v18, %v4234_v62  ;;  %v3730_v22 = vrot.slane %v3728_v47, 5  ;;  %v8627_v24 = vpop.f32.mrf.mxu1  ;;  %v11759_v5 = vpop.f32.mrf.mxu0  ;;  %v9146_v8 = vld [vmem:[#allocation3 + $0x408] sm:$0xff]   ;;  %4090 = vst.msk [vmem:[#allocation3 + $0x38c] sm:$0xf] %vm1228_vm4, %v3717_v7  ;;  %v4943_v11 = vadd.f32 %v4942_v37, %v11552_v4  ;;  %v7999_v15 = vrot.slane %v4128_v30, 9 }
 0x5d0   : > { %4365 = vst.msk [vmem:[#allocation3 + $0x414] sm:$0xf] %vm1228_vm4, %v4235_v55  ;;  %v3725_v59 = vor.u32 %v3724_v38, %v3721_v2  ;;  %v3734_v63 = vrot.slane %v3732_v49, 4  ;;  %v4954_v17 = vadd.f32 %v8627_v24, %v11567_v61  ;;  %v4130_v1 = vld [vmem:[#allocation2 + $0x44] sm:$0x1]  ;;  %v9145_v60 = vld [vmem:[#allocation3 + $0x380] sm:$0xff]   ;;  %v11768_v3 = vadd.f32 %v11727_v33, %v4951_v56  ;;  %8877 = vmatmul.mubr.msk.bf16.vlgmr.msra.gmra.mxu0 %vm413_vm1, %v9146_v8 }
 0x5d1   : > { %v3740_v62 = vrot.slane %v3738_v43, 5  ;;  %v4945_v12 = vpop.f32.mrf.mxu1  ;;  %v4238_v18 = vrot.slane %v4129_v51, 5  ;;  %v11765_v47 = vpop.f32.mrf.mxu0  ;;  %v4241_v4 = vrot.slane %v4130_v1, 5  ;;  %v3631_v37 = vld [vmem:[#allocation2 + $0x3c] sm:$0xf]  ;;  %8840 = vmatprep.mubr.msk.bf16.mxu1 %vm413_vm1, %v9145_v60 }
 0x5d2   : > { %12773 = vst [vmem:[#allocation21_spill] sm:$0xff] %v11768_v3  ;;  %v3726_v7 = vrot.slane %v3725_v59, 4  ;;  %v3735_v2 = vor.u32 %v3734_v63, %v3730_v22  ;;  %v4946_v38 = vadd.f32 %v4945_v12, %v11580_v26  ;;  %v3632_v61 = vld [vmem:[#allocation2 + $0x40] sm:$0xf]  ;;  %v3633_v43 = vld [vmem:[#allocation2 + $0x44] sm:$0x1] }
 0x5d3   : > { %v4239_v30 = vsel %vm11151_vm15, %v7999_v15, %v4238_v18  ;;  %v4240_v49 = vrot.slane %v4238_v18, 4  ;;  %v3743_v24 = vshrl.u32 %v3631_v37, 16  ;;  %v3746_v33 = vshll.u32 %v3631_v37, 16  ;;  %v11775_v56 = vpop.f32.mrf.mxu0  ;;  %v4131_v63 = vld [vmem:[#allocation2 + $0x48] sm:$0xe] }
 0x5d4   : > { %v8630_v55 = vpop.f32.mrf.mxu1  ;;  %v3731_v51 = vsel %vm10494_vm10, %v3726_v7, %v3730_v22  ;;  %v3736_v8 = vrot.slane %v3735_v2, 4  ;;  %4366 = vst.msk [vmem:[#allocation3 + $0x418] sm:$0xf] %vm1228_vm4, %v4239_v30  ;;  %v3752_v59 = vshll.u32 %v3632_v61, 16  ;;  %v4132_v1 = vld [vmem:[#allocation2 + $0x4c] sm:$0xf] }
 0x5d5   : > { %v11781_v26 = vadd.f32 %v8630_v55, %v11593_v23  ;;  %4091 = vst.msk [vmem:[#allocation3 + $0x390] sm:$0xf] %vm1228_vm4, %v3731_v51  ;;  %v4242_v60 = vsel %vm11151_vm15, %v4240_v49, %v4241_v4  ;;  %v3745_v12 = vrot.slane %v3743_v24, 4  ;;  %v3748_v15 = vrot.slane %v3746_v33, 5  ;;  %v11786_v31 = vpop.f32.mrf.mxu0  ;;  %v4133_v2 = vld [vmem:[#allocation2 + $0x50] sm:$0x1] }
 0x5d6   : > { %v3756_v18 = vshrl.u32 %v3632_v61, 16  ;;  %v4958_v37 = vpop.f32.mrf.mxu1  ;;  %v3741_v22 = vsel %vm10494_vm10, %v3736_v8, %v3740_v62  ;;  %4367 = vst.msk [vmem:[#allocation3 + $0x41c] sm:$0xf] %vm1228_vm4, %v4242_v60  ;;  %v3754_v23 = vrot.slane %v3752_v59, 5  ;;  %v3762_v7 = vshll.u32 %v3633_v43, 16  ;;  %v9147_v55 = vld [vmem:[#allocation3 + $0x388] sm:$0xff]  }
 0x5d7   : > { %v11792_v30 = vadd.f32 %v4958_v37, %v11606_v50  ;;  %4092 = vst.msk [vmem:[#allocation3 + $0x394] sm:$0xf] %vm1228_vm4, %v3741_v22  ;;  %v3749_v4 = vor.u32 %v3748_v15, %v3745_v12  ;;  %v11798_v33 = vadd.f32 %v11739_v36, %v4943_v11  ;;  %v11801_v62 = vadd.f32 %v11744_v32, %v4954_v17  ;;  %v9148_v51 = vld [vmem:[#allocation3 + $0x410] sm:$0xff]   ;;  %v3636_v17 = vld [vmem:[#allocation2 + $0x50] sm:$0x1] }
 0x5d8   : > { %v3758_v49 = vrot.slane %v3756_v18, 4  ;;  %v8631_v61 = vpop.f32.mrf.mxu1  ;;  %v11795_v24 = vpop.f32.mrf.mxu0  ;;  %v3764_v43 = vrot.slane %v3762_v7, 5  ;;  %v8000_v8 = vrot.slane %v4131_v63, 9  ;;  %v4245_v59 = vrot.slane %v4132_v1, 5  ;;  %8841 = vmatmul.mubr.msk.bf16.vlgmr.msra.gmra.mxu1 %vm413_vm1, %v9147_v55  ;;  %v3634_v12 = vld [vmem:[#allocation2 + $0x48] sm:$0xf]  ;;  %8880 = vmatprep.mubr.msk.bf16.mxu0 %vm413_vm1, %v9148_v51 }
 0x5d9   : > { %v4248_v50 = vrot.slane %v4133_v2, 5  ;;  %v3750_v60 = vrot.slane %v3749_v4, 4  ;;  %v3635_v15 = vld [vmem:[#allocation2 + $0x4c] sm:$0xf]  ;;  %v4970_v18 = vadd.f32 %v8631_v61, %v11619_v53  ;;  %v11808_v36 = vadd.f32 %v11749_v42, %v4946_v38 }
 0x5da   : > { %v3759_v37 = vor.u32 %v3758_v49, %v3754_v23  ;;  %v4961_v22 = vpop.f32.mrf.mxu1  ;;  %v11805_v3 = vpop.f32.mrf.mxu0  ;;  %v4246_v32 = vsel %vm11151_vm15, %v8000_v8, %v4245_v59  ;;  %v4247_v11 = vrot.slane %v4245_v59, 4  ;;  %v3767_v63 = vshrl.u32 %v3634_v12, 16 }
 0x5db   : > { %v3770_v1 = vshll.u32 %v3634_v12, 16  ;;  %v3755_v7 = vsel %vm10494_vm10, %v3750_v60, %v3754_v23  ;;  %4368 = vst.msk [vmem:[#allocation3 + $0x420] sm:$0xf] %vm1228_vm4, %v4246_v32  ;;  %v3776_v53 = vshll.u32 %v3635_v15, 16  ;;  %v3780_v55 = vshrl.u32 %v3635_v15, 16 }
 0x5dc   : > { %v3760_v2 = vrot.slane %v3759_v37, 4  ;;  %v8634_v4 = vpop.f32.mrf.mxu1  ;;  %v11816_v42 = vpop.f32.mrf.mxu0  ;;  %4093 = vst.msk [vmem:[#allocation3 + $0x398] sm:$0xf] %vm1228_vm4, %v3755_v7  ;;  %v4249_v38 = vsel %vm11151_vm15, %v4247_v11, %v4248_v50  ;;  %v3769_v49 = vrot.slane %v3767_v63, 4  ;;  %v3786_v51 = vshll.u32 %v3636_v17, 16 }
 0x5dd   : > { %v3772_v61 = vrot.slane %v3770_v1, 5  ;;  %v9150_v8 = vld [vmem:[#allocation3 + $0x418] sm:$0xff]   ;;  %4369 = vst.msk [vmem:[#allocation3 + $0x424] sm:$0xf] %vm1228_vm4, %v4249_v38  ;;  %v3778_v59 = vrot.slane %v3776_v53, 5  ;;  %v3782_v60 = vrot.slane %v3780_v55, 4  ;;  %v4962_v37 = vadd.f32 %v4961_v22, %v11630_v45 }
 0x5de   : > { %v3765_v23 = vsel %vm10494_vm10, %v3760_v2, %v3764_v43  ;;  %v4974_v12 = vpop.f32.mrf.mxu1  ;;  %v11825_v15 = vpop.f32.mrf.mxu0  ;;  %v9149_v32 = vld [vmem:[#allocation3 + $0x390] sm:$0xff]   ;;  %v3788_v11 = vrot.slane %v3786_v51, 5  ;;  %v4134_v63 = vld [vmem:[#allocation2 + $0x54] sm:$0xe]  ;;  %v4983_v17 = vadd.f32 %v8634_v4, %v11646_v35  ;;  %8881 = vmatmul.mubr.msk.bf16.gmra.mxu0 %vm413_vm1, %v9150_v8  ;;  %v4135_v7 = vld [vmem:[#allocation2 + $0x58] sm:$0xf]  ;;  %v11837_v55 = vadd.f32 %v11759_v5, %v11781_v26 }
 0x5df   : > { %4094 = vst.msk [vmem:[#allocation3 + $0x39c] sm:$0xf] %vm1228_vm4, %v3765_v23  ;;  %v3773_v50 = vor.u32 %v3772_v61, %v3769_v49  ;;  %v11830_v1 = vadd.f32 %v4974_v12, %v11659_v10  ;;  %v3783_v43 = vor.u32 %v3782_v60, %v3778_v59  ;;  %v4136_v2 = vld [vmem:[#allocation2 + $0x5c] sm:$0x1]  ;;  %v8001_v45 = vrot.slane %v4134_v63, 9  ;;  %8844 = vmatprep.mubr.msk.bf16.mxu1 %vm413_vm1, %v9149_v32 }
 0x5e0   : > { %v8635_v22 = vpop.f32.mrf.mxu1  ;;  %v11833_v53 = vpop.f32.mrf.mxu0  ;;  %v11841_v38 = vadd.f32 %v11765_v47, %v11792_v30  ;;  %v4252_v10 = vrot.slane %v4135_v7, 5  ;;  %v4255_v4 = vrot.slane %v4136_v2, 5  ;;  %v3637_v49 = vld [vmem:[#allocation2 + $0x54] sm:$0xf]  ;;  %v3638_v8 = vld [vmem:[#allocation2 + $0x58] sm:$0xf]  ;;  %v11850_v26 = vadd.f32 %v11775_v56, %v4970_v18 }
 0x5e1   : > { %v3774_v35 = vrot.slane %v3773_v50, 4  ;;  %v11845_v61 = vadd.f32 %v8635_v22, %v11673_v14  ;;  %v3784_v51 = vrot.slane %v3783_v43, 4  ;;  %v3639_v23 = vld [vmem:[#allocation2 + $0x5c] sm:$0x1]  ;;  %v3791_v60 = vshrl.u32 %v3637_v49, 16 }
 0x5e2   : > { %v4977_v12 = vpop.f32.mrf.mxu1  ;;  %v11847_v5 = vpop.f32.mrf.mxu0  ;;  %v11853_v47 = vadd.f32 %v11786_v31, %v4962_v37  ;;  %v4253_v14 = vsel %vm11151_vm15, %v8001_v45, %v4252_v10  ;;  %v4254_v32 = vrot.slane %v4252_v10, 4  ;;  %v3794_v50 = vshll.u32 %v3637_v49, 16  ;;  %v4137_v63 = vld [vmem:[#allocation2 + $0x60] sm:$0xe] }
 0x5e3   : > { %v3779_v30 = vsel %vm10494_vm10, %v3774_v35, %v3778_v59  ;;  %v3789_v43 = vsel %vm10494_vm10, %v3784_v51, %v3788_v11  ;;  %4370 = vst.msk [vmem:[#allocation3 + $0x428] sm:$0xf] %vm1228_vm4, %v4253_v14  ;;  %v3793_v56 = vrot.slane %v3791_v60, 4  ;;  %v3800_v18 = vshll.u32 %v3638_v8, 16 }
 0x5e4   : > { %4095 = vst.msk [vmem:[#allocation3 + $0x3a0] sm:$0xf] %vm1228_vm4, %v3779_v30  ;;  %v3804_v31 = vshrl.u32 %v3638_v8, 16  ;;  %v8638_v37 = vpop.f32.mrf.mxu1  ;;  %v11863_v7 = vpop.f32.mrf.mxu0  ;;  %v9152_v59 = vld [vmem:[#allocation3 + $0x420] sm:$0xff]   ;;  %4096 = vst.msk [vmem:[#allocation3 + $0x3a4] sm:$0xf] %vm1228_vm4, %v3789_v43  ;;  %v4256_v2 = vsel %vm11151_vm15, %v4254_v32, %v4255_v4  ;;  %v11870_v51 = vadd.f32 %v4977_v12, %v11688_v20 }
 0x5e5   : > { %v3796_v45 = vrot.slane %v3794_v50, 5  ;;  %v3810_v22 = vshll.u32 %v3639_v23, 16  ;;  %v8002_v35 = vrot.slane %v4137_v63, 9  ;;  %4371 = vst.msk [vmem:[#allocation3 + $0x42c] sm:$0xf] %vm1228_vm4, %v4256_v2  ;;  %v3802_v10 = vrot.slane %v3800_v18, 5  ;;  %8884 = vmatprep.mubr.msk.bf16.mxu0 %vm413_vm1, %v9152_v59 }
 0x5e6   : > { %v9151_v11 = vld [vmem:[#allocation3 + $0x398] sm:$0xff]   ;;  %v3806_v49 = vrot.slane %v3804_v31, 4  ;;  %v11873_v8 = vadd.f32 %v8638_v37, %v11699_v28  ;;  %v4990_v60 = vpop.f32.mrf.mxu1  ;;  %v11875_v30 = vpop.f32.mrf.mxu0  ;;  %v4138_v23 = vld [vmem:[#allocation2 + $0x64] sm:$0xf]  ;;  %v4139_v32 = vld [vmem:[#allocation2 + $0x68] sm:$0x1]  ;;  %v11882_v63 = vadd.f32 %v11795_v24, %v4983_v17 }
 0x5e7   : > { %v3797_v4 = vor.u32 %v3796_v45, %v3793_v56  ;;  %v3812_v14 = vrot.slane %v3810_v22, 5  ;;  %v11879_v50 = vadd.f32 %v4990_v60, %v11709_v41  ;;  %8845 = vmatmul.mubr.msk.bf16.gmra.mxu1 %vm413_vm1, %v9151_v11  ;;  %v4259_v28 = vrot.slane %v4138_v23, 5  ;;  %v3640_v43 = vld [vmem:[#allocation2 + $0x60] sm:$0xf]  ;;  %v3641_v18 = vld [vmem:[#allocation2 + $0x64] sm:$0xf] }
 0x5e8   : > { %12774 = vst [vmem:[#allocation22_spill] sm:$0xff] %v11882_v63  ;;  %v3807_v20 = vor.u32 %v3806_v49, %v3802_v10  ;;  %v4262_v12 = vrot.slane %v4139_v32, 5  ;;  %v8639_v31 = vpop.f32.mrf.mxu1  ;;  %v11885_v37 = vpop.f32.mrf.mxu0  ;;  %v11889_v56 = vadd.f32 %v11805_v3, %v11830_v1  ;;  %v3642_v41 = vld [vmem:[#allocation2 + $0x68] sm:$0x1]  ;;  %v3815_v2 = vshrl.u32 %v3640_v43, 16 }
 0x5e9   : > { %v3798_v59 = vrot.slane %v3797_v4, 4  ;;  %v3818_v45 = vshll.u32 %v3640_v43, 16  ;;  %v3824_v24 = vshll.u32 %v3641_v18, 16  ;;  %v4260_v22 = vsel %vm11151_vm15, %v8002_v35, %v4259_v28  ;;  %v4140_v60 = vld [vmem:[#allocation2 + $0x6c] sm:$0xe] }
 0x5ea   : > { %12775 = vst [vmem:[#allocation23_spill] sm:$0xff] %v11889_v56  ;;  %v3808_v17 = vrot.slane %v3807_v20, 4  ;;  %v4261_v11 = vrot.slane %v4259_v28, 4  ;;  %v3828_v49 = vshrl.u32 %v3641_v18, 16  ;;  %v4993_v23 = vpop.f32.mrf.mxu1  ;;  %v11893_v32 = vpop.f32.mrf.mxu0  ;;  %4372 = vst.msk [vmem:[#allocation3 + $0x430] sm:$0xf] %vm1228_vm4, %v4260_v22  ;;  %v11899_v4 = vadd.f32 %v8639_v31, %v11715_v46 }
 0x5eb   : > { %v3803_v63 = vsel %vm10494_vm10, %v3798_v59, %v3802_v10  ;;  %v3817_v3 = vrot.slane %v3815_v2, 4  ;;  %v3820_v1 = vrot.slane %v3818_v45, 5  ;;  %v9153_v20 = vld [vmem:[#allocation3 + $0x3a0] sm:$0xff]   ;;  %v3826_v43 = vrot.slane %v3824_v24, 5  ;;  %v4141_v2 = vld [vmem:[#allocation2 + $0x70] sm:$0xf] }
 0x5ec   : > { %v3813_v35 = vsel %vm10494_vm10, %v3808_v17, %v3812_v14  ;;  %4097 = vst.msk [vmem:[#allocation3 + $0x3a8] sm:$0xf] %vm1228_vm4, %v3803_v63  ;;  %v4263_v28 = vsel %vm11151_vm15, %v4261_v11, %v4262_v12  ;;  %v3830_v18 = vrot.slane %v3828_v49, 4  ;;  %v8642_v56 = vpop.f32.mrf.mxu1  ;;  %v11906_v10 = vpop.f32.mrf.mxu0  ;;  %v9154_v59 = vld [vmem:[#allocation3 + $0x428] sm:$0xff]   ;;  %v3834_v31 = vshll.u32 %v3642_v41, 16  ;;  %8848 = vmatprep.mubr.msk.bf16.mxu1 %vm413_vm1, %v9153_v20 }
 0x5ed   : > { %4098 = vst.msk [vmem:[#allocation3 + $0x3ac] sm:$0xf] %vm1228_vm4, %v3813_v35  ;;  %4373 = vst.msk [vmem:[#allocation3 + $0x434] sm:$0xf] %vm1228_vm4, %v4263_v28  ;;  %v3821_v46 = vor.u32 %v3820_v1, %v3817_v3  ;;  %v11911_v14 = vadd.f32 %v4993_v23, %v11719_v9  ;;  %v11914_v63 = vadd.f32 %v8642_v56, %v11565_v27  ;;  %v4142_v45 = vld [vmem:[#allocation2 + $0x74] sm:$0x1]  ;;  %8885 = vmatmul.mubr.msk.bf16.gmra.mxu0 %vm413_vm1, %v9154_v59 }
 0x5ee   : > { %v3831_v12 = vor.u32 %v3830_v18, %v3826_v43  ;;  %v8003_v24 = vrot.slane %v4140_v60, 9  ;;  %v4266_v17 = vrot.slane %v4141_v2, 5  ;;  %v3643_v22 = vld [vmem:[#allocation2 + $0x6c] sm:$0xf]  ;;  %v5006_v11 = vpop.f32.mrf.mxu1  ;;  %v11917_v49 = vpop.f32.mrf.mxu0  ;;  %v11921_v41 = vadd.f32 %v11816_v42, %v11845_v61  ;;  %v3644_v56 = vld [vmem:[#allocation2 + $0x70] sm:$0xf] }
 0x5ef   : > { %v3822_v9 = vrot.slane %v3821_v46, 4  ;;  %v3836_v23 = vrot.slane %v3834_v31, 5  ;;  %v4269_v27 = vrot.slane %v4142_v45, 5  ;;  %v3839_v3 = vshrl.u32 %v3643_v22, 16  ;;  %v3645_v35 = vld [vmem:[#allocation2 + $0x74] sm:$0x1] }
 0x5f0   : > { %12776 = vst [vmem:[#allocation24_spill] sm:$0xff] %v11921_v41  ;;  %v3832_v1 = vrot.slane %v3831_v12, 4  ;;  %v4267_v60 = vsel %vm11151_vm15, %v8003_v24, %v4266_v17  ;;  %v4268_v20 = vrot.slane %v4266_v17, 4  ;;  %v3842_v28 = vshll.u32 %v3643_v22, 16  ;;  %v8643_v18 = vpop.f32.mrf.mxu1  ;;  %v11926_v2 = vpop.f32.mrf.mxu0  ;;  %v4143_v31 = vld [vmem:[#allocation2 + $0x78] sm:$0xe] }
 0x5f1   : > { %12777 = vst [vmem:[#allocation18_spill] sm:$0xff] %v11926_v2  ;;  %v3827_v42 = vsel %vm10494_vm10, %v3822_v9, %v3826_v43  ;;  %4374 = vst.msk [vmem:[#allocation3 + $0x438] sm:$0xf] %vm1228_vm4, %v4267_v60  ;;  %v3841_v61 = vrot.slane %v3839_v3, 4  ;;  %v3848_v59 = vshll.u32 %v3644_v56, 16  ;;  %v3852_v46 = vshrl.u32 %v3644_v56, 16 }
 0x5f2   : > { %v3837_v12 = vsel %vm10494_vm10, %v3832_v1, %v3836_v23  ;;  %4099 = vst.msk [vmem:[#allocation3 + $0x3b0] sm:$0xf] %vm1228_vm4, %v3827_v42  ;;  %v4270_v45 = vsel %vm11151_vm15, %v4268_v20, %v4269_v27  ;;  %v3844_v24 = vrot.slane %v3842_v28, 5  ;;  %v3858_v17 = vshll.u32 %v3645_v35, 16  ;;  %v4144_v22 = vld [vmem:[#allocation2 + $0x7c] sm:$0xf]  ;;  %v5009_v41 = vpop.f32.mrf.mxu1  ;;  %v11936_v2 = vpop.f32.mrf.mxu0 }
 0x5f3   : > { %4100 = vst.msk [vmem:[#allocation3 + $0x3b4] sm:$0xf] %vm1228_vm4, %v3837_v12  ;;  %4375 = vst.msk [vmem:[#allocation3 + $0x43c] sm:$0xf] %vm1228_vm4, %v4270_v45  ;;  %v3850_v43 = vrot.slane %v3848_v59, 5  ;;  %v3854_v9 = vrot.slane %v3852_v46, 4  ;;  %v11941_v23 = vadd.f32 %v5006_v11, %v11578_v0  ;;  %v11944_v3 = vadd.f32 %v8643_v18, %v11591_v57 }
 0x5f4   : > { %v4145_v56 = vld [vmem:[#allocation2 + $0x80] sm:$0x1]  ;;  %v3845_v1 = vor.u32 %v3844_v24, %v3841_v61  ;;  %v3860_v60 = vrot.slane %v3858_v17, 5  ;;  %v11947_v20 = vadd.f32 %v5009_v41, %v11604_v39  ;;  %v8646_v35 = vpop.f32.mrf.mxu1  ;;  %v11949_v28 = vpop.f32.mrf.mxu0  ;;  %v11953_v42 = vadd.f32 %v11825_v15, %v11870_v51  ;;  %v9156_v59 = vld [vmem:[#allocation3 + $0x430] sm:$0xff]   ;;  %v3646_v57 = vld [vmem:[#allocation2 + $0x78] sm:$0xf] }
 0x5f5   : > { %v9155_v27 = vld [vmem:[#allocation3 + $0x3a8] sm:$0xff]   ;;  %v3855_v46 = vor.u32 %v3854_v9, %v3850_v43  ;;  %v8004_v0 = vrot.slane %v4143_v31, 9  ;;  %v4273_v11 = vrot.slane %v4144_v22, 5  ;;  %v4276_v12 = vrot.slane %v4145_v56, 5  ;;  %v3647_v61 = vld [vmem:[#allocation2 + $0x7c] sm:$0xf]  ;;  %8888 = vmatprep.mubr.msk.bf16.mxu0 %vm413_vm1, %v9156_v59 }
 0x5f6   : > { %8849 = vmatmul.mubr.msk.bf16.gmra.mxu1 %vm413_vm1, %v9155_v27  ;;  %v3846_v18 = vrot.slane %v3845_v1, 4  ;;  %v3648_v45 = vld [vmem:[#allocation2 + $0x80] sm:$0x1]  ;;  %v3863_v39 = vshrl.u32 %v3646_v57, 16  ;;  %v11957_v41 = vadd.f32 %v8646_v35, %v11617_v34  ;;  %v5022_v24 = vpop.f32.mrf.mxu1  ;;  %v11959_v17 = vpop.f32.mrf.mxu0  ;;  %v11963_v15 = vadd.f32 %v11833_v53, %v11873_v8  ;;  %v4146_v56 = vld [vmem:[#allocation2 + $0x84] sm:$0xe] }
 0x5f7   : > { %12778 = vst [vmem:[#allocation25_spill] sm:$0xff] %v11959_v17  ;;  %v3856_v51 = vrot.slane %v3855_v46, 4  ;;  %v4274_v31 = vsel %vm11151_vm15, %v8004_v0, %v4273_v11  ;;  %v4275_v22 = vrot.slane %v4273_v11, 4  ;;  %v3866_v9 = vshll.u32 %v3646_v57, 16  ;;  %v4147_v11 = vld [vmem:[#allocation2 + $0x88] sm:$0xf] }
 0x5f8   : > { %v3851_v34 = vsel %vm10494_vm10, %v3846_v18, %v3850_v43  ;;  %4376 = vst.msk [vmem:[#allocation3 + $0x440] sm:$0xf] %vm1228_vm4, %v4274_v31  ;;  %v3865_v27 = vrot.slane %v3863_v39, 4  ;;  %v3872_v1 = vshll.u32 %v3647_v61, 16  ;;  %v3876_v35 = vshrl.u32 %v3647_v61, 16  ;;  %v8647_v17 = vpop.f32.mrf.mxu1  ;;  %v11971_v53 = vpop.f32.mrf.mxu0 }
 0x5f9   : > { %v3861_v8 = vsel %vm10494_vm10, %v3856_v51, %v3860_v60  ;;  %4101 = vst.msk [vmem:[#allocation3 + $0x3b8] sm:$0xf] %vm1228_vm4, %v3851_v34  ;;  %v4277_v59 = vsel %vm11151_vm15, %v4275_v22, %v4276_v12  ;;  %v3868_v46 = vrot.slane %v3866_v9, 5  ;;  %v3882_v0 = vshll.u32 %v3648_v45, 16  ;;  %v4148_v9 = vld [vmem:[#allocation2 + $0x8c] sm:$0x1] }
 0x5fa   : > { %v9157_v43 = vld [vmem:[#allocation3 + $0x3b0] sm:$0xff]   ;;  %4102 = vst.msk [vmem:[#allocation3 + $0x3bc] sm:$0xf] %vm1228_vm4, %v3861_v8  ;;  %4377 = vst.msk [vmem:[#allocation3 + $0x444] sm:$0xf] %vm1228_vm4, %v4277_v59  ;;  %v3874_v57 = vrot.slane %v3872_v1, 5  ;;  %v11981_v18 = vadd.f32 %v5022_v24, %v11628_v25  ;;  %v11984_v61 = vadd.f32 %v8647_v17, %v11641_v52  ;;  %v5025_v60 = vpop.f32.mrf.mxu1  ;;  %v11986_v39 = vpop.f32.mrf.mxu0  ;;  %v11990_v12 = vadd.f32 %v11847_v5, %v11879_v50 }
 0x5fb   : > { %12779 = vst [vmem:[#allocation26_spill] sm:$0xff] %v11986_v39  ;;  %v9158_v45 = vld [vmem:[#allocation3 + $0x438] sm:$0xff]   ;;  %v3869_v51 = vor.u32 %v3868_v46, %v3865_v27  ;;  %v3878_v31 = vrot.slane %v3876_v35, 4  ;;  %v3884_v22 = vrot.slane %v3882_v0, 5  ;;  %v8005_v34 = vrot.slane %v4146_v56, 9  ;;  %8852 = vmatprep.mubr.msk.bf16.mxu1 %vm413_vm1, %v9157_v43 }
 0x5fc   : > { %v4280_v25 = vrot.slane %v4147_v11, 5  ;;  %v4283_v24 = vrot.slane %v4148_v9, 5  ;;  %v3649_v1 = vld [vmem:[#allocation2 + $0x84] sm:$0xf]  ;;  %v3650_v52 = vld [vmem:[#allocation2 + $0x88] sm:$0xf]  ;;  %v11994_v17 = vadd.f32 %v5025_v60, %v11654_v19  ;;  %v8650_v8 = vpop.f32.mrf.mxu1  ;;  %v11996_v59 = vpop.f32.mrf.mxu0  ;;  %v12000_v5 = vadd.f32 %v11863_v7, %v11899_v4  ;;  %8889 = vmatmul.mubr.msk.bf16.gmra.mxu0 %vm413_vm1, %v9158_v45 }
 0x5fd   : > { %12780 = vst [vmem:[#allocation30_spill] sm:$0xff] %v11996_v59  ;;  %v3870_v50 = vrot.slane %v3869_v51, 4  ;;  %v3879_v56 = vor.u32 %v3878_v31, %v3874_v57  ;;  %v3651_v27 = vld [vmem:[#allocation2 + $0x8c] sm:$0x1]  ;;  %v3887_v35 = vshrl.u32 %v3649_v1, 16  ;;  %v3890_v46 = vshll.u32 %v3649_v1, 16 }
 0x5fe   : > { %v4281_v0 = vsel %vm11151_vm15, %v8005_v34, %v4280_v25  ;;  %v4282_v11 = vrot.slane %v4280_v25, 4  ;;  %v3896_v19 = vshll.u32 %v3650_v52, 16  ;;  %v3900_v43 = vshrl.u32 %v3650_v52, 16  ;;  %v4149_v60 = vld [vmem:[#allocation2 + $0x90] sm:$0xe]  ;;  %v5038_v9 = vpop.f32.mrf.mxu1  ;;  %v12005_v59 = vpop.f32.mrf.mxu0 }
 0x5ff   : > { %12781 = vst [vmem:[#allocation27_spill] sm:$0xff] %v12005_v59  ;;  %v3875_v7 = vsel %vm10494_vm10, %v3870_v50, %v3874_v57  ;;  %v3880_v4 = vrot.slane %v3879_v56, 4  ;;  %4378 = vst.msk [vmem:[#allocation3 + $0x448] sm:$0xf] %vm1228_vm4, %v4281_v0  ;;  %v3889_v45 = vrot.slane %v3887_v35, 4  ;;  %v3892_v51 = vrot.slane %v3890_v46, 5 }
 0x600   : > { %4103 = vst.msk [vmem:[#allocation3 + $0x3c0] sm:$0xf] %vm1228_vm4, %v3875_v7  ;;  %v4284_v31 = vsel %vm11151_vm15, %v4282_v11, %v4283_v24  ;;  %v3898_v34 = vrot.slane %v3896_v19, 5  ;;  %v3902_v25 = vrot.slane %v3900_v43, 4  ;;  %v3906_v1 = vshll.u32 %v3651_v27, 16  ;;  %v8651_v52 = vpop.f32.mrf.mxu1  ;;  %v12013_v39 = vpop.f32.mrf.mxu0 }
 0x601   : > { %v9159_v59 = vld [vmem:[#allocation3 + $0x3b8] sm:$0xff]   ;;  %v3885_v57 = vsel %vm10494_vm10, %v3880_v4, %v3884_v22  ;;  %4379 = vst.msk [vmem:[#allocation3 + $0x44c] sm:$0xf] %vm1228_vm4, %v4284_v31  ;;  %v3893_v50 = vor.u32 %v3892_v51, %v3889_v45  ;;  %v8006_v56 = vrot.slane %v4149_v60, 9  ;;  %v12019_v35 = vadd.f32 %v8650_v8, %v11666_v21  ;;  %v9160_v46 = vld [vmem:[#allocation3 + $0x440] sm:$0xff]  }
 0x602   : > { %4104 = vst.msk [vmem:[#allocation3 + $0x3c4] sm:$0xf] %vm1228_vm4, %v3885_v57  ;;  %v3903_v24 = vor.u32 %v3902_v25, %v3898_v34  ;;  %v3908_v0 = vrot.slane %v3906_v1, 5  ;;  %v4150_v27 = vld [vmem:[#allocation2 + $0x94] sm:$0xf]  ;;  %v12023_v19 = vadd.f32 %v5038_v9, %v11677_v29  ;;  %v12026_v43 = vadd.f32 %v8651_v52, %v11686_v16  ;;  %v5041_v22 = vpop.f32.mrf.mxu1  ;;  %v12028_v7 = vpop.f32.mrf.mxu0  ;;  %8853 = vmatmul.mubr.msk.bf16.gmra.mxu1 %vm413_vm1, %v9159_v59 }
 0x603   : > { %v4151_v11 = vld [vmem:[#allocation2 + $0x98] sm:$0x1]  ;;  %v3894_v21 = vrot.slane %v3893_v50, 4  ;;  %v4287_v8 = vrot.slane %v4150_v27, 5  ;;  %v3652_v4 = vld [vmem:[#allocation2 + $0x90] sm:$0xf]  ;;  %v12032_v45 = vadd.f32 %v5041_v22, %v11697_v6  ;;  %8892 = vmatprep.mubr.msk.bf16.mxu0 %vm413_vm1, %v9160_v46  ;;  %v12039_v1 = vadd.f32 %v11875_v30, %v11911_v14 }
 0x604   : > { %v4290_v60 = vrot.slane %v4151_v11, 5  ;;  %v3904_v51 = vrot.slane %v3903_v24, 4  ;;  %v3653_v29 = vld [vmem:[#allocation2 + $0x94] sm:$0xf]  ;;  %v3654_v9 = vld [vmem:[#allocation2 + $0x98] sm:$0x1]  ;;  %v8654_v16 = vpop.f32.mrf.mxu1  ;;  %v12035_v25 = vpop.f32.mrf.mxu0  ;;  %v12043_v59 = vadd.f32 %v11885_v37, %v11914_v63 }
 0x605   : > { %v3911_v31 = vshrl.u32 %v3652_v4, 16  ;;  %v3899_v6 = vsel %vm10494_vm10, %v3894_v21, %v3898_v34  ;;  %v4288_v52 = vsel %vm11151_vm15, %v8006_v56, %v4287_v8  ;;  %v4289_v57 = vrot.slane %v4287_v8, 4  ;;  %v4152_v46 = vld [vmem:[#allocation2 + $0x9c] sm:$0xe]  ;;  %v4153_v24 = vld [vmem:[#allocation2 + $0xa0] sm:$0xf] }
 0x606   : > { %v3914_v50 = vshll.u32 %v3652_v4, 16  ;;  %v3909_v27 = vsel %vm10494_vm10, %v3904_v51, %v3908_v0  ;;  %4105 = vst.msk [vmem:[#allocation3 + $0x3c8] sm:$0xf] %vm1228_vm4, %v3899_v6  ;;  %4380 = vst.msk [vmem:[#allocation3 + $0x450] sm:$0xf] %vm1228_vm4, %v4288_v52  ;;  %v3920_v37 = vshll.u32 %v3653_v29, 16  ;;  %v5054_v63 = vpop.f32.mrf.mxu1  ;;  %v12053_v11 = vpop.f32.mrf.mxu0  ;;  %v12059_v0 = vadd.f32 %v8654_v16, %v11713_v58 }
 0x607   : > { %v3913_v30 = vrot.slane %v3911_v31, 4  ;;  %v3924_v14 = vshrl.u32 %v3653_v29, 16  ;;  %12782 = vst [vmem:[#allocation28_spill] sm:$0xff] %v12053_v11  ;;  %4106 = vst.msk [vmem:[#allocation3 + $0x3cc] sm:$0xf] %vm1228_vm4, %v3909_v27  ;;  %v4291_v34 = vsel %vm11151_vm15, %v4289_v57, %v4290_v60  ;;  %v3930_v22 = vshll.u32 %v3654_v9, 16 }
 0x608   : > { %v3916_v56 = vrot.slane %v3914_v50, 5  ;;  %v4154_v21 = vld [vmem:[#allocation2 + $0xa4] sm:$0x1]  ;;  %4381 = vst.msk [vmem:[#allocation3 + $0x454] sm:$0xf] %vm1228_vm4, %v4291_v34  ;;  %v3922_v4 = vrot.slane %v3920_v37, 5  ;;  %v12063_v31 = vadd.f32 %v5054_v63, %v11717_v54  ;;  %v8655_v6 = vpop.f32.mrf.mxu1  ;;  %v12065_v52 = vpop.f32.mrf.mxu0 }
 0x609   : > { %v9162_v8 = vld [vmem:[#allocation3 + $0x448] sm:$0xff]   ;;  %v3926_v51 = vrot.slane %v3924_v14, 4  ;;  %v8007_v29 = vrot.slane %v4152_v46, 9  ;;  %v9161_v27 = vld [vmem:[#allocation3 + $0x3c0] sm:$0xff]   ;;  %v3932_v57 = vrot.slane %v3930_v22, 5  ;;  %v4294_v9 = vrot.slane %v4153_v24, 5 }
 0x60a   : > { %v3917_v60 = vor.u32 %v3916_v56, %v3913_v30  ;;  %v4297_v50 = vrot.slane %v4154_v21, 5  ;;  %8893 = vmatmul.mubr.msk.bf16.gmra.mxu0 %vm413_vm1, %v9162_v8  ;;  %v3655_v16 = vld [vmem:[#allocation2 + $0x9c] sm:$0xf]  ;;  %v3656_v11 = vld [vmem:[#allocation2 + $0xa0] sm:$0xf]  ;;  %v12069_v37 = vadd.f32 %v8655_v6, %v11725_v13  ;;  %v5057_v46 = vpop.f32.mrf.mxu1  ;;  %v12071_v54 = vpop.f32.mrf.mxu0  ;;  %v12075_v14 = vadd.f32 %v11893_v32, %v11941_v23  ;;  %8856 = vmatprep.mubr.msk.bf16.mxu1 %vm413_vm1, %v9161_v27 }
 0x60b   : > { %v3927_v58 = vor.u32 %v3926_v51, %v3922_v4  ;;  %v3657_v34 = vld [vmem:[#allocation2 + $0xa4] sm:$0x1]  ;;  %12783 = vst [vmem:[#allocation29_spill] sm:$0xff] %v12071_v54  ;;  %v12079_v24 = vadd.f32 %v11906_v10, %v11944_v3  ;;  %v4295_v63 = vsel %vm11151_vm15, %v8007_v29, %v4294_v9  ;;  %v4296_v56 = vrot.slane %v4294_v9, 4  ;;  %v4155_v22 = vld [vmem:[#allocation2 + $0xa8] sm:$0xe] }
 0x60c   : > { %12784 = vst [vmem:[#allocation32_spill] sm:$0xff] %v12075_v14  ;;  %v3918_v30 = vrot.slane %v3917_v60, 4  ;;  %v3935_v13 = vshrl.u32 %v3655_v16, 16  ;;  %4382 = vst.msk [vmem:[#allocation3 + $0x458] sm:$0xf] %vm1228_vm4, %v4295_v63  ;;  %v3938_v8 = vshll.u32 %v3655_v16, 16  ;;  %v8698_v6 = vpop.f32.mrf.mxu1  ;;  %v12085_v14 = vpop.f32.mrf.mxu0 }
 0x60d   : > { %12785 = vst [vmem:[#allocation31_spill] sm:$0xff] %v12079_v24  ;;  %v3928_v21 = vrot.slane %v3927_v58, 4  ;;  %v3944_v51 = vshll.u32 %v3656_v11, 16  ;;  %v3948_v32 = vshrl.u32 %v3656_v11, 16  ;;  %v4156_v23 = vld [vmem:[#allocation2 + $0xac] sm:$0xf]  ;;  %v4298_v3 = vsel %vm11151_vm15, %v4296_v56, %v4297_v50 }
 0x60e   : > { %12786 = vst [vmem:[#allocation20_spill] sm:$0xff] %v12085_v14  ;;  %v3923_v10 = vsel %vm10494_vm10, %v3918_v30, %v3922_v4  ;;  %v3937_v29 = vrot.slane %v3935_v13, 4  ;;  %v3954_v27 = vshll.u32 %v3657_v34, 16  ;;  %v9163_v60 = vld [vmem:[#allocation3 + $0x3c8] sm:$0xff]   ;;  %4383 = vst.msk [vmem:[#allocation3 + $0x45c] sm:$0xf] %vm1228_vm4, %v4298_v3  ;;  %v5652_v63 = vpop.f32.mrf.mxu1  ;;  %v12095_v24 = vpop.f32.mrf.mxu0  ;;  %v12099_v34 = vadd.f32 %v5057_v46, %v11736_v48 }
 0x60f   : > { %v3933_v9 = vsel %vm10494_vm10, %v3928_v21, %v3932_v57  ;;  %4107 = vst.msk [vmem:[#allocation3 + $0x3d0] sm:$0xf] %vm1228_vm4, %v3923_v10  ;;  %v3940_v11 = vrot.slane %v3938_v8, 5  ;;  %v3946_v58 = vrot.slane %v3944_v51, 5  ;;  %v3950_v16 = vrot.slane %v3948_v32, 4  ;;  %12787 = vst [vmem:[#allocation33_spill] sm:$0xff] %v12095_v24  ;;  %8857 = vmatmul.mubr.msk.bf16.gmra.mxu1 %vm413_vm1, %v9163_v60 }
 0x610   : > { %v9164_v4 = vld [vmem:[#allocation3 + $0x450] sm:$0xff]   ;;  %4108 = vst.msk [vmem:[#allocation3 + $0x3d4] sm:$0xf] %vm1228_vm4, %v3933_v9  ;;  %v3956_v50 = vrot.slane %v3954_v27, 5  ;;  %v4157_v30 = vld [vmem:[#allocation2 + $0xb0] sm:$0x1]  ;;  %v12105_v13 = vadd.f32 %v5652_v63, %v11798_v33  ;;  %v8699_v9 = vpop.f32.mrf.mxu1  ;;  %v12108_v27 = vpop.f32.mrf.mxu0 }
 0x611   : > { %v12788_v56 = vld [vmem:[#allocation21_spill] sm:$0xff]  ;;  %v3941_v21 = vor.u32 %v3940_v11, %v3937_v29  ;;  %v3951_v8 = vor.u32 %v3950_v16, %v3946_v58  ;;  %v8008_v51 = vrot.slane %v4155_v22, 9  ;;  %v4301_v32 = vrot.slane %v4156_v23, 5  ;;  %v3658_v10 = vld [vmem:[#allocation2 + $0xa8] sm:$0xf]  ;;  %8896 = vmatprep.mubr.msk.bf16.mxu0 %vm413_vm1, %v9164_v4 }
 0x612   : > { %v12102_v57 = vadd.f32 %v8698_v6, %v12788_v56  ;;  %v3659_v3 = vld [vmem:[#allocation2 + $0xac] sm:$0xf]  ;;  %12789 = vst [vmem:[#allocation21_spill] sm:$0xff] %v12108_v27  ;;  %v4304_v48 = vrot.slane %v4157_v30, 5  ;;  %v3660_v46 = vld [vmem:[#allocation2 + $0xb0] sm:$0x1]  ;;  %v5655_v23 = vpop.f32.mrf.mxu1  ;;  %v12113_v11 = vpop.f32.mrf.mxu0 }
 0x613   : > { %v3959_v6 = vshrl.u32 %v3658_v10, 16  ;;  %v3962_v56 = vshll.u32 %v3658_v10, 16  ;;  %v3968_v24 = vshll.u32 %v3659_v3, 16  ;;  %v3942_v33 = vrot.slane %v3941_v21, 4  ;;  %v4158_v22 = vld [vmem:[#allocation2 + $0xb4] sm:$0xe] }
 0x614   : > { %v3952_v63 = vrot.slane %v3951_v8, 4  ;;  %v4302_v29 = vsel %vm11151_vm15, %v8008_v51, %v4301_v32  ;;  %v4303_v60 = vrot.slane %v4301_v32, 4  ;;  %12790 = vst [vmem:[#allocation34_spill] sm:$0xff] %v12113_v11  ;;  %v3972_v30 = vshrl.u32 %v3659_v3, 16  ;;  %v4159_v32 = vld [vmem:[#allocation2 + $0xb8] sm:$0xf]  ;;  %v8702_v54 = vpop.f32.mrf.mxu1  ;;  %v12122_v11 = vpop.f32.mrf.mxu0 }
 0x615   : > { %4384 = vst.msk [vmem:[#allocation3 + $0x460] sm:$0xf] %vm1228_vm4, %v4302_v29  ;;  %v3961_v16 = vrot.slane %v3959_v6, 4  ;;  %v3964_v27 = vrot.slane %v3962_v56, 5  ;;  %v3970_v4 = vrot.slane %v3968_v24, 5  ;;  %v3947_v10 = vsel %vm10494_vm10, %v3942_v33, %v3946_v58  ;;  %v9166_v29 = vld [vmem:[#allocation3 + $0x458] sm:$0xff]  }
 0x616   : > { %v3957_v21 = vsel %vm10494_vm10, %v3952_v63, %v3956_v50  ;;  %v4305_v8 = vsel %vm11151_vm15, %v4303_v60, %v4304_v48  ;;  %v3978_v51 = vshll.u32 %v3660_v46, 16  ;;  %v4160_v14 = vld [vmem:[#allocation2 + $0xbc] sm:$0x1]  ;;  %4109 = vst.msk [vmem:[#allocation3 + $0x3d8] sm:$0xf] %vm1228_vm4, %v3947_v10  ;;  %v3974_v58 = vrot.slane %v3972_v30, 4  ;;  %v5668_v63 = vpop.f32.mrf.mxu1  ;;  %v12136_v60 = vpop.f32.mrf.mxu0  ;;  %8897 = vmatmul.mubr.msk.bf16.gmra.mxu0 %vm413_vm1, %v9166_v29 }
 0x617   : > { %4110 = vst.msk [vmem:[#allocation3 + $0x3dc] sm:$0xf] %vm1228_vm4, %v3957_v21  ;;  %4385 = vst.msk [vmem:[#allocation3 + $0x464] sm:$0xf] %vm1228_vm4, %v4305_v8  ;;  %v3965_v24 = vor.u32 %v3964_v27, %v3961_v16  ;;  %v12128_v50 = vadd.f32 %v8699_v9, %v11801_v62  ;;  %v12131_v3 = vadd.f32 %v5655_v23, %v11808_v36  ;;  %v9165_v48 = vld [vmem:[#allocation3 + $0x3d0] sm:$0xff]   ;;  %v8009_v6 = vrot.slane %v4158_v22, 9 }
 0x618   : > { %v3980_v46 = vrot.slane %v3978_v51, 5  ;;  %v4308_v56 = vrot.slane %v4159_v32, 5  ;;  %v12134_v33 = vadd.f32 %v8702_v54, %v11837_v55  ;;  %v3975_v16 = vor.u32 %v3974_v58, %v3970_v4  ;;  %v3661_v62 = vld [vmem:[#allocation2 + $0xb4] sm:$0xf]  ;;  %v3662_v9 = vld [vmem:[#allocation2 + $0xb8] sm:$0xf]  ;;  %8860 = vmatprep.mubr.msk.bf16.mxu1 %vm413_vm1, %v9165_v48  ;;  %v8703_v21 = vpop.f32.mrf.mxu1  ;;  %v12145_v8 = vpop.f32.mrf.mxu0 }
 0x619   : > { %v3966_v27 = vrot.slane %v3965_v24, 4  ;;  %v4311_v30 = vrot.slane %v4160_v14, 5  ;;  %v12140_v36 = vadd.f32 %v5668_v63, %v11841_v38  ;;  %v3663_v54 = vld [vmem:[#allocation2 + $0xbc] sm:$0x1]  ;;  %v3983_v23 = vshrl.u32 %v3661_v62, 16 }
 0x61a   : > { %v4309_v22 = vsel %vm11151_vm15, %v8009_v6, %v4308_v56  ;;  %v4310_v55 = vrot.slane %v4308_v56, 4  ;;  %v3986_v10 = vshll.u32 %v3661_v62, 16  ;;  %v3976_v51 = vrot.slane %v3975_v16, 4  ;;  %v4161_v29 = vld [vmem:[#allocation2 + $0xc0] sm:$0xe]  ;;  %v5671_v56 = vpop.f32.mrf.mxu1  ;;  %v12153_v63 = vpop.f32.mrf.mxu0  ;;  %v12809_v44 = vld [vmem:[#allocation20_spill] sm:$0xff] }
 0x61b   : > { %v3971_v14 = vsel %vm10494_vm10, %v3966_v27, %v3970_v4  ;;  %4386 = vst.msk [vmem:[#allocation3 + $0x468] sm:$0xf] %vm1228_vm4, %v4309_v22  ;;  %v3992_v38 = vshll.u32 %v3662_v9, 16  ;;  %v3996_v32 = vshrl.u32 %v3662_v9, 16  ;;  %v3985_v58 = vrot.slane %v3983_v23, 4 }
 0x61c   : > { %4111 = vst.msk [vmem:[#allocation3 + $0x3e0] sm:$0xf] %vm1228_vm4, %v3971_v14  ;;  %v4312_v24 = vsel %vm11151_vm15, %v4310_v55, %v4311_v30  ;;  %v3988_v48 = vrot.slane %v3986_v10, 5  ;;  %v4002_v6 = vshll.u32 %v3663_v54, 16  ;;  %v3981_v4 = vsel %vm10494_vm10, %v3976_v51, %v3980_v46  ;;  %v4162_v62 = vld [vmem:[#allocation2 + $0xc4] sm:$0xf]  ;;  %v8706_v23 = vpop.f32.mrf.mxu1  ;;  %v12165_v10 = vpop.f32.mrf.mxu0 }
 0x61d   : > { %4387 = vst.msk [vmem:[#allocation3 + $0x46c] sm:$0xf] %vm1228_vm4, %v4312_v24  ;;  %v3994_v27 = vrot.slane %v3992_v38, 5  ;;  %v3998_v16 = vrot.slane %v3996_v32, 4  ;;  %v4163_v9 = vld [vmem:[#allocation2 + $0xc8] sm:$0x1]  ;;  %v12159_v22 = vadd.f32 %v8703_v21, %v11850_v26  ;;  %v12163_v54 = vadd.f32 %v5671_v56, %v11853_v47 }
 0x61e   : > { %v9167_v14 = vld [vmem:[#allocation3 + $0x3d8] sm:$0xff]   ;;  %4112 = vst.msk [vmem:[#allocation3 + $0x3e4] sm:$0xf] %vm1228_vm4, %v3981_v4  ;;  %v3989_v30 = vor.u32 %v3988_v48, %v3985_v58  ;;  %v4004_v55 = vrot.slane %v4002_v6, 5  ;;  %12791 = vst [vmem:[#allocation35_spill] sm:$0xff] %v12165_v10  ;;  %v12169_v46 = vadd.f32 %v11917_v49, %v11947_v20  ;;  %v9168_v51 = vld [vmem:[#allocation3 + $0x460] sm:$0xff]   ;;  %v5684_v56 = vpop.f32.mrf.mxu1  ;;  %v12175_v4 = vpop.f32.mrf.mxu0  ;;  %v12183_v20 = vadd.f32 %v11936_v2, %v11981_v18 }
 0x61f   : > { %v3999_v38 = vor.u32 %v3998_v16, %v3994_v27  ;;  %v8010_v32 = vrot.slane %v4161_v29, 9  ;;  %v4315_v26 = vrot.slane %v4162_v62, 5  ;;  %v4318_v21 = vrot.slane %v4163_v9, 5  ;;  %8861 = vmatmul.mubr.msk.bf16.gmra.mxu1 %vm413_vm1, %v9167_v14  ;;  %v3664_v58 = vld [vmem:[#allocation2 + $0xc0] sm:$0xf]  ;;  %v12793_v6 = vld [vmem:[#allocation22_spill] sm:$0xff]  ;;  %8900 = vmatprep.mubr.msk.bf16.mxu0 %vm413_vm1, %v9168_v51 }
 0x620   : > { %12792 = vst [vmem:[#allocation36_spill] sm:$0xff] %v12169_v46  ;;  %v3990_v24 = vrot.slane %v3989_v30, 4  ;;  %v3665_v48 = vld [vmem:[#allocation2 + $0xc4] sm:$0xf]  ;;  %v12173_v47 = vadd.f32 %v8706_v23, %v12793_v6  ;;  %v12794_v10 = vld [vmem:[#allocation18_spill] sm:$0xff]  ;;  %v4007_v14 = vshrl.u32 %v3664_v58, 16  ;;  %v8707_v6 = vpop.f32.mrf.mxu1  ;;  %v12191_v2 = vpop.f32.mrf.mxu0 }
 0x621   : > { %v12179_v49 = vadd.f32 %v12794_v10, %v11957_v41  ;;  %12796 = vst [vmem:[#allocation18_spill] sm:$0xff] %v12183_v20  ;;  %v4000_v29 = vrot.slane %v3999_v38, 4  ;;  %v4316_v16 = vsel %vm11151_vm15, %v8010_v32, %v4315_v26  ;;  %v4317_v62 = vrot.slane %v4315_v26, 4  ;;  %v3666_v9 = vld [vmem:[#allocation2 + $0xc8] sm:$0x1] }
 0x622   : > { %v3995_v30 = vsel %vm10494_vm10, %v3990_v24, %v3994_v27  ;;  %4388 = vst.msk [vmem:[#allocation3 + $0x470] sm:$0xf] %vm1228_vm4, %v4316_v16  ;;  %v4010_v41 = vshll.u32 %v3664_v58, 16  ;;  %v4016_v23 = vshll.u32 %v3665_v48, 16  ;;  %v4020_v10 = vshrl.u32 %v3665_v48, 16  ;;  %v12797_v16 = vld [vmem:[#allocation23_spill] sm:$0xff] }
 0x623   : > { %12795 = vst [vmem:[#allocation22_spill] sm:$0xff] %v12179_v49  ;;  %v4005_v18 = vsel %vm10494_vm10, %v4000_v29, %v4004_v55  ;;  %4113 = vst.msk [vmem:[#allocation3 + $0x3e8] sm:$0xf] %vm1228_vm4, %v3995_v30  ;;  %v4319_v51 = vsel %vm11151_vm15, %v4317_v62, %v4318_v21  ;;  %v4009_v38 = vrot.slane %v4007_v14, 4  ;;  %v4026_v32 = vshll.u32 %v3666_v9, 16  ;;  %v5687_v55 = vpop.f32.mrf.mxu1  ;;  %v12203_v29 = vpop.f32.mrf.mxu0  ;;  %v12800_v9 = vld [vmem:[#allocation24_spill] sm:$0xff] }
 0x624   : > { %v1347_v26 = vld [vmem:[#allocation2 + $0xd4] sm:$0xf]  ;;  %v9170_v27 = vld [vmem:[#allocation3 + $0x468] sm:$0xff]   ;;  %4114 = vst.msk [vmem:[#allocation3 + $0x3ec] sm:$0xf] %vm1228_vm4, %v4005_v18  ;;  %v4012_v24 = vrot.slane %v4010_v41, 5  ;;  %v12201_v20 = vadd.f32 %v5684_v56, %v12797_v16  ;;  %v12208_v14 = vadd.f32 %v8707_v6, %v12800_v9  ;;  %v12211_v18 = vadd.f32 %v5687_v55, %v11953_v42 }
 0x625   : > { %4389 = vst.msk [vmem:[#allocation3 + $0x474] sm:$0xf] %vm1228_vm4, %v4319_v51  ;;  %v4018_v58 = vrot.slane %v4016_v23, 5  ;;  %v4022_v48 = vrot.slane %v4020_v10, 4  ;;  %12798 = vst [vmem:[#allocation23_spill] sm:$0xff] %v12203_v29  ;;  %v9169_v30 = vld [vmem:[#allocation3 + $0x3e0] sm:$0xff]   ;;  %8901 = vmatmul.mubr.msk.bf16.gmra.mxu0 %vm413_vm1, %v9170_v27  ;;  %v8710_v16 = vpop.f32.mrf.mxu1  ;;  %v12214_v46 = vpop.f32.mrf.mxu0  ;;  %v12322_v40 = vadd.f32 %v12145_v8, %v12173_v47 }
 0x626   : > { %v4028_v49 = vrot.slane %v4026_v32, 5  ;;  %v1348_v62 = vsel %vm9862_vm7, 0, %v1347_v26  ;;  %v4013_v41 = vor.u32 %v4012_v24, %v4009_v38  ;;  %v4164_v56 = vld [vmem:[#allocation2 + $0xcc] sm:$0xe]  ;;  %v4165_v10 = vld [vmem:[#allocation2 + $0xd0] sm:$0xf]  ;;  %v12218_v32 = vadd.f32 %v11949_v28, %v11984_v61  ;;  %8864 = vmatprep.mubr.msk.bf16.mxu1 %vm413_vm1, %v9169_v30 }
 0x627   : > { %v4023_v23 = vor.u32 %v4022_v48, %v4018_v58  ;;  %1349 = vst [vmem:[#allocation2 + $0xd4] sm:$0xf] %v1348_v62  ;;  %v3667_v51 = vld [vmem:[#allocation2 + $0xcc] sm:$0xf]  ;;  %12801 = vst [vmem:[#allocation19_spill] sm:$0xff] %v12214_v46  ;;  %v12802_v6 = vld [vmem:[#allocation25_spill] sm:$0xff]  ;;  %v5700_v46 = vpop.f32.mrf.mxu1  ;;  %v12225_v29 = vpop.f32.mrf.mxu0 }
 0x628   : > { %v12222_v26 = vadd.f32 %v12802_v6, %v11994_v17  ;;  %v8011_v42 = vrot.slane %v4164_v56, 9  ;;  %v4322_v38 = vrot.slane %v4165_v10, 5  ;;  %v3668_v27 = vld [vmem:[#allocation2 + $0xd0] sm:$0xf]  ;;  %v4031_v24 = vshrl.u32 %v3667_v51, 16 }
 0x629   : > { %v4034_v48 = vshll.u32 %v3667_v51, 16  ;;  %v4014_v55 = vrot.slane %v4013_v41, 4  ;;  %v4024_v21 = vrot.slane %v4023_v23, 4  ;;  %v4040_v62 = vshll.u32 %v3668_v27, 16  ;;  %v8711_v10 = vpop.f32.mrf.mxu1  ;;  %v12234_v51 = vpop.f32.mrf.mxu0 }
 0x62a   : > { %v4044_v9 = vshrl.u32 %v3668_v27, 16  ;;  %v4323_v28 = vsel %vm11151_vm15, %v8011_v42, %v4322_v38  ;;  %v4324_v61 = vrot.slane %v4322_v38, 4  ;;  %v4033_v17 = vrot.slane %v4031_v24, 4 }
 0x62b   : > { %v4036_v6 = vrot.slane %v4034_v48, 5  ;;  %v4019_v30 = vsel %vm10494_vm10, %v4014_v55, %v4018_v58  ;;  %v4029_v56 = vsel %vm10494_vm10, %v4024_v21, %v4028_v49  ;;  %4390 = vst.msk [vmem:[#allocation3 + $0x478] sm:$0xf] %vm1228_vm4, %v4323_v28  ;;  %v4042_v41 = vrot.slane %v4040_v62, 5  ;;  %v9171_v27 = vld [vmem:[#allocation3 + $0x3e8] sm:$0xff]   ;;  %v5703_v55 = vpop.f32.mrf.mxu1  ;;  %v6087_v21 = vpop.f32.mrf.mxu0 }
 0x62c   : > { %v4046_v23 = vrot.slane %v4044_v9, 4  ;;  %4115 = vst.msk [vmem:[#allocation3 + $0x3f0] sm:$0xf] %vm1228_vm4, %v4019_v30  ;;  %4116 = vst.msk [vmem:[#allocation3 + $0x3f4] sm:$0xf] %vm1228_vm4, %v4029_v56  ;;  %v5793_v38 = vadd.f32 %v8710_v16, %v11963_v15  ;;  %v5791_v58 = vadd.f32 %v5700_v46, %v11990_v12  ;;  %v5794_v24 = vadd.f32 %v8711_v10, %v12000_v5  ;;  %v9172_v49 = vld [vmem:[#allocation3 + $0x470] sm:$0xff]  }
 0x62d   : > { %v4037_v42 = vor.u32 %v4036_v6, %v4033_v17  ;;  %v12243_v62 = vadd.f32 %v11971_v53, %v12019_v35  ;;  %v12803_v9 = vld [vmem:[#allocation26_spill] sm:$0xff]  ;;  %8865 = vmatmul.mubr.msk.bf16.gmra.mxu1 %vm413_vm1, %v9171_v27  ;;  %v5792_v46 = vadd.f32 %v5703_v55, %v12039_v1  ;;  %v12805_v16 = vld [vmem:[#allocation27_spill] sm:$0xff]  ;;  %v12261_v53 = vadd.f32 %v12013_v39, %v12059_v0  ;;  %v8714_v56 = vpop.f32.mrf.mxu1  ;;  %v12806_v0 = vld [vmem:[#allocation28_spill] sm:$0xff] }
 0x62e   : > { %v4047_v48 = vor.u32 %v4046_v23, %v4042_v41  ;;  %v12247_v28 = vadd.f32 %v12803_v9, %v12023_v19  ;;  %v12804_v17 = vld [vmem:[#allocation30_spill] sm:$0xff]  ;;  %v4166_v15 = vld [vmem:[#allocation2 + $0xd4] sm:$0x1]  ;;  %v12257_v30 = vadd.f32 %v12805_v16, %v12032_v45  ;;  %8904 = vmatprep.mubr.msk.bf16.mxu0 %vm413_vm1, %v9172_v49  ;;  %v8751_v23 = vpop.f32.mrf.mxu0  ;;  %v12266_v10 = vadd.f32 %v12028_v7, %v12063_v31  ;;  %v12811_v9 = vld [vmem:[#allocation21_spill] sm:$0xff] }
 0x62f   : > { %v12251_v6 = vadd.f32 %v12804_v17, %v12026_v43  ;;  %v3669_v12 = vld [vmem:[#allocation2 + $0xd4] sm:$0x1]  ;;  %v4038_v5 = vrot.slane %v4037_v42, 4  ;;  %v4325_v35 = vrot.slane %v4166_v15, 5  ;;  %v5797_v45 = vadd.f32 %v8714_v56, %v12043_v59  ;;  %v5716_v7 = vpop.f32.mrf.mxu1  ;;  %v12807_v59 = vld [vmem:[#allocation29_spill] sm:$0xff]  ;;  %v12812_v15 = vld [vmem:[#allocation34_spill] sm:$0xff] }
 0x630   : > { %v4048_v19 = vrot.slane %v4047_v48, 4  ;;  %v4050_v43 = vshll.u32 %v3669_v12, 16  ;;  %v12273_v39 = vadd.f32 %v12035_v25, %v12069_v37  ;;  %v12277_v27 = vadd.f32 %v12806_v0, %v12099_v34  ;;  %v6090_v31 = vpop.f32.mrf.mxu0  ;;  %v12808_v37 = vld [vmem:[#allocation32_spill] sm:$0xff]  ;;  %v12810_v48 = vld [vmem:[#allocation33_spill] sm:$0xff]  ;;  %v12815_v8 = vld [vmem:[#allocation23_spill] sm:$0xff] }
 0x631   : > { %v4043_v1 = vsel %vm10494_vm10, %v4038_v5, %v4042_v41  ;;  %v4326_v42 = vsel %vm11151_vm15, %v4324_v61, %v4325_v35  ;;  %v12284_v41 = vadd.f32 %v12065_v52, %v12102_v57  ;;  %v12288_v25 = vadd.f32 %v12807_v59, %v12105_v13  ;;  %v8715_v17 = vpop.f32.mrf.mxu1 }
 0x632   : > { %v4052_v49 = vrot.slane %v4050_v43, 5  ;;  %4117 = vst.msk [vmem:[#allocation3 + $0x3f8] sm:$0xf] %vm1228_vm4, %v4043_v1  ;;  %4391 = vst.msk [vmem:[#allocation3 + $0x47c] sm:$0xf] %vm1228_vm4, %v4326_v42  ;;  %v5795_v34 = vadd.f32 %v5716_v7, %v12808_v37  ;;  %v12294_v61 = vadd.f32 %v12809_v44, %v12128_v50  ;;  %v12298_v55 = vadd.f32 %v12810_v48, %v12131_v3  ;;  %v8754_v16 = vpop.f32.mrf.mxu0  ;;  %v12819_v7 = vld [vmem:[#allocation18_spill] sm:$0xff] }
 0x633   : > { %v12302_v52 = vadd.f32 %v12811_v9, %v12134_v33  ;;  %v9173_v57 = vld [vmem:[#allocation3 + $0x3f0] sm:$0xff]   ;;  %v12308_v12 = vadd.f32 %v12812_v15, %v12140_v36  ;;  %v12312_v50 = vadd.f32 %v12122_v11, %v12159_v22  ;;  %v12316_v3 = vadd.f32 %v12136_v60, %v12163_v54  ;;  %v12813_v33 = vld [vmem:[#allocation31_spill] sm:$0xff]  ;;  %v5719_v60 = vpop.f32.mrf.mxu1 }
 0x634   : > { %v4053_v13 = vsel %vm10494_vm10, %v4048_v19, %v4052_v49  ;;  %v5798_v5 = vadd.f32 %v8715_v17, %v12813_v33  ;;  %v12326_v36 = vadd.f32 %v12153_v63, %v12201_v20  ;;  %v12814_v11 = vld [vmem:[#allocation35_spill] sm:$0xff]  ;;  %8868 = vmatprep.mubr.msk.bf16.mxu1 %vm413_vm1, %v9173_v57  ;;  %v12335_v54 = vadd.f32 %v12175_v4, %v12211_v18  ;;  %v12817_v20 = vld [vmem:[#allocation36_spill] sm:$0xff] }
 0x635   : > { %4118 = vst.msk [vmem:[#allocation3 + $0x3fc] sm:$0xf] %vm1228_vm4, %v4053_v13  ;;  %v12330_v22 = vadd.f32 %v12814_v11, %v12208_v14  ;;  %v12338_v35 = vadd.f32 %v12191_v2, %v5793_v38  ;;  %v12341_v47 = vadd.f32 %v12815_v8, %v5791_v58  ;;  %v12816_v19 = vld [vmem:[#allocation19_spill] sm:$0xff]  ;;  %v5796_v43 = vadd.f32 %v5719_v60, %v12817_v20  ;;  %v6103_v14 = vpop.f32.mrf.mxu0  ;;  %v8718_v18 = vpop.f32.mrf.mxu1  ;;  %v12818_v38 = vld [vmem:[#allocation22_spill] sm:$0xff] }
 0x636   : > { %v12344_v63 = vadd.f32 %v12816_v19, %v5794_v24  ;;  %v12348_v56 = vadd.f32 %v12225_v29, %v5792_v46  ;;  %v12351_v1 = vadd.f32 %v12234_v51, %v5797_v45  ;;  %v12353_v4 = vadd.f32 %v6087_v21, %v5795_v34 }
 0x637   : > { %v12355_v2 = vadd.f32 %v8751_v23, %v5798_v5  ;;  %v5801_v58 = vadd.f32 %v8718_v18, %v12818_v38  ;;  %v8755_v0 = vpop.f32.mrf.mxu0  ;;  %v12358_v42 = vadd.f32 %v6090_v31, %v5796_v43  ;;  %v5732_v49 = vpop.f32.mrf.mxu1 }
 0x638   : > { %v5799_v59 = vadd.f32 %v5732_v49, %v12819_v7 }
 0x639   : > { %v9174_v24 = vld [vmem:[#allocation3 + $0x478] sm:$0xff]   ;;  %v6106_v37 = vpop.f32.mrf.mxu0  ;;  %v12361_v29 = vadd.f32 %v8754_v16, %v5801_v58  ;;  %v8719_v21 = vpop.f32.mrf.mxu1 }
 0x63a   : > { %8905 = vmatmul.mubr.msk.bf16.gmra.mxu0 %vm413_vm1, %v9174_v24  ;;  %v5802_v46 = vadd.f32 %v8719_v21, %v12218_v32  ;;  %v12365_v23 = vadd.f32 %v6103_v14, %v5799_v59 }
 0x63b   : > { %v5735_v45 = vpop.f32.mrf.mxu1  ;;  %v8758_v34 = vpop.f32.mrf.mxu0 }
 0x63c   : > { %v9175_v51 = vld [vmem:[#allocation3 + $0x3f8] sm:$0xff]   ;;  %v5800_v31 = vadd.f32 %v5735_v45, %v12222_v26  ;;  %v12369_v44 = vadd.f32 %v8755_v0, %v5802_v46 }
 0x63d   : > { %8869 = vmatmul.mubr.msk.bf16.gmra.mxu1 %vm413_vm1, %v9175_v51  ;;  %v8722_v48 = vpop.f32.mrf.mxu1  ;;  %v6119_v57 = vpop.f32.mrf.mxu0 }
 0x63e   : > { %v5805_v9 = vadd.f32 %v8722_v48, %v12243_v62  ;;  %v12372_v13 = vadd.f32 %v6106_v37, %v5800_v31 }
 0x63f   : > { %v5748_v17 = vpop.f32.mrf.mxu1  ;;  %v8759_v32 = vpop.f32.mrf.mxu0 }
 0x640   : > { %v5803_v15 = vadd.f32 %v5748_v17, %v12247_v28  ;;  %v12375_v33 = vadd.f32 %v8758_v34, %v5805_v9 }
 0x641   : > { %v8723_v5 = vpop.f32.mrf.mxu1  ;;  %v6122_v26 = vpop.f32.mrf.mxu0 }
 0x642   : > { %v5806_v16 = vadd.f32 %v8723_v5, %v12251_v6  ;;  %v12378_v11 = vadd.f32 %v6119_v57, %v5803_v15 }
 0x643   : > { %v5751_v60 = vpop.f32.mrf.mxu1 }
 0x644   : > { %v5804_v8 = vadd.f32 %v5751_v60, %v12257_v30  ;;  %v12381_v19 = vadd.f32 %v8759_v32, %v5806_v16 }
 0x645   : > { %v8726_v62 = vpop.f32.mrf.mxu1  ;;  %v8762_v28 = vpop.f32.mrf.mxu0 }
 0x646   : > { %v5809_v20 = vadd.f32 %v8726_v62, %v12261_v53  ;;  %v12384_v43 = vadd.f32 %v6122_v26, %v5804_v8 }
 0x647   : > { %v5764_v14 = vpop.f32.mrf.mxu1  ;;  %v6135_v6 = vpop.f32.mrf.mxu0 }
 0x648   : > { %v5807_v18 = vadd.f32 %v5764_v14, %v12266_v10  ;;  %v12387_v38 = vadd.f32 %v8762_v28, %v5809_v20 }
 0x649   : > { %v8727_v58 = vpop.f32.mrf.mxu1  ;;  %v8763_v30 = vpop.f32.mrf.mxu0 }
 0x64a   : > { %v5810_v0 = vadd.f32 %v8727_v58, %v12273_v39  ;;  %v12390_v24 = vadd.f32 %v6135_v6, %v5807_v18 }
 0x64b   : > { %v5767_v49 = vpop.f32.mrf.mxu1  ;;  %v6138_v53 = vpop.f32.mrf.mxu0 }
 0x64c   : > { %v5808_v7 = vadd.f32 %v5767_v49, %v12277_v27  ;;  %v12393_v59 = vadd.f32 %v8763_v30, %v5810_v0 }
 0x64d   : > { %v12395_v37 = vpop.f32.mrf.mxu1  ;;  %v12399_v10 = vpop.f32.mrf.mxu0 }
 0x64e   : > { %v12397_v51 = vadd.f32 %v6138_v53, %v5808_v7 }
 0x64f   : > { %v12401_v21 = vpop.f32.mrf.mxu1  ;;  %v12403_v46 = vpop.f32.mrf.mxu0 }
 0x651   : > { %v12405_v39 = vpop.f32.mrf.mxu1  ;;  %v12407_v45 = vpop.f32.mrf.mxu0 }
 0x653   : > { %v12409_v31 = vpop.f32.mrf.mxu1  ;;  %v12411_v27 = vpop.f32.mrf.mxu0 }
 0x655   : > { %v8774_v34 = vpop.f32.mrf.mxu1  ;;  %v8810_v48 = vpop.f32.mrf.mxu0 }
 0x656   : > { %v6527_v9 = vadd.f32 %v8774_v34, %v12302_v52 }
 0x657   : > { %v6410_v57 = vpop.f32.mrf.mxu1  ;;  %v6781_v17 = vpop.f32.mrf.mxu0 }
 0x658   : > { %v6525_v15 = vadd.f32 %v6410_v57, %v12308_v12  ;;  %v12415_v32 = vadd.f32 %v8810_v48, %v6527_v9 }
 0x659   : > { %v8775_v5 = vpop.f32.mrf.mxu1  ;;  %v8811_v16 = vpop.f32.mrf.mxu0 }
 0x65a   : > { %v6528_v26 = vadd.f32 %v8775_v5, %v12312_v50  ;;  %v12418_v60 = vadd.f32 %v6781_v17, %v6525_v15 }
 0x65b   : > { %v6413_v8 = vpop.f32.mrf.mxu1  ;;  %v6784_v62 = vpop.f32.mrf.mxu0 }
 0x65c   : > { %v6526_v20 = vadd.f32 %v6413_v8, %v12316_v3  ;;  %v12421_v28 = vadd.f32 %v8811_v16, %v6528_v26 }
 0x65d   : > { %v8814_v14 = vpop.f32.mrf.mxu0  ;;  %v8778_v52 = vpop.f32.mrf.mxu1 }
 0x65e   : > { %v12423_v18 = vadd.f32 %v6784_v62, %v6526_v20  ;;  %v6531_v12 = vadd.f32 %v8778_v52, %v12322_v40 }
 0x65f   : > { %v6797_v6 = vpop.f32.mrf.mxu0  ;;  %v6426_v58 = vpop.f32.mrf.mxu1 }
 0x660   : > { %v6529_v0 = vadd.f32 %v6426_v58, %v12326_v36  ;;  %v12427_v30 = vadd.f32 %v8814_v14, %v6531_v12 }
 0x661   : > { %v8815_v50 = vpop.f32.mrf.mxu0  ;;  %v8779_v49 = vpop.f32.mrf.mxu1 }
 0x662   : > { %v6532_v7 = vadd.f32 %v8779_v49, %v12330_v22  ;;  %v12430_v53 = vadd.f32 %v6797_v6, %v6529_v0 }
 0x663   : > { %v6800_v3 = vpop.f32.mrf.mxu0  ;;  %v6429_v34 = vpop.f32.mrf.mxu1 }
 0x664   : > { %v6530_v48 = vadd.f32 %v6429_v34, %v12335_v54  ;;  %v12433_v9 = vadd.f32 %v8815_v50, %v6532_v7 }
 0x665   : > { %v8818_v57 = vpop.f32.mrf.mxu0  ;;  %v8782_v40 = vpop.f32.mrf.mxu1 }
 0x666   : > { %v6535_v17 = vadd.f32 %v8782_v40, %v12338_v35  ;;  %v12436_v15 = vadd.f32 %v6800_v3, %v6530_v48 }
 0x667   : > { %v6813_v36 = vpop.f32.mrf.mxu0  ;;  %v6442_v5 = vpop.f32.mrf.mxu1 }
 0x668   : > { %v6533_v16 = vadd.f32 %v6442_v5, %v12341_v47  ;;  %v12439_v26 = vadd.f32 %v8818_v57, %v6535_v17 }
 0x669   : > { %v8819_v22 = vpop.f32.mrf.mxu0  ;;  %v8783_v8 = vpop.f32.mrf.mxu1 }
 0x66a   : > { %v6536_v62 = vadd.f32 %v8783_v8, %v12344_v63  ;;  %v12442_v20 = vadd.f32 %v6813_v36, %v6533_v16 }
 0x66b   : > { %v6816_v54 = vpop.f32.mrf.mxu0  ;;  %v6445_v14 = vpop.f32.mrf.mxu1 }
 0x66c   : > { %v6534_v52 = vadd.f32 %v6445_v14, %v12348_v56  ;;  %v12445_v12 = vadd.f32 %v8819_v22, %v6536_v62 }
 0x66d   : > { %v8822_v35 = vpop.f32.mrf.mxu0  ;;  %v8786_v6 = vpop.f32.mrf.mxu1 }
 0x66e   : > { %v12447_v58 = vadd.f32 %v6816_v54, %v6534_v52  ;;  %v6539_v47 = vadd.f32 %v8786_v6, %v12351_v1 }
 0x66f   : > { %v6829_v0 = vpop.f32.mrf.mxu0  ;;  %v6458_v50 = vpop.f32.mrf.mxu1 }
 0x670   : > { %v6537_v49 = vadd.f32 %v6458_v50, %v12353_v4  ;;  %v12451_v63 = vadd.f32 %v8822_v35, %v6539_v47 }
 0x671   : > { %v8823_v7 = vpop.f32.mrf.mxu0  ;;  %v8787_v3 = vpop.f32.mrf.mxu1 }
 0x672   : > { %v6540_v34 = vadd.f32 %v8787_v3, %v12355_v2  ;;  %v12454_v56 = vadd.f32 %v6829_v0, %v6537_v49 }
 0x673   : > { %v6832_v48 = vpop.f32.mrf.mxu0  ;;  %v6461_v57 = vpop.f32.mrf.mxu1 }
 0x674   : > { %v6538_v40 = vadd.f32 %v6461_v57, %v12358_v42  ;;  %v12457_v36 = vadd.f32 %v8823_v7, %v6540_v34 }
 0x675   : > { %v8826_v17 = vpop.f32.mrf.mxu0 }
 0x676   : > { %v12459_v5 = vadd.f32 %v6832_v48, %v6538_v40  ;;  %v8790_v16 = vpop.f32.mrf.mxu1 }
 0x677   : > { %v6845_v1 = vpop.f32.mrf.mxu0  ;;  %v6543_v4 = vadd.f32 %v8790_v16, %v12361_v29 }
 0x678   : > { %v6474_v8 = vpop.f32.mrf.mxu1 }
 0x679   : > { %v8827_v22 = vpop.f32.mrf.mxu0  ;;  %v6541_v62 = vadd.f32 %v6474_v8, %v12365_v23  ;;  %v12463_v54 = vadd.f32 %v8826_v17, %v6543_v4 }
 0x67a   : > { %v8791_v14 = vpop.f32.mrf.mxu1 }
 0x67b   : > { %v6848_v2 = vpop.f32.mrf.mxu0  ;;  %v6544_v52 = vadd.f32 %v8791_v14, %v12369_v44  ;;  %v12466_v35 = vadd.f32 %v6845_v1, %v6541_v62 }
 0x67c   : > { %v6477_v6 = vpop.f32.mrf.mxu1 }
 0x67d   : > { %v8830_v42 = vpop.f32.mrf.mxu0  ;;  %v6542_v47 = vadd.f32 %v6477_v6, %v12372_v13  ;;  %v12469_v50 = vadd.f32 %v8827_v22, %v6544_v52 }
 0x67f   : > { %v6861_v0 = vpop.f32.mrf.mxu0  ;;  %v8794_v29 = vpop.f32.mrf.mxu1  ;;  %v12472_v7 = vadd.f32 %v6848_v2, %v6542_v47 }
 0x680   : > { %v6547_v49 = vadd.f32 %v8794_v29, %v12375_v33 }
 0x681   : > { %v6490_v23 = vpop.f32.mrf.mxu1  ;;  %v8831_v3 = vpop.f32.mrf.mxu0 }
 0x682   : > { %v6545_v34 = vadd.f32 %v6490_v23, %v12378_v11  ;;  %v12475_v48 = vadd.f32 %v8830_v42, %v6547_v49 }
 0x683   : > { %v8795_v44 = vpop.f32.mrf.mxu1  ;;  %v6864_v13 = vpop.f32.mrf.mxu0 }
 0x684   : > { %v6548_v57 = vadd.f32 %v8795_v44, %v12381_v19  ;;  %v12478_v40 = vadd.f32 %v6861_v0, %v6545_v34  ;;  %v6524_v34 = vadd.f32 %v12405_v39, %v12294_v61 }
 0x685   : > { %v6493_v17 = vpop.f32.mrf.mxu1 }
 0x686   : > { %v6546_v1 = vadd.f32 %v6493_v17, %v12384_v43  ;;  %v12481_v16 = vadd.f32 %v8831_v3, %v6548_v57  ;;  %v6521_v3 = vadd.f32 %v12401_v21, %v12288_v25  ;;  %v6522_v57 = vadd.f32 %v12409_v31, %v12298_v55 }
 0x687   : > { %v8798_v33 = vpop.f32.mrf.mxu1  ;;  %v8834_v8 = vpop.f32.mrf.mxu0  ;;  %v6895_v61 = vadd.f32 %v12407_v45, %v6524_v34 }
 0x688   : > { %v6551_v4 = vadd.f32 %v8798_v33, %v12387_v38  ;;  %v12484_v22 = vadd.f32 %v6864_v13, %v6546_v1  ;;  %v6892_v17 = vadd.f32 %v12403_v46, %v6521_v3  ;;  %v6893_v31 = vadd.f32 %v12411_v27, %v6522_v57 }
 0x689   : > { %v6506_v11 = vpop.f32.mrf.mxu1  ;;  %v6877_v19 = vpop.f32.mrf.mxu0 }
 0x68a   : > { %v6549_v62 = vadd.f32 %v6506_v11, %v12390_v24  ;;  %v12487_v2 = vadd.f32 %v8834_v8, %v6551_v4  ;;  %v6523_v24 = vadd.f32 %v12395_v37, %v12284_v41  ;;  %v12510_v41 = vld [vmem:[%s12667_s2] ss:$0 sm:$0xff] }
 0x68b   : > { %v8799_v14 = vpop.f32.mrf.mxu1  ;;  %v8835_v43 = vpop.f32.mrf.mxu0 }
 0x68c   : > { %v6552_v52 = vadd.f32 %v8799_v14, %v12393_v59  ;;  %v12490_v42 = vadd.f32 %v6877_v19, %v6549_v62  ;;  %v6894_v44 = vadd.f32 %v12399_v10, %v6523_v24 }
 0x68d   : > { %v6509_v6 = vpop.f32.mrf.mxu1  ;;  %v6880_v38 = vpop.f32.mrf.mxu0 }
 0x68e   : > { %v6550_v47 = vadd.f32 %v6509_v6, %v12397_v51  ;;  %v12493_v0 = vadd.f32 %v8835_v43, %v6552_v52 }
 0x690   : > { %v12495_v29 = vadd.f32 %v6880_v38, %v6550_v47  ;;  %v8878_v49 = vpop.f32.mrf.mxu0 }
 0x692   : > { %v7507_v23 = vpop.f32.mrf.mxu0 }
 0x694   : > { %v8879_v59 = vpop.f32.mrf.mxu0 }
 0x696   : > { %v7510_v37 = vpop.f32.mrf.mxu0 }
 0x698   : > { %v8842_v51 = vpop.f32.mrf.mxu1 }
 0x699   : > { %v7265_v13 = vadd.f32 %v8842_v51, %v6894_v44 }
 0x69a   : > { %v7136_v25 = vpop.f32.mrf.mxu1 }
 0x69b   : > { %v7636_v21 = vadd.f32 %v8878_v49, %v7265_v13  ;;  %v7263_v1 = vadd.f32 %v7136_v25, %v6892_v17 }
 0x69c   : > { %v8843_v10 = vpop.f32.mrf.mxu1 }
 0x69d   : > { %v7675_v39 = vadd.f32 %v12510_v41, %v7636_v21  ;;  %v7634_v33 = vadd.f32 %v7507_v23, %v7263_v1  ;;  %v7266_v55 = vadd.f32 %v8843_v10, %v6895_v61 }
 0x69e   : > { %v7139_v4 = vpop.f32.mrf.mxu1  ;;  %v8882_v46 = vpop.f32.mrf.mxu0 }
 0x69f   : > { %7707 = vst [vmem:[%s12517_s22 + $0x10] sm:$0xff] %v7675_v39  ;;  %v7673_v8 = vadd.f32 %v12510_v41, %v7634_v33  ;;  %v7637_v45 = vadd.f32 %v8879_v59, %v7266_v55  ;;  %v7264_v11 = vadd.f32 %v7139_v4, %v6893_v31 }
 0x6a0   : > { %v7523_v14 = vpop.f32.mrf.mxu0 }
 0x6a1   : > { %7705 = vst [vmem:[%s12517_s22] sm:$0xff] %v7673_v8  ;;  %v7676_v62 = vadd.f32 %v12510_v41, %v7637_v45  ;;  %v7635_v19 = vadd.f32 %v7510_v37, %v7264_v11 }
 0x6a2   : > { %v8883_v52 = vpop.f32.mrf.mxu0 }
 0x6a3   : > { %7708 = vst [vmem:[%s12517_s22 + $0x18] sm:$0xff] %v7676_v62  ;;  %v7674_v27 = vadd.f32 %v12510_v41, %v7635_v19 }
 0x6a4   : > { %v7526_v24 = vpop.f32.mrf.mxu0 }
 0x6a5   : > { %7706 = vst [vmem:[%s12517_s22 + $0x8] sm:$0xff] %v7674_v27 }
 0x6a7   : > { %v8846_v43 = vpop.f32.mrf.mxu1 }
 0x6a8   : > { %v7269_v6 = vadd.f32 %v8846_v43, %v12415_v32 }
 0x6a9   : > { %v7152_v47 = vpop.f32.mrf.mxu1 }
 0x6aa   : > { %v7640_v38 = vadd.f32 %v8882_v46, %v7269_v6  ;;  %v7267_v49 = vadd.f32 %v7152_v47, %v12418_v60 }
 0x6ab   : > { %v8847_v23 = vpop.f32.mrf.mxu1 }
 0x6ac   : > { %v7679_v3 = vadd.f32 %v12510_v41, %v7640_v38  ;;  %v7638_v59 = vadd.f32 %v7523_v14, %v7267_v49  ;;  %v7270_v34 = vadd.f32 %v8847_v23, %v12421_v28 }
 0x6ad   : > { %v7155_v44 = vpop.f32.mrf.mxu1  ;;  %v8886_v13 = vpop.f32.mrf.mxu0 }
 0x6ae   : > { %7711 = vst [vmem:[%s12517_s22 + $0x30] sm:$0xff] %v7679_v3  ;;  %v7677_v51 = vadd.f32 %v12510_v41, %v7638_v59  ;;  %v7641_v57 = vadd.f32 %v8883_v52, %v7270_v34  ;;  %v7268_v32 = vadd.f32 %v7155_v44, %v12423_v18 }
 0x6af   : > { %v7539_v25 = vpop.f32.mrf.mxu0 }
 0x6b0   : > { %7709 = vst [vmem:[%s12517_s22 + $0x20] sm:$0xff] %v7677_v51  ;;  %v7680_v60 = vadd.f32 %v12510_v41, %v7641_v57  ;;  %v7639_v17 = vadd.f32 %v7526_v24, %v7268_v32 }
 0x6b1   : > { %v8887_v21 = vpop.f32.mrf.mxu0 }
 0x6b2   : > { %7712 = vst [vmem:[%s12517_s22 + $0x38] sm:$0xff] %v7680_v60  ;;  %v7678_v37 = vadd.f32 %v12510_v41, %v7639_v17 }
 0x6b3   : > { %v7542_v39 = vpop.f32.mrf.mxu0 }
 0x6b4   : > { %7710 = vst [vmem:[%s12517_s22 + $0x28] sm:$0xff] %v7678_v37 }
 0x6b6   : > { %v8850_v28 = vpop.f32.mrf.mxu1 }
 0x6b7   : > { %v7273_v1 = vadd.f32 %v8850_v28, %v12427_v30 }
 0x6b8   : > { %v7168_v61 = vpop.f32.mrf.mxu1 }
 0x6b9   : > { %v7644_v10 = vadd.f32 %v8886_v13, %v7273_v1  ;;  %v7271_v18 = vadd.f32 %v7168_v61, %v12430_v53 }
 0x6ba   : > { %v8851_v33 = vpop.f32.mrf.mxu1 }
 0x6bb   : > { %v7683_v55 = vadd.f32 %v12510_v41, %v7644_v10  ;;  %v7642_v31 = vadd.f32 %v7539_v25, %v7271_v18  ;;  %v7274_v4 = vadd.f32 %v8851_v33, %v12433_v9 }
 0x6bc   : > { %v7171_v46 = vpop.f32.mrf.mxu1  ;;  %v8890_v11 = vpop.f32.mrf.mxu0 }
 0x6bd   : > { %7715 = vst [vmem:[%s12517_s22 + $0x50] sm:$0xff] %v7683_v55  ;;  %v7681_v8 = vadd.f32 %v12510_v41, %v7642_v31  ;;  %v7645_v45 = vadd.f32 %v8887_v21, %v7274_v4  ;;  %v7272_v30 = vadd.f32 %v7171_v46, %v12436_v15 }
 0x6be   : > { %v7555_v19 = vpop.f32.mrf.mxu0 }
 0x6bf   : > { %7713 = vst [vmem:[%s12517_s22 + $0x40] sm:$0xff] %v7681_v8  ;;  %v7684_v53 = vadd.f32 %v12510_v41, %v7645_v45  ;;  %v7643_v62 = vadd.f32 %v7542_v39, %v7272_v30 }
 0x6c0   : > { %v8891_v27 = vpop.f32.mrf.mxu0 }
 0x6c1   : > { %7716 = vst [vmem:[%s12517_s22 + $0x58] sm:$0xff] %v7684_v53  ;;  %v7682_v14 = vadd.f32 %v12510_v41, %v7643_v62 }
 0x6c2   : > { %v8854_v9 = vpop.f32.mrf.mxu1  ;;  %v7558_v47 = vpop.f32.mrf.mxu0 }
 0x6c3   : > { %7714 = vst [vmem:[%s12517_s22 + $0x48] sm:$0xff] %v7682_v14  ;;  %v7277_v52 = vadd.f32 %v8854_v9, %v12439_v26 }
 0x6c4   : > { %v7184_v43 = vpop.f32.mrf.mxu1 }
 0x6c5   : > { %v7648_v6 = vadd.f32 %v8890_v11, %v7277_v52  ;;  %v7275_v15 = vadd.f32 %v7184_v43, %v12442_v20 }
 0x6c6   : > { %v8855_v38 = vpop.f32.mrf.mxu1 }
 0x6c7   : > { %v7687_v49 = vadd.f32 %v12510_v41, %v7648_v6  ;;  %v7646_v24 = vadd.f32 %v7555_v19, %v7275_v15  ;;  %v7278_v23 = vadd.f32 %v8855_v38, %v12445_v12 }
 0x6c8   : > { %v7187_v3 = vpop.f32.mrf.mxu1 }
 0x6c9   : > { %7719 = vst [vmem:[%s12517_s22 + $0x70] sm:$0xff] %v7687_v49  ;;  %v7685_v59 = vadd.f32 %v12510_v41, %v7646_v24  ;;  %v7649_v34 = vadd.f32 %v8891_v27, %v7278_v23  ;;  %v7276_v26 = vadd.f32 %v7187_v3, %v12447_v58 }
 0x6ca   : > { %v8894_v44 = vpop.f32.mrf.mxu0 }
 0x6cb   : > { %7717 = vst [vmem:[%s12517_s22 + $0x60] sm:$0xff] %v7685_v59  ;;  %v7688_v20 = vadd.f32 %v12510_v41, %v7649_v34  ;;  %v7647_v51 = vadd.f32 %v7558_v47, %v7276_v26 }
 0x6cc   : > { %v7571_v57 = vpop.f32.mrf.mxu0 }
 0x6cd   : > { %7720 = vst [vmem:[%s12517_s22 + $0x78] sm:$0xff] %v7688_v20  ;;  %v7686_v32 = vadd.f32 %v12510_v41, %v7647_v51 }
 0x6ce   : > { %v8895_v13 = vpop.f32.mrf.mxu0 }
 0x6cf   : > { %7718 = vst [vmem:[%s12517_s22 + $0x68] sm:$0xff] %v7686_v32  ;;  %v8858_v12 = vpop.f32.mrf.mxu1 }
 0x6d0   : > { %v7281_v60 = vadd.f32 %v8858_v12, %v12451_v63  ;;  %v7574_v37 = vpop.f32.mrf.mxu0 }
 0x6d1   : > { %v7200_v17 = vpop.f32.mrf.mxu1 }
 0x6d2   : > { %v7652_v25 = vadd.f32 %v8894_v44, %v7281_v60  ;;  %v7279_v58 = vadd.f32 %v7200_v17, %v12454_v56 }
 0x6d3   : > { %v8859_v21 = vpop.f32.mrf.mxu1 }
 0x6d4   : > { %v7691_v28 = vadd.f32 %v12510_v41, %v7652_v25  ;;  %v7650_v1 = vadd.f32 %v7571_v57, %v7279_v58  ;;  %v7282_v61 = vadd.f32 %v8859_v21, %v12457_v36 }
 0x6d5   : > { %v7203_v10 = vpop.f32.mrf.mxu1 }
 0x6d6   : > { %7723 = vst [vmem:[%s12517_s22 + $0x90] sm:$0xff] %v7691_v28  ;;  %v7689_v18 = vadd.f32 %v12510_v41, %v7650_v1  ;;  %v7653_v39 = vadd.f32 %v8895_v13, %v7282_v61  ;;  %v7280_v63 = vadd.f32 %v7203_v10, %v12459_v5  ;;  %v8898_v33 = vpop.f32.mrf.mxu0 }
 0x6d8   : > { %7721 = vst [vmem:[%s12517_s22 + $0x80] sm:$0xff] %v7689_v18  ;;  %v7692_v55 = vadd.f32 %v12510_v41, %v7653_v39  ;;  %v7651_v56 = vadd.f32 %v7574_v37, %v7280_v63  ;;  %v7587_v4 = vpop.f32.mrf.mxu0 }
 0x6da   : > { %7724 = vst [vmem:[%s12517_s22 + $0x98] sm:$0xff] %v7692_v55  ;;  %v7690_v31 = vadd.f32 %v12510_v41, %v7651_v56  ;;  %v8899_v8 = vpop.f32.mrf.mxu0 }
 0x6dc   : > { %7722 = vst [vmem:[%s12517_s22 + $0x88] sm:$0xff] %v7690_v31  ;;  %v7590_v14 = vpop.f32.mrf.mxu0 }
 0x6df   : > { %v8862_v46 = vpop.f32.mrf.mxu1 }
 0x6e0   : > { %v7285_v36 = vadd.f32 %v8862_v46, %v12463_v54 }
 0x6e1   : > { %v7216_v45 = vpop.f32.mrf.mxu1 }
 0x6e2   : > { %v7656_v30 = vadd.f32 %v8898_v33, %v7285_v36  ;;  %v7283_v5 = vadd.f32 %v7216_v45, %v12466_v35 }
 0x6e3   : > { %v8863_v11 = vpop.f32.mrf.mxu1 }
 0x6e4   : > { %v7695_v53 = vadd.f32 %v12510_v41, %v7656_v30  ;;  %v7654_v62 = vadd.f32 %v7587_v4, %v7283_v5  ;;  %v7286_v19 = vadd.f32 %v8863_v11, %v12469_v50 }
 0x6e5   : > { %v7219_v27 = vpop.f32.mrf.mxu1  ;;  %v8902_v35 = vpop.f32.mrf.mxu0 }
 0x6e6   : > { %7727 = vst [vmem:[%s12517_s22 + $0xb0] sm:$0xff] %v7695_v53  ;;  %v7693_v9 = vadd.f32 %v12510_v41, %v7654_v62  ;;  %v7657_v52 = vadd.f32 %v8899_v8, %v7286_v19  ;;  %v7284_v54 = vadd.f32 %v7219_v27, %v12472_v7 }
 0x6e7   : > { %v7603_v50 = vpop.f32.mrf.mxu0 }
 0x6e8   : > { %7725 = vst [vmem:[%s12517_s22 + $0xa0] sm:$0xff] %v7693_v9  ;;  %v7696_v43 = vadd.f32 %v12510_v41, %v7657_v52  ;;  %v7655_v6 = vadd.f32 %v7590_v14, %v7284_v54 }
 0x6e9   : > { %v8903_v23 = vpop.f32.mrf.mxu0 }
 0x6ea   : > { %7728 = vst [vmem:[%s12517_s22 + $0xb8] sm:$0xff] %v7696_v43  ;;  %v7694_v15 = vadd.f32 %v12510_v41, %v7655_v6 }
 0x6eb   : > { %v7606_v57 = vpop.f32.mrf.mxu0 }
 0x6ec   : > { %7726 = vst [vmem:[%s12517_s22 + $0xa8] sm:$0xff] %v7694_v15 }
 0x6ed   : > { %v8866_v47 = vpop.f32.mrf.mxu1 }
 0x6ee   : > { %v7289_v38 = vadd.f32 %v8866_v47, %v12475_v48 }
 0x6ef   : > { %v7232_v49 = vpop.f32.mrf.mxu1 }
 0x6f0   : > { %v7660_v24 = vadd.f32 %v8902_v35, %v7289_v38  ;;  %v7287_v7 = vadd.f32 %v7232_v49, %v12478_v40 }
 0x6f1   : > { %v8867_v3 = vpop.f32.mrf.mxu1 }
 0x6f2   : > { %v7699_v59 = vadd.f32 %v12510_v41, %v7660_v24  ;;  %v7658_v34 = vadd.f32 %v7603_v50, %v7287_v7  ;;  %v7290_v26 = vadd.f32 %v8867_v3, %v12481_v16 }
 0x6f3   : > { %v7235_v44 = vpop.f32.mrf.mxu1 }
 0x6f4   : > { %7731 = vst [vmem:[%s12517_s22 + $0xd0] sm:$0xff] %v7699_v59  ;;  %v7697_v20 = vadd.f32 %v12510_v41, %v7658_v34  ;;  %v7661_v51 = vadd.f32 %v8903_v23, %v7290_v26  ;;  %v7288_v48 = vadd.f32 %v7235_v44, %v12484_v22 }
 0x6f6   : > { %7729 = vst [vmem:[%s12517_s22 + $0xc0] sm:$0xff] %v7697_v20  ;;  %v7700_v32 = vadd.f32 %v12510_v41, %v7661_v51  ;;  %v7659_v40 = vadd.f32 %v7606_v57, %v7288_v48 }
 0x6f8   : > { %7732 = vst [vmem:[%s12517_s22 + $0xd8] sm:$0xff] %v7700_v32  ;;  %v7698_v13 = vadd.f32 %v12510_v41, %v7659_v40 }
 0x6fa   : > { %7730 = vst [vmem:[%s12517_s22 + $0xc8] sm:$0xff] %v7698_v13  ;;  %v8906_v12 = vpop.f32.mrf.mxu0 }
 0x6fc   : > { %v7619_v16 = vpop.f32.mrf.mxu0 }
 0x6fd   : > { %v8870_v60 = vpop.f32.mrf.mxu1 }
 0x6fe   : > { %v7293_v17 = vadd.f32 %v8870_v60, %v12487_v2  ;;  %v8907_v37 = vpop.f32.mrf.mxu0 }
 0x6ff   : > { %v7248_v25 = vpop.f32.mrf.mxu1 }
 0x700   : > { %v7664_v22 = vadd.f32 %v8906_v12, %v7293_v17  ;;  %v7291_v58 = vadd.f32 %v7248_v25, %v12490_v42  ;;  %v7622_v42 = vpop.f32.mrf.mxu0 }
 0x701   : > { %v8871_v21 = vpop.f32.mrf.mxu1 }
 0x702   : > { %v7703_v28 = vadd.f32 %v12510_v41, %v7664_v22  ;;  %v7662_v1 = vadd.f32 %v7619_v16, %v7291_v58  ;;  %v7294_v61 = vadd.f32 %v8871_v21, %v12493_v0 }
 0x703   : > { %v7251_v10 = vpop.f32.mrf.mxu1 }
 0x704   : > { %7735 = vst [vmem:[%s12517_s22 + $0xf0] sm:$0xff] %v7703_v28  ;;  %v7701_v18 = vadd.f32 %v12510_v41, %v7662_v1  ;;  %v7665_v2 = vadd.f32 %v8907_v37, %v7294_v61  ;;  %v7292_v39 = vadd.f32 %v7251_v10, %v12495_v29 }
 0x706   : > { %7733 = vst [vmem:[%s12517_s22 + $0xe0] sm:$0xff] %v7701_v18  ;;  %v7704_v63 = vadd.f32 %v12510_v41, %v7665_v2  ;;  %v7663_v33 = vadd.f32 %v7622_v42, %v7292_v39 }
 0x708   : > { %7736 = vst [vmem:[%s12517_s22 + $0xf8] sm:$0xff] %v7704_v63  ;;  %v7702_v0 = vadd.f32 %v12510_v41, %v7663_v33 }
 0x70a   : > { %7734 = vst [vmem:[%s12517_s22 + $0xe8] sm:$0xff] %v7702_v0 }
 0x70b   : > { %9427 = shalt.err (!%p9424_p9)
}
 0x70c   : > { %s9428_s5 = scalar_lea.hbm %s12612_s1, 4096  ;;  %s9432_s11 = scalar_lea.hbm %s12672_s7, 8192 }
 0x70d   : > { %p9429_p13 = scmp.ne.s32.totalorder %s12612_s1, %s9428_s5  ;;  %p9433_p5 = scmp.lt.s32.totalorder %s12612_s1, %s12672_s7 }
 0x70e   : > { %p9434_p10 = scmp.lt.s32.totalorder %s9432_s11, %s9428_s5 }
 0x70f   : > { %p9430_p12 = pnand %p9429_p13, %p9670_p6 }
 0x710   : > { %p9435_p11 = por %p9434_p10, %p9433_p5 }
 0x711   : > { %p9431_p0 = pneg %p9430_p12 }
 0x713   : > { %p9436_p8 = pnand %p9435_p11, %p9431_p0 }
 0x715   : > { %9439 = shalt.err (!%p9436_p8)
}
 0x716   : > { %s9516_s22 = smov 128   ;;  %s9517_s10 = smov 8  }
 0x717   : > { %8926 = dma.vmem_to_hbm [thread:$0]  (%p9670_p6), %s12614_s17, 4096, %s12612_s1, %s7738_s27, %s9516_s22, %s9516_s22, %s9517_s10  }
 0x718 PF: > { %s7767_s16 = sand.u32 1, %s9482_s24   ;;  %p12820_p1 = scmp.ne.s32.totalorder %s12701_s12, 0 }
 0x719   : > { %p12821_p2 = scmp.ge.s32.totalorder %s9502_s29, 2  ;;  %s7768_s8 = scalar_lea.sflag [#allocation6], %s7767_s16 }
 0x71b   : > { %p8943_p4 = pnand %p12821_p2, %p12820_p1 }
 0x71d   : > { %p8944_p3 = pneg %p8943_p4 }
 0x71f   : > { %9477 = dma.done.wait (%p8944_p3), %s7768_s8, 4096  }
 0x720   : > { %9479 = vsyncadd (%p8944_p3), %s7768_s8, 4294963200  ;;  %s25_s29 = sadd.s32 1, %s9502_s29   ;;  %s12822_s15 = sld [smem:[#allocation17_spill]] }
 0x721   : > { %p22_p7 = scmp.ge.s32.totalorder %s25_s29, 4   ;;  %s12823_s24 = smov %s9486_s25 }
 0x722   : > { %s12824_s25 = smov %s9490_s26  ;;  %s12825_s26 = smov %s9679_s21 }
 0x723   : > { %s12826_s27 = smov %s9498_s28  ;;  %24 = sbr.rel (!%p22_p7) target bundleno = 12 (0xc), region = 140 }
 0x726   : > { %s12827_s28 = smov %s12822_s15 }
 0x728   :  { %7773 = vsyncpa [#allocation5], 1 }
 0x729   :  { %7775 = vsyncpa [#allocation5 + $0x1], 1 }
 0x72a   :  { %7776 = vsyncpa [#allocation8], 1 }
 0x72b   :  { %7777 = vsyncpa [#allocation11], 1 }
 0x72c   :  { %7778 = vsyncpa [#allocation6], 1 }
 0x72d   :  { %7780 = vsyncpa [#allocation6 + $0x1], 1 }

</bundles_post_ra>
